<compile_context>
chip_gen: v7x
topology: tpu7x:2x2x1
jax: 0.10.0
libtpu: 0.0.40
codegen_flags: <defaults>
</compile_context>

<pallas_src>
import functools

import jax
import jax.numpy as jnp
import numpy as np
from jax.experimental import pallas as pl
from jax.experimental.pallas import tpu as pltpu


_CHANNELS = [(1, 16), (16, 32), (32, 64), (64, 64), (64, 1)]
_W0 = 8   # column offset of the image interior inside the padded scratch
          # (multiple of 8 so interior stores are sublane-aligned for f32)


def _fused_convnet_kernel(x_ref, *refs, H, W, channels, relus):
    """Whole ComplexConvNet forward for one batch element.

    x_ref   : (1, H, W, 2)  input, channels = [real | imag]
    refs    : (w_1, b_1, ..., w_L, b_L, o_ref, pad_ref)
      w_l   : (9, 2*Cin_l, 2*Cout_l) bf16  per-tap block weights
              [[Wr, Wi], [-Wi, Wr]]
      b_l   : (1, 2*Cout_l) f32            [br - bi | br + bi]
      o_ref : (1, H, W, 2)  output, channels = [real | imag]
      pad_ref: (H+2, W+2*_W0, Cmax) f32 VMEM scratch (zero border = "same" pad)
    """
    o_ref, pad_ref = refs[-2], refs[-1]
    wb = refs[:-2]
    HW = H * W
    w0 = _W0

    # Zero the padded scratch (provides the conv zero border), then place the
    # input image in the interior.
    pad_ref[...] = jnp.zeros_like(pad_ref)
    pad_ref[1:H + 1, w0:w0 + W, 0:2] = x_ref[0]

    n_layers = len(channels)
    for l in range(n_layers):
        cin, cout = channels[l]
        K, C2 = 2 * cin, 2 * cout
        w_ref, b_ref = wb[2 * l], wb[2 * l + 1]

        acc = None
        for dy in range(3):
            for dx in range(3):
                t = dy * 3 + dx
                # Shifted window of the zero-padded activation for this tap.
                slab = pad_ref[dy:dy + H, w0 - 1 + dx:w0 - 1 + dx + W, 0:K]
                lhs = slab.reshape(HW, K)                       # f32
                if K < 8:
                    # Tiny contraction (first layer): VPU broadcast-accumulate
                    # instead of a K=2 MXU matmul.
                    w_tap = w_ref[t].astype(jnp.float32)        # (K, C2)
                    d = lhs[:, 0:1] * w_tap[0:1, :]
                    for k in range(1, K):
                        d = d + lhs[:, k:k + 1] * w_tap[k:k + 1, :]
                else:
                    d = jnp.dot(lhs.astype(jnp.bfloat16), w_ref[t],
                                preferred_element_type=jnp.float32)
                acc = d if acc is None else acc + d

        act = acc + b_ref[...]                                  # (HW, C2) f32
        if relus[l]:
            act = jnp.maximum(act, 0.0)

        if l + 1 < n_layers:
            # Keep the activation resident in VMEM for the next layer.
            pad_ref[1:H + 1, w0:w0 + W, 0:C2] = act.reshape(H, W, C2)
        else:
            o_ref[0] = act.reshape(H, W, C2)


def _pack_layer(wr, wi, br, bi):
    """Pack one ComplexConv2d layer into block weights / combined bias."""
    cout, cin = wr.shape[0], wr.shape[1]
    # (Cout, Cin, ky, kx) -> (ky, kx, Cin, Cout) -> (9, Cin, Cout)
    wr_t = jnp.transpose(wr, (2, 3, 1, 0)).reshape(9, cin, cout)
    wi_t = jnp.transpose(wi, (2, 3, 1, 0)).reshape(9, cin, cout)
    top = jnp.concatenate([wr_t, wi_t], axis=-1)     # rows multiplying Xr
    bot = jnp.concatenate([-wi_t, wr_t], axis=-1)    # rows multiplying Xi
    w_big = jnp.concatenate([top, bot], axis=1).astype(jnp.bfloat16)
    b_big = jnp.concatenate([br - bi, br + bi]).reshape(1, 2 * cout)
    return w_big, b_big.astype(jnp.float32)


def complex_convnet_forward(xr_nchw, xi_nchw, params):
    """Forward pass of ComplexConvNet.  Inputs / outputs are NCHW like PyTorch."""
    N, _, H, W = xr_nchw.shape
    channels = tuple((p[0].shape[1], p[0].shape[0]) for p in params)
    relus = tuple([True] * (len(params) - 1) + [False])
    cmax = max(max(2 * ci, 2 * co) for ci, co in channels)

    # Pack real/imag into one NHWC tensor with 2*Cin channels.
    x = jnp.concatenate(
        [jnp.transpose(xr_nchw, (0, 2, 3, 1)),
         jnp.transpose(xi_nchw, (0, 2, 3, 1))], axis=-1)        # (N, H, W, 2)

    inputs = [x]
    in_specs = [pl.BlockSpec((1, H, W, 2), lambda n: (n, 0, 0, 0))]
    for p in params:
        w_big, b_big = _pack_layer(*p)
        inputs += [w_big, b_big]
        in_specs += [pl.BlockSpec(w_big.shape, lambda n: (0, 0, 0)),
                     pl.BlockSpec(b_big.shape, lambda n: (0, 0))]

    kernel = functools.partial(_fused_convnet_kernel,
                               H=H, W=W, channels=channels, relus=relus)

    out = pl.pallas_call(
        kernel,
        out_shape=jax.ShapeDtypeStruct((N, H, W, 2), jnp.float32),
        grid_spec=pltpu.PrefetchScalarGridSpec(
            num_scalar_prefetch=0,
            grid=(N,),
            in_specs=in_specs,
            out_specs=pl.BlockSpec((1, H, W, 2), lambda n: (n, 0, 0, 0)),
            scratch_shapes=[pltpu.VMEM((H + 2, W + 2 * _W0, cmax),
                                       jnp.float32)]),
        compiler_params=pltpu.CompilerParams(
            dimension_semantics=("parallel",)),
    )(*inputs)

    out_r = jnp.transpose(out[..., 0:1], (0, 3, 1, 2))          # NHWC -> NCHW
    out_i = jnp.transpose(out[..., 1:2], (0, 3, 1, 2))
    # nn.Dropout(0.5) after conv3/relu is the identity in eval mode.
    # TODO(synk): training-mode dropout (p=0.5, via pltpu PRNG) not implemented.
    return out_r, out_i


# --------------------------------------------------------------------------
# Parameter init + plain-JAX reference (for correctness check only)
# --------------------------------------------------------------------------

def init_params(key):
    params = []
    for cin, cout in _CHANNELS:
        key, k1, k2, k3, k4 = jax.random.split(key, 5)
        scale = 1.0 / np.sqrt(9.0 * cin)
        wr = scale * jax.random.normal(k1, (cout, cin, 3, 3), jnp.float32)
        wi = scale * jax.random.normal(k2, (cout, cin, 3, 3), jnp.float32)
        br = scale * jax.random.normal(k3, (cout,), jnp.float32)
        bi = scale * jax.random.normal(k4, (cout,), jnp.float32)
        params.append((wr, wi, br, bi))
    return params


def _ref_conv(x, w, b):
    return jax.lax.conv_general_dilated(
        x, jnp.transpose(w, (2, 3, 1, 0)), (1, 1), "SAME",
        dimension_numbers=("NHWC", "HWIO", "NHWC"),
        precision=jax.lax.Precision.HIGHEST) + b


def ref_forward(xr_nchw, xi_nchw, params):
    xr = jnp.transpose(xr_nchw, (0, 2, 3, 1))
    xi = jnp.transpose(xi_nchw, (0, 2, 3, 1))
    n_layers = len(params)
    for l, (wr, wi, br, bi) in enumerate(params):
        new_r = _ref_conv(xr, wr, br) - _ref_conv(xi, wi, bi)
        new_i = _ref_conv(xr, wi, bi) + _ref_conv(xi, wr, br)
        if l + 1 < n_layers:
            new_r = jnp.maximum(new_r, 0.0)
            new_i = jnp.maximum(new_i, 0.0)
        xr, xi = new_r, new_i
    return (jnp.transpose(xr, (0, 3, 1, 2)),
            jnp.transpose(xi, (0, 3, 1, 2)))


if __name__ == "__main__":
    key = jax.random.PRNGKey(0)
    key, kr, ki, kp = jax.random.split(key, 4)

    N, C, H, W = 2, 1, 16, 16
    x_real = jax.random.normal(kr, (N, C, H, W), jnp.float32)
    x_imag = jax.random.normal(ki, (N, C, H, W), jnp.float32)
    params = init_params(kp)

    fwd = jax.jit(complex_convnet_forward)
    out_real, out_imag = fwd(x_real, x_imag, params)
    out_real = jax.block_until_ready(out_real)
    out_imag = jax.block_until_ready(out_imag)

    assert out_real.shape == (N, 1, H, W)
    assert out_imag.shape == (N, 1, H, W)

    ref_real, ref_imag = ref_forward(x_real, x_imag, params)
    # bf16 matmul inputs with f32 accumulation across 5 layers: ~1% worst-case
    # deviation vs. the f32 reference, so validate at 2e-2.
    np.testing.assert_allclose(np.asarray(out_real), np.asarray(ref_real),
                               rtol=2e-2, atol=2e-2)
    np.testing.assert_allclose(np.asarray(out_imag), np.asarray(ref_imag),
                               rtol=2e-2, atol=2e-2)

    print("KERNEL_OK")
</pallas_src>

<mosaic_0001>
module attributes {stable_mosaic.version = 11 : i64} {
  func.func @_fused_convnet_kernel(%arg0: i32, %arg1: memref<1x16x16x2xf32, #tpu.memory_space<vmem>>, %arg2: memref<9x2x32xbf16, #tpu.memory_space<vmem>>, %arg3: memref<1x32xf32, #tpu.memory_space<vmem>>, %arg4: memref<9x32x64xbf16, #tpu.memory_space<vmem>>, %arg5: memref<1x64xf32, #tpu.memory_space<vmem>>, %arg6: memref<9x64x128xbf16, #tpu.memory_space<vmem>>, %arg7: memref<1x128xf32, #tpu.memory_space<vmem>>, %arg8: memref<9x128x128xbf16, #tpu.memory_space<vmem>>, %arg9: memref<1x128xf32, #tpu.memory_space<vmem>>, %arg10: memref<9x128x2xbf16, #tpu.memory_space<vmem>>, %arg11: memref<1x2xf32, #tpu.memory_space<vmem>>, %arg12: memref<1x16x16x2xf32, #tpu.memory_space<vmem>>, %arg13: memref<18x32x128xf32, #tpu.memory_space<vmem>>) attributes {dimension_semantics = [#tpu.dimension_semantics<parallel>], iteration_bounds = array<i64: 2>, scalar_prefetch = 0 : i64, scratch_operands = 1 : i64, tpu.core_type = #tpu.core_type<tc>, window_params = [{transform_indices = @transform_0, window_bounds = array<i64: 1, 16, 16, 2>}, {pipeline_mode = #tpu.pipeline_mode<synchronous>, transform_indices = @transform_1, window_bounds = array<i64: 9, 2, 32>}, {pipeline_mode = #tpu.pipeline_mode<synchronous>, transform_indices = @transform_2, window_bounds = array<i64: 1, 32>}, {pipeline_mode = #tpu.pipeline_mode<synchronous>, transform_indices = @transform_3, window_bounds = array<i64: 9, 32, 64>}, {pipeline_mode = #tpu.pipeline_mode<synchronous>, transform_indices = @transform_4, window_bounds = array<i64: 1, 64>}, {pipeline_mode = #tpu.pipeline_mode<synchronous>, transform_indices = @transform_5, window_bounds = array<i64: 9, 64, 128>}, {pipeline_mode = #tpu.pipeline_mode<synchronous>, transform_indices = @transform_6, window_bounds = array<i64: 1, 128>}, {pipeline_mode = #tpu.pipeline_mode<synchronous>, transform_indices = @transform_7, window_bounds = array<i64: 9, 128, 128>}, {pipeline_mode = #tpu.pipeline_mode<synchronous>, transform_indices = @transform_8, window_bounds = array<i64: 1, 128>}, {pipeline_mode = #tpu.pipeline_mode<synchronous>, transform_indices = @transform_9, window_bounds = array<i64: 9, 128, 2>}, {pipeline_mode = #tpu.pipeline_mode<synchronous>, transform_indices = @transform_10, window_bounds = array<i64: 1, 2>}, {transform_indices = @transform_11, window_bounds = array<i64: 1, 16, 16, 2>}]} {
    %cst = arith.constant 0.000000e+00 : f32
    %0 = vector.broadcast %cst : f32 to vector<18x32x128xf32>
    %c0 = arith.constant 0 : index
    %c0_0 = arith.constant 0 : index
    %c0_1 = arith.constant 0 : index
    %1 = vector.load %arg13[%c0, %c0_0, %c0_1] : memref<18x32x128xf32, #tpu.memory_space<vmem>>, vector<18x32x128xf32>
    tpu.vector_store %arg13[%c0, %c0_0, %c0_1], %0 {strides = array<i32>} : memref<18x32x128xf32, #tpu.memory_space<vmem>>, vector<18x32x128xf32>,
    %c0_2 = arith.constant 0 : index
    %c0_3 = arith.constant 0 : index
    %c0_4 = arith.constant 0 : index
    %c0_5 = arith.constant 0 : index
    %2 = vector.load %arg1[%c0_2, %c0_3, %c0_4, %c0_5] : memref<1x16x16x2xf32, #tpu.memory_space<vmem>>, vector<1x16x16x2xf32>
    %3 = vector.shape_cast %2 : vector<1x16x16x2xf32> to vector<16x16x2xf32>
    %c1 = arith.constant 1 : index
    %c8 = arith.constant 8 : index
    %c0_6 = arith.constant 0 : index
    %4 = vector.load %arg13[%c1, %c8, %c0_6] : memref<18x32x128xf32, #tpu.memory_space<vmem>>, vector<16x16x2xf32>
    tpu.vector_store %arg13[%c1, %c8, %c0_6], %3 {strides = array<i32>} : memref<18x32x128xf32, #tpu.memory_space<vmem>>, vector<16x16x2xf32>,
    %c0_7 = arith.constant 0 : index
    %c7 = arith.constant 7 : index
    %c0_8 = arith.constant 0 : index
    %5 = vector.load %arg13[%c0_7, %c7, %c0_8] : memref<18x32x128xf32, #tpu.memory_space<vmem>>, vector<16x16x2xf32>
    %6 = vector.shape_cast %5 : vector<16x16x2xf32> to vector<256x2xf32>
    %c0_9 = arith.constant 0 : index
    %c0_10 = arith.constant 0 : index
    %c0_11 = arith.constant 0 : index
    %7 = vector.load %arg2[%c0_9, %c0_10, %c0_11] : memref<9x2x32xbf16, #tpu.memory_space<vmem>>, vector<1x2x32xbf16>
    %8 = vector.shape_cast %7 : vector<1x2x32xbf16> to vector<2x32xbf16>
    %9 = arith.extf %8 : vector<2x32xbf16> to vector<2x32xf32>
    %10 = vector.extract_strided_slice %6 {offsets = [0, 0], sizes = [256, 1], strides = [1, 1]} : vector<256x2xf32> to vector<256x1xf32>
    %11 = vector.extract_strided_slice %9 {offsets = [0, 0], sizes = [1, 32], strides = [1, 1]} : vector<2x32xf32> to vector<1x32xf32>
    %12 = vector.broadcast %10 : vector<256x1xf32> to vector<256x32xf32>
    %13 = vector.broadcast %11 : vector<1x32xf32> to vector<256x32xf32>
    %14 = arith.mulf %12, %13 : vector<256x32xf32>
    %15 = vector.extract_strided_slice %6 {offsets = [0, 1], sizes = [256, 1], strides = [1, 1]} : vector<256x2xf32> to vector<256x1xf32>
    %16 = vector.extract_strided_slice %9 {offsets = [1, 0], sizes = [1, 32], strides = [1, 1]} : vector<2x32xf32> to vector<1x32xf32>
    %17 = vector.broadcast %15 : vector<256x1xf32> to vector<256x32xf32>
    %18 = vector.broadcast %16 : vector<1x32xf32> to vector<256x32xf32>
    %19 = arith.mulf %17, %18 : vector<256x32xf32>
    %20 = arith.addf %14, %19 : vector<256x32xf32>
    %c0_12 = arith.constant 0 : index
    %c8_13 = arith.constant 8 : index
    %c0_14 = arith.constant 0 : index
    %21 = vector.load %arg13[%c0_12, %c8_13, %c0_14] : memref<18x32x128xf32, #tpu.memory_space<vmem>>, vector<16x16x2xf32>
    %22 = vector.shape_cast %21 : vector<16x16x2xf32> to vector<256x2xf32>
    %c1_15 = arith.constant 1 : index
    %c0_16 = arith.constant 0 : index
    %c0_17 = arith.constant 0 : index
    %23 = vector.load %arg2[%c1_15, %c0_16, %c0_17] : memref<9x2x32xbf16, #tpu.memory_space<vmem>>, vector<1x2x32xbf16>
    %24 = vector.shape_cast %23 : vector<1x2x32xbf16> to vector<2x32xbf16>
    %25 = arith.extf %24 : vector<2x32xbf16> to vector<2x32xf32>
    %26 = vector.extract_strided_slice %22 {offsets = [0, 0], sizes = [256, 1], strides = [1, 1]} : vector<256x2xf32> to vector<256x1xf32>
    %27 = vector.extract_strided_slice %25 {offsets = [0, 0], sizes = [1, 32], strides = [1, 1]} : vector<2x32xf32> to vector<1x32xf32>
    %28 = vector.broadcast %26 : vector<256x1xf32> to vector<256x32xf32>
    %29 = vector.broadcast %27 : vector<1x32xf32> to vector<256x32xf32>
    %30 = arith.mulf %28, %29 : vector<256x32xf32>
    %31 = vector.extract_strided_slice %22 {offsets = [0, 1], sizes = [256, 1], strides = [1, 1]} : vector<256x2xf32> to vector<256x1xf32>
    %32 = vector.extract_strided_slice %25 {offsets = [1, 0], sizes = [1, 32], strides = [1, 1]} : vector<2x32xf32> to vector<1x32xf32>
    %33 = vector.broadcast %31 : vector<256x1xf32> to vector<256x32xf32>
    %34 = vector.broadcast %32 : vector<1x32xf32> to vector<256x32xf32>
    %35 = arith.mulf %33, %34 : vector<256x32xf32>
    %36 = arith.addf %30, %35 : vector<256x32xf32>
    %37 = arith.addf %20, %36 : vector<256x32xf32>
    %c0_18 = arith.constant 0 : index
    %c9 = arith.constant 9 : index
    %c0_19 = arith.constant 0 : index
    %38 = vector.load %arg13[%c0_18, %c9, %c0_19] : memref<18x32x128xf32, #tpu.memory_space<vmem>>, vector<16x16x2xf32>
    %39 = vector.shape_cast %38 : vector<16x16x2xf32> to vector<256x2xf32>
    %c2 = arith.constant 2 : index
    %c0_20 = arith.constant 0 : index
    %c0_21 = arith.constant 0 : index
    %40 = vector.load %arg2[%c2, %c0_20, %c0_21] : memref<9x2x32xbf16, #tpu.memory_space<vmem>>, vector<1x2x32xbf16>
    %41 = vector.shape_cast %40 : vector<1x2x32xbf16> to vector<2x32xbf16>
    %42 = arith.extf %41 : vector<2x32xbf16> to vector<2x32xf32>
    %43 = vector.extract_strided_slice %39 {offsets = [0, 0], sizes = [256, 1], strides = [1, 1]} : vector<256x2xf32> to vector<256x1xf32>
    %44 = vector.extract_strided_slice %42 {offsets = [0, 0], sizes = [1, 32], strides = [1, 1]} : vector<2x32xf32> to vector<1x32xf32>
    %45 = vector.broadcast %43 : vector<256x1xf32> to vector<256x32xf32>
    %46 = vector.broadcast %44 : vector<1x32xf32> to vector<256x32xf32>
    %47 = arith.mulf %45, %46 : vector<256x32xf32>
    %48 = vector.extract_strided_slice %39 {offsets = [0, 1], sizes = [256, 1], strides = [1, 1]} : vector<256x2xf32> to vector<256x1xf32>
    %49 = vector.extract_strided_slice %42 {offsets = [1, 0], sizes = [1, 32], strides = [1, 1]} : vector<2x32xf32> to vector<1x32xf32>
    %50 = vector.broadcast %48 : vector<256x1xf32> to vector<256x32xf32>
    %51 = vector.broadcast %49 : vector<1x32xf32> to vector<256x32xf32>
    %52 = arith.mulf %50, %51 : vector<256x32xf32>
    %53 = arith.addf %47, %52 : vector<256x32xf32>
    %54 = arith.addf %37, %53 : vector<256x32xf32>
    %c1_22 = arith.constant 1 : index
    %c7_23 = arith.constant 7 : index
    %c0_24 = arith.constant 0 : index
    %55 = vector.load %arg13[%c1_22, %c7_23, %c0_24] : memref<18x32x128xf32, #tpu.memory_space<vmem>>, vector<16x16x2xf32>
    %56 = vector.shape_cast %55 : vector<16x16x2xf32> to vector<256x2xf32>
    %c3 = arith.constant 3 : index
    %c0_25 = arith.constant 0 : index
    %c0_26 = arith.constant 0 : index
    %57 = vector.load %arg2[%c3, %c0_25, %c0_26] : memref<9x2x32xbf16, #tpu.memory_space<vmem>>, vector<1x2x32xbf16>
    %58 = vector.shape_cast %57 : vector<1x2x32xbf16> to vector<2x32xbf16>
    %59 = arith.extf %58 : vector<2x32xbf16> to vector<2x32xf32>
    %60 = vector.extract_strided_slice %56 {offsets = [0, 0], sizes = [256, 1], strides = [1, 1]} : vector<256x2xf32> to vector<256x1xf32>
    %61 = vector.extract_strided_slice %59 {offsets = [0, 0], sizes = [1, 32], strides = [1, 1]} : vector<2x32xf32> to vector<1x32xf32>
    %62 = vector.broadcast %60 : vector<256x1xf32> to vector<256x32xf32>
    %63 = vector.broadcast %61 : vector<1x32xf32> to vector<256x32xf32>
    %64 = arith.mulf %62, %63 : vector<256x32xf32>
    %65 = vector.extract_strided_slice %56 {offsets = [0, 1], sizes = [256, 1], strides = [1, 1]} : vector<256x2xf32> to vector<256x1xf32>
    %66 = vector.extract_strided_slice %59 {offsets = [1, 0], sizes = [1, 32], strides = [1, 1]} : vector<2x32xf32> to vector<1x32xf32>
    %67 = vector.broadcast %65 : vector<256x1xf32> to vector<256x32xf32>
    %68 = vector.broadcast %66 : vector<1x32xf32> to vector<256x32xf32>
    %69 = arith.mulf %67, %68 : vector<256x32xf32>
    %70 = arith.addf %64, %69 : vector<256x32xf32>
    %71 = arith.addf %54, %70 : vector<256x32xf32>
    %c1_27 = arith.constant 1 : index
    %c8_28 = arith.constant 8 : index
    %c0_29 = arith.constant 0 : index
    %72 = vector.load %arg13[%c1_27, %c8_28, %c0_29] : memref<18x32x128xf32, #tpu.memory_space<vmem>>, vector<16x16x2xf32>
    %73 = vector.shape_cast %72 : vector<16x16x2xf32> to vector<256x2xf32>
    %c4 = arith.constant 4 : index
    %c0_30 = arith.constant 0 : index
    %c0_31 = arith.constant 0 : index
    %74 = vector.load %arg2[%c4, %c0_30, %c0_31] : memref<9x2x32xbf16, #tpu.memory_space<vmem>>, vector<1x2x32xbf16>
    %75 = vector.shape_cast %74 : vector<1x2x32xbf16> to vector<2x32xbf16>
    %76 = arith.extf %75 : vector<2x32xbf16> to vector<2x32xf32>
    %77 = vector.extract_strided_slice %73 {offsets = [0, 0], sizes = [256, 1], strides = [1, 1]} : vector<256x2xf32> to vector<256x1xf32>
    %78 = vector.extract_strided_slice %76 {offsets = [0, 0], sizes = [1, 32], strides = [1, 1]} : vector<2x32xf32> to vector<1x32xf32>
    %79 = vector.broadcast %77 : vector<256x1xf32> to vector<256x32xf32>
    %80 = vector.broadcast %78 : vector<1x32xf32> to vector<256x32xf32>
    %81 = arith.mulf %79, %80 : vector<256x32xf32>
    %82 = vector.extract_strided_slice %73 {offsets = [0, 1], sizes = [256, 1], strides = [1, 1]} : vector<256x2xf32> to vector<256x1xf32>
    %83 = vector.extract_strided_slice %76 {offsets = [1, 0], sizes = [1, 32], strides = [1, 1]} : vector<2x32xf32> to vector<1x32xf32>
    %84 = vector.broadcast %82 : vector<256x1xf32> to vector<256x32xf32>
    %85 = vector.broadcast %83 : vector<1x32xf32> to vector<256x32xf32>
    %86 = arith.mulf %84, %85 : vector<256x32xf32>
    %87 = arith.addf %81, %86 : vector<256x32xf32>
    %88 = arith.addf %71, %87 : vector<256x32xf32>
    %c1_32 = arith.constant 1 : index
    %c9_33 = arith.constant 9 : index
    %c0_34 = arith.constant 0 : index
    %89 = vector.load %arg13[%c1_32, %c9_33, %c0_34] : memref<18x32x128xf32, #tpu.memory_space<vmem>>, vector<16x16x2xf32>
    %90 = vector.shape_cast %89 : vector<16x16x2xf32> to vector<256x2xf32>
    %c5 = arith.constant 5 : index
    %c0_35 = arith.constant 0 : index
    %c0_36 = arith.constant 0 : index
    %91 = vector.load %arg2[%c5, %c0_35, %c0_36] : memref<9x2x32xbf16, #tpu.memory_space<vmem>>, vector<1x2x32xbf16>
    %92 = vector.shape_cast %91 : vector<1x2x32xbf16> to vector<2x32xbf16>
    %93 = arith.extf %92 : vector<2x32xbf16> to vector<2x32xf32>
    %94 = vector.extract_strided_slice %90 {offsets = [0, 0], sizes = [256, 1], strides = [1, 1]} : vector<256x2xf32> to vector<256x1xf32>
    %95 = vector.extract_strided_slice %93 {offsets = [0, 0], sizes = [1, 32], strides = [1, 1]} : vector<2x32xf32> to vector<1x32xf32>
    %96 = vector.broadcast %94 : vector<256x1xf32> to vector<256x32xf32>
    %97 = vector.broadcast %95 : vector<1x32xf32> to vector<256x32xf32>
    %98 = arith.mulf %96, %97 : vector<256x32xf32>
    %99 = vector.extract_strided_slice %90 {offsets = [0, 1], sizes = [256, 1], strides = [1, 1]} : vector<256x2xf32> to vector<256x1xf32>
    %100 = vector.extract_strided_slice %93 {offsets = [1, 0], sizes = [1, 32], strides = [1, 1]} : vector<2x32xf32> to vector<1x32xf32>
    %101 = vector.broadcast %99 : vector<256x1xf32> to vector<256x32xf32>
    %102 = vector.broadcast %100 : vector<1x32xf32> to vector<256x32xf32>
    %103 = arith.mulf %101, %102 : vector<256x32xf32>
    %104 = arith.addf %98, %103 : vector<256x32xf32>
    %105 = arith.addf %88, %104 : vector<256x32xf32>
    %c2_37 = arith.constant 2 : index
    %c7_38 = arith.constant 7 : index
    %c0_39 = arith.constant 0 : index
    %106 = vector.load %arg13[%c2_37, %c7_38, %c0_39] : memref<18x32x128xf32, #tpu.memory_space<vmem>>, vector<16x16x2xf32>
    %107 = vector.shape_cast %106 : vector<16x16x2xf32> to vector<256x2xf32>
    %c6 = arith.constant 6 : index
    %c0_40 = arith.constant 0 : index
    %c0_41 = arith.constant 0 : index
    %108 = vector.load %arg2[%c6, %c0_40, %c0_41] : memref<9x2x32xbf16, #tpu.memory_space<vmem>>, vector<1x2x32xbf16>
    %109 = vector.shape_cast %108 : vector<1x2x32xbf16> to vector<2x32xbf16>
    %110 = arith.extf %109 : vector<2x32xbf16> to vector<2x32xf32>
    %111 = vector.extract_strided_slice %107 {offsets = [0, 0], sizes = [256, 1], strides = [1, 1]} : vector<256x2xf32> to vector<256x1xf32>
    %112 = vector.extract_strided_slice %110 {offsets = [0, 0], sizes = [1, 32], strides = [1, 1]} : vector<2x32xf32> to vector<1x32xf32>
    %113 = vector.broadcast %111 : vector<256x1xf32> to vector<256x32xf32>
    %114 = vector.broadcast %112 : vector<1x32xf32> to vector<256x32xf32>
    %115 = arith.mulf %113, %114 : vector<256x32xf32>
    %116 = vector.extract_strided_slice %107 {offsets = [0, 1], sizes = [256, 1], strides = [1, 1]} : vector<256x2xf32> to vector<256x1xf32>
    %117 = vector.extract_strided_slice %110 {offsets = [1, 0], sizes = [1, 32], strides = [1, 1]} : vector<2x32xf32> to vector<1x32xf32>
    %118 = vector.broadcast %116 : vector<256x1xf32> to vector<256x32xf32>
    %119 = vector.broadcast %117 : vector<1x32xf32> to vector<256x32xf32>
    %120 = arith.mulf %118, %119 : vector<256x32xf32>
    %121 = arith.addf %115, %120 : vector<256x32xf32>
    %122 = arith.addf %105, %121 : vector<256x32xf32>
    %c2_42 = arith.constant 2 : index
    %c8_43 = arith.constant 8 : index
    %c0_44 = arith.constant 0 : index
    %123 = vector.load %arg13[%c2_42, %c8_43, %c0_44] : memref<18x32x128xf32, #tpu.memory_space<vmem>>, vector<16x16x2xf32>
    %124 = vector.shape_cast %123 : vector<16x16x2xf32> to vector<256x2xf32>
    %c7_45 = arith.constant 7 : index
    %c0_46 = arith.constant 0 : index
    %c0_47 = arith.constant 0 : index
    %125 = vector.load %arg2[%c7_45, %c0_46, %c0_47] : memref<9x2x32xbf16, #tpu.memory_space<vmem>>, vector<1x2x32xbf16>
    %126 = vector.shape_cast %125 : vector<1x2x32xbf16> to vector<2x32xbf16>
    %127 = arith.extf %126 : vector<2x32xbf16> to vector<2x32xf32>
    %128 = vector.extract_strided_slice %124 {offsets = [0, 0], sizes = [256, 1], strides = [1, 1]} : vector<256x2xf32> to vector<256x1xf32>
    %129 = vector.extract_strided_slice %127 {offsets = [0, 0], sizes = [1, 32], strides = [1, 1]} : vector<2x32xf32> to vector<1x32xf32>
    %130 = vector.broadcast %128 : vector<256x1xf32> to vector<256x32xf32>
    %131 = vector.broadcast %129 : vector<1x32xf32> to vector<256x32xf32>
    %132 = arith.mulf %130, %131 : vector<256x32xf32>
    %133 = vector.extract_strided_slice %124 {offsets = [0, 1], sizes = [256, 1], strides = [1, 1]} : vector<256x2xf32> to vector<256x1xf32>
    %134 = vector.extract_strided_slice %127 {offsets = [1, 0], sizes = [1, 32], strides = [1, 1]} : vector<2x32xf32> to vector<1x32xf32>
    %135 = vector.broadcast %133 : vector<256x1xf32> to vector<256x32xf32>
    %136 = vector.broadcast %134 : vector<1x32xf32> to vector<256x32xf32>
    %137 = arith.mulf %135, %136 : vector<256x32xf32>
    %138 = arith.addf %132, %137 : vector<256x32xf32>
    %139 = arith.addf %122, %138 : vector<256x32xf32>
    %c2_48 = arith.constant 2 : index
    %c9_49 = arith.constant 9 : index
    %c0_50 = arith.constant 0 : index
    %140 = vector.load %arg13[%c2_48, %c9_49, %c0_50] : memref<18x32x128xf32, #tpu.memory_space<vmem>>, vector<16x16x2xf32>
    %141 = vector.shape_cast %140 : vector<16x16x2xf32> to vector<256x2xf32>
    %c8_51 = arith.constant 8 : index
    %c0_52 = arith.constant 0 : index
    %c0_53 = arith.constant 0 : index
    %142 = vector.load %arg2[%c8_51, %c0_52, %c0_53] : memref<9x2x32xbf16, #tpu.memory_space<vmem>>, vector<1x2x32xbf16>
    %143 = vector.shape_cast %142 : vector<1x2x32xbf16> to vector<2x32xbf16>
    %144 = arith.extf %143 : vector<2x32xbf16> to vector<2x32xf32>
    %145 = vector.extract_strided_slice %141 {offsets = [0, 0], sizes = [256, 1], strides = [1, 1]} : vector<256x2xf32> to vector<256x1xf32>
    %146 = vector.extract_strided_slice %144 {offsets = [0, 0], sizes = [1, 32], strides = [1, 1]} : vector<2x32xf32> to vector<1x32xf32>
    %147 = vector.broadcast %145 : vector<256x1xf32> to vector<256x32xf32>
    %148 = vector.broadcast %146 : vector<1x32xf32> to vector<256x32xf32>
    %149 = arith.mulf %147, %148 : vector<256x32xf32>
    %150 = vector.extract_strided_slice %141 {offsets = [0, 1], sizes = [256, 1], strides = [1, 1]} : vector<256x2xf32> to vector<256x1xf32>
    %151 = vector.extract_strided_slice %144 {offsets = [1, 0], sizes = [1, 32], strides = [1, 1]} : vector<2x32xf32> to vector<1x32xf32>
    %152 = vector.broadcast %150 : vector<256x1xf32> to vector<256x32xf32>
    %153 = vector.broadcast %151 : vector<1x32xf32> to vector<256x32xf32>
    %154 = arith.mulf %152, %153 : vector<256x32xf32>
    %155 = arith.addf %149, %154 : vector<256x32xf32>
    %156 = arith.addf %139, %155 : vector<256x32xf32>
    %c0_54 = arith.constant 0 : index
    %c0_55 = arith.constant 0 : index
    %157 = vector.load %arg3[%c0_54, %c0_55] : memref<1x32xf32, #tpu.memory_space<vmem>>, vector<1x32xf32>
    %158 = vector.broadcast %157 : vector<1x32xf32> to vector<256x32xf32>
    %159 = arith.addf %156, %158 : vector<256x32xf32>
    %cst_56 = arith.constant 0.000000e+00 : f32
    %160 = vector.broadcast %cst_56 : f32 to vector<256x32xf32>
    %161 = arith.maximumf %159, %160 : vector<256x32xf32>
    %162 = vector.shape_cast %161 : vector<256x32xf32> to vector<16x16x32xf32>
    %c1_57 = arith.constant 1 : index
    %c8_58 = arith.constant 8 : index
    %c0_59 = arith.constant 0 : index
    %163 = vector.load %arg13[%c1_57, %c8_58, %c0_59] : memref<18x32x128xf32, #tpu.memory_space<vmem>>, vector<16x16x32xf32>
    tpu.vector_store %arg13[%c1_57, %c8_58, %c0_59], %162 {strides = array<i32>} : memref<18x32x128xf32, #tpu.memory_space<vmem>>, vector<16x16x32xf32>,
    %c0_60 = arith.constant 0 : index
    %c7_61 = arith.constant 7 : index
    %c0_62 = arith.constant 0 : index
    %164 = vector.load %arg13[%c0_60, %c7_61, %c0_62] : memref<18x32x128xf32, #tpu.memory_space<vmem>>, vector<16x16x32xf32>
    %165 = vector.shape_cast %164 : vector<16x16x32xf32> to vector<256x32xf32>
    %166 = arith.truncf %165 : vector<256x32xf32> to vector<256x32xbf16>
    %c0_63 = arith.constant 0 : index
    %c0_64 = arith.constant 0 : index
    %c0_65 = arith.constant 0 : index
    %167 = vector.load %arg4[%c0_63, %c0_64, %c0_65] : memref<9x32x64xbf16, #tpu.memory_space<vmem>>, vector<1x32x64xbf16>
    %168 = vector.shape_cast %167 : vector<1x32x64xbf16> to vector<32x64xbf16>
    %cst_66 = arith.constant dense<0.000000e+00> : vector<256x64xf32>
    %169 = tpu.matmul %166, %168, %cst_66 {dimension_numbers = #tpu.dot_dimension_numbers<[1], [0], [0], [1], [0, 0, 1, 1], [], []>} : vector<256x32xbf16>, vector<32x64xbf16>, vector<256x64xf32> -> vector<256x64xf32>
    %c0_67 = arith.constant 0 : index
    %c8_68 = arith.constant 8 : index
    %c0_69 = arith.constant 0 : index
    %170 = vector.load %arg13[%c0_67, %c8_68, %c0_69] : memref<18x32x128xf32, #tpu.memory_space<vmem>>, vector<16x16x32xf32>
    %171 = vector.shape_cast %170 : vector<16x16x32xf32> to vector<256x32xf32>
    %172 = arith.truncf %171 : vector<256x32xf32> to vector<256x32xbf16>
    %c1_70 = arith.constant 1 : index
    %c0_71 = arith.constant 0 : index
    %c0_72 = arith.constant 0 : index
    %173 = vector.load %arg4[%c1_70, %c0_71, %c0_72] : memref<9x32x64xbf16, #tpu.memory_space<vmem>>, vector<1x32x64xbf16>
    %174 = vector.shape_cast %173 : vector<1x32x64xbf16> to vector<32x64xbf16>
    %cst_73 = arith.constant dense<0.000000e+00> : vector<256x64xf32>
    %175 = tpu.matmul %172, %174, %cst_73 {dimension_numbers = #tpu.dot_dimension_numbers<[1], [0], [0], [1], [0, 0, 1, 1], [], []>} : vector<256x32xbf16>, vector<32x64xbf16>, vector<256x64xf32> -> vector<256x64xf32>
    %176 = arith.addf %169, %175 : vector<256x64xf32>
    %c0_74 = arith.constant 0 : index
    %c9_75 = arith.constant 9 : index
    %c0_76 = arith.constant 0 : index
    %177 = vector.load %arg13[%c0_74, %c9_75, %c0_76] : memref<18x32x128xf32, #tpu.memory_space<vmem>>, vector<16x16x32xf32>
    %178 = vector.shape_cast %177 : vector<16x16x32xf32> to vector<256x32xf32>
    %179 = arith.truncf %178 : vector<256x32xf32> to vector<256x32xbf16>
    %c2_77 = arith.constant 2 : index
    %c0_78 = arith.constant 0 : index
    %c0_79 = arith.constant 0 : index
    %180 = vector.load %arg4[%c2_77, %c0_78, %c0_79] : memref<9x32x64xbf16, #tpu.memory_space<vmem>>, vector<1x32x64xbf16>
    %181 = vector.shape_cast %180 : vector<1x32x64xbf16> to vector<32x64xbf16>
    %cst_80 = arith.constant dense<0.000000e+00> : vector<256x64xf32>
    %182 = tpu.matmul %179, %181, %cst_80 {dimension_numbers = #tpu.dot_dimension_numbers<[1], [0], [0], [1], [0, 0, 1, 1], [], []>} : vector<256x32xbf16>, vector<32x64xbf16>, vector<256x64xf32> -> vector<256x64xf32>
    %183 = arith.addf %176, %182 : vector<256x64xf32>
    %c1_81 = arith.constant 1 : index
    %c7_82 = arith.constant 7 : index
    %c0_83 = arith.constant 0 : index
    %184 = vector.load %arg13[%c1_81, %c7_82, %c0_83] : memref<18x32x128xf32, #tpu.memory_space<vmem>>, vector<16x16x32xf32>
    %185 = vector.shape_cast %184 : vector<16x16x32xf32> to vector<256x32xf32>
    %186 = arith.truncf %185 : vector<256x32xf32> to vector<256x32xbf16>
    %c3_84 = arith.constant 3 : index
    %c0_85 = arith.constant 0 : index
    %c0_86 = arith.constant 0 : index
    %187 = vector.load %arg4[%c3_84, %c0_85, %c0_86] : memref<9x32x64xbf16, #tpu.memory_space<vmem>>, vector<1x32x64xbf16>
    %188 = vector.shape_cast %187 : vector<1x32x64xbf16> to vector<32x64xbf16>
    %cst_87 = arith.constant dense<0.000000e+00> : vector<256x64xf32>
    %189 = tpu.matmul %186, %188, %cst_87 {dimension_numbers = #tpu.dot_dimension_numbers<[1], [0], [0], [1], [0, 0, 1, 1], [], []>} : vector<256x32xbf16>, vector<32x64xbf16>, vector<256x64xf32> -> vector<256x64xf32>
    %190 = arith.addf %183, %189 : vector<256x64xf32>
    %c1_88 = arith.constant 1 : index
    %c8_89 = arith.constant 8 : index
    %c0_90 = arith.constant 0 : index
    %191 = vector.load %arg13[%c1_88, %c8_89, %c0_90] : memref<18x32x128xf32, #tpu.memory_space<vmem>>, vector<16x16x32xf32>
    %192 = vector.shape_cast %191 : vector<16x16x32xf32> to vector<256x32xf32>
    %193 = arith.truncf %192 : vector<256x32xf32> to vector<256x32xbf16>
    %c4_91 = arith.constant 4 : index
    %c0_92 = arith.constant 0 : index
    %c0_93 = arith.constant 0 : index
    %194 = vector.load %arg4[%c4_91, %c0_92, %c0_93] : memref<9x32x64xbf16, #tpu.memory_space<vmem>>, vector<1x32x64xbf16>
    %195 = vector.shape_cast %194 : vector<1x32x64xbf16> to vector<32x64xbf16>
    %cst_94 = arith.constant dense<0.000000e+00> : vector<256x64xf32>
    %196 = tpu.matmul %193, %195, %cst_94 {dimension_numbers = #tpu.dot_dimension_numbers<[1], [0], [0], [1], [0, 0, 1, 1], [], []>} : vector<256x32xbf16>, vector<32x64xbf16>, vector<256x64xf32> -> vector<256x64xf32>
    %197 = arith.addf %190, %196 : vector<256x64xf32>
    %c1_95 = arith.constant 1 : index
    %c9_96 = arith.constant 9 : index
    %c0_97 = arith.constant 0 : index
    %198 = vector.load %arg13[%c1_95, %c9_96, %c0_97] : memref<18x32x128xf32, #tpu.memory_space<vmem>>, vector<16x16x32xf32>
    %199 = vector.shape_cast %198 : vector<16x16x32xf32> to vector<256x32xf32>
    %200 = arith.truncf %199 : vector<256x32xf32> to vector<256x32xbf16>
    %c5_98 = arith.constant 5 : index
    %c0_99 = arith.constant 0 : index
    %c0_100 = arith.constant 0 : index
    %201 = vector.load %arg4[%c5_98, %c0_99, %c0_100] : memref<9x32x64xbf16, #tpu.memory_space<vmem>>, vector<1x32x64xbf16>
    %202 = vector.shape_cast %201 : vector<1x32x64xbf16> to vector<32x64xbf16>
    %cst_101 = arith.constant dense<0.000000e+00> : vector<256x64xf32>
    %203 = tpu.matmul %200, %202, %cst_101 {dimension_numbers = #tpu.dot_dimension_numbers<[1], [0], [0], [1], [0, 0, 1, 1], [], []>} : vector<256x32xbf16>, vector<32x64xbf16>, vector<256x64xf32> -> vector<256x64xf32>
    %204 = arith.addf %197, %203 : vector<256x64xf32>
    %c2_102 = arith.constant 2 : index
    %c7_103 = arith.constant 7 : index
    %c0_104 = arith.constant 0 : index
    %205 = vector.load %arg13[%c2_102, %c7_103, %c0_104] : memref<18x32x128xf32, #tpu.memory_space<vmem>>, vector<16x16x32xf32>
    %206 = vector.shape_cast %205 : vector<16x16x32xf32> to vector<256x32xf32>
    %207 = arith.truncf %206 : vector<256x32xf32> to vector<256x32xbf16>
    %c6_105 = arith.constant 6 : index
    %c0_106 = arith.constant 0 : index
    %c0_107 = arith.constant 0 : index
    %208 = vector.load %arg4[%c6_105, %c0_106, %c0_107] : memref<9x32x64xbf16, #tpu.memory_space<vmem>>, vector<1x32x64xbf16>
    %209 = vector.shape_cast %208 : vector<1x32x64xbf16> to vector<32x64xbf16>
    %cst_108 = arith.constant dense<0.000000e+00> : vector<256x64xf32>
    %210 = tpu.matmul %207, %209, %cst_108 {dimension_numbers = #tpu.dot_dimension_numbers<[1], [0], [0], [1], [0, 0, 1, 1], [], []>} : vector<256x32xbf16>, vector<32x64xbf16>, vector<256x64xf32> -> vector<256x64xf32>
    %211 = arith.addf %204, %210 : vector<256x64xf32>
    %c2_109 = arith.constant 2 : index
    %c8_110 = arith.constant 8 : index
    %c0_111 = arith.constant 0 : index
    %212 = vector.load %arg13[%c2_109, %c8_110, %c0_111] : memref<18x32x128xf32, #tpu.memory_space<vmem>>, vector<16x16x32xf32>
    %213 = vector.shape_cast %212 : vector<16x16x32xf32> to vector<256x32xf32>
    %214 = arith.truncf %213 : vector<256x32xf32> to vector<256x32xbf16>
    %c7_112 = arith.constant 7 : index
    %c0_113 = arith.constant 0 : index
    %c0_114 = arith.constant 0 : index
    %215 = vector.load %arg4[%c7_112, %c0_113, %c0_114] : memref<9x32x64xbf16, #tpu.memory_space<vmem>>, vector<1x32x64xbf16>
    %216 = vector.shape_cast %215 : vector<1x32x64xbf16> to vector<32x64xbf16>
    %cst_115 = arith.constant dense<0.000000e+00> : vector<256x64xf32>
    %217 = tpu.matmul %214, %216, %cst_115 {dimension_numbers = #tpu.dot_dimension_numbers<[1], [0], [0], [1], [0, 0, 1, 1], [], []>} : vector<256x32xbf16>, vector<32x64xbf16>, vector<256x64xf32> -> vector<256x64xf32>
    %218 = arith.addf %211, %217 : vector<256x64xf32>
    %c2_116 = arith.constant 2 : index
    %c9_117 = arith.constant 9 : index
    %c0_118 = arith.constant 0 : index
    %219 = vector.load %arg13[%c2_116, %c9_117, %c0_118] : memref<18x32x128xf32, #tpu.memory_space<vmem>>, vector<16x16x32xf32>
    %220 = vector.shape_cast %219 : vector<16x16x32xf32> to vector<256x32xf32>
    %221 = arith.truncf %220 : vector<256x32xf32> to vector<256x32xbf16>
    %c8_119 = arith.constant 8 : index
    %c0_120 = arith.constant 0 : index
    %c0_121 = arith.constant 0 : index
    %222 = vector.load %arg4[%c8_119, %c0_120, %c0_121] : memref<9x32x64xbf16, #tpu.memory_space<vmem>>, vector<1x32x64xbf16>
    %223 = vector.shape_cast %222 : vector<1x32x64xbf16> to vector<32x64xbf16>
    %cst_122 = arith.constant dense<0.000000e+00> : vector<256x64xf32>
    %224 = tpu.matmul %221, %223, %cst_122 {dimension_numbers = #tpu.dot_dimension_numbers<[1], [0], [0], [1], [0, 0, 1, 1], [], []>} : vector<256x32xbf16>, vector<32x64xbf16>, vector<256x64xf32> -> vector<256x64xf32>
    %225 = arith.addf %218, %224 : vector<256x64xf32>
    %c0_123 = arith.constant 0 : index
    %c0_124 = arith.constant 0 : index
    %226 = vector.load %arg5[%c0_123, %c0_124] : memref<1x64xf32, #tpu.memory_space<vmem>>, vector<1x64xf32>
    %227 = vector.broadcast %226 : vector<1x64xf32> to vector<256x64xf32>
    %228 = arith.addf %225, %227 : vector<256x64xf32>
    %cst_125 = arith.constant 0.000000e+00 : f32
    %229 = vector.broadcast %cst_125 : f32 to vector<256x64xf32>
    %230 = arith.maximumf %228, %229 : vector<256x64xf32>
    %231 = vector.shape_cast %230 : vector<256x64xf32> to vector<16x16x64xf32>
    %c1_126 = arith.constant 1 : index
    %c8_127 = arith.constant 8 : index
    %c0_128 = arith.constant 0 : index
    %232 = vector.load %arg13[%c1_126, %c8_127, %c0_128] : memref<18x32x128xf32, #tpu.memory_space<vmem>>, vector<16x16x64xf32>
    tpu.vector_store %arg13[%c1_126, %c8_127, %c0_128], %231 {strides = array<i32>} : memref<18x32x128xf32, #tpu.memory_space<vmem>>, vector<16x16x64xf32>,
    %c0_129 = arith.constant 0 : index
    %c7_130 = arith.constant 7 : index
    %c0_131 = arith.constant 0 : index
    %233 = vector.load %arg13[%c0_129, %c7_130, %c0_131] : memref<18x32x128xf32, #tpu.memory_space<vmem>>, vector<16x16x64xf32>
    %234 = vector.shape_cast %233 : vector<16x16x64xf32> to vector<256x64xf32>
    %235 = arith.truncf %234 : vector<256x64xf32> to vector<256x64xbf16>
    %c0_132 = arith.constant 0 : index
    %c0_133 = arith.constant 0 : index
    %c0_134 = arith.constant 0 : index
    %236 = vector.load %arg6[%c0_132, %c0_133, %c0_134] : memref<9x64x128xbf16, #tpu.memory_space<vmem>>, vector<1x64x128xbf16>
    %237 = vector.shape_cast %236 : vector<1x64x128xbf16> to vector<64x128xbf16>
    %cst_135 = arith.constant dense<0.000000e+00> : vector<256x128xf32>
    %238 = tpu.matmul %235, %237, %cst_135 {dimension_numbers = #tpu.dot_dimension_numbers<[1], [0], [0], [1], [0, 0, 1, 1], [], []>} : vector<256x64xbf16>, vector<64x128xbf16>, vector<256x128xf32> -> vector<256x128xf32>
    %c0_136 = arith.constant 0 : index
    %c8_137 = arith.constant 8 : index
    %c0_138 = arith.constant 0 : index
    %239 = vector.load %arg13[%c0_136, %c8_137, %c0_138] : memref<18x32x128xf32, #tpu.memory_space<vmem>>, vector<16x16x64xf32>
    %240 = vector.shape_cast %239 : vector<16x16x64xf32> to vector<256x64xf32>
    %241 = arith.truncf %240 : vector<256x64xf32> to vector<256x64xbf16>
    %c1_139 = arith.constant 1 : index
    %c0_140 = arith.constant 0 : index
    %c0_141 = arith.constant 0 : index
    %242 = vector.load %arg6[%c1_139, %c0_140, %c0_141] : memref<9x64x128xbf16, #tpu.memory_space<vmem>>, vector<1x64x128xbf16>
    %243 = vector.shape_cast %242 : vector<1x64x128xbf16> to vector<64x128xbf16>
    %cst_142 = arith.constant dense<0.000000e+00> : vector<256x128xf32>
    %244 = tpu.matmul %241, %243, %cst_142 {dimension_numbers = #tpu.dot_dimension_numbers<[1], [0], [0], [1], [0, 0, 1, 1], [], []>} : vector<256x64xbf16>, vector<64x128xbf16>, vector<256x128xf32> -> vector<256x128xf32>
    %245 = arith.addf %238, %244 : vector<256x128xf32>
    %c0_143 = arith.constant 0 : index
    %c9_144 = arith.constant 9 : index
    %c0_145 = arith.constant 0 : index
    %246 = vector.load %arg13[%c0_143, %c9_144, %c0_145] : memref<18x32x128xf32, #tpu.memory_space<vmem>>, vector<16x16x64xf32>
    %247 = vector.shape_cast %246 : vector<16x16x64xf32> to vector<256x64xf32>
    %248 = arith.truncf %247 : vector<256x64xf32> to vector<256x64xbf16>
    %c2_146 = arith.constant 2 : index
    %c0_147 = arith.constant 0 : index
    %c0_148 = arith.constant 0 : index
    %249 = vector.load %arg6[%c2_146, %c0_147, %c0_148] : memref<9x64x128xbf16, #tpu.memory_space<vmem>>, vector<1x64x128xbf16>
    %250 = vector.shape_cast %249 : vector<1x64x128xbf16> to vector<64x128xbf16>
    %cst_149 = arith.constant dense<0.000000e+00> : vector<256x128xf32>
    %251 = tpu.matmul %248, %250, %cst_149 {dimension_numbers = #tpu.dot_dimension_numbers<[1], [0], [0], [1], [0, 0, 1, 1], [], []>} : vector<256x64xbf16>, vector<64x128xbf16>, vector<256x128xf32> -> vector<256x128xf32>
    %252 = arith.addf %245, %251 : vector<256x128xf32>
    %c1_150 = arith.constant 1 : index
    %c7_151 = arith.constant 7 : index
    %c0_152 = arith.constant 0 : index
    %253 = vector.load %arg13[%c1_150, %c7_151, %c0_152] : memref<18x32x128xf32, #tpu.memory_space<vmem>>, vector<16x16x64xf32>
    %254 = vector.shape_cast %253 : vector<16x16x64xf32> to vector<256x64xf32>
    %255 = arith.truncf %254 : vector<256x64xf32> to vector<256x64xbf16>
    %c3_153 = arith.constant 3 : index
    %c0_154 = arith.constant 0 : index
    %c0_155 = arith.constant 0 : index
    %256 = vector.load %arg6[%c3_153, %c0_154, %c0_155] : memref<9x64x128xbf16, #tpu.memory_space<vmem>>, vector<1x64x128xbf16>
    %257 = vector.shape_cast %256 : vector<1x64x128xbf16> to vector<64x128xbf16>
    %cst_156 = arith.constant dense<0.000000e+00> : vector<256x128xf32>
    %258 = tpu.matmul %255, %257, %cst_156 {dimension_numbers = #tpu.dot_dimension_numbers<[1], [0], [0], [1], [0, 0, 1, 1], [], []>} : vector<256x64xbf16>, vector<64x128xbf16>, vector<256x128xf32> -> vector<256x128xf32>
    %259 = arith.addf %252, %258 : vector<256x128xf32>
    %c1_157 = arith.constant 1 : index
    %c8_158 = arith.constant 8 : index
    %c0_159 = arith.constant 0 : index
    %260 = vector.load %arg13[%c1_157, %c8_158, %c0_159] : memref<18x32x128xf32, #tpu.memory_space<vmem>>, vector<16x16x64xf32>
    %261 = vector.shape_cast %260 : vector<16x16x64xf32> to vector<256x64xf32>
    %262 = arith.truncf %261 : vector<256x64xf32> to vector<256x64xbf16>
    %c4_160 = arith.constant 4 : index
    %c0_161 = arith.constant 0 : index
    %c0_162 = arith.constant 0 : index
    %263 = vector.load %arg6[%c4_160, %c0_161, %c0_162] : memref<9x64x128xbf16, #tpu.memory_space<vmem>>, vector<1x64x128xbf16>
    %264 = vector.shape_cast %263 : vector<1x64x128xbf16> to vector<64x128xbf16>
    %cst_163 = arith.constant dense<0.000000e+00> : vector<256x128xf32>
    %265 = tpu.matmul %262, %264, %cst_163 {dimension_numbers = #tpu.dot_dimension_numbers<[1], [0], [0], [1], [0, 0, 1, 1], [], []>} : vector<256x64xbf16>, vector<64x128xbf16>, vector<256x128xf32> -> vector<256x128xf32>
    %266 = arith.addf %259, %265 : vector<256x128xf32>
    %c1_164 = arith.constant 1 : index
    %c9_165 = arith.constant 9 : index
    %c0_166 = arith.constant 0 : index
    %267 = vector.load %arg13[%c1_164, %c9_165, %c0_166] : memref<18x32x128xf32, #tpu.memory_space<vmem>>, vector<16x16x64xf32>
    %268 = vector.shape_cast %267 : vector<16x16x64xf32> to vector<256x64xf32>
    %269 = arith.truncf %268 : vector<256x64xf32> to vector<256x64xbf16>
    %c5_167 = arith.constant 5 : index
    %c0_168 = arith.constant 0 : index
    %c0_169 = arith.constant 0 : index
    %270 = vector.load %arg6[%c5_167, %c0_168, %c0_169] : memref<9x64x128xbf16, #tpu.memory_space<vmem>>, vector<1x64x128xbf16>
    %271 = vector.shape_cast %270 : vector<1x64x128xbf16> to vector<64x128xbf16>
    %cst_170 = arith.constant dense<0.000000e+00> : vector<256x128xf32>
    %272 = tpu.matmul %269, %271, %cst_170 {dimension_numbers = #tpu.dot_dimension_numbers<[1], [0], [0], [1], [0, 0, 1, 1], [], []>} : vector<256x64xbf16>, vector<64x128xbf16>, vector<256x128xf32> -> vector<256x128xf32>
    %273 = arith.addf %266, %272 : vector<256x128xf32>
    %c2_171 = arith.constant 2 : index
    %c7_172 = arith.constant 7 : index
    %c0_173 = arith.constant 0 : index
    %274 = vector.load %arg13[%c2_171, %c7_172, %c0_173] : memref<18x32x128xf32, #tpu.memory_space<vmem>>, vector<16x16x64xf32>
    %275 = vector.shape_cast %274 : vector<16x16x64xf32> to vector<256x64xf32>
    %276 = arith.truncf %275 : vector<256x64xf32> to vector<256x64xbf16>
    %c6_174 = arith.constant 6 : index
    %c0_175 = arith.constant 0 : index
    %c0_176 = arith.constant 0 : index
    %277 = vector.load %arg6[%c6_174, %c0_175, %c0_176] : memref<9x64x128xbf16, #tpu.memory_space<vmem>>, vector<1x64x128xbf16>
    %278 = vector.shape_cast %277 : vector<1x64x128xbf16> to vector<64x128xbf16>
    %cst_177 = arith.constant dense<0.000000e+00> : vector<256x128xf32>
    %279 = tpu.matmul %276, %278, %cst_177 {dimension_numbers = #tpu.dot_dimension_numbers<[1], [0], [0], [1], [0, 0, 1, 1], [], []>} : vector<256x64xbf16>, vector<64x128xbf16>, vector<256x128xf32> -> vector<256x128xf32>
    %280 = arith.addf %273, %279 : vector<256x128xf32>
    %c2_178 = arith.constant 2 : index
    %c8_179 = arith.constant 8 : index
    %c0_180 = arith.constant 0 : index
    %281 = vector.load %arg13[%c2_178, %c8_179, %c0_180] : memref<18x32x128xf32, #tpu.memory_space<vmem>>, vector<16x16x64xf32>
    %282 = vector.shape_cast %281 : vector<16x16x64xf32> to vector<256x64xf32>
    %283 = arith.truncf %282 : vector<256x64xf32> to vector<256x64xbf16>
    %c7_181 = arith.constant 7 : index
    %c0_182 = arith.constant 0 : index
    %c0_183 = arith.constant 0 : index
    %284 = vector.load %arg6[%c7_181, %c0_182, %c0_183] : memref<9x64x128xbf16, #tpu.memory_space<vmem>>, vector<1x64x128xbf16>
    %285 = vector.shape_cast %284 : vector<1x64x128xbf16> to vector<64x128xbf16>
    %cst_184 = arith.constant dense<0.000000e+00> : vector<256x128xf32>
    %286 = tpu.matmul %283, %285, %cst_184 {dimension_numbers = #tpu.dot_dimension_numbers<[1], [0], [0], [1], [0, 0, 1, 1], [], []>} : vector<256x64xbf16>, vector<64x128xbf16>, vector<256x128xf32> -> vector<256x128xf32>
    %287 = arith.addf %280, %286 : vector<256x128xf32>
    %c2_185 = arith.constant 2 : index
    %c9_186 = arith.constant 9 : index
    %c0_187 = arith.constant 0 : index
    %288 = vector.load %arg13[%c2_185, %c9_186, %c0_187] : memref<18x32x128xf32, #tpu.memory_space<vmem>>, vector<16x16x64xf32>
    %289 = vector.shape_cast %288 : vector<16x16x64xf32> to vector<256x64xf32>
    %290 = arith.truncf %289 : vector<256x64xf32> to vector<256x64xbf16>
    %c8_188 = arith.constant 8 : index
    %c0_189 = arith.constant 0 : index
    %c0_190 = arith.constant 0 : index
    %291 = vector.load %arg6[%c8_188, %c0_189, %c0_190] : memref<9x64x128xbf16, #tpu.memory_space<vmem>>, vector<1x64x128xbf16>
    %292 = vector.shape_cast %291 : vector<1x64x128xbf16> to vector<64x128xbf16>
    %cst_191 = arith.constant dense<0.000000e+00> : vector<256x128xf32>
    %293 = tpu.matmul %290, %292, %cst_191 {dimension_numbers = #tpu.dot_dimension_numbers<[1], [0], [0], [1], [0, 0, 1, 1], [], []>} : vector<256x64xbf16>, vector<64x128xbf16>, vector<256x128xf32> -> vector<256x128xf32>
    %294 = arith.addf %287, %293 : vector<256x128xf32>
    %c0_192 = arith.constant 0 : index
    %c0_193 = arith.constant 0 : index
    %295 = vector.load %arg7[%c0_192, %c0_193] : memref<1x128xf32, #tpu.memory_space<vmem>>, vector<1x128xf32>
    %296 = vector.broadcast %295 : vector<1x128xf32> to vector<256x128xf32>
    %297 = arith.addf %294, %296 : vector<256x128xf32>
    %cst_194 = arith.constant 0.000000e+00 : f32
    %298 = vector.broadcast %cst_194 : f32 to vector<256x128xf32>
    %299 = arith.maximumf %297, %298 : vector<256x128xf32>
    %300 = vector.shape_cast %299 : vector<256x128xf32> to vector<16x16x128xf32>
    %c1_195 = arith.constant 1 : index
    %c8_196 = arith.constant 8 : index
    %c0_197 = arith.constant 0 : index
    %301 = vector.load %arg13[%c1_195, %c8_196, %c0_197] : memref<18x32x128xf32, #tpu.memory_space<vmem>>, vector<16x16x128xf32>
    tpu.vector_store %arg13[%c1_195, %c8_196, %c0_197], %300 {strides = array<i32>} : memref<18x32x128xf32, #tpu.memory_space<vmem>>, vector<16x16x128xf32>,
    %c0_198 = arith.constant 0 : index
    %c7_199 = arith.constant 7 : index
    %c0_200 = arith.constant 0 : index
    %302 = vector.load %arg13[%c0_198, %c7_199, %c0_200] : memref<18x32x128xf32, #tpu.memory_space<vmem>>, vector<16x16x128xf32>
    %303 = vector.shape_cast %302 : vector<16x16x128xf32> to vector<256x128xf32>
    %304 = arith.truncf %303 : vector<256x128xf32> to vector<256x128xbf16>
    %c0_201 = arith.constant 0 : index
    %c0_202 = arith.constant 0 : index
    %c0_203 = arith.constant 0 : index
    %305 = vector.load %arg8[%c0_201, %c0_202, %c0_203] : memref<9x128x128xbf16, #tpu.memory_space<vmem>>, vector<1x128x128xbf16>
    %306 = vector.shape_cast %305 : vector<1x128x128xbf16> to vector<128x128xbf16>
    %cst_204 = arith.constant dense<0.000000e+00> : vector<256x128xf32>
    %307 = tpu.matmul %304, %306, %cst_204 {dimension_numbers = #tpu.dot_dimension_numbers<[1], [0], [0], [1], [0, 0, 1, 1], [], []>} : vector<256x128xbf16>, vector<128x128xbf16>, vector<256x128xf32> -> vector<256x128xf32>
    %c0_205 = arith.constant 0 : index
    %c8_206 = arith.constant 8 : index
    %c0_207 = arith.constant 0 : index
    %308 = vector.load %arg13[%c0_205, %c8_206, %c0_207] : memref<18x32x128xf32, #tpu.memory_space<vmem>>, vector<16x16x128xf32>
    %309 = vector.shape_cast %308 : vector<16x16x128xf32> to vector<256x128xf32>
    %310 = arith.truncf %309 : vector<256x128xf32> to vector<256x128xbf16>
    %c1_208 = arith.constant 1 : index
    %c0_209 = arith.constant 0 : index
    %c0_210 = arith.constant 0 : index
    %311 = vector.load %arg8[%c1_208, %c0_209, %c0_210] : memref<9x128x128xbf16, #tpu.memory_space<vmem>>, vector<1x128x128xbf16>
    %312 = vector.shape_cast %311 : vector<1x128x128xbf16> to vector<128x128xbf16>
    %cst_211 = arith.constant dense<0.000000e+00> : vector<256x128xf32>
    %313 = tpu.matmul %310, %312, %cst_211 {dimension_numbers = #tpu.dot_dimension_numbers<[1], [0], [0], [1], [0, 0, 1, 1], [], []>} : vector<256x128xbf16>, vector<128x128xbf16>, vector<256x128xf32> -> vector<256x128xf32>
    %314 = arith.addf %307, %313 : vector<256x128xf32>
    %c0_212 = arith.constant 0 : index
    %c9_213 = arith.constant 9 : index
    %c0_214 = arith.constant 0 : index
    %315 = vector.load %arg13[%c0_212, %c9_213, %c0_214] : memref<18x32x128xf32, #tpu.memory_space<vmem>>, vector<16x16x128xf32>
    %316 = vector.shape_cast %315 : vector<16x16x128xf32> to vector<256x128xf32>
    %317 = arith.truncf %316 : vector<256x128xf32> to vector<256x128xbf16>
    %c2_215 = arith.constant 2 : index
    %c0_216 = arith.constant 0 : index
    %c0_217 = arith.constant 0 : index
    %318 = vector.load %arg8[%c2_215, %c0_216, %c0_217] : memref<9x128x128xbf16, #tpu.memory_space<vmem>>, vector<1x128x128xbf16>
    %319 = vector.shape_cast %318 : vector<1x128x128xbf16> to vector<128x128xbf16>
    %cst_218 = arith.constant dense<0.000000e+00> : vector<256x128xf32>
    %320 = tpu.matmul %317, %319, %cst_218 {dimension_numbers = #tpu.dot_dimension_numbers<[1], [0], [0], [1], [0, 0, 1, 1], [], []>} : vector<256x128xbf16>, vector<128x128xbf16>, vector<256x128xf32> -> vector<256x128xf32>
    %321 = arith.addf %314, %320 : vector<256x128xf32>
    %c1_219 = arith.constant 1 : index
    %c7_220 = arith.constant 7 : index
    %c0_221 = arith.constant 0 : index
    %322 = vector.load %arg13[%c1_219, %c7_220, %c0_221] : memref<18x32x128xf32, #tpu.memory_space<vmem>>, vector<16x16x128xf32>
    %323 = vector.shape_cast %322 : vector<16x16x128xf32> to vector<256x128xf32>
    %324 = arith.truncf %323 : vector<256x128xf32> to vector<256x128xbf16>
    %c3_222 = arith.constant 3 : index
    %c0_223 = arith.constant 0 : index
    %c0_224 = arith.constant 0 : index
    %325 = vector.load %arg8[%c3_222, %c0_223, %c0_224] : memref<9x128x128xbf16, #tpu.memory_space<vmem>>, vector<1x128x128xbf16>
    %326 = vector.shape_cast %325 : vector<1x128x128xbf16> to vector<128x128xbf16>
    %cst_225 = arith.constant dense<0.000000e+00> : vector<256x128xf32>
    %327 = tpu.matmul %324, %326, %cst_225 {dimension_numbers = #tpu.dot_dimension_numbers<[1], [0], [0], [1], [0, 0, 1, 1], [], []>} : vector<256x128xbf16>, vector<128x128xbf16>, vector<256x128xf32> -> vector<256x128xf32>
    %328 = arith.addf %321, %327 : vector<256x128xf32>
    %c1_226 = arith.constant 1 : index
    %c8_227 = arith.constant 8 : index
    %c0_228 = arith.constant 0 : index
    %329 = vector.load %arg13[%c1_226, %c8_227, %c0_228] : memref<18x32x128xf32, #tpu.memory_space<vmem>>, vector<16x16x128xf32>
    %330 = vector.shape_cast %329 : vector<16x16x128xf32> to vector<256x128xf32>
    %331 = arith.truncf %330 : vector<256x128xf32> to vector<256x128xbf16>
    %c4_229 = arith.constant 4 : index
    %c0_230 = arith.constant 0 : index
    %c0_231 = arith.constant 0 : index
    %332 = vector.load %arg8[%c4_229, %c0_230, %c0_231] : memref<9x128x128xbf16, #tpu.memory_space<vmem>>, vector<1x128x128xbf16>
    %333 = vector.shape_cast %332 : vector<1x128x128xbf16> to vector<128x128xbf16>
    %cst_232 = arith.constant dense<0.000000e+00> : vector<256x128xf32>
    %334 = tpu.matmul %331, %333, %cst_232 {dimension_numbers = #tpu.dot_dimension_numbers<[1], [0], [0], [1], [0, 0, 1, 1], [], []>} : vector<256x128xbf16>, vector<128x128xbf16>, vector<256x128xf32> -> vector<256x128xf32>
    %335 = arith.addf %328, %334 : vector<256x128xf32>
    %c1_233 = arith.constant 1 : index
    %c9_234 = arith.constant 9 : index
    %c0_235 = arith.constant 0 : index
    %336 = vector.load %arg13[%c1_233, %c9_234, %c0_235] : memref<18x32x128xf32, #tpu.memory_space<vmem>>, vector<16x16x128xf32>
    %337 = vector.shape_cast %336 : vector<16x16x128xf32> to vector<256x128xf32>
    %338 = arith.truncf %337 : vector<256x128xf32> to vector<256x128xbf16>
    %c5_236 = arith.constant 5 : index
    %c0_237 = arith.constant 0 : index
    %c0_238 = arith.constant 0 : index
    %339 = vector.load %arg8[%c5_236, %c0_237, %c0_238] : memref<9x128x128xbf16, #tpu.memory_space<vmem>>, vector<1x128x128xbf16>
    %340 = vector.shape_cast %339 : vector<1x128x128xbf16> to vector<128x128xbf16>
    %cst_239 = arith.constant dense<0.000000e+00> : vector<256x128xf32>
    %341 = tpu.matmul %338, %340, %cst_239 {dimension_numbers = #tpu.dot_dimension_numbers<[1], [0], [0], [1], [0, 0, 1, 1], [], []>} : vector<256x128xbf16>, vector<128x128xbf16>, vector<256x128xf32> -> vector<256x128xf32>
    %342 = arith.addf %335, %341 : vector<256x128xf32>
    %c2_240 = arith.constant 2 : index
    %c7_241 = arith.constant 7 : index
    %c0_242 = arith.constant 0 : index
    %343 = vector.load %arg13[%c2_240, %c7_241, %c0_242] : memref<18x32x128xf32, #tpu.memory_space<vmem>>, vector<16x16x128xf32>
    %344 = vector.shape_cast %343 : vector<16x16x128xf32> to vector<256x128xf32>
    %345 = arith.truncf %344 : vector<256x128xf32> to vector<256x128xbf16>
    %c6_243 = arith.constant 6 : index
    %c0_244 = arith.constant 0 : index
    %c0_245 = arith.constant 0 : index
    %346 = vector.load %arg8[%c6_243, %c0_244, %c0_245] : memref<9x128x128xbf16, #tpu.memory_space<vmem>>, vector<1x128x128xbf16>
    %347 = vector.shape_cast %346 : vector<1x128x128xbf16> to vector<128x128xbf16>
    %cst_246 = arith.constant dense<0.000000e+00> : vector<256x128xf32>
    %348 = tpu.matmul %345, %347, %cst_246 {dimension_numbers = #tpu.dot_dimension_numbers<[1], [0], [0], [1], [0, 0, 1, 1], [], []>} : vector<256x128xbf16>, vector<128x128xbf16>, vector<256x128xf32> -> vector<256x128xf32>
    %349 = arith.addf %342, %348 : vector<256x128xf32>
    %c2_247 = arith.constant 2 : index
    %c8_248 = arith.constant 8 : index
    %c0_249 = arith.constant 0 : index
    %350 = vector.load %arg13[%c2_247, %c8_248, %c0_249] : memref<18x32x128xf32, #tpu.memory_space<vmem>>, vector<16x16x128xf32>
    %351 = vector.shape_cast %350 : vector<16x16x128xf32> to vector<256x128xf32>
    %352 = arith.truncf %351 : vector<256x128xf32> to vector<256x128xbf16>
    %c7_250 = arith.constant 7 : index
    %c0_251 = arith.constant 0 : index
    %c0_252 = arith.constant 0 : index
    %353 = vector.load %arg8[%c7_250, %c0_251, %c0_252] : memref<9x128x128xbf16, #tpu.memory_space<vmem>>, vector<1x128x128xbf16>
    %354 = vector.shape_cast %353 : vector<1x128x128xbf16> to vector<128x128xbf16>
    %cst_253 = arith.constant dense<0.000000e+00> : vector<256x128xf32>
    %355 = tpu.matmul %352, %354, %cst_253 {dimension_numbers = #tpu.dot_dimension_numbers<[1], [0], [0], [1], [0, 0, 1, 1], [], []>} : vector<256x128xbf16>, vector<128x128xbf16>, vector<256x128xf32> -> vector<256x128xf32>
    %356 = arith.addf %349, %355 : vector<256x128xf32>
    %c2_254 = arith.constant 2 : index
    %c9_255 = arith.constant 9 : index
    %c0_256 = arith.constant 0 : index
    %357 = vector.load %arg13[%c2_254, %c9_255, %c0_256] : memref<18x32x128xf32, #tpu.memory_space<vmem>>, vector<16x16x128xf32>
    %358 = vector.shape_cast %357 : vector<16x16x128xf32> to vector<256x128xf32>
    %359 = arith.truncf %358 : vector<256x128xf32> to vector<256x128xbf16>
    %c8_257 = arith.constant 8 : index
    %c0_258 = arith.constant 0 : index
    %c0_259 = arith.constant 0 : index
    %360 = vector.load %arg8[%c8_257, %c0_258, %c0_259] : memref<9x128x128xbf16, #tpu.memory_space<vmem>>, vector<1x128x128xbf16>
    %361 = vector.shape_cast %360 : vector<1x128x128xbf16> to vector<128x128xbf16>
    %cst_260 = arith.constant dense<0.000000e+00> : vector<256x128xf32>
    %362 = tpu.matmul %359, %361, %cst_260 {dimension_numbers = #tpu.dot_dimension_numbers<[1], [0], [0], [1], [0, 0, 1, 1], [], []>} : vector<256x128xbf16>, vector<128x128xbf16>, vector<256x128xf32> -> vector<256x128xf32>
    %363 = arith.addf %356, %362 : vector<256x128xf32>
    %c0_261 = arith.constant 0 : index
    %c0_262 = arith.constant 0 : index
    %364 = vector.load %arg9[%c0_261, %c0_262] : memref<1x128xf32, #tpu.memory_space<vmem>>, vector<1x128xf32>
    %365 = vector.broadcast %364 : vector<1x128xf32> to vector<256x128xf32>
    %366 = arith.addf %363, %365 : vector<256x128xf32>
    %cst_263 = arith.constant 0.000000e+00 : f32
    %367 = vector.broadcast %cst_263 : f32 to vector<256x128xf32>
    %368 = arith.maximumf %366, %367 : vector<256x128xf32>
    %369 = vector.shape_cast %368 : vector<256x128xf32> to vector<16x16x128xf32>
    %c1_264 = arith.constant 1 : index
    %c8_265 = arith.constant 8 : index
    %c0_266 = arith.constant 0 : index
    %370 = vector.load %arg13[%c1_264, %c8_265, %c0_266] : memref<18x32x128xf32, #tpu.memory_space<vmem>>, vector<16x16x128xf32>
    tpu.vector_store %arg13[%c1_264, %c8_265, %c0_266], %369 {strides = array<i32>} : memref<18x32x128xf32, #tpu.memory_space<vmem>>, vector<16x16x128xf32>,
    %c0_267 = arith.constant 0 : index
    %c7_268 = arith.constant 7 : index
    %c0_269 = arith.constant 0 : index
    %371 = vector.load %arg13[%c0_267, %c7_268, %c0_269] : memref<18x32x128xf32, #tpu.memory_space<vmem>>, vector<16x16x128xf32>
    %372 = vector.shape_cast %371 : vector<16x16x128xf32> to vector<256x128xf32>
    %373 = arith.truncf %372 : vector<256x128xf32> to vector<256x128xbf16>
    %c0_270 = arith.constant 0 : index
    %c0_271 = arith.constant 0 : index
    %c0_272 = arith.constant 0 : index
    %374 = vector.load %arg10[%c0_270, %c0_271, %c0_272] : memref<9x128x2xbf16, #tpu.memory_space<vmem>>, vector<1x128x2xbf16>
    %375 = vector.shape_cast %374 : vector<1x128x2xbf16> to vector<128x2xbf16>
    %cst_273 = arith.constant dense<0.000000e+00> : vector<256x2xf32>
    %376 = tpu.matmul %373, %375, %cst_273 {dimension_numbers = #tpu.dot_dimension_numbers<[1], [0], [0], [1], [0, 0, 1, 1], [], []>} : vector<256x128xbf16>, vector<128x2xbf16>, vector<256x2xf32> -> vector<256x2xf32>
    %c0_274 = arith.constant 0 : index
    %c8_275 = arith.constant 8 : index
    %c0_276 = arith.constant 0 : index
    %377 = vector.load %arg13[%c0_274, %c8_275, %c0_276] : memref<18x32x128xf32, #tpu.memory_space<vmem>>, vector<16x16x128xf32>
    %378 = vector.shape_cast %377 : vector<16x16x128xf32> to vector<256x128xf32>
    %379 = arith.truncf %378 : vector<256x128xf32> to vector<256x128xbf16>
    %c1_277 = arith.constant 1 : index
    %c0_278 = arith.constant 0 : index
    %c0_279 = arith.constant 0 : index
    %380 = vector.load %arg10[%c1_277, %c0_278, %c0_279] : memref<9x128x2xbf16, #tpu.memory_space<vmem>>, vector<1x128x2xbf16>
    %381 = vector.shape_cast %380 : vector<1x128x2xbf16> to vector<128x2xbf16>
    %cst_280 = arith.constant dense<0.000000e+00> : vector<256x2xf32>
    %382 = tpu.matmul %379, %381, %cst_280 {dimension_numbers = #tpu.dot_dimension_numbers<[1], [0], [0], [1], [0, 0, 1, 1], [], []>} : vector<256x128xbf16>, vector<128x2xbf16>, vector<256x2xf32> -> vector<256x2xf32>
    %383 = arith.addf %376, %382 : vector<256x2xf32>
    %c0_281 = arith.constant 0 : index
    %c9_282 = arith.constant 9 : index
    %c0_283 = arith.constant 0 : index
    %384 = vector.load %arg13[%c0_281, %c9_282, %c0_283] : memref<18x32x128xf32, #tpu.memory_space<vmem>>, vector<16x16x128xf32>
    %385 = vector.shape_cast %384 : vector<16x16x128xf32> to vector<256x128xf32>
    %386 = arith.truncf %385 : vector<256x128xf32> to vector<256x128xbf16>
    %c2_284 = arith.constant 2 : index
    %c0_285 = arith.constant 0 : index
    %c0_286 = arith.constant 0 : index
    %387 = vector.load %arg10[%c2_284, %c0_285, %c0_286] : memref<9x128x2xbf16, #tpu.memory_space<vmem>>, vector<1x128x2xbf16>
    %388 = vector.shape_cast %387 : vector<1x128x2xbf16> to vector<128x2xbf16>
    %cst_287 = arith.constant dense<0.000000e+00> : vector<256x2xf32>
    %389 = tpu.matmul %386, %388, %cst_287 {dimension_numbers = #tpu.dot_dimension_numbers<[1], [0], [0], [1], [0, 0, 1, 1], [], []>} : vector<256x128xbf16>, vector<128x2xbf16>, vector<256x2xf32> -> vector<256x2xf32>
    %390 = arith.addf %383, %389 : vector<256x2xf32>
    %c1_288 = arith.constant 1 : index
    %c7_289 = arith.constant 7 : index
    %c0_290 = arith.constant 0 : index
    %391 = vector.load %arg13[%c1_288, %c7_289, %c0_290] : memref<18x32x128xf32, #tpu.memory_space<vmem>>, vector<16x16x128xf32>
    %392 = vector.shape_cast %391 : vector<16x16x128xf32> to vector<256x128xf32>
    %393 = arith.truncf %392 : vector<256x128xf32> to vector<256x128xbf16>
    %c3_291 = arith.constant 3 : index
    %c0_292 = arith.constant 0 : index
    %c0_293 = arith.constant 0 : index
    %394 = vector.load %arg10[%c3_291, %c0_292, %c0_293] : memref<9x128x2xbf16, #tpu.memory_space<vmem>>, vector<1x128x2xbf16>
    %395 = vector.shape_cast %394 : vector<1x128x2xbf16> to vector<128x2xbf16>
    %cst_294 = arith.constant dense<0.000000e+00> : vector<256x2xf32>
    %396 = tpu.matmul %393, %395, %cst_294 {dimension_numbers = #tpu.dot_dimension_numbers<[1], [0], [0], [1], [0, 0, 1, 1], [], []>} : vector<256x128xbf16>, vector<128x2xbf16>, vector<256x2xf32> -> vector<256x2xf32>
    %397 = arith.addf %390, %396 : vector<256x2xf32>
    %c1_295 = arith.constant 1 : index
    %c8_296 = arith.constant 8 : index
    %c0_297 = arith.constant 0 : index
    %398 = vector.load %arg13[%c1_295, %c8_296, %c0_297] : memref<18x32x128xf32, #tpu.memory_space<vmem>>, vector<16x16x128xf32>
    %399 = vector.shape_cast %398 : vector<16x16x128xf32> to vector<256x128xf32>
    %400 = arith.truncf %399 : vector<256x128xf32> to vector<256x128xbf16>
    %c4_298 = arith.constant 4 : index
    %c0_299 = arith.constant 0 : index
    %c0_300 = arith.constant 0 : index
    %401 = vector.load %arg10[%c4_298, %c0_299, %c0_300] : memref<9x128x2xbf16, #tpu.memory_space<vmem>>, vector<1x128x2xbf16>
    %402 = vector.shape_cast %401 : vector<1x128x2xbf16> to vector<128x2xbf16>
    %cst_301 = arith.constant dense<0.000000e+00> : vector<256x2xf32>
    %403 = tpu.matmul %400, %402, %cst_301 {dimension_numbers = #tpu.dot_dimension_numbers<[1], [0], [0], [1], [0, 0, 1, 1], [], []>} : vector<256x128xbf16>, vector<128x2xbf16>, vector<256x2xf32> -> vector<256x2xf32>
    %404 = arith.addf %397, %403 : vector<256x2xf32>
    %c1_302 = arith.constant 1 : index
    %c9_303 = arith.constant 9 : index
    %c0_304 = arith.constant 0 : index
    %405 = vector.load %arg13[%c1_302, %c9_303, %c0_304] : memref<18x32x128xf32, #tpu.memory_space<vmem>>, vector<16x16x128xf32>
    %406 = vector.shape_cast %405 : vector<16x16x128xf32> to vector<256x128xf32>
    %407 = arith.truncf %406 : vector<256x128xf32> to vector<256x128xbf16>
    %c5_305 = arith.constant 5 : index
    %c0_306 = arith.constant 0 : index
    %c0_307 = arith.constant 0 : index
    %408 = vector.load %arg10[%c5_305, %c0_306, %c0_307] : memref<9x128x2xbf16, #tpu.memory_space<vmem>>, vector<1x128x2xbf16>
    %409 = vector.shape_cast %408 : vector<1x128x2xbf16> to vector<128x2xbf16>
    %cst_308 = arith.constant dense<0.000000e+00> : vector<256x2xf32>
    %410 = tpu.matmul %407, %409, %cst_308 {dimension_numbers = #tpu.dot_dimension_numbers<[1], [0], [0], [1], [0, 0, 1, 1], [], []>} : vector<256x128xbf16>, vector<128x2xbf16>, vector<256x2xf32> -> vector<256x2xf32>
    %411 = arith.addf %404, %410 : vector<256x2xf32>
    %c2_309 = arith.constant 2 : index
    %c7_310 = arith.constant 7 : index
    %c0_311 = arith.constant 0 : index
    %412 = vector.load %arg13[%c2_309, %c7_310, %c0_311] : memref<18x32x128xf32, #tpu.memory_space<vmem>>, vector<16x16x128xf32>
    %413 = vector.shape_cast %412 : vector<16x16x128xf32> to vector<256x128xf32>
    %414 = arith.truncf %413 : vector<256x128xf32> to vector<256x128xbf16>
    %c6_312 = arith.constant 6 : index
    %c0_313 = arith.constant 0 : index
    %c0_314 = arith.constant 0 : index
    %415 = vector.load %arg10[%c6_312, %c0_313, %c0_314] : memref<9x128x2xbf16, #tpu.memory_space<vmem>>, vector<1x128x2xbf16>
    %416 = vector.shape_cast %415 : vector<1x128x2xbf16> to vector<128x2xbf16>
    %cst_315 = arith.constant dense<0.000000e+00> : vector<256x2xf32>
    %417 = tpu.matmul %414, %416, %cst_315 {dimension_numbers = #tpu.dot_dimension_numbers<[1], [0], [0], [1], [0, 0, 1, 1], [], []>} : vector<256x128xbf16>, vector<128x2xbf16>, vector<256x2xf32> -> vector<256x2xf32>
    %418 = arith.addf %411, %417 : vector<256x2xf32>
    %c2_316 = arith.constant 2 : index
    %c8_317 = arith.constant 8 : index
    %c0_318 = arith.constant 0 : index
    %419 = vector.load %arg13[%c2_316, %c8_317, %c0_318] : memref<18x32x128xf32, #tpu.memory_space<vmem>>, vector<16x16x128xf32>
    %420 = vector.shape_cast %419 : vector<16x16x128xf32> to vector<256x128xf32>
    %421 = arith.truncf %420 : vector<256x128xf32> to vector<256x128xbf16>
    %c7_319 = arith.constant 7 : index
    %c0_320 = arith.constant 0 : index
    %c0_321 = arith.constant 0 : index
    %422 = vector.load %arg10[%c7_319, %c0_320, %c0_321] : memref<9x128x2xbf16, #tpu.memory_space<vmem>>, vector<1x128x2xbf16>
    %423 = vector.shape_cast %422 : vector<1x128x2xbf16> to vector<128x2xbf16>
    %cst_322 = arith.constant dense<0.000000e+00> : vector<256x2xf32>
    %424 = tpu.matmul %421, %423, %cst_322 {dimension_numbers = #tpu.dot_dimension_numbers<[1], [0], [0], [1], [0, 0, 1, 1], [], []>} : vector<256x128xbf16>, vector<128x2xbf16>, vector<256x2xf32> -> vector<256x2xf32>
    %425 = arith.addf %418, %424 : vector<256x2xf32>
    %c2_323 = arith.constant 2 : index
    %c9_324 = arith.constant 9 : index
    %c0_325 = arith.constant 0 : index
    %426 = vector.load %arg13[%c2_323, %c9_324, %c0_325] : memref<18x32x128xf32, #tpu.memory_space<vmem>>, vector<16x16x128xf32>
    %427 = vector.shape_cast %426 : vector<16x16x128xf32> to vector<256x128xf32>
    %428 = arith.truncf %427 : vector<256x128xf32> to vector<256x128xbf16>
    %c8_326 = arith.constant 8 : index
    %c0_327 = arith.constant 0 : index
    %c0_328 = arith.constant 0 : index
    %429 = vector.load %arg10[%c8_326, %c0_327, %c0_328] : memref<9x128x2xbf16, #tpu.memory_space<vmem>>, vector<1x128x2xbf16>
    %430 = vector.shape_cast %429 : vector<1x128x2xbf16> to vector<128x2xbf16>
    %cst_329 = arith.constant dense<0.000000e+00> : vector<256x2xf32>
    %431 = tpu.matmul %428, %430, %cst_329 {dimension_numbers = #tpu.dot_dimension_numbers<[1], [0], [0], [1], [0, 0, 1, 1], [], []>} : vector<256x128xbf16>, vector<128x2xbf16>, vector<256x2xf32> -> vector<256x2xf32>
    %432 = arith.addf %425, %431 : vector<256x2xf32>
    %c0_330 = arith.constant 0 : index
    %c0_331 = arith.constant 0 : index
    %433 = vector.load %arg11[%c0_330, %c0_331] : memref<1x2xf32, #tpu.memory_space<vmem>>, vector<1x2xf32>
    %434 = vector.broadcast %433 : vector<1x2xf32> to vector<256x2xf32>
    %435 = arith.addf %432, %434 : vector<256x2xf32>
    %436 = vector.shape_cast %435 : vector<256x2xf32> to vector<16x16x2xf32>
    %c0_332 = arith.constant 0 : index
    %c0_333 = arith.constant 0 : index
    %c0_334 = arith.constant 0 : index
    %c0_335 = arith.constant 0 : index
    %437 = vector.load %arg12[%c0_332, %c0_333, %c0_334, %c0_335] : memref<1x16x16x2xf32, #tpu.memory_space<vmem>>, vector<1x16x16x2xf32>
    %438 = vector.shape_cast %437 : vector<1x16x16x2xf32> to vector<16x16x2xf32>
    %439 = vector.shape_cast %436 : vector<16x16x2xf32> to vector<1x16x16x2xf32>
    tpu.vector_store %arg12[%c0_332, %c0_333, %c0_334, %c0_335], %439 {strides = array<i32>} : memref<1x16x16x2xf32, #tpu.memory_space<vmem>>, vector<1x16x16x2xf32>,
    return
  }
  func.func @transform_0(%arg0: i32) -> (i32, i32, i32, i32) {
    %c0_i32 = arith.constant 0 : i32
    %c0_i32_0 = arith.constant 0 : i32
    %c0_i32_1 = arith.constant 0 : i32
    %c0_i32_2 = arith.constant 0 : i32
    return %arg0, %c0_i32, %c0_i32_0, %c0_i32_1 : i32, i32, i32, i32
  }
  func.func @transform_1(%arg0: i32) -> (i32, i32, i32) {
    %c0_i32 = arith.constant 0 : i32
    %c0_i32_0 = arith.constant 0 : i32
    %c0_i32_1 = arith.constant 0 : i32
    %c0_i32_2 = arith.constant 0 : i32
    return %c0_i32, %c0_i32_0, %c0_i32_1 : i32, i32, i32
  }
  func.func @transform_2(%arg0: i32) -> (i32, i32) {
    %c0_i32 = arith.constant 0 : i32
    %c0_i32_0 = arith.constant 0 : i32
    %c0_i32_1 = arith.constant 0 : i32
    return %c0_i32, %c0_i32_0 : i32, i32
  }
  func.func @transform_3(%arg0: i32) -> (i32, i32, i32) {
    %c0_i32 = arith.constant 0 : i32
    %c0_i32_0 = arith.constant 0 : i32
    %c0_i32_1 = arith.constant 0 : i32
    %c0_i32_2 = arith.constant 0 : i32
    return %c0_i32, %c0_i32_0, %c0_i32_1 : i32, i32, i32
  }
  func.func @transform_4(%arg0: i32) -> (i32, i32) {
    %c0_i32 = arith.constant 0 : i32
    %c0_i32_0 = arith.constant 0 : i32
    %c0_i32_1 = arith.constant 0 : i32
    return %c0_i32, %c0_i32_0 : i32, i32
  }
  func.func @transform_5(%arg0: i32) -> (i32, i32, i32) {
    %c0_i32 = arith.constant 0 : i32
    %c0_i32_0 = arith.constant 0 : i32
    %c0_i32_1 = arith.constant 0 : i32
    %c0_i32_2 = arith.constant 0 : i32
    return %c0_i32, %c0_i32_0, %c0_i32_1 : i32, i32, i32
  }
  func.func @transform_6(%arg0: i32) -> (i32, i32) {
    %c0_i32 = arith.constant 0 : i32
    %c0_i32_0 = arith.constant 0 : i32
    %c0_i32_1 = arith.constant 0 : i32
    return %c0_i32, %c0_i32_0 : i32, i32
  }
  func.func @transform_7(%arg0: i32) -> (i32, i32, i32) {
    %c0_i32 = arith.constant 0 : i32
    %c0_i32_0 = arith.constant 0 : i32
    %c0_i32_1 = arith.constant 0 : i32
    %c0_i32_2 = arith.constant 0 : i32
    return %c0_i32, %c0_i32_0, %c0_i32_1 : i32, i32, i32
  }
  func.func @transform_8(%arg0: i32) -> (i32, i32) {
    %c0_i32 = arith.constant 0 : i32
    %c0_i32_0 = arith.constant 0 : i32
    %c0_i32_1 = arith.constant 0 : i32
    return %c0_i32, %c0_i32_0 : i32, i32
  }
  func.func @transform_9(%arg0: i32) -> (i32, i32, i32) {
    %c0_i32 = arith.constant 0 : i32
    %c0_i32_0 = arith.constant 0 : i32
    %c0_i32_1 = arith.constant 0 : i32
    %c0_i32_2 = arith.constant 0 : i32
    return %c0_i32, %c0_i32_0, %c0_i32_1 : i32, i32, i32
  }
  func.func @transform_10(%arg0: i32) -> (i32, i32) {
    %c0_i32 = arith.constant 0 : i32
    %c0_i32_0 = arith.constant 0 : i32
    %c0_i32_1 = arith.constant 0 : i32
    return %c0_i32, %c0_i32_0 : i32, i32
  }
  func.func @transform_11(%arg0: i32) -> (i32, i32, i32, i32) {
    %c0_i32 = arith.constant 0 : i32
    %c0_i32_0 = arith.constant 0 : i32
    %c0_i32_1 = arith.constant 0 : i32
    %c0_i32_2 = arith.constant 0 : i32
    return %arg0, %c0_i32, %c0_i32_0, %c0_i32_1 : i32, i32, i32, i32
  }
}

</mosaic_0001>

<bundles_post_ra>
// kernel: complex_convnet_forward.1
= control target key start
LH: loop header
LB: loop body
LE: loop exit
PB: predicated region body
PF: predicated region fallthrough
CT: control target
= control target key end

     0   :  { %s20985_s17 = smov 0   ;;  %s26049_s0 = inlined_call_operand.vmem [shape: f32[2,16,16,2], index: 0, kind: input, shape index: {}]   ;;  %s26050_s1 = inlined_call_operand.vmem [shape: bf16[9,2,32], index: 1, kind: input, shape index: {}]   ;;  %s26051_s2 = inlined_call_operand.vmem [shape: f32[1,32], index: 2, kind: input, shape index: {}]   ;;  %s26052_s3 = inlined_call_operand.vmem [shape: bf16[9,32,64], index: 3, kind: input, shape index: {}]   ;;  %s26053_s4 = inlined_call_operand.vmem [shape: f32[1,64], index: 4, kind: input, shape index: {}]   ;;  %s26054_s5 = inlined_call_operand.vmem [shape: bf16[9,64,128], index: 5, kind: input, shape index: {}]   ;;  %s26055_s6 = inlined_call_operand.vmem [shape: f32[1,128], index: 6, kind: input, shape index: {}]   ;;  %s26056_s7 = inlined_call_operand.vmem [shape: bf16[9,128,128], index: 7, kind: input, shape index: {}]   ;;  %s26057_s8 = inlined_call_operand.vmem [shape: f32[1,128], index: 8, kind: input, shape index: {}]   ;;  %s26058_s9 = inlined_call_operand.vmem [shape: bf16[9,128,2], index: 9, kind: input, shape index: {}]   ;;  %s26059_s10 = inlined_call_operand.vmem [shape: f32[1,2], index: 10, kind: input, shape index: {}]   ;;  %s26060_s11 = inlined_call_operand.vmem [shape: f32[2,16,16,2], index: 11, kind: output, shape index: {}]  }
   0x1 LB: > { %s16065_s18 = sadd.s32 4294967295, %s20920_s17   ;;  %p16069_p0 = scmp.ge.s32.totalorder %s20920_s17, 1  ;;  %s20920_s17 = sphi %s20985_s17, %s21_s17  }
   0x2   : > { %p337_p1 = scmp.lt.s32.totalorder %s20920_s17, 3 }
   0x4   : > { %p338_p2 = pnand %p16069_p0, %p337_p1 }
   0x6   : > { %341 = sbr.rel (%p338_p2) target bundleno = 4724 (0x1274), region = 64 }
   0xd   : > { %p20995_p3 = scmp.lt.s32.totalorder %s16065_s18, 1  ;;  %v26061_v0 = vmov 0   ;;  %v20923_v1 = vmov 0.0   ;;  %vm493_vm0 = vcmask 15360   ;;  %v26063_v5 = vmov 1  }
   0xe   : > { %20292 = vset.pattern.permute.xlu1 %v26061_v0  ;;  %20286 = vset.pattern.permute.xlu0 %v26061_v0  ;;  %389 = vst [vmem:[#allocation2 + $0x8] sm:$0xff] %v20923_v1  ;;  %390 = vst [vmem:[#allocation2 + $0x10] sm:$0xff] %v20923_v1  ;;  %vm4696_vm1 = vcmask 261120   ;;  %vm7489_vm2 = vcmask 523264  }
   0xf   : > { %388 = vst [vmem:[#allocation2] sm:$0xff] %v20923_v1  ;;  %391 = vst [vmem:[#allocation2 + $0x18] sm:$0xff] %v20923_v1  ;;  %s26778_s18 = smov (!%p20995_p3, %s16065_s18), 1  ;;  %20294 = vperm.xlu1 %20292, %v20923_v1  }
  0x10   : > { %392 = vst [vmem:[#allocation2 + $0x20] sm:$0xff] %v20923_v1  ;;  %393 = vst [vmem:[#allocation2 + $0x28] sm:$0xff] %v20923_v1  ;;  %s16927_s20 = sshll.u32 %s26778_s18, 8 }
  0x11   : > { %394 = vst [vmem:[#allocation2 + $0x30] sm:$0xff] %v20923_v1  ;;  %395 = vst [vmem:[#allocation2 + $0x38] sm:$0xff] %v20923_v1  ;;  %s21086_s23 = scalar_lea.vmem %s26049_s0, %s16927_s20  ;;  %s25948_s26 = scalar_lea.vmem %s26060_s11, %s16927_s20 }
  0x12   : > { %396 = vst [vmem:[#allocation2 + $0x40] sm:$0xff] %v20923_v1  ;;  %397 = vst [vmem:[#allocation2 + $0x48] sm:$0xff] %v20923_v1  ;;  %v460_v2 = vld [vmem:[%s21086_s23] sm:$0xff]  ;;  %v461_v3 = vld [vmem:[%s21086_s23 + $0x8] sm:$0xff] }
  0x13   : > { %398 = vst [vmem:[#allocation2 + $0x50] sm:$0xff] %v20923_v1  ;;  %399 = vst [vmem:[#allocation2 + $0x58] sm:$0xff] %v20923_v1  ;;  %v462_v4 = vld [vmem:[%s21086_s23 + $0x10] sm:$0xff]  ;;  %20298 = vset.pattern.permute.xlu1 %v26063_v5  ;;  %v463_v6 = vld [vmem:[%s21086_s23 + $0x18] sm:$0xff] }
  0x14   : > { %400 = vst [vmem:[#allocation2 + $0x60] sm:$0xff] %v20923_v1  ;;  %401 = vst [vmem:[#allocation2 + $0x68] sm:$0xff] %v20923_v1  ;;  %v464_v7 = vld [vmem:[%s21086_s23 + $0x20] sm:$0xff]  ;;  %v465_v8 = vld [vmem:[%s21086_s23 + $0x28] sm:$0xff]  ;;  %20300 = vperm.xlu1 %20298, %v20923_v1  }
  0x15   : > { %402 = vst [vmem:[#allocation2 + $0x70] sm:$0xff] %v20923_v1  ;;  %403 = vst [vmem:[#allocation2 + $0x78] sm:$0xff] %v20923_v1  ;;  %v527_v10 = vld [vmem:[#allocation2 + $0xf] sm:$0xff]  ;;  %v467_v15 = vld [vmem:[%s21086_s23 + $0x38] sm:$0xff] }
  0x16   : > { %404 = vst [vmem:[#allocation2 + $0x80] sm:$0xff] %v20923_v1  ;;  %405 = vst [vmem:[#allocation2 + $0x88] sm:$0xff] %v20923_v1  ;;  %v526_v9 = vld [vmem:[#allocation2 + $0x7] sm:$0xff]  ;;  %v1412_v13 = vld [vmem:[#allocation2 + $0x11] sm:$0xff] }
  0x17   : > { %406 = vst [vmem:[#allocation2 + $0x90] sm:$0xff] %v20923_v1  ;;  %407 = vst [vmem:[#allocation2 + $0x98] sm:$0xff] %v20923_v1  ;;  %v1411_v11 = vld [vmem:[#allocation2 + $0x9] sm:$0xff]  ;;  %v21102_v12 = vpack.i.bf16 %v527_v10, %v526_v9  ;;  %v468_v17 = vld [vmem:[%s21086_s23 + $0x40] sm:$0xff] }
  0x18   : > { %408 = vst [vmem:[#allocation2 + $0xa0] sm:$0xff] %v20923_v1  ;;  %409 = vst [vmem:[#allocation2 + $0xa8] sm:$0xff] %v20923_v1  ;;  %v466_v14 = vld [vmem:[%s21086_s23 + $0x30] sm:$0xff]  ;;  %v21106_v16 = vpack.i.bf16 %v1412_v13, %v1411_v11  ;;  %v469_v18 = vld [vmem:[%s21086_s23 + $0x48] sm:$0xff]  ;;  %20304 = vset.pattern.permute.xlu1 %v26061_v0 }
  0x19   : > { %410 = vst [vmem:[#allocation2 + $0xb0] sm:$0xff] %v20923_v1  ;;  %411 = vst [vmem:[#allocation2 + $0xb8] sm:$0xff] %v20923_v1  ;;  %20288 = vperm.xlu0 %20286, %v21102_v12   ;;  %v470_v24 = vld [vmem:[%s21086_s23 + $0x50] sm:$0xff]  ;;  %v471_v26 = vld [vmem:[%s21086_s23 + $0x58] sm:$0xff] }
  0x1a   : > { %412 = vst [vmem:[#allocation2 + $0xc0] sm:$0xff] %v20923_v1  ;;  %413 = vst [vmem:[#allocation2 + $0xc8] sm:$0xff] %v20923_v1  ;;  %20306 = vperm.xlu1 %20304, %v21106_v16   ;;  %v472_v33 = vld [vmem:[%s21086_s23 + $0x60] sm:$0xff]  ;;  %v473_v34 = vld [vmem:[%s21086_s23 + $0x68] sm:$0xff] }
  0x1b   : > { %414 = vst [vmem:[#allocation2 + $0xd0] sm:$0xff] %v20923_v1  ;;  %415 = vst [vmem:[#allocation2 + $0xd8] sm:$0xff] %v20923_v1  ;;  %v474_v43 = vld [vmem:[%s21086_s23 + $0x70] sm:$0xff]  ;;  %v475_v44 = vld [vmem:[%s21086_s23 + $0x78] sm:$0xff] }
  0x1c   : > { %416 = vst [vmem:[#allocation2 + $0xe0] sm:$0xff] %v20923_v1  ;;  %417 = vst [vmem:[#allocation2 + $0xe8] sm:$0xff] %v20923_v1  ;;  %v476_v50 = vld [vmem:[%s21086_s23 + $0x80] sm:$0xff]  ;;  %v477_v51 = vld [vmem:[%s21086_s23 + $0x88] sm:$0xff] }
  0x1d   : > { %418 = vst [vmem:[#allocation2 + $0xf0] sm:$0xff] %v20923_v1  ;;  %419 = vst [vmem:[#allocation2 + $0xf8] sm:$0xff] %v20923_v1 }
  0x1e   : > { %420 = vst [vmem:[#allocation2 + $0x100] sm:$0xff] %v20923_v1  ;;  %421 = vst [vmem:[#allocation2 + $0x108] sm:$0xff] %v20923_v1 }
  0x1f   : > { %422 = vst [vmem:[#allocation2 + $0x110] sm:$0xff] %v20923_v1  ;;  %423 = vst [vmem:[#allocation2 + $0x118] sm:$0xff] %v20923_v1 }
  0x20   : > { %424 = vst [vmem:[#allocation2 + $0x120] sm:$0xff] %v20923_v1  ;;  %425 = vst [vmem:[#allocation2 + $0x128] sm:$0xff] %v20923_v1 }
  0x21   : > { %426 = vst [vmem:[#allocation2 + $0x130] sm:$0xff] %v20923_v1  ;;  %427 = vst [vmem:[#allocation2 + $0x138] sm:$0xff] %v20923_v1 }
  0x22   : > { %428 = vst [vmem:[#allocation2 + $0x140] sm:$0xff] %v20923_v1  ;;  %429 = vst [vmem:[#allocation2 + $0x148] sm:$0xff] %v20923_v1 }
  0x23   : > { %430 = vst [vmem:[#allocation2 + $0x150] sm:$0xff] %v20923_v1  ;;  %431 = vst [vmem:[#allocation2 + $0x158] sm:$0xff] %v20923_v1 }
  0x24   : > { %432 = vst [vmem:[#allocation2 + $0x160] sm:$0xff] %v20923_v1  ;;  %433 = vst [vmem:[#allocation2 + $0x168] sm:$0xff] %v20923_v1 }
  0x25   : > { %434 = vst [vmem:[#allocation2 + $0x170] sm:$0xff] %v20923_v1  ;;  %435 = vst [vmem:[#allocation2 + $0x178] sm:$0xff] %v20923_v1 }
  0x26   : > { %436 = vst [vmem:[#allocation2 + $0x180] sm:$0xff] %v20923_v1  ;;  %437 = vst [vmem:[#allocation2 + $0x188] sm:$0xff] %v20923_v1 }
  0x27   : > { %438 = vst [vmem:[#allocation2 + $0x190] sm:$0xff] %v20923_v1  ;;  %439 = vst [vmem:[#allocation2 + $0x198] sm:$0xff] %v20923_v1 }
  0x28   : > { %440 = vst [vmem:[#allocation2 + $0x1a0] sm:$0xff] %v20923_v1  ;;  %441 = vst [vmem:[#allocation2 + $0x1a8] sm:$0xff] %v20923_v1 }
  0x29   : > { %442 = vst [vmem:[#allocation2 + $0x1b0] sm:$0xff] %v20923_v1  ;;  %443 = vst [vmem:[#allocation2 + $0x1b8] sm:$0xff] %v20923_v1 }
  0x2a   : > { %444 = vst [vmem:[#allocation2 + $0x1c0] sm:$0xff] %v20923_v1  ;;  %445 = vst [vmem:[#allocation2 + $0x1c8] sm:$0xff] %v20923_v1 }
  0x2b   : > { %446 = vst [vmem:[#allocation2 + $0x1d0] sm:$0xff] %v20923_v1  ;;  %447 = vst [vmem:[#allocation2 + $0x1d8] sm:$0xff] %v20923_v1 }
  0x2c   : > { %448 = vst [vmem:[#allocation2 + $0x1e0] sm:$0xff] %v20923_v1  ;;  %449 = vst [vmem:[#allocation2 + $0x1e8] sm:$0xff] %v20923_v1 }
  0x2d   : > { %450 = vst [vmem:[#allocation2 + $0x1f0] sm:$0xff] %v20923_v1  ;;  %451 = vst [vmem:[#allocation2 + $0x1f8] sm:$0xff] %v20923_v1 }
  0x2e   : > { %452 = vst [vmem:[#allocation2 + $0x200] sm:$0xff] %v20923_v1  ;;  %453 = vst [vmem:[#allocation2 + $0x208] sm:$0xff] %v20923_v1 }
  0x2f   : > { %454 = vst [vmem:[#allocation2 + $0x210] sm:$0xff] %v20923_v1  ;;  %455 = vst [vmem:[#allocation2 + $0x218] sm:$0xff] %v20923_v1 }
  0x30   : > { %456 = vst [vmem:[#allocation2 + $0x220] sm:$0xff] %v20923_v1  ;;  %457 = vst [vmem:[#allocation2 + $0x228] sm:$0xff] %v20923_v1 }
  0x31   : > { %458 = vst [vmem:[#allocation2 + $0x230] sm:$0xff] %v20923_v1  ;;  %459 = vst [vmem:[#allocation2 + $0x238] sm:$0xff] %v20923_v1 }
  0x32   : > { %494 = vst.msk [vmem:[#allocation2 + $0x28] sm:$0xff] %vm493_vm0, %v460_v2  ;;  %495 = vst.msk [vmem:[#allocation2 + $0x30] sm:$0xff] %vm493_vm0, %v461_v3 }
  0x33   : > { %496 = vst.msk [vmem:[#allocation2 + $0x48] sm:$0xff] %vm493_vm0, %v462_v4  ;;  %497 = vst.msk [vmem:[#allocation2 + $0x50] sm:$0xff] %vm493_vm0, %v463_v6 }
  0x34   : > { %498 = vst.msk [vmem:[#allocation2 + $0x68] sm:$0xff] %vm493_vm0, %v464_v7  ;;  %499 = vst.msk [vmem:[#allocation2 + $0x70] sm:$0xff] %vm493_vm0, %v465_v8 }
  0x35   : > { %26121 = vst [vmem:[#allocation3_spill] sm:$0xff] %v21106_v16  ;;  %500 = vst.msk [vmem:[#allocation2 + $0x88] sm:$0xff] %vm493_vm0, %v466_v14  ;;  %v478_v14 = vld [vmem:[%s21086_s23 + $0x90] sm:$0xff] }
  0x36   : > { %501 = vst.msk [vmem:[#allocation2 + $0x90] sm:$0xff] %vm493_vm0, %v467_v15  ;;  %502 = vst.msk [vmem:[#allocation2 + $0xa8] sm:$0xff] %vm493_vm0, %v468_v17 }
  0x37   : > { %503 = vst.msk [vmem:[#allocation2 + $0xb0] sm:$0xff] %vm493_vm0, %v469_v18  ;;  %504 = vst.msk [vmem:[#allocation2 + $0xc8] sm:$0xff] %vm493_vm0, %v470_v24 }
  0x38   : > { %505 = vst.msk [vmem:[#allocation2 + $0xd0] sm:$0xff] %vm493_vm0, %v471_v26  ;;  %506 = vst.msk [vmem:[#allocation2 + $0xe8] sm:$0xff] %vm493_vm0, %v472_v33 }
  0x39   : > { %v1871_v19 = vld [vmem:[#allocation2 + $0x2f] sm:$0xff]  ;;  %v1870_v20 = vld [vmem:[#allocation2 + $0x27] sm:$0xff]  ;;  %507 = vst.msk [vmem:[#allocation2 + $0xf0] sm:$0xff] %vm493_vm0, %v473_v34  ;;  %508 = vst.msk [vmem:[#allocation2 + $0x108] sm:$0xff] %vm493_vm0, %v474_v43 }
  0x3a   : > { %1912 = vperm.xlu0 %20286, %v1871_v19   ;;  %v2329_v21 = vld [vmem:[#allocation2 + $0x28] sm:$0xff]  ;;  %1907 = vperm.xlu1 %20304, %v1870_v20   ;;  %v2330_v23 = vld [vmem:[#allocation2 + $0x30] sm:$0xff]  ;;  %509 = vst.msk [vmem:[#allocation2 + $0x110] sm:$0xff] %vm493_vm0, %v475_v44  ;;  %510 = vst.msk [vmem:[#allocation2 + $0x128] sm:$0xff] %vm493_vm0, %v476_v50 }
  0x3b   : > { %v21118_v22 = vld [vmem:[#allocation2 + $0x4f] sm:$0xff]  ;;  %v21138_v30 = vld [vmem:[#allocation2 + $0x47] sm:$0xff]  ;;  %511 = vst.msk [vmem:[#allocation2 + $0x130] sm:$0xff] %vm493_vm0, %v477_v51  ;;  %512 = vst.msk [vmem:[#allocation2 + $0x148] sm:$0xff] %vm493_vm0, %v478_v14 }
  0x3c   : > { %v21122_v25 = vld [vmem:[#allocation2 + $0x48] sm:$0xff]  ;;  %v21128_v27 = vld [vmem:[#allocation2 + $0x31] sm:$0xff] }
  0x3d   : > { %v1413_v28 = vld [vmem:[#allocation2 + $0x29] sm:$0xff]  ;;  %v21134_v29 = vld [vmem:[#allocation2 + $0x51] sm:$0xff] }
  0x3e   : > { %2366 = vperm.xlu0 %20286, %v2329_v21   ;;  %20310 = vset.pattern.permute.xlu1 %v26063_v5  ;;  %v21141_v31 = vld [vmem:[#allocation2 + $0x67] sm:$0xff]  ;;  %v21146_v32 = vld [vmem:[#allocation2 + $0x50] sm:$0xff] }
  0x3f   : > { %2102 = vperm.xlu1 %20310, %v1870_v20   ;;  %v21156_v35 = vld [vmem:[#allocation2 + $0x70] sm:$0xff]  ;;  %v21168_v38 = vld [vmem:[#allocation2 + $0x68] sm:$0xff] }
  0x40   : > { %v21162_v36 = vld [vmem:[#allocation2 + $0x49] sm:$0xff]  ;;  %v21184_v42 = vld [vmem:[#allocation2 + $0x71] sm:$0xff] }
  0x41   : > { %26122 = vst [vmem:[#allocation4_spill] sm:$0xff] %v21162_v36  ;;  %v21166_v37 = vld [vmem:[#allocation2 + $0x6f] sm:$0xff]  ;;  %v534_v39 = vld [vmem:[#allocation2 + $0x87] sm:$0xff] }
  0x42   : > { %577 = vperm.xlu0 %20286, %v1871_v19   ;;  %v21178_v40 = vld [vmem:[#allocation2 + $0x90] sm:$0xff]  ;;  %v21212_v48 = vld [vmem:[#allocation2 + $0x88] sm:$0xff] }
  0x43   : > { %2106 = vperm.xlu1 %20310, %v1871_v19   ;;  %v21182_v41 = vld [vmem:[#allocation2 + $0x69] sm:$0xff]  ;;  %v21195_v45 = vld [vmem:[#allocation2 + $0x91] sm:$0xff] }
  0x44   : > { %26123 = vst [vmem:[#allocation5_spill] sm:$0xff] %v21182_v41  ;;  %v21203_v46 = vld [vmem:[#allocation2 + $0x8f] sm:$0xff]  ;;  %v538_v4 = vld [vmem:[#allocation2 + $0xc7] sm:$0xff] }
  0x45   : > { %v21210_v47 = vld [vmem:[#allocation2 + $0xaf] sm:$0xff] }
  0x46   : > { %999 = vperm.xlu0 %20286, %v2329_v21   ;;  %v21233_v54 = vld [vmem:[#allocation2 + $0xb0] sm:$0xff]  ;;  %v962_v62 = vld [vmem:[#allocation2 + $0xa8] sm:$0xff] }
  0x47   : > { %20311 = vset.pattern.permute.xlu1 %v26061_v0  ;;  %v21243_v57 = vld [vmem:[#allocation2 + $0x89] sm:$0xff]  ;;  %v21289_v15 = vld [vmem:[#allocation2 + $0xb1] sm:$0xff] }
  0x48   : > { %2371 = vperm.xlu1 %20311, %v2330_v23   ;;  %v21275_v8 = vld [vmem:[#allocation2 + $0xd0] sm:$0xff]  ;;  %v481_v14 = vld [vmem:[%s21086_s23 + $0xa8] sm:$0xff] }
  0x49   : > { %v2796_v10 = vld [vmem:[#allocation2 + $0xa9] sm:$0xff]  ;;  %515 = vst.msk [vmem:[#allocation2 + $0x170] sm:$0xff] %vm493_vm0, %v481_v14 }
  0x4a   : > { %587 = vperm.xlu0 %20286, %v21118_v22   ;;  %v1883_v34 = vld [vmem:[#allocation2 + $0xef] sm:$0xff] }
  0x4c   : > { %20312 = vset.pattern.permute.xlu1 %v26063_v5 }
  0x4d   : > { %2565 = vperm.xlu1 %20312, %v2330_v23  }
  0x4e   : > { %1009 = vperm.xlu0 %20286, %v21122_v25  }
  0x51   : > { %20313 = vset.pattern.permute.xlu1 %v26061_v0 }
  0x52   : > { %2830 = vperm.xlu0 %20286, %v21128_v27   ;;  %572 = vperm.xlu1 %20313, %v1870_v20  }
  0x56   : > { %1458 = vperm.xlu0 %20286, %v1413_v28   ;;  %20314 = vset.pattern.permute.xlu1 %v26063_v5 }
  0x57   : > { %765 = vperm.xlu1 %20314, %v1870_v20   ;;  %v21300_v20 = vld [vmem:[#allocation2 + $0xa7] sm:$0xff] }
  0x5a   : > { %1473 = vperm.xlu0 %20286, %v21134_v29  }
  0x5b   : > { %769 = vperm.xlu1 %20314, %v1871_v19   ;;  %v479_v19 = vld [vmem:[%s21086_s23 + $0x98] sm:$0xff] }
  0x5c   : > { %513 = vst.msk [vmem:[#allocation2 + $0x150] sm:$0xff] %vm493_vm0, %v479_v19 }
  0x5e   : > { %3285 = vperm.xlu0 %20286, %v21138_v30  }
  0x5f   : > { %20315 = vset.pattern.permute.xlu1 %v26061_v0 }
  0x60   : > { %1004 = vperm.xlu1 %20315, %v2330_v23  }
  0x62   : > { %1922 = vperm.xlu0 %20286, %v21118_v22  }
  0x64   : > { %20316 = vset.pattern.permute.xlu1 %v26063_v5 }
  0x65   : > { %1196 = vperm.xlu1 %20316, %v2330_v23   ;;  %v21308_v23 = vld [vmem:[#allocation2 + $0xd1] sm:$0xff] }
  0x66   : > { %1927 = vperm.xlu0 %20286, %v21141_v31  }
  0x69   : > { %20317 = vset.pattern.permute.xlu1 %v26061_v0 }
  0x6a   : > { %3749 = vperm.xlu0 %20286, %v21146_v32   ;;  %582 = vperm.xlu1 %20317, %v21138_v30  }
  0x6e   : > { %2376 = vperm.xlu0 %20286, %v21122_v25   ;;  %20318 = vset.pattern.permute.xlu1 %v26063_v5 }
  0x6f   : > { %773 = vperm.xlu1 %20318, %v21138_v30  }
  0x72   : > { %2391 = vperm.xlu0 %20286, %v21156_v35  }
  0x73   : > { %777 = vperm.xlu1 %20318, %v21118_v22  }
  0x76   : > { %4203 = vperm.xlu0 %20286, %v21162_v36  }
  0x77   : > { %20319 = vset.pattern.permute.xlu1 %v26061_v0 }
  0x78   : > { %1014 = vperm.xlu1 %20319, %v21146_v32  }
  0x7a   : > { %597 = vperm.xlu0 %20286, %v21166_v37  }
  0x7c   : > { %20320 = vset.pattern.permute.xlu1 %v26063_v5 }
  0x7d   : > { %1204 = vperm.xlu1 %20320, %v21146_v32  }
  0x7e   : > { %1019 = vperm.xlu0 %20286, %v21168_v38  }
  0x81   : > { %20321 = vset.pattern.permute.xlu1 %v26061_v0 }
  0x82   : > { %2840 = vperm.xlu0 %20286, %v21134_v29   ;;  %2825 = vperm.xlu1 %20321, %v1413_v28  }
  0x86   : > { %602 = vperm.xlu0 %20286, %v534_v39   ;;  %20322 = vset.pattern.permute.xlu1 %v26063_v5 }
  0x87   : > { %3020 = vperm.xlu1 %20322, %v1413_v28   ;;  %v1881_v28 = vld [vmem:[#allocation2 + $0xcf] sm:$0xff] }
  0x8a   : > { %1034 = vperm.xlu0 %20286, %v21178_v40  }
  0x8b   : > { %3024 = vperm.xlu1 %20322, %v21128_v27  }
  0x8e   : > { %2845 = vperm.xlu0 %20286, %v21182_v41   ;;  %v21217_v49 = vpop.permute.xlu1 %20294 }
  0x8f   : > { %20323 = vset.pattern.permute.xlu1 %v26061_v0  ;;  %26124 = vst [vmem:[#allocation6_spill] sm:$0xff] %v21217_v49 }
  0x90   : > { %1463 = vperm.xlu1 %20323, %v21128_v27  }
  0x92   : > { %1483 = vperm.xlu0 %20286, %v21184_v42  }
  0x93   : > { %v21225_v52 = vpop.permute.xlu1 %20300 }
  0x94   : > { %20324 = vset.pattern.permute.xlu1 %v26063_v5  ;;  %26125 = vst [vmem:[#allocation7_spill] sm:$0xff] %v21225_v52 }
  0x95   : > { %1655 = vperm.xlu1 %20324, %v21128_v27  }
  0x96   : > { %3295 = vperm.xlu0 %20286, %v21141_v31  }
  0x98   : > { %v21231_v53 = vpop.permute.xlu0 %20288 }
  0x99   : > { %20325 = vset.pattern.permute.xlu1 %v26061_v0  ;;  %26126 = vst [vmem:[#allocation8_spill] sm:$0xff] %v21231_v53  ;;  %v21236_v55 = vpop.permute.xlu1 %20306 }
  0x9a   : > { %1493 = vperm.xlu0 %20286, %v21195_v45   ;;  %1468 = vperm.xlu1 %20325, %v21162_v36   ;;  %26127 = vst [vmem:[#allocation9_spill] sm:$0xff] %v21236_v55 }
  0x9e   : > { %3305 = vperm.xlu0 %20286, %v534_v39   ;;  %20326 = vset.pattern.permute.xlu1 %v26063_v5 }
  0x9f   : > { %1659 = vperm.xlu1 %20326, %v21162_v36  }
  0xa2   : > { %1942 = vperm.xlu0 %20286, %v21203_v46  }
  0xa3   : > { %1663 = vperm.xlu1 %20326, %v21134_v29  }
  0xa6   : > { %3754 = vperm.xlu0 %20286, %v21168_v38  }
  0xa7   : > { %20327 = vset.pattern.permute.xlu1 %v26061_v0 }
  0xa8   : > { %3290 = vperm.xlu1 %20327, %v21118_v22  }
  0xaa   : > { %1952 = vperm.xlu0 %20286, %v21210_v47  }
  0xac   : > { %20328 = vset.pattern.permute.xlu1 %v26063_v5 }
  0xad   : > { %3484 = vperm.xlu1 %20328, %v21118_v22  }
  0xae   : > { %3764 = vperm.xlu0 %20286, %v21212_v48  }
  0xb1   : > { %20329 = vset.pattern.permute.xlu1 %v26061_v0 }
  0xb2   : > { %2401 = vperm.xlu0 %20286, %v21178_v40   ;;  %1917 = vperm.xlu1 %20329, %v21138_v30  }
  0xb6   : > { %4213 = vperm.xlu0 %20286, %v21182_v41   ;;  %20330 = vset.pattern.permute.xlu1 %v26063_v5 }
  0xb7   : > { %2110 = vperm.xlu1 %20330, %v21138_v30  }
  0xb9   : > { %v21239_v56 = vpop.permute.xlu0 %1912  ;;  %v21245_v58 = vpop.permute.xlu1 %1907 }
  0xba   : > { %26128 = vst [vmem:[#allocation10_spill] sm:$0xff] %v21239_v56  ;;  %2411 = vperm.xlu0 %20286, %v21233_v54   ;;  %26129 = vst [vmem:[#allocation11_spill] sm:$0xff] %v21245_v58 }
  0xbb   : > { %2114 = vperm.xlu1 %20330, %v21118_v22  }
  0xbd   : > { %v21247_v59 = vpop.permute.xlu0 %2366 }
  0xbe   : > { %26130 = vst [vmem:[#allocation12_spill] sm:$0xff] %v21247_v59  ;;  %4223 = vperm.xlu0 %20286, %v21243_v57   ;;  %v21251_v60 = vpop.permute.xlu1 %2102 }
  0xbf   : > { %26131 = vst [vmem:[#allocation13_spill] sm:$0xff] %v21251_v60  ;;  %20331 = vset.pattern.permute.xlu1 %v26061_v0 }
  0xc0   : > { %1932 = vperm.xlu1 %20331, %v21166_v37  }
  0xc1   : > { %v21253_v61 = vpop.permute.xlu0 %577 }
  0xc2   : > { %617 = vperm.xlu0 %20286, %v21210_v47   ;;  %v21258_v63 = vpop.permute.xlu1 %2106 }
  0xc3   : > { %26132 = vst [vmem:[#allocation14_spill] sm:$0xff] %v21258_v63 }
  0xc4   : > { %20332 = vset.pattern.permute.xlu1 %v26063_v5 }
  0xc5   : > { %v21260_v1 = vpop.permute.xlu0 %999  ;;  %2122 = vperm.xlu1 %20332, %v21166_v37  }
  0xc6   : > { %26133 = vst [vmem:[#allocation15_spill] sm:$0xff] %v21260_v1  ;;  %1039 = vperm.xlu0 %20286, %v962_v62  }
  0xc7   : > { %v21266_v3 = vpop.permute.xlu1 %2371 }
  0xc8   : > { %26134 = vst [vmem:[#allocation16_spill] sm:$0xff] %v21266_v3 }
  0xc9   : > { %v21264_v2 = vpop.permute.xlu0 %587  ;;  %20333 = vset.pattern.permute.xlu1 %v26061_v0 }
  0xca   : > { %2860 = vperm.xlu0 %20286, %v21195_v45   ;;  %3744 = vperm.xlu1 %20333, %v21122_v25  }
  0xcc   : > { %v21273_v7 = vpop.permute.xlu1 %2565 }
  0xcd   : > { %v21271_v6 = vpop.permute.xlu0 %1009  ;;  %26136 = vst [vmem:[#allocation18_spill] sm:$0xff] %v21273_v7 }
  0xce   : > { %26135 = vst [vmem:[#allocation17_spill] sm:$0xff] %v21271_v6  ;;  %622 = vperm.xlu0 %20286, %v538_v4   ;;  %20334 = vset.pattern.permute.xlu1 %v26063_v5 }
  0xcf   : > { %3939 = vperm.xlu1 %20334, %v21122_v25  }
  0xd1   : > { %v21278_v9 = vpop.permute.xlu0 %2830  ;;  %v21282_v11 = vpop.permute.xlu1 %572 }
  0xd2   : > { %26137 = vst [vmem:[#allocation19_spill] sm:$0xff] %v21278_v9  ;;  %1054 = vperm.xlu0 %20286, %v21275_v8   ;;  %26138 = vst [vmem:[#allocation20_spill] sm:$0xff] %v21282_v11 }
  0xd3   : > { %3943 = vperm.xlu1 %20334, %v21146_v32  }
  0xd5   : > { %v21284_v13 = vpop.permute.xlu0 %1458 }
  0xd6   : > { %26139 = vst [vmem:[#allocation21_spill] sm:$0xff] %v21284_v13  ;;  %2865 = vperm.xlu0 %20286, %v2796_v10   ;;  %v21291_v17 = vpop.permute.xlu1 %765 }
  0xd7   : > { %26140 = vst [vmem:[#allocation22_spill] sm:$0xff] %v21291_v17  ;;  %20335 = vset.pattern.permute.xlu1 %v26061_v0 }
  0xd8   : > { %2381 = vperm.xlu1 %20335, %v21146_v32  }
  0xd9   : > { %v21293_v18 = vpop.permute.xlu0 %1473 }
  0xda   : > { %1503 = vperm.xlu0 %20286, %v21289_v15   ;;  %v21302_v21 = vpop.permute.xlu1 %769 }
  0xdc   : > { %20336 = vset.pattern.permute.xlu1 %v26063_v5 }
  0xdd   : > { %v21304_v22 = vpop.permute.xlu0 %3285  ;;  %2573 = vperm.xlu1 %20336, %v21146_v32  }
  0xde   : > { %26141 = vst [vmem:[#allocation23_spill] sm:$0xff] %v21304_v22  ;;  %3315 = vperm.xlu0 %20286, %v21300_v20  }
  0xdf   : > { %v21313_v25 = vpop.permute.xlu1 %1004 }
  0xe1   : > { %v21311_v24 = vpop.permute.xlu0 %1922  ;;  %20337 = vset.pattern.permute.xlu1 %v26061_v0 }
  0xe2   : > { %1513 = vperm.xlu0 %20286, %v21308_v23   ;;  %2386 = vperm.xlu1 %20337, %v21168_v38  }
  0xe4   : > { %v21320_v27 = vpop.permute.xlu1 %1196 }
  0xe5   : > { %v21318_v26 = vpop.permute.xlu0 %1927 }
  0xe6   : > { %26142 = vst [vmem:[#allocation24_spill] sm:$0xff] %v21318_v26  ;;  %3325 = vperm.xlu0 %20286, %v538_v4   ;;  %20338 = vset.pattern.permute.xlu1 %v26063_v5  ;;  %v480_v4 = vld [vmem:[%s21086_s23 + $0xa0] sm:$0xff]  ;;  %v20827_v26 = vld [vmem:[#allocation2 + $0x51] sm:$0xff] }
  0xe7   : > { %2577 = vperm.xlu1 %20338, %v21168_v38   ;;  %v3715_v38 = vld [vmem:[#allocation2 + $0xc8] sm:$0xff]  ;;  %514 = vst.msk [vmem:[#allocation2 + $0x168] sm:$0xff] %vm493_vm0, %v480_v4 }
  0xe8   : > { %v4174_v4 = vld [vmem:[#allocation2 + $0xc9] sm:$0xff] }
  0xe9   : > { %v21323_v30 = vpop.permute.xlu0 %3749  ;;  %v21326_v32 = vpop.permute.xlu1 %582 }
  0xea   : > { %26143 = vst [vmem:[#allocation25_spill] sm:$0xff] %v21323_v30  ;;  %1962 = vperm.xlu0 %20286, %v1881_v28   ;;  %26144 = vst [vmem:[#allocation26_spill] sm:$0xff] %v21326_v32  ;;  %v2342_v28 = vld [vmem:[#allocation2 + $0xf0] sm:$0xff] }
  0xeb   : > { %2581 = vperm.xlu1 %20338, %v21156_v35  }
  0xed   : > { %v21328_v33 = vpop.permute.xlu0 %2376 }
  0xee   : > { %26145 = vst [vmem:[#allocation27_spill] sm:$0xff] %v21328_v33  ;;  %3774 = vperm.xlu0 %20286, %v962_v62   ;;  %v21331_v39 = vpop.permute.xlu1 %773  ;;  %v26157_v33 = vmov 1   ;;  %v1891_v22 = vld [vmem:[#allocation2 + $0x16f] sm:$0xff] }
  0xef   : > { %26146 = vst [vmem:[#allocation28_spill] sm:$0xff] %v21331_v39  ;;  %20339 = vset.pattern.permute.xlu1 %v26061_v0  ;;  %v1426_v39 = vld [vmem:[#allocation2 + $0xf1] sm:$0xff] }
  0xf0   : > { %4208 = vperm.xlu1 %20339, %v21134_v29  }
  0xf1   : > { %v21333_v43 = vpop.permute.xlu0 %2391 }
  0xf2   : > { %1972 = vperm.xlu0 %20286, %v1883_v34   ;;  %v21337_v44 = vpop.permute.xlu1 %777 }
  0xf4   : > { %20340 = vset.pattern.permute.xlu1 %v26063_v5 }
  0xf5   : > { %v21339_v50 = vpop.permute.xlu0 %4203  ;;  %4402 = vperm.xlu1 %20340, %v21134_v29  }
  0xf6   : > { %26147 = vst [vmem:[#allocation29_spill] sm:$0xff] %v21339_v50  ;;  %3784 = vperm.xlu0 %20286, %v3715_v38   ;;  %v1430_v50 = vld [vmem:[#allocation2 + $0x131] sm:$0xff] }
  0xf7   : > { %v21345_v62 = vpop.permute.xlu1 %1014 }
  0xf9   : > { %v21343_v51 = vpop.permute.xlu0 %597  ;;  %20341 = vset.pattern.permute.xlu1 %v26061_v0 }
  0xfa   : > { %26148 = vst [vmem:[#allocation30_spill] sm:$0xff] %v21343_v51  ;;  %2421 = vperm.xlu0 %20286, %v21275_v8   ;;  %592 = vperm.xlu1 %20341, %v21141_v31  }
  0xfc   : > { %v21356_v29 = vpop.permute.xlu1 %1204 }
  0xfd   : > { %v21354_v19 = vpop.permute.xlu0 %1019 }
  0xfe   : > { %26149 = vst [vmem:[#allocation31_spill] sm:$0xff] %v21354_v19  ;;  %4233 = vperm.xlu0 %20286, %v2796_v10   ;;  %20342 = vset.pattern.permute.xlu1 %v26063_v5  ;;  %v26154_v19 = vmov 0   ;;  %v966_v5 = vld [vmem:[#allocation2 + $0xe8] sm:$0xff] }
  0xff   : > { %781 = vperm.xlu1 %20342, %v21141_v31  }
 0x101   : > { %v21359_v38 = vpop.permute.xlu0 %2840  ;;  %v21362_v51 = vpop.permute.xlu1 %2825 }
 0x102   : > { %2431 = vperm.xlu0 %20286, %v2342_v28   ;;  %26150 = vst [vmem:[#allocation32_spill] sm:$0xff] %v21362_v51 }
 0x103   : > { %785 = vperm.xlu1 %20342, %v21166_v37  }
 0x105   : > { %v21364_v14 = vpop.permute.xlu0 %602 }
 0x106   : > { %26151 = vst [vmem:[#allocation33_spill] sm:$0xff] %v21364_v14  ;;  %4243 = vperm.xlu0 %20286, %v4174_v4   ;;  %v21367_v0 = vpop.permute.xlu1 %3020  ;;  %v542_v14 = vld [vmem:[#allocation2 + $0x107] sm:$0xff] }
 0x107   : > { %26152 = vst [vmem:[#allocation34_spill] sm:$0xff] %v21367_v0  ;;  %20343 = vset.pattern.permute.xlu1 %v26154_v19 }
 0x108   : > { %1024 = vperm.xlu1 %20343, %v21156_v35  }
 0x109   : > { %v21369_v10 = vpop.permute.xlu0 %1034 }
 0x10a   : > { %26153 = vst [vmem:[#allocation35_spill] sm:$0xff] %v21369_v10  ;;  %637 = vperm.xlu0 %20286, %v1883_v34   ;;  %v21373_v31 = vpop.permute.xlu1 %3024 }
 0x10b   : > { %26155 = vst [vmem:[#allocation36_spill] sm:$0xff] %v21373_v31 }
 0x10c   : > { %20344 = vset.pattern.permute.xlu1 %v26157_v33 }
 0x10d   : > { %v21375_v28 = vpop.permute.xlu0 %2845  ;;  %1212 = vperm.xlu1 %20344, %v21156_v35  }
 0x10e   : > { %26156 = vst [vmem:[#allocation37_spill] sm:$0xff] %v21375_v28  ;;  %1059 = vperm.xlu0 %20286, %v966_v5   ;;  %v969_v28 = vld [vmem:[#allocation2 + $0x110] sm:$0xff] }
 0x10f   : > { %v21381_v4 = vpop.permute.xlu1 %1463 }
 0x111   : > { %v21379_v37 = vpop.permute.xlu0 %1483  ;;  %20345 = vset.pattern.permute.xlu1 %v26154_v19 }
 0x112   : > { %26158 = vst [vmem:[#allocation38_spill] sm:$0xff] %v21379_v37  ;;  %2880 = vperm.xlu0 %20286, %v21308_v23   ;;  %2835 = vperm.xlu1 %20345, %v21162_v36   ;;  %v2800_v23 = vld [vmem:[#allocation2 + $0xe9] sm:$0xff] }
 0x114   : > { %v21388_v10 = vpop.permute.xlu1 %1655 }
 0x115   : > { %v21386_v34 = vpop.permute.xlu0 %3295 }
 0x116   : > { %26159 = vst [vmem:[#allocation39_spill] sm:$0xff] %v21386_v34  ;;  %642 = vperm.xlu0 %20286, %v542_v14   ;;  %20346 = vset.pattern.permute.xlu1 %v26157_v33  ;;  %v482_v34 = vld [vmem:[%s21086_s23 + $0xb0] sm:$0xff] }
 0x117   : > { %3028 = vperm.xlu1 %20346, %v21162_v36   ;;  %516 = vst.msk [vmem:[#allocation2 + $0x188] sm:$0xff] %vm493_vm0, %v482_v34  ;;  %v21413_v34 = vld [vmem:[#allocation2 + $0x111] sm:$0xff] }
 0x119   : > { %v21391_v35 = vpop.permute.xlu0 %1493  ;;  %v21394_v37 = vpop.permute.xlu1 %1468 }
 0x11a   : > { %26160 = vst [vmem:[#allocation40_spill] sm:$0xff] %v21391_v35  ;;  %1074 = vperm.xlu0 %20286, %v969_v28   ;;  %26161 = vst [vmem:[#allocation41_spill] sm:$0xff] %v21394_v37  ;;  %v483_v35 = vld [vmem:[%s21086_s23 + $0xb8] sm:$0xff]  ;;  %v3258_v37 = vld [vmem:[#allocation2 + $0xe7] sm:$0xff] }
 0x11b   : > { %3032 = vperm.xlu1 %20346, %v20827_v26   ;;  %517 = vst.msk [vmem:[#allocation2 + $0x190] sm:$0xff] %vm493_vm0, %v483_v35  ;;  %v1885_v35 = vld [vmem:[#allocation2 + $0x10f] sm:$0xff] }
 0x11d   : > { %v21396_v32 = vpop.permute.xlu0 %3305 }
 0x11e   : > { %26162 = vst [vmem:[#allocation42_spill] sm:$0xff] %v21396_v32  ;;  %2885 = vperm.xlu0 %20286, %v2800_v23   ;;  %v21400_v13 = vpop.permute.xlu1 %1659 }
 0x11f   : > { %26163 = vst [vmem:[#allocation43_spill] sm:$0xff] %v21400_v13  ;;  %20347 = vset.pattern.permute.xlu1 %v26154_v19 }
 0x120   : > { %607 = vperm.xlu1 %20347, %v21203_v46  }
 0x121   : > { %v21402_v6 = vpop.permute.xlu0 %1942 }
 0x122   : > { %26164 = vst [vmem:[#allocation44_spill] sm:$0xff] %v21402_v6  ;;  %1523 = vperm.xlu0 %20286, %v1426_v39   ;;  %v21408_v32 = vpop.permute.xlu1 %1663 }
 0x124   : > { %20348 = vset.pattern.permute.xlu1 %v26157_v33 }
 0x125   : > { %v21410_v26 = vpop.permute.xlu0 %3754  ;;  %793 = vperm.xlu1 %20348, %v21203_v46  }
 0x126   : > { %26165 = vst [vmem:[#allocation45_spill] sm:$0xff] %v21410_v26  ;;  %3335 = vperm.xlu0 %20286, %v3258_v37  }
 0x127   : > { %v21418_v13 = vpop.permute.xlu1 %3290 }
 0x128   : > { %26167 = vst [vmem:[#allocation47_spill] sm:$0xff] %v21418_v13 }
 0x129   : > { %v21416_v6 = vpop.permute.xlu0 %1952  ;;  %20349 = vset.pattern.permute.xlu1 %v26154_v19 }
 0x12a   : > { %26166 = vst [vmem:[#allocation46_spill] sm:$0xff] %v21416_v6  ;;  %1533 = vperm.xlu0 %20286, %v21413_v34   ;;  %1029 = vperm.xlu1 %20349, %v21212_v48  }
 0x12c   : > { %v21425_v37 = vpop.permute.xlu1 %3484 }
 0x12d   : > { %v21423_v39 = vpop.permute.xlu0 %3764  ;;  %26169 = vst [vmem:[#allocation49_spill] sm:$0xff] %v21425_v37 }
 0x12e   : > { %26168 = vst [vmem:[#allocation48_spill] sm:$0xff] %v21423_v39  ;;  %3345 = vperm.xlu0 %20286, %v542_v14   ;;  %20350 = vset.pattern.permute.xlu1 %v26157_v33  ;;  %v1887_v14 = vld [vmem:[#allocation2 + $0x12f] sm:$0xff] }
 0x12f   : > { %1216 = vperm.xlu1 %20350, %v21212_v48   ;;  %v3719_v48 = vld [vmem:[#allocation2 + $0x108] sm:$0xff] }
 0x131   : > { %v21428_v26 = vpop.permute.xlu0 %2401  ;;  %v21431_v6 = vpop.permute.xlu1 %1917 }
 0x132   : > { %26170 = vst [vmem:[#allocation50_spill] sm:$0xff] %v21428_v26  ;;  %1982 = vperm.xlu0 %20286, %v1885_v35   ;;  %26171 = vst [vmem:[#allocation51_spill] sm:$0xff] %v21431_v6  ;;  %v20828_v26 = vld [vmem:[#allocation2 + $0x6f] sm:$0xff] }
 0x133   : > { %1220 = vperm.xlu1 %20350, %v21178_v40  }
 0x135   : > { %v21433_v11 = vpop.permute.xlu0 %4213 }
 0x136   : > { %26172 = vst [vmem:[#allocation52_spill] sm:$0xff] %v21433_v11  ;;  %3794 = vperm.xlu0 %20286, %v966_v5   ;;  %v21436_v39 = vpop.permute.xlu1 %2110  ;;  %v485_v11 = vld [vmem:[%s21086_s23 + $0xc8] sm:$0xff] }
 0x137   : > { %26173 = vst [vmem:[#allocation53_spill] sm:$0xff] %v21436_v39  ;;  %20351 = vset.pattern.permute.xlu1 %v26154_v19  ;;  %519 = vst.msk [vmem:[#allocation2 + $0x1b0] sm:$0xff] %vm493_vm0, %v485_v11  ;;  %v2346_v39 = vld [vmem:[#allocation2 + $0x130] sm:$0xff] }
 0x138   : > { %2850 = vperm.xlu1 %20351, %v21184_v42  }
 0x139   : > { %v21438_v1 = vpop.permute.xlu0 %2411 }
 0x13a   : > { %26174 = vst [vmem:[#allocation54_spill] sm:$0xff] %v21438_v1  ;;  %1992 = vperm.xlu0 %20286, %v1887_v14   ;;  %v21442_v35 = vpop.permute.xlu1 %2114  ;;  %v484_v1 = vld [vmem:[%s21086_s23 + $0xc0] sm:$0xff] }
 0x13b   : > { %518 = vst.msk [vmem:[#allocation2 + $0x1a8] sm:$0xff] %vm493_vm0, %v484_v1  ;;  %v4178_v1 = vld [vmem:[#allocation2 + $0x109] sm:$0xff] }
 0x13c   : > { %20352 = vset.pattern.permute.xlu1 %v26157_v33 }
 0x13d   : > { %v21444_v6 = vpop.permute.xlu0 %4223  ;;  %3040 = vperm.xlu1 %20352, %v21184_v42  }
 0x13e   : > { %26175 = vst [vmem:[#allocation55_spill] sm:$0xff] %v21444_v6  ;;  %3804 = vperm.xlu0 %20286, %v3719_v48  }
 0x13f   : > { %v21450_v40 = vpop.permute.xlu1 %1932 }
 0x141   : > { %v21448_v5 = vpop.permute.xlu0 %617  ;;  %20353 = vset.pattern.permute.xlu1 %v26154_v19 }
 0x142   : > { %26176 = vst [vmem:[#allocation56_spill] sm:$0xff] %v21448_v5  ;;  %2441 = vperm.xlu0 %20286, %v969_v28   ;;  %1478 = vperm.xlu1 %20353, %v21182_v41  }
 0x144   : > { %v21460_v6 = vpop.permute.xlu1 %2122 }
 0x145   : > { %v21458_v48 = vpop.permute.xlu0 %1039 }
 0x146   : > { %26177 = vst [vmem:[#allocation57_spill] sm:$0xff] %v21458_v48  ;;  %4253 = vperm.xlu0 %20286, %v2800_v23   ;;  %20354 = vset.pattern.permute.xlu1 %v26157_v33 }
 0x147   : > { %1667 = vperm.xlu1 %20354, %v21182_v41  }
 0x149   : > { %v21463_v5 = vpop.permute.xlu0 %2860  ;;  %v21466_v28 = vpop.permute.xlu1 %3744 }
 0x14a   : > { %26178 = vst [vmem:[#allocation58_spill] sm:$0xff] %v21463_v5  ;;  %2451 = vperm.xlu0 %20286, %v2346_v39   ;;  %26179 = vst [vmem:[#allocation59_spill] sm:$0xff] %v21466_v28  ;;  %v970_v5 = vld [vmem:[#allocation2 + $0x128] sm:$0xff] }
 0x14b   : > { %1671 = vperm.xlu1 %20354, %v21184_v42  }
 0x14d   : > { %v21468_v11 = vpop.permute.xlu0 %622 }
 0x14e   : > { %26180 = vst [vmem:[#allocation60_spill] sm:$0xff] %v21468_v11  ;;  %4263 = vperm.xlu0 %20286, %v4178_v1   ;;  %v21471_v48 = vpop.permute.xlu1 %3939 }
 0x14f   : > { %26181 = vst [vmem:[#allocation61_spill] sm:$0xff] %v21471_v48  ;;  %20355 = vset.pattern.permute.xlu1 %v26154_v19 }
 0x150   : > { %3300 = vperm.xlu1 %20355, %v20828_v26  }
 0x151   : > { %v21473_v23 = vpop.permute.xlu0 %1054 }
 0x152   : > { %26182 = vst [vmem:[#allocation62_spill] sm:$0xff] %v21473_v23  ;;  %657 = vperm.xlu0 %20286, %v1887_v14   ;;  %v21476_v17 = vpop.permute.xlu1 %3943  ;;  %v546_v23 = vld [vmem:[#allocation2 + $0x147] sm:$0xff] }
 0x153   : > { %26183 = vst [vmem:[#allocation63_spill] sm:$0xff] %v21476_v17 }
 0x154   : > { %20356 = vset.pattern.permute.xlu1 %v26157_v33 }
 0x155   : > { %v21478_v39 = vpop.permute.xlu0 %2865  ;;  %3492 = vperm.xlu1 %20356, %v20828_v26  }
 0x156   : > { %26184 = vst [vmem:[#allocation64_spill] sm:$0xff] %v21478_v39  ;;  %1079 = vperm.xlu0 %20286, %v970_v5   ;;  %v973_v39 = vld [vmem:[#allocation2 + $0x150] sm:$0xff] }
 0x157   : > { %v21483_v1 = vpop.permute.xlu1 %2381 }
 0x159   : > { %v21481_v42 = vpop.permute.xlu0 %1503  ;;  %20357 = vset.pattern.permute.xlu1 %v26154_v19 }
 0x15a   : > { %26185 = vst [vmem:[#allocation65_spill] sm:$0xff] %v21481_v42  ;;  %2900 = vperm.xlu0 %20286, %v21413_v34   ;;  %1488 = vperm.xlu1 %20357, %v21243_v57   ;;  %v2804_v34 = vld [vmem:[#allocation2 + $0x129] sm:$0xff] }
 0x15c   : > { %v21490_v11 = vpop.permute.xlu1 %2573 }
 0x15d   : > { %v21488_v14 = vpop.permute.xlu0 %3315 }
 0x15e   : > { %26186 = vst [vmem:[#allocation66_spill] sm:$0xff] %v21488_v14  ;;  %662 = vperm.xlu0 %20286, %v546_v23   ;;  %20358 = vset.pattern.permute.xlu1 %v26157_v33  ;;  %v486_v14 = vld [vmem:[%s21086_s23 + $0xd0] sm:$0xff] }
 0x15f   : > { %1675 = vperm.xlu1 %20358, %v21243_v57   ;;  %520 = vst.msk [vmem:[#allocation2 + $0x1c8] sm:$0xff] %vm493_vm0, %v486_v14  ;;  %v487_v57 = vld [vmem:[%s21086_s23 + $0xd8] sm:$0xff] }
 0x160   : > { %521 = vst.msk [vmem:[#allocation2 + $0x1d0] sm:$0xff] %vm493_vm0, %v487_v57  ;;  %v21516_v14 = vld [vmem:[#allocation2 + $0x151] sm:$0xff] }
 0x161   : > { %v21493_v26 = vpop.permute.xlu0 %1513  ;;  %v21496_v42 = vpop.permute.xlu1 %2386 }
 0x162   : > { %26187 = vst [vmem:[#allocation67_spill] sm:$0xff] %v21493_v26  ;;  %1094 = vperm.xlu0 %20286, %v973_v39   ;;  %26188 = vst [vmem:[#allocation68_spill] sm:$0xff] %v21496_v42  ;;  %v3262_v26 = vld [vmem:[#allocation2 + $0x127] sm:$0xff] }
 0x163   : > { %1679 = vperm.xlu1 %20358, %v21195_v45  }
 0x165   : > { %v21498_v28 = vpop.permute.xlu0 %3325 }
 0x166   : > { %26189 = vst [vmem:[#allocation69_spill] sm:$0xff] %v21498_v28  ;;  %2905 = vperm.xlu0 %20286, %v2804_v34   ;;  %v21503_v48 = vpop.permute.xlu1 %2577 }
 0x167   : > { %26190 = vst [vmem:[#allocation70_spill] sm:$0xff] %v21503_v48  ;;  %20359 = vset.pattern.permute.xlu1 %v26154_v19 }
 0x168   : > { %3310 = vperm.xlu1 %20359, %v21203_v46  }
 0x169   : > { %v21505_v51 = vpop.permute.xlu0 %1962 }
 0x16a   : > { %26191 = vst [vmem:[#allocation71_spill] sm:$0xff] %v21505_v51  ;;  %1543 = vperm.xlu0 %20286, %v1430_v50   ;;  %v21511_v28 = vpop.permute.xlu1 %2581  ;;  %v1876_v50 = vld [vmem:[#allocation2 + $0x87] sm:$0xff] }
 0x16c   : > { %20360 = vset.pattern.permute.xlu1 %v26157_v33 }
 0x16d   : > { %v21513_v45 = vpop.permute.xlu0 %3774  ;;  %3500 = vperm.xlu1 %20360, %v21203_v46  }
 0x16e   : > { %26192 = vst [vmem:[#allocation72_spill] sm:$0xff] %v21513_v45  ;;  %3355 = vperm.xlu0 %20286, %v3262_v26   ;;  %v1889_v45 = vld [vmem:[#allocation2 + $0x14f] sm:$0xff] }
 0x16f   : > { %v21521_v48 = vpop.permute.xlu1 %4208 }
 0x170   : > { %26194 = vst [vmem:[#allocation74_spill] sm:$0xff] %v21521_v48  ;;  %v21691_v48 = vld [vmem:[#allocation2 + $0xcf] sm:$0xff] }
 0x171   : > { %v21519_v51 = vpop.permute.xlu0 %1972  ;;  %20361 = vset.pattern.permute.xlu1 %v26154_v19 }
 0x172   : > { %26193 = vst [vmem:[#allocation73_spill] sm:$0xff] %v21519_v51  ;;  %1553 = vperm.xlu0 %20286, %v21516_v14   ;;  %1937 = vperm.xlu1 %20361, %v1876_v50  }
 0x174   : > { %v21527_v26 = vpop.permute.xlu1 %4402 }
 0x175   : > { %v21525_v57 = vpop.permute.xlu0 %3784  ;;  %26196 = vst [vmem:[#allocation76_spill] sm:$0xff] %v21527_v26 }
 0x176   : > { %26195 = vst [vmem:[#allocation75_spill] sm:$0xff] %v21525_v57  ;;  %3365 = vperm.xlu0 %20286, %v546_v23   ;;  %20362 = vset.pattern.permute.xlu1 %v26157_v33  ;;  %v3710_v23 = vld [vmem:[#allocation2 + $0x70] sm:$0xff] }
 0x177   : > { %2126 = vperm.xlu1 %20362, %v1876_v50  }
 0x179   : > { %v21530_v42 = vpop.permute.xlu0 %2421  ;;  %v21532_v51 = vpop.permute.xlu1 %592 }
 0x17a   : > { %26197 = vst [vmem:[#allocation77_spill] sm:$0xff] %v21530_v42  ;;  %2002 = vperm.xlu0 %20286, %v1889_v45   ;;  %26198 = vst [vmem:[#allocation78_spill] sm:$0xff] %v21532_v51  ;;  %v3723_v45 = vld [vmem:[#allocation2 + $0x148] sm:$0xff] }
 0x17b   : > { %2130 = vperm.xlu1 %20362, %v21203_v46   ;;  %v489_v51 = vld [vmem:[%s21086_s23 + $0xe8] sm:$0xff] }
 0x17c   : > { %523 = vst.msk [vmem:[#allocation2 + $0x1f0] sm:$0xff] %vm493_vm0, %v489_v51 }
 0x17d   : > { %v21534_v0 = vpop.permute.xlu0 %4233 }
 0x17e   : > { %26199 = vst [vmem:[#allocation79_spill] sm:$0xff] %v21534_v0  ;;  %3814 = vperm.xlu0 %20286, %v970_v5   ;;  %v21537_v57 = vpop.permute.xlu1 %781  ;;  %v488_v0 = vld [vmem:[%s21086_s23 + $0xe0] sm:$0xff] }
 0x17f   : > { %26200 = vst [vmem:[#allocation80_spill] sm:$0xff] %v21537_v57  ;;  %20363 = vset.pattern.permute.xlu1 %v26154_v19  ;;  %522 = vst.msk [vmem:[#allocation2 + $0x1e8] sm:$0xff] %vm493_vm0, %v488_v0  ;;  %v4182_v0 = vld [vmem:[#allocation2 + $0x149] sm:$0xff] }
 0x180   : > { %3759 = vperm.xlu1 %20363, %v3710_v23   ;;  %v977_v57 = vld [vmem:[#allocation2 + $0x190] sm:$0xff] }
 0x181   : > { %v21539_v58 = vpop.permute.xlu0 %2431 }
 0x182   : > { %26201 = vst [vmem:[#allocation81_spill] sm:$0xff] %v21539_v58  ;;  %2012 = vperm.xlu0 %20286, %v1891_v22   ;;  %v21542_v50 = vpop.permute.xlu1 %785 }
 0x183   : > { %26202 = vst [vmem:[#allocation82_spill] sm:$0xff] %v21542_v50 }
 0x184   : > { %20364 = vset.pattern.permute.xlu1 %v26157_v33 }
 0x185   : > { %v21544_v42 = vpop.permute.xlu0 %4243  ;;  %3951 = vperm.xlu1 %20364, %v3710_v23   ;;  %v2350_v23 = vld [vmem:[#allocation2 + $0x170] sm:$0xff] }
 0x186   : > { %26203 = vst [vmem:[#allocation83_spill] sm:$0xff] %v21544_v42  ;;  %3824 = vperm.xlu0 %20286, %v3723_v45   ;;  %v21729_v13 = vld [vmem:[#allocation2 + $0x1ef] sm:$0xff] }
 0x187   : > { %v21549_v5 = vpop.permute.xlu1 %1024 }
 0x188   : > { %26205 = vst [vmem:[#allocation85_spill] sm:$0xff] %v21549_v5 }
 0x189   : > { %v21547_v46 = vpop.permute.xlu0 %637  ;;  %20365 = vset.pattern.permute.xlu1 %v26154_v19 }
 0x18a   : > { %26204 = vst [vmem:[#allocation84_spill] sm:$0xff] %v21547_v46  ;;  %2461 = vperm.xlu0 %20286, %v973_v39   ;;  %1947 = vperm.xlu1 %20365, %v21300_v20  }
 0x18c   : > { %v21559_v45 = vpop.permute.xlu1 %1212 }
 0x18d   : > { %v21557_v58 = vpop.permute.xlu0 %1059  ;;  %26207 = vst [vmem:[#allocation87_spill] sm:$0xff] %v21559_v45 }
 0x18e   : > { %26206 = vst [vmem:[#allocation86_spill] sm:$0xff] %v21557_v58  ;;  %4273 = vperm.xlu0 %20286, %v2804_v34   ;;  %20366 = vset.pattern.permute.xlu1 %v26157_v33  ;;  %v3712_v58 = vld [vmem:[#allocation2 + $0x90] sm:$0xff] }
 0x18f   : > { %2134 = vperm.xlu1 %20366, %v21300_v20  }
 0x191   : > { %v21562_v46 = vpop.permute.xlu0 %2880  ;;  %v21565_v39 = vpop.permute.xlu1 %2835 }
 0x192   : > { %26208 = vst [vmem:[#allocation88_spill] sm:$0xff] %v21562_v46  ;;  %2471 = vperm.xlu0 %20286, %v2350_v23   ;;  %26209 = vst [vmem:[#allocation89_spill] sm:$0xff] %v21565_v39  ;;  %v974_v46 = vld [vmem:[#allocation2 + $0x168] sm:$0xff]  ;;  %v20829_v39 = vld [vmem:[#allocation2 + $0x90] sm:$0xff] }
 0x193   : > { %2138 = vperm.xlu1 %20366, %v21210_v47  }
 0x195   : > { %v21567_v51 = vpop.permute.xlu0 %642 }
 0x196   : > { %26210 = vst [vmem:[#allocation90_spill] sm:$0xff] %v21567_v51  ;;  %4283 = vperm.xlu0 %20286, %v4182_v0   ;;  %v21570_v34 = vpop.permute.xlu1 %3028  ;;  %v2335_v51 = vld [vmem:[#allocation2 + $0x88] sm:$0xff] }
 0x197   : > { %26211 = vst [vmem:[#allocation91_spill] sm:$0xff] %v21570_v34  ;;  %20367 = vset.pattern.permute.xlu1 %v26154_v19  ;;  %v490_v34 = vld [vmem:[%s21086_s23 + $0xf0] sm:$0xff] }
 0x198   : > { %3769 = vperm.xlu1 %20367, %v3712_v58   ;;  %524 = vst.msk [vmem:[#allocation2 + $0x208] sm:$0xff] %vm493_vm0, %v490_v34 }
 0x199   : > { %v21572_v42 = vpop.permute.xlu0 %1074 }
 0x19a   : > { %26212 = vst [vmem:[#allocation92_spill] sm:$0xff] %v21572_v42  ;;  %677 = vperm.xlu0 %20286, %v1891_v22   ;;  %v21575_v20 = vpop.permute.xlu1 %3032  ;;  %v550_v42 = vld [vmem:[#allocation2 + $0x187] sm:$0xff] }
 0x19c   : > { %20368 = vset.pattern.permute.xlu1 %v26157_v33 }
 0x19d   : > { %v21577_v23 = vpop.permute.xlu0 %2885  ;;  %3959 = vperm.xlu1 %20368, %v3712_v58  }
 0x19e   : > { %26213 = vst [vmem:[#allocation93_spill] sm:$0xff] %v21577_v23  ;;  %1099 = vperm.xlu0 %20286, %v974_v46  }
 0x19f   : > { %v21582_v0 = vpop.permute.xlu1 %607 }
 0x1a0   : > { %26215 = vst [vmem:[#allocation95_spill] sm:$0xff] %v21582_v0 }
 0x1a1   : > { %v21580_v47 = vpop.permute.xlu0 %1523  ;;  %20369 = vset.pattern.permute.xlu1 %v26154_v19 }
 0x1a2   : > { %26214 = vst [vmem:[#allocation94_spill] sm:$0xff] %v21580_v47  ;;  %2920 = vperm.xlu0 %20286, %v21516_v14   ;;  %2396 = vperm.xlu1 %20369, %v2335_v51   ;;  %v2808_v47 = vld [vmem:[#allocation2 + $0x169] sm:$0xff] }
 0x1a4   : > { %v21588_v23 = vpop.permute.xlu1 %793 }
 0x1a5   : > { %v21586_v22 = vpop.permute.xlu0 %3335  ;;  %26217 = vst [vmem:[#allocation97_spill] sm:$0xff] %v21588_v23  ;;  %v4169_v23 = vld [vmem:[#allocation2 + $0x71] sm:$0xff] }
 0x1a6   : > { %26216 = vst [vmem:[#allocation96_spill] sm:$0xff] %v21586_v22  ;;  %682 = vperm.xlu0 %20286, %v550_v42   ;;  %20370 = vset.pattern.permute.xlu1 %v26157_v33  ;;  %v1434_v22 = vld [vmem:[#allocation2 + $0x171] sm:$0xff] }
 0x1a7   : > { %2585 = vperm.xlu1 %20370, %v2335_v51   ;;  %v3266_v51 = vld [vmem:[#allocation2 + $0x167] sm:$0xff] }
 0x1a9   : > { %v21591_v58 = vpop.permute.xlu0 %1533  ;;  %v21593_v0 = vpop.permute.xlu1 %1029 }
 0x1aa   : > { %26218 = vst [vmem:[#allocation98_spill] sm:$0xff] %v21591_v58  ;;  %1114 = vperm.xlu0 %20286, %v977_v57   ;;  %26219 = vst [vmem:[#allocation99_spill] sm:$0xff] %v21593_v0 }
 0x1ab   : > { %2589 = vperm.xlu1 %20370, %v20829_v39   ;;  %v21609_v39 = vld [vmem:[#allocation2 + $0x191] sm:$0xff] }
 0x1ad   : > { %v21595_v14 = vpop.permute.xlu0 %3345 }
 0x1ae   : > { %26220 = vst [vmem:[#allocation100_spill] sm:$0xff] %v21595_v14  ;;  %2925 = vperm.xlu0 %20286, %v2808_v47   ;;  %v21599_v5 = vpop.permute.xlu1 %1216 }
 0x1af   : > { %26221 = vst [vmem:[#allocation101_spill] sm:$0xff] %v21599_v5  ;;  %20371 = vset.pattern.permute.xlu1 %v26154_v19  ;;  %v491_v5 = vld [vmem:[%s21086_s23 + $0xf8] sm:$0xff] }
 0x1b0   : > { %4218 = vperm.xlu1 %20371, %v4169_v23   ;;  %525 = vst.msk [vmem:[#allocation2 + $0x210] sm:$0xff] %vm493_vm0, %v491_v5  ;;  %v3727_v5 = vld [vmem:[#allocation2 + $0x188] sm:$0xff] }
 0x1b1   : > { %v21601_v50 = vpop.permute.xlu0 %1982 }
 0x1b2   : > { %26222 = vst [vmem:[#allocation102_spill] sm:$0xff] %v21601_v50  ;;  %1563 = vperm.xlu0 %20286, %v1434_v22   ;;  %v21604_v58 = vpop.permute.xlu1 %1220  ;;  %v2337_v50 = vld [vmem:[#allocation2 + $0xa8] sm:$0xff] }
 0x1b3   : > { %26223 = vst [vmem:[#allocation103_spill] sm:$0xff] %v21604_v58 }
 0x1b4   : > { %20372 = vset.pattern.permute.xlu1 %v26157_v33 }
 0x1b5   : > { %v21606_v14 = vpop.permute.xlu0 %3794  ;;  %4410 = vperm.xlu1 %20372, %v4169_v23  }
 0x1b6   : > { %26224 = vst [vmem:[#allocation104_spill] sm:$0xff] %v21606_v14  ;;  %3375 = vperm.xlu0 %20286, %v3266_v51   ;;  %v1893_v14 = vld [vmem:[#allocation2 + $0x18f] sm:$0xff] }
 0x1b7   : > { %v21613_v0 = vpop.permute.xlu1 %2850 }
 0x1b9   : > { %v21611_v34 = vpop.permute.xlu0 %1992  ;;  %20373 = vset.pattern.permute.xlu1 %v26154_v19 }
 0x1ba   : > { %26225 = vst [vmem:[#allocation105_spill] sm:$0xff] %v21611_v34  ;;  %1573 = vperm.xlu0 %20286, %v21609_v39   ;;  %2406 = vperm.xlu1 %20373, %v2337_v50  }
 0x1bc   : > { %v21620_v51 = vpop.permute.xlu1 %3040 }
 0x1bd   : > { %v21617_v22 = vpop.permute.xlu0 %3804 }
 0x1be   : > { %26226 = vst [vmem:[#allocation106_spill] sm:$0xff] %v21617_v22  ;;  %3385 = vperm.xlu0 %20286, %v550_v42   ;;  %20374 = vset.pattern.permute.xlu1 %v26157_v33  ;;  %v1895_v22 = vld [vmem:[#allocation2 + $0x1af] sm:$0xff] }
 0x1bf   : > { %2593 = vperm.xlu1 %20374, %v2337_v50   ;;  %v4171_v42 = vld [vmem:[#allocation2 + $0x91] sm:$0xff] }
 0x1c1   : > { %v21624_v23 = vpop.permute.xlu0 %2441  ;;  %v21626_v34 = vpop.permute.xlu1 %1478 }
 0x1c2   : > { %26227 = vst [vmem:[#allocation107_spill] sm:$0xff] %v21624_v23  ;;  %2022 = vperm.xlu0 %20286, %v1893_v14   ;;  %26228 = vst [vmem:[#allocation108_spill] sm:$0xff] %v21626_v34  ;;  %v536_v23 = vld [vmem:[#allocation2 + $0xa7] sm:$0xff]  ;;  %v2354_v34 = vld [vmem:[#allocation2 + $0x1b0] sm:$0xff] }
 0x1c3   : > { %2597 = vperm.xlu1 %20374, %v21233_v54  }
 0x1c5   : > { %v21628_v58 = vpop.permute.xlu0 %4253 }
 0x1c6   : > { %26229 = vst [vmem:[#allocation109_spill] sm:$0xff] %v21628_v58  ;;  %3834 = vperm.xlu0 %20286, %v974_v46   ;;  %v21631_v45 = vpop.permute.xlu1 %1667 }
 0x1c7   : > { %26230 = vst [vmem:[#allocation110_spill] sm:$0xff] %v21631_v45  ;;  %20375 = vset.pattern.permute.xlu1 %v26154_v19  ;;  %v21657_v45 = vld [vmem:[#allocation2 + $0xb0] sm:$0xff] }
 0x1c8   : > { %4228 = vperm.xlu1 %20375, %v4171_v42   ;;  %26239 = vst [vmem:[#allocation119_spill] sm:$0xff] %v21657_v45 }
 0x1c9   : > { %v21633_v59 = vpop.permute.xlu0 %2451 }
 0x1ca   : > { %26231 = vst [vmem:[#allocation111_spill] sm:$0xff] %v21633_v59  ;;  %2032 = vperm.xlu0 %20286, %v1895_v22   ;;  %v21636_v50 = vpop.permute.xlu1 %1671 }
 0x1cb   : > { %26232 = vst [vmem:[#allocation112_spill] sm:$0xff] %v21636_v50  ;;  %v20831_v50 = vld [vmem:[#allocation2 + $0x91] sm:$0xff] }
 0x1cc   : > { %20376 = vset.pattern.permute.xlu1 %v26157_v33 }
 0x1cd   : > { %v21638_v14 = vpop.permute.xlu0 %4263  ;;  %4418 = vperm.xlu1 %20376, %v4171_v42   ;;  %v4186_v42 = vld [vmem:[#allocation2 + $0x189] sm:$0xff] }
 0x1ce   : > { %26233 = vst [vmem:[#allocation113_spill] sm:$0xff] %v21638_v14  ;;  %3844 = vperm.xlu0 %20286, %v3727_v5  }
 0x1cf   : > { %v21643_v46 = vpop.permute.xlu1 %3300 }
 0x1d1   : > { %v21641_v54 = vpop.permute.xlu0 %657  ;;  %20377 = vset.pattern.permute.xlu1 %v26154_v19 }
 0x1d2   : > { %26234 = vst [vmem:[#allocation114_spill] sm:$0xff] %v21641_v54  ;;  %2481 = vperm.xlu0 %20286, %v977_v57   ;;  %612 = vperm.xlu1 %20377, %v536_v23   ;;  %v20830_v57 = vld [vmem:[#allocation2 + $0xaf] sm:$0xff] }
 0x1d4   : > { %v21648_v58 = vpop.permute.xlu1 %3492 }
 0x1d5   : > { %v21646_v59 = vpop.permute.xlu0 %1079 }
 0x1d6   : > { %26235 = vst [vmem:[#allocation115_spill] sm:$0xff] %v21646_v59  ;;  %4293 = vperm.xlu0 %20286, %v2808_v47   ;;  %20378 = vset.pattern.permute.xlu1 %v26157_v33 }
 0x1d7   : > { %797 = vperm.xlu1 %20378, %v536_v23  }
 0x1d9   : > { %v21651_v5 = vpop.permute.xlu0 %2900  ;;  %v21653_v54 = vpop.permute.xlu1 %1488 }
 0x1da   : > { %26236 = vst [vmem:[#allocation116_spill] sm:$0xff] %v21651_v5  ;;  %2491 = vperm.xlu0 %20286, %v2354_v34   ;;  %26237 = vst [vmem:[#allocation117_spill] sm:$0xff] %v21653_v54  ;;  %v978_v34 = vld [vmem:[#allocation2 + $0x1a8] sm:$0xff]  ;;  %v981_v54 = vld [vmem:[#allocation2 + $0x1d0] sm:$0xff] }
 0x1db   : > { %801 = vperm.xlu1 %20378, %v20830_v57  }
 0x1dd   : > { %v21655_v14 = vpop.permute.xlu0 %662 }
 0x1de   : > { %26238 = vst [vmem:[#allocation118_spill] sm:$0xff] %v21655_v14  ;;  %4303 = vperm.xlu0 %20286, %v4186_v42   ;;  %v21659_v47 = vpop.permute.xlu1 %1675 }
 0x1df   : > { %26240 = vst [vmem:[#allocation120_spill] sm:$0xff] %v21659_v47  ;;  %20379 = vset.pattern.permute.xlu1 %v26154_v19 }
 0x1e0   : > { %1044 = vperm.xlu1 %20379, %v21657_v45  }
 0x1e1   : > { %v21661_v59 = vpop.permute.xlu0 %1094 }
 0x1e2   : > { %26241 = vst [vmem:[#allocation121_spill] sm:$0xff] %v21661_v59  ;;  %697 = vperm.xlu0 %20286, %v1895_v22   ;;  %v21665_v23 = vpop.permute.xlu1 %1679  ;;  %v2794_v59 = vld [vmem:[#allocation2 + $0x89] sm:$0xff] }
 0x1e3   : > { %26242 = vst [vmem:[#allocation122_spill] sm:$0xff] %v21665_v23  ;;  %v554_v22 = vld [vmem:[#allocation2 + $0x1c7] sm:$0xff] }
 0x1e4   : > { %20380 = vset.pattern.permute.xlu1 %v26157_v33 }
 0x1e5   : > { %v21667_v5 = vpop.permute.xlu0 %2905  ;;  %1228 = vperm.xlu1 %20380, %v21657_v45  }
 0x1e6   : > { %26243 = vst [vmem:[#allocation123_spill] sm:$0xff] %v21667_v5  ;;  %1119 = vperm.xlu0 %20286, %v978_v34  }
 0x1e7   : > { %v21673_v57 = vpop.permute.xlu1 %3310 }
 0x1e9   : > { %v21671_v42 = vpop.permute.xlu0 %1543  ;;  %20381 = vset.pattern.permute.xlu1 %v26154_v19 }
 0x1ea   : > { %26244 = vst [vmem:[#allocation124_spill] sm:$0xff] %v21671_v42  ;;  %2940 = vperm.xlu0 %20286, %v21609_v39   ;;  %2855 = vperm.xlu1 %20381, %v2794_v59   ;;  %v21684_v42 = vld [vmem:[#allocation2 + $0x1a9] sm:$0xff] }
 0x1ec   : > { %v21679_v5 = vpop.permute.xlu1 %3500 }
 0x1ed   : > { %v21677_v14 = vpop.permute.xlu0 %3355 }
 0x1ee   : > { %26245 = vst [vmem:[#allocation125_spill] sm:$0xff] %v21677_v14  ;;  %702 = vperm.xlu0 %20286, %v554_v22   ;;  %20382 = vset.pattern.permute.xlu1 %v26157_v33  ;;  %v1438_v14 = vld [vmem:[#allocation2 + $0x1b1] sm:$0xff] }
 0x1ef   : > { %3044 = vperm.xlu1 %20382, %v2794_v59   ;;  %v3270_v59 = vld [vmem:[#allocation2 + $0x1a7] sm:$0xff] }
 0x1f1   : > { %v21682_v47 = vpop.permute.xlu0 %1553  ;;  %v21686_v23 = vpop.permute.xlu1 %1937 }
 0x1f2   : > { %26246 = vst [vmem:[#allocation126_spill] sm:$0xff] %v21682_v47  ;;  %1134 = vperm.xlu0 %20286, %v981_v54   ;;  %26247 = vst [vmem:[#allocation127_spill] sm:$0xff] %v21686_v23 }
 0x1f3   : > { %3048 = vperm.xlu1 %20382, %v20831_v50   ;;  %v21704_v50 = vld [vmem:[#allocation2 + $0x1d1] sm:$0xff] }
 0x1f5   : > { %v21688_v39 = vpop.permute.xlu0 %3365 }
 0x1f6   : > { %26248 = vst [vmem:[#allocation128_spill] sm:$0xff] %v21688_v39  ;;  %2945 = vperm.xlu0 %20286, %v21684_v42   ;;  %v21693_v60 = vpop.permute.xlu1 %2126 }
 0x1f7   : > { %26249 = vst [vmem:[#allocation129_spill] sm:$0xff] %v21693_v60  ;;  %20383 = vset.pattern.permute.xlu1 %v26154_v19  ;;  %v21711_v60 = vld [vmem:[#allocation2 + $0xc8] sm:$0xff] }
 0x1f8   : > { %627 = vperm.xlu1 %20383, %v21691_v48   ;;  %26254 = vst [vmem:[#allocation134_spill] sm:$0xff] %v21711_v60 }
 0x1f9   : > { %v21695_v26 = vpop.permute.xlu0 %2002 }
 0x1fa   : > { %26250 = vst [vmem:[#allocation130_spill] sm:$0xff] %v21695_v26  ;;  %1583 = vperm.xlu0 %20286, %v1438_v14   ;;  %v21699_v47 = vpop.permute.xlu1 %2130 }
 0x1fb   : > { %26251 = vst [vmem:[#allocation131_spill] sm:$0xff] %v21699_v47 }
 0x1fc   : > { %20384 = vset.pattern.permute.xlu1 %v26157_v33 }
 0x1fd   : > { %v21701_v39 = vpop.permute.xlu0 %3814  ;;  %809 = vperm.xlu1 %20384, %v21691_v48  }
 0x1fe   : > { %26252 = vst [vmem:[#allocation132_spill] sm:$0xff] %v21701_v39  ;;  %3395 = vperm.xlu0 %20286, %v3270_v59   ;;  %v1897_v39 = vld [vmem:[#allocation2 + $0x1cf] sm:$0xff] }
 0x1ff   : > { %v21709_v26 = vpop.permute.xlu1 %3759 }
 0x201   : > { %v21707_v23 = vpop.permute.xlu0 %2012  ;;  %20385 = vset.pattern.permute.xlu1 %v26154_v19 }
 0x202   : > { %26253 = vst [vmem:[#allocation133_spill] sm:$0xff] %v21707_v23  ;;  %1593 = vperm.xlu0 %20286, %v21704_v50   ;;  %1049 = vperm.xlu1 %20385, %v21711_v60  }
 0x204   : > { %v21718_v59 = vpop.permute.xlu1 %3951 }
 0x205   : > { %v21716_v14 = vpop.permute.xlu0 %3824 }
 0x206   : > { %26255 = vst [vmem:[#allocation135_spill] sm:$0xff] %v21716_v14  ;;  %3405 = vperm.xlu0 %20286, %v554_v22   ;;  %20386 = vset.pattern.permute.xlu1 %v26157_v33  ;;  %v21731_v22 = vld [vmem:[#allocation2 + $0xb1] sm:$0xff] }
 0x207   : > { %1232 = vperm.xlu1 %20386, %v21711_v60   ;;  %26259 = vst [vmem:[#allocation139_spill] sm:$0xff] %v21731_v22 }
 0x209   : > { %v21721_v47 = vpop.permute.xlu0 %2461  ;;  %v21724_v23 = vpop.permute.xlu1 %1947 }
 0x20a   : > { %26256 = vst [vmem:[#allocation136_spill] sm:$0xff] %v21721_v47  ;;  %2042 = vperm.xlu0 %20286, %v1897_v39   ;;  %26257 = vst [vmem:[#allocation137_spill] sm:$0xff] %v21724_v23  ;;  %v3731_v39 = vld [vmem:[#allocation2 + $0x1c8] sm:$0xff] }
 0x20b   : > { %1236 = vperm.xlu1 %20386, %v21275_v8   ;;  %v720_v8 = vlaneseq  ;;  %v1421_v23 = vld [vmem:[#allocation2 + $0xa9] sm:$0xff] }
 0x20d   : > { %v21726_v17 = vpop.permute.xlu0 %4273 }
 0x20e   : > { %26258 = vst [vmem:[#allocation138_spill] sm:$0xff] %v21726_v17  ;;  %3854 = vperm.xlu0 %20286, %v978_v34   ;;  %v21733_v14 = vpop.permute.xlu1 %2134 }
 0x20f   : > { %26260 = vst [vmem:[#allocation140_spill] sm:$0xff] %v21733_v14  ;;  %20387 = vset.pattern.permute.xlu1 %v26154_v19  ;;  %v721_v14 = vshrl.u32 %v720_v8, 7 }
 0x210   : > { %2870 = vperm.xlu1 %20387, %v21731_v22  }
 0x211   : > { %v21735_v30 = vpop.permute.xlu0 %2471  ;;  %v21759_v37 = vsub.s32 1, %v721_v14  ;;  %v21769_v3 = vsub.s32 0, %v721_v14 }
 0x212   : > { %26261 = vst [vmem:[#allocation141_spill] sm:$0xff] %v21735_v30  ;;  %2052 = vperm.xlu0 %20286, %v21729_v13   ;;  %v21740_v47 = vpop.permute.xlu1 %2138 }
 0x213   : > { %26262 = vst [vmem:[#allocation142_spill] sm:$0xff] %v21740_v47 }
 0x214   : > { %20388 = vset.pattern.permute.xlu1 %v26157_v33 }
 0x215   : > { %v21742_v17 = vpop.permute.xlu0 %4283  ;;  %3056 = vperm.xlu1 %20388, %v21731_v22  }
 0x216   : > { %26263 = vst [vmem:[#allocation143_spill] sm:$0xff] %v21742_v17  ;;  %3864 = vperm.xlu0 %20286, %v3731_v39   ;;  %v16074_v17 = vld [vmem:[%s26050_s1 + $0x1] sm:$0x1]  ;;  %v558_v39 = vld [vmem:[%s26050_s1] sm:$0x1] }
 0x217   : > { %v21748_v30 = vpop.permute.xlu1 %3769  ;;  %v986_v31 = vunpack.c.l.bf16 %v16074_v17  ;;  %v559_v9 = vunpack.c.l.bf16 %v558_v39  ;;  %v16077_v17 = vld [vmem:[%s26050_s1 + $0x4] sm:$0x1]  ;;  %v4190_v39 = vld [vmem:[#allocation2 + $0x1c9] sm:$0xff] }
 0x219   : > { %v21746_v34 = vpop.permute.xlu0 %677  ;;  %20389 = vset.pattern.permute.xlu1 %v26154_v19 }
 0x21a   : > { %26264 = vst [vmem:[#allocation144_spill] sm:$0xff] %v21746_v34  ;;  %2501 = vperm.xlu0 %20286, %v981_v54   ;;  %1498 = vperm.xlu1 %20389, %v1421_v23   ;;  %v16075_v54 = vld [vmem:[%s26050_s1 + $0x2] sm:$0x1]  ;;  %v21767_v34 = vld [vmem:[#allocation2 + $0x1f0] sm:$0xff] }
 0x21b   : > { %v1445_v7 = vunpack.c.l.bf16 %v16075_v54  ;;  %v21790_v54 = vrot.slane %v986_v31, %v21769_v3 }
 0x21c   : > { %v21765_v8 = vpop.permute.xlu1 %3959 }
 0x21d   : > { %v21757_v47 = vpop.permute.xlu0 %1099  ;;  %v21785_v14 = vrot.slane %v1445_v7, %v21759_v37  ;;  %v21804_v52 = vrot.slane %v1445_v7, %v21769_v3 }
 0x21e   : > { %26265 = vst [vmem:[#allocation145_spill] sm:$0xff] %v21757_v47  ;;  %4313 = vperm.xlu0 %20286, %v21684_v42   ;;  %v16076_v47 = vld [vmem:[%s26050_s1 + $0x3] sm:$0x1]  ;;  %20390 = vset.pattern.permute.xlu1 %v26157_v33  ;;  %v21778_v42 = vrot.slane %v986_v31, %v21759_v37  ;;  %v2363_v31 = vunpack.c.l.bf16 %v16077_v17  ;;  %v3255_v17 = vld [vmem:[#allocation2 + $0xaf] sm:$0xff] }
 0x21f   : > { %1683 = vperm.xlu1 %20390, %v1421_v23   ;;  %v1904_v56 = vunpack.c.l.bf16 %v16076_v47  ;;  %26267 = vst [vmem:[#allocation147_spill] sm:$0xff] %v21785_v14  ;;  %v21793_v23 = vrot.slane %v559_v9, %v21769_v3  ;;  %v16078_v47 = vld [vmem:[%s26050_s1 + $0x5] sm:$0x1] }
 0x220   : > { %v1318_v49 = vmul.f32 %v21778_v42, %v21320_v27 }
 0x221   : > { %v21775_v63 = vpop.permute.xlu0 %2920  ;;  %v21787_v55 = vpop.permute.xlu1 %2396  ;;  %26269 = vst [vmem:[#allocation149_spill] sm:$0xff] %v21793_v23  ;;  %v727_v53 = vmul.f32 %v21793_v23, %v21253_v61  ;;  %v21816_v27 = vrot.slane %v1904_v56, %v21769_v3  ;;  %v21819_v7 = vrot.slane %v1904_v56, %v21759_v37  ;;  %v1777_v61 = vmul.f32 %v21785_v14, %v21388_v10  ;;  %v16080_v56 = vld [vmem:[%s26050_s1 + $0x7] sm:$0x1] }
 0x222   : > { %26266 = vst [vmem:[#allocation146_spill] sm:$0xff] %v21775_v63  ;;  %2511 = vperm.xlu0 %20286, %v21767_v34   ;;  %26268 = vst [vmem:[#allocation148_spill] sm:$0xff] %v21787_v55  ;;  %v21799_v63 = vrot.slane %v559_v9, %v21759_v37  ;;  %v1154_v9 = vmul.f32 %v21790_v54, %v21313_v25  ;;  %v21829_v25 = vrot.slane %v2363_v31, %v21759_v37 }
 0x223   : > { %1687 = vperm.xlu1 %20390, %v21289_v15   ;;  %v16079_v15 = vld [vmem:[%s26050_s1 + $0x6] sm:$0x1]  ;;  %v2236_v10 = vmul.f32 %v21819_v7, %v21442_v35  ;;  %v3741_v45 = vunpack.c.l.bf16 %v16080_v56 }
 0x224   : > { %26270 = vst [vmem:[#allocation150_spill] sm:$0xff] %v21799_v63  ;;  %v891_v22 = vmul.f32 %v21799_v63, %v21302_v21  ;;  %v1350_v21 = vadd.f32 %v1318_v49, %v1154_v9  ;;  %v21844_v49 = vrot.slane %v2363_v31, %v21769_v3  ;;  %v3282_v9 = vunpack.c.l.bf16 %v16079_v15 }
 0x225   : > { %v21806_v55 = vpop.permute.xlu0 %682  ;;  %v2695_v35 = vmul.f32 %v21829_v25, %v21490_v11  ;;  %v21876_v56 = vrot.slane %v3741_v45, %v21759_v37 }
 0x226   : > { %26271 = vst [vmem:[#allocation151_spill] sm:$0xff] %v21806_v55  ;;  %4323 = vperm.xlu0 %20286, %v4190_v39   ;;  %v2822_v55 = vunpack.c.l.bf16 %v16078_v47  ;;  %v21826_v60 = vpop.permute.xlu1 %2585  ;;  %v2072_v39 = vmul.f32 %v21816_v27, %v21311_v24  ;;  %v1613_v47 = vmul.f32 %v21804_v52, %v21381_v4  ;;  %v21856_v31 = vrot.slane %v3282_v9, %v21759_v37 }
 0x227   : > { %26272 = vst [vmem:[#allocation152_spill] sm:$0xff] %v21826_v60  ;;  %20391 = vset.pattern.permute.xlu1 %v26154_v19  ;;  %v923_v60 = vadd.f32 %v891_v22, %v727_v53  ;;  %v2531_v15 = vmul.f32 %v21844_v49, %v21483_v1  ;;  %v21881_v1 = vrot.slane %v3741_v45, %v21769_v3 }
 0x228   : > { %3320 = vperm.xlu1 %20391, %v3255_v17   ;;  %v21848_v24 = vrot.slane %v2822_v55, %v21769_v3  ;;  %v21851_v4 = vrot.slane %v2822_v55, %v21759_v37  ;;  %v1809_v36 = vadd.f32 %v1777_v61, %v1613_v47  ;;  %v2268_v22 = vadd.f32 %v2236_v10, %v2072_v39 }
 0x229   : > { %v21840_v41 = vpop.permute.xlu0 %1114  ;;  %v1382_v16 = vadd.f32 %v1350_v21, %v923_v60  ;;  %v21872_v61 = vrot.slane %v3282_v9, %v21769_v3  ;;  %v3614_v39 = vmul.f32 %v21856_v31, %v21648_v58  ;;  %v3909_v45 = vmul.f32 %v21881_v1, %v21709_v26 }
 0x22a   : > { %26273 = vst [vmem:[#allocation153_spill] sm:$0xff] %v21840_v41  ;;  %2960 = vperm.xlu0 %20286, %v21704_v50   ;;  %v2816_v41 = vld [vmem:[#allocation2 + $0x1e9] sm:$0xff]  ;;  %v21858_v53 = vpop.permute.xlu1 %2589  ;;  %v16081_v50 = vld [vmem:[%s26050_s1 + $0x8] sm:$0x1]  ;;  %v2990_v55 = vmul.f32 %v21848_v24, %v21359_v38  ;;  %v3154_v11 = vmul.f32 %v21851_v4, %v21575_v20  ;;  %v2727_v38 = vadd.f32 %v2695_v35, %v2531_v15 }
 0x22b   : > { %v1841_v21 = vadd.f32 %v1809_v36, %v1382_v16  ;;  %v4200_v20 = vunpack.c.l.bf16 %v16081_v50  ;;  %v4073_v16 = vmul.f32 %v21876_v56, %v21718_v59  ;;  %v21889_v35 = vld [vmem:[#allocation2 + $0xc9] sm:$0xff] }
 0x22c   : > { %20392 = vset.pattern.permute.xlu1 %v26157_v33  ;;  %v3186_v10 = vadd.f32 %v3154_v11, %v2990_v55  ;;  %v3276_v50 = vld [vmem:[#allocation2 + $0x207] sm:$0xff] }
 0x22d   : > { %v21869_v60 = vpop.permute.xlu0 %2925  ;;  %3508 = vperm.xlu1 %20392, %v3255_v17   ;;  %v2300_v47 = vadd.f32 %v2268_v22, %v1841_v21  ;;  %v21900_v59 = vrot.slane %v4200_v20, %v21759_v37  ;;  %v4105_v22 = vadd.f32 %v4073_v16, %v3909_v45  ;;  %v21914_v37 = vld [vmem:[%s26051_s2] ss:$0 sm:$0xff]  ;;  %v893_v45 = vmul.f32 %v21799_v63, %v21337_v44 }
 0x22e   : > { %26274 = vst [vmem:[#allocation154_spill] sm:$0xff] %v21869_v60  ;;  %2965 = vperm.xlu0 %20286, %v2816_v41   ;;  %v3450_v41 = vmul.f32 %v21872_v61, %v21643_v46  ;;  %v21897_v46 = vrot.slane %v4200_v20, %v21769_v3  ;;  %v3735_v20 = vld [vmem:[#allocation2 + $0x208] sm:$0xff]  ;;  %v2533_v44 = vmul.f32 %v21844_v49, %v21333_v43 }
 0x22f   : > { %v4219_v9 = vpop.permute.xlu1 %4218  ;;  %v2759_v58 = vadd.f32 %v2727_v38, %v2300_v47 }
 0x230   : > { %v3646_v17 = vadd.f32 %v3614_v39, %v3450_v41  ;;  %v4368_v26 = vmul.f32 %v21897_v46, %v4219_v9  ;;  %v1320_v41 = vmul.f32 %v21778_v42, %v21356_v29  ;;  %v1156_v29 = vmul.f32 %v21790_v54, %v21345_v62 }
 0x231   : > { %v21887_v36 = vpop.permute.xlu0 %1563  ;;  %20393 = vset.pattern.permute.xlu1 %v26154_v19  ;;  %v3218_v55 = vadd.f32 %v3186_v10, %v2759_v58  ;;  %v21923_v58 = vld [vmem:[#allocation2 + $0xd1] sm:$0xff] }
 0x232   : > { %26275 = vst [vmem:[#allocation155_spill] sm:$0xff] %v21887_v36  ;;  %3420 = vperm.xlu0 %20286, %v21729_v13   ;;  %1508 = vperm.xlu1 %20393, %v21889_v35  }
 0x233   : > { %v3678_v11 = vadd.f32 %v3646_v17, %v3218_v55  ;;  %v1615_v17 = vmul.f32 %v21804_v52, %v21293_v18 }
 0x234   : > { %v4411_v13 = vpop.permute.xlu1 %4410 }
 0x235   : > { %v21902_v15 = vpop.permute.xlu0 %3375  ;;  %v4532_v21 = vmul.f32 %v21900_v59, %v4411_v13  ;;  %v4137_v38 = vadd.f32 %v4105_v22, %v3678_v11  ;;  %v4193_v22 = vld [vmem:[#allocation2 + $0x1f1] sm:$0xff]  ;;  %v1352_v11 = vadd.f32 %v1320_v41, %v1156_v29 }
 0x236   : > { %26276 = vst [vmem:[#allocation156_spill] sm:$0xff] %v21902_v15  ;;  %3425 = vperm.xlu0 %20286, %v3276_v50   ;;  %20394 = vset.pattern.permute.xlu1 %v26157_v33  ;;  %v1779_v50 = vmul.f32 %v21785_v14, %v21408_v32 }
 0x237   : > { %v4564_v3 = vadd.f32 %v4532_v21, %v4368_v26  ;;  %1691 = vperm.xlu1 %20394, %v21889_v35   ;;  %v2074_v26 = vmul.f32 %v21816_v27, %v21450_v40  ;;  %v4194_v21 = vld [vmem:[#allocation2 + $0x209] sm:$0xff]  ;;  %v2992_v40 = vmul.f32 %v21848_v24, %v21613_v0 }
 0x238   : > { %v1811_v62 = vadd.f32 %v1779_v50, %v1615_v17 }
 0x239   : > { %v21907_v39 = vpop.permute.xlu0 %1573  ;;  %v4596_v47 = vadd.f32 %v4564_v3, %v4137_v38  ;;  %v21916_v10 = vpop.permute.xlu1 %2406 }
 0x23a   : > { %26277 = vst [vmem:[#allocation157_spill] sm:$0xff] %v21907_v39  ;;  %3879 = vperm.xlu0 %20286, %v21767_v34   ;;  %26278 = vst [vmem:[#allocation158_spill] sm:$0xff] %v21916_v10  ;;  %v729_v34 = vmul.f32 %v21793_v23, %v21264_v2  ;;  %v2238_v2 = vmul.f32 %v21819_v7, %v21460_v6  ;;  %v2697_v6 = vmul.f32 %v21829_v25, %v21511_v28 }
 0x23b   : > { %v4635_v9 = vadd.f32 %v21914_v37, %v4596_v47  ;;  %1695 = vperm.xlu1 %20394, %v21923_v58   ;;  %v3156_v47 = vmul.f32 %v21851_v4, %v21620_v51  ;;  %v3616_v28 = vmul.f32 %v21856_v31, %v21679_v5  ;;  %v3452_v51 = vmul.f32 %v21872_v61, %v21673_v57 }
 0x23c   : > { %v925_v32 = vadd.f32 %v893_v45, %v729_v34  ;;  %v4075_v45 = vmul.f32 %v21876_v56, %v21765_v8  ;;  %v3911_v5 = vmul.f32 %v21881_v1, %v21748_v30 }
 0x23d   : > { %v21920_v16 = vpop.permute.xlu0 %3385  ;;  %v4667_v55 = vmax.f32 %v4635_v9, 0.0  ;;  %v2729_v9 = vadd.f32 %v2697_v6, %v2533_v44  ;;  %v3188_v17 = vadd.f32 %v3156_v47, %v2992_v40  ;;  %v26286_v44 = vld [vmem:[#allocation3_spill] sm:$0xff]  ;;  %v20833_v6 = vld [vmem:[#allocation2 + $0x28] sm:$0xff] }
 0x23e   : > { %26279 = vst [vmem:[#allocation159_spill] sm:$0xff] %v21920_v16  ;;  %3884 = vperm.xlu0 %20286, %v3735_v20   ;;  %v21936_v13 = vpop.permute.xlu1 %2593  ;;  %v1384_v3 = vadd.f32 %v1352_v11, %v925_v32  ;;  %v2270_v20 = vadd.f32 %v2238_v2, %v2074_v26  ;;  %v4107_v57 = vadd.f32 %v4075_v45, %v3911_v5  ;;  %v20837_v5 = vld [vmem:[#allocation2 + $0x47] sm:$0xff]  ;;  %v26347_v16 = vld [vmem:[#allocation6_spill] sm:$0xff] }
 0x23f   : > { %26280 = vst [vmem:[#allocation160_spill] sm:$0xff] %v21936_v13  ;;  %20395 = vset.pattern.permute.xlu1 %v26154_v19  ;;  %4700 = vst.msk [vmem:[#allocation2 + $0x50] sm:$0xff] %vm4696_vm1, %v4667_v55  ;;  %v1880_v55 = vld [vmem:[#allocation2 + $0xc7] sm:$0xff]  ;;  %v20297_v60 = vunpack.i.h.bf16 %v26347_v16  ;;  %v26397_v13 = vld [vmem:[#allocation82_spill] sm:$0xff] }
 0x240   : > { %3330 = vperm.xlu1 %20395, %v21691_v48   ;;  %v1843_v41 = vadd.f32 %v1811_v62, %v1384_v3 }
 0x241   : > { %v21940_v18 = vpop.permute.xlu0 %2022 }
 0x242   : > { %26281 = vst [vmem:[#allocation161_spill] sm:$0xff] %v21940_v18  ;;  %4338 = vperm.xlu0 %20286, %v4193_v22   ;;  %v21951_v38 = vpop.permute.xlu1 %2597  ;;  %v2302_v34 = vadd.f32 %v2270_v20, %v1843_v41  ;;  %v3648_v22 = vadd.f32 %v3616_v28, %v3452_v51  ;;  %v20834_v41 = vld [vmem:[#allocation2 + $0xcf] sm:$0xff] }
 0x243   : > { %26282 = vst [vmem:[#allocation162_spill] sm:$0xff] %v21951_v38  ;;  %v20846_v18 = vld [vmem:[#allocation2 + $0xa8] sm:$0xff] }
 0x244   : > { %20396 = vset.pattern.permute.xlu1 %v26157_v33  ;;  %v2761_v0 = vadd.f32 %v2729_v9, %v2302_v34  ;;  %v26292_v34 = vld [vmem:[#allocation119_spill] sm:$0xff]  ;;  %v20866_v38 = vld [vmem:[#allocation2 + $0x149] sm:$0xff] }
 0x245   : > { %v21955_v43 = vpop.permute.xlu0 %3834  ;;  %3516 = vperm.xlu1 %20396, %v21691_v48  }
 0x246   : > { %26283 = vst [vmem:[#allocation163_spill] sm:$0xff] %v21955_v43  ;;  %4343 = vperm.xlu0 %20286, %v4194_v21   ;;  %v3220_v48 = vadd.f32 %v3188_v17, %v2761_v0  ;;  %v20835_v17 = vld [vmem:[#allocation2 + $0x48] sm:$0xff] }
 0x247   : > { %v4229_v50 = vpop.permute.xlu1 %4228  ;;  %v26345_v43 = vld [vmem:[#allocation8_spill] sm:$0xff] }
 0x248   : > { %v3680_v2 = vadd.f32 %v3648_v22, %v3220_v48  ;;  %v4370_v32 = vmul.f32 %v21897_v46, %v4229_v50  ;;  %v20836_v50 = vld [vmem:[#allocation2 + $0x29] sm:$0xff]  ;;  %v20291_v15 = vunpack.i.h.bf16 %v26345_v43 }
 0x249   : > { %v21967_v29 = vpop.permute.xlu0 %2032  ;;  %20397 = vset.pattern.permute.xlu1 %v26154_v19  ;;  %v22004_v22 = vld [vmem:[#allocation2 + $0xe7] sm:$0xff] }
 0x24a   : > { %26284 = vst [vmem:[#allocation164_spill] sm:$0xff] %v21967_v29  ;;  %20571 = vset.pattern.permute.xlu0 %v26157_v33  ;;  %1957 = vperm.xlu1 %20397, %v1880_v55   ;;  %v4139_v30 = vadd.f32 %v4107_v57, %v3680_v2  ;;  %v20842_v29 = vld [vmem:[#allocation2 + $0x8] sm:$0xff] }
 0x24b   : > { %20573 = vperm.xlu0 %20571, %v21102_v12   ;;  %v4813_v39 = vpack.c.bf16 %v20842_v29, %v20842_v29 }
 0x24c   : > { %v4419_v8 = vpop.permute.xlu1 %4418 }
 0x24d   : > { %v21974_v11 = vpop.permute.xlu0 %3844  ;;  %v4534_v62 = vmul.f32 %v21900_v59, %v4419_v8  ;;  %v20838_v8 = vld [vmem:[#allocation2 + $0x67] sm:$0xff]  ;;  %17707 = vmatprep.mubr.msk.bf16.mxu0 %vm4696_vm1, %v4813_v39 }
 0x24e   : > { %26285 = vst [vmem:[#allocation165_spill] sm:$0xff] %v21974_v11  ;;  %20398 = vset.pattern.permute.xlu1 %v26157_v33  ;;  %v26346_v11 = vld [vmem:[#allocation7_spill] sm:$0xff] }
 0x24f   : > { %20578 = vperm.xlu0 %20571, %v26286_v44   ;;  %v4566_v12 = vadd.f32 %v4534_v62, %v4370_v32  ;;  %2142 = vperm.xlu1 %20398, %v1880_v55   ;;  %v22020_v62 = vld [vmem:[#allocation2 + $0xef] sm:$0xff] }
 0x251   : > { %v21980_v26 = vpop.permute.xlu0 %2481  ;;  %v4598_v21 = vadd.f32 %v4566_v12, %v4139_v30  ;;  %v21982_v3 = vpop.permute.xlu1 %612  ;;  %v26302_v30 = vld [vmem:[#allocation4_spill] sm:$0xff]  ;;  %v3716_v12 = vld [vmem:[#allocation2 + $0xd0] sm:$0xff] }
 0x252   : > { %26287 = vst [vmem:[#allocation3_spill] sm:$0xff] %v21980_v26  ;;  %26288 = vst [vmem:[#allocation166_spill] sm:$0xff] %v21982_v3 }
 0x253   : > { %2561 = vperm.xlu0 %20571, %v20833_v6   ;;  %v4637_v47 = vadd.f32 %v21914_v37, %v4598_v21  ;;  %2146 = vperm.xlu1 %20398, %v20834_v41  }
 0x255   : > { %v21984_v20 = vpop.permute.xlu0 %4293  ;;  %v4669_v9 = vmax.f32 %v4637_v47, 0.0  ;;  %v20840_v47 = vld [vmem:[#allocation2 + $0x68] sm:$0xff] }
 0x256   : > { %26289 = vst [vmem:[#allocation167_spill] sm:$0xff] %v21984_v20  ;;  %v21987_v40 = vpop.permute.xlu1 %797 }
 0x257   : > { %1192 = vperm.xlu0 %20571, %v20833_v6   ;;  %26290 = vst [vmem:[#allocation168_spill] sm:$0xff] %v21987_v40  ;;  %20399 = vset.pattern.permute.xlu1 %v26154_v19  ;;  %4702 = vst.msk [vmem:[#allocation2 + $0x70] sm:$0xff] %vm4696_vm1, %v4669_v9 }
 0x258   : > { %3779 = vperm.xlu1 %20399, %v26292_v34  }
 0x259   : > { %v21989_v28 = vpop.permute.xlu0 %2491 }
 0x25a   : > { %26291 = vst [vmem:[#allocation169_spill] sm:$0xff] %v21989_v28  ;;  %v21994_v51 = vpop.permute.xlu1 %801 }
 0x25b   : > { %1200 = vperm.xlu0 %20571, %v20835_v17   ;;  %26293 = vst [vmem:[#allocation119_spill] sm:$0xff] %v21994_v51  ;;  %v1152_v51 = vmul.f32 %v20297_v60, %v21790_v54 }
 0x25c   : > { %20400 = vset.pattern.permute.xlu1 %v26157_v33 }
 0x25d   : > { %v21996_v45 = vpop.permute.xlu0 %4303  ;;  %3967 = vperm.xlu1 %20400, %v26292_v34   ;;  %v20841_v34 = vld [vmem:[#allocation2 + $0x87] sm:$0xff] }
 0x25e   : > { %26294 = vst [vmem:[#allocation170_spill] sm:$0xff] %v21996_v45  ;;  %v20856_v45 = vld [vmem:[#allocation2 + $0xe7] sm:$0xff] }
 0x25f   : > { %1651 = vperm.xlu0 %20571, %v20836_v50   ;;  %v22002_v0 = vpop.permute.xlu1 %1044 }
 0x260   : > { %26296 = vst [vmem:[#allocation172_spill] sm:$0xff] %v22002_v0 }
 0x261   : > { %v22000_v55 = vpop.permute.xlu0 %697  ;;  %20401 = vset.pattern.permute.xlu1 %v26154_v19 }
 0x262   : > { %26295 = vst [vmem:[#allocation171_spill] sm:$0xff] %v22000_v55  ;;  %1967 = vperm.xlu1 %20401, %v22004_v22  }
 0x263   : > { %3480 = vperm.xlu0 %20571, %v20837_v5   ;;  %v20629_v5 = vld [vmem:[%s26052_s3 + $0x10] sm:$0xff]  }
 0x264   : > { %v22010_v57 = vpop.permute.xlu1 %1228  ;;  %17703 = vmatprep.subr.bf16.mxu0 %v20629_v5 }
 0x265   : > { %v22008_v48 = vpop.permute.xlu0 %1119  ;;  %26298 = vst [vmem:[#allocation174_spill] sm:$0xff] %v22010_v57  ;;  %17704 = vmatpush3.bf16.msra.mxu0 %v20629_v5 }
 0x266   : > { %26297 = vst [vmem:[#allocation173_spill] sm:$0xff] %v22008_v48  ;;  %20402 = vset.pattern.permute.xlu1 %v26157_v33  ;;  %v20849_v48 = vld [vmem:[#allocation2 + $0xa9] sm:$0xff] }
 0x267   : > { %2118 = vperm.xlu0 %20571, %v20838_v8   ;;  %2150 = vperm.xlu1 %20402, %v22004_v22  }
 0x269   : > { %v22013_v2 = vpop.permute.xlu0 %2940  ;;  %v22016_v44 = vpop.permute.xlu1 %2855 }
 0x26a   : > { %26299 = vst [vmem:[#allocation175_spill] sm:$0xff] %v22013_v2  ;;  %26300 = vst [vmem:[#allocation176_spill] sm:$0xff] %v22016_v44  ;;  %v20843_v2 = vld [vmem:[#allocation2 + $0xd0] sm:$0xff]  ;;  %v26394_v44 = vld [vmem:[#allocation30_spill] sm:$0xff] }
 0x26b   : > { %2569 = vperm.xlu0 %20571, %v20835_v17   ;;  %2154 = vperm.xlu1 %20402, %v22020_v62  }
 0x26d   : > { %v22018_v32 = vpop.permute.xlu0 %702 }
 0x26e   : > { %26301 = vst [vmem:[#allocation177_spill] sm:$0xff] %v22018_v32  ;;  %v22024_v6 = vpop.permute.xlu1 %3044 }
 0x26f   : > { %4398 = vperm.xlu0 %20571, %v26302_v30   ;;  %26303 = vst [vmem:[#allocation4_spill] sm:$0xff] %v22024_v6  ;;  %20403 = vset.pattern.permute.xlu1 %v26154_v19  ;;  %v26308_v30 = vld [vmem:[#allocation5_spill] sm:$0xff] }
 0x270   : > { %3789 = vperm.xlu1 %20403, %v3716_v12   ;;  %v26398_v6 = vld [vmem:[#allocation85_spill] sm:$0xff] }
 0x271   : > { %v22026_v21 = vpop.permute.xlu0 %1134 }
 0x272   : > { %26304 = vst [vmem:[#allocation178_spill] sm:$0xff] %v22026_v21  ;;  %v22029_v41 = vpop.permute.xlu1 %3048  ;;  %v26309_v21 = vld [vmem:[#allocation134_spill] sm:$0xff] }
 0x273   : > { %1208 = vperm.xlu0 %20571, %v20840_v47  }
 0x274   : > { %20404 = vset.pattern.permute.xlu1 %v26157_v33 }
 0x275   : > { %v22031_v9 = vpop.permute.xlu0 %2945  ;;  %3975 = vperm.xlu1 %20404, %v3716_v12   ;;  %v20630_v12 = vld [vmem:[%s26052_s3 + $0x18] sm:$0xff]  }
 0x276   : > { %26305 = vst [vmem:[#allocation179_spill] sm:$0xff] %v22031_v9  ;;  %17705 = vmatprep.subr.bf16.mxu0 %v20630_v12  ;;  %v20851_v9 = vld [vmem:[#allocation2 + $0xc8] sm:$0xff] }
 0x277   : > { %789 = vperm.xlu0 %20571, %v20841_v34   ;;  %v22036_v50 = vpop.permute.xlu1 %627  ;;  %17706 = vmatpush3.bf16.msra.mxu0 %v20630_v12  ;;  %v20844_v12 = vld [vmem:[#allocation2 + $0x88] sm:$0xff] }
 0x278   : > { %26307 = vst [vmem:[#allocation181_spill] sm:$0xff] %v22036_v50 }
 0x279   : > { %v22034_v17 = vpop.permute.xlu0 %1583  ;;  %20405 = vset.pattern.permute.xlu1 %v26154_v19 }
 0x27a   : > { %26306 = vst [vmem:[#allocation180_spill] sm:$0xff] %v22034_v17  ;;  %2416 = vperm.xlu1 %20405, %v26309_v21  }
 0x27b   : > { %3036 = vperm.xlu0 %20571, %v26308_v30  }
 0x27c   : > { %v22046_v28 = vpop.permute.xlu1 %809 }
 0x27d   : > { %v22044_v55 = vpop.permute.xlu0 %3395  ;;  %26311 = vst [vmem:[#allocation134_spill] sm:$0xff] %v22046_v28 }
 0x27e   : > { %26310 = vst [vmem:[#allocation5_spill] sm:$0xff] %v22044_v55  ;;  %20406 = vset.pattern.permute.xlu1 %v26157_v33 }
 0x27f   : > { %3488 = vperm.xlu0 %20571, %v20838_v8   ;;  %2601 = vperm.xlu1 %20406, %v26309_v21   ;;  %v26317_v21 = vld [vmem:[#allocation139_spill] sm:$0xff] }
 0x281   : > { %v22052_v17 = vpop.permute.xlu0 %1593  ;;  %v22055_v32 = vpop.permute.xlu1 %1049 }
 0x282   : > { %26312 = vst [vmem:[#allocation182_spill] sm:$0xff] %v22052_v17  ;;  %26313 = vst [vmem:[#allocation183_spill] sm:$0xff] %v22055_v32  ;;  %v20845_v17 = vld [vmem:[#allocation2 + $0x89] sm:$0xff] }
 0x283   : > { %3496 = vperm.xlu0 %20571, %v20841_v34   ;;  %2605 = vperm.xlu1 %20406, %v20843_v2  }
 0x285   : > { %v22058_v5 = vpop.permute.xlu0 %3405 }
 0x286   : > { %26314 = vst [vmem:[#allocation184_spill] sm:$0xff] %v22058_v5  ;;  %v22060_v8 = vpop.permute.xlu1 %1232 }
 0x287   : > { %3947 = vperm.xlu0 %20571, %v20840_v47   ;;  %26315 = vst [vmem:[#allocation185_spill] sm:$0xff] %v22060_v8  ;;  %20407 = vset.pattern.permute.xlu1 %v26154_v19  ;;  %v2341_v47 = vld [vmem:[#allocation2 + $0xe8] sm:$0xff] }
 0x288   : > { %4238 = vperm.xlu1 %20407, %v26317_v21   ;;  %v20857_v8 = vld [vmem:[#allocation2 + $0x108] sm:$0xff] }
 0x289   : > { %v22062_v26 = vpop.permute.xlu0 %2042 }
 0x28a   : > { %26316 = vst [vmem:[#allocation186_spill] sm:$0xff] %v22062_v26  ;;  %v22066_v29 = vpop.permute.xlu1 %1236 }
 0x28b   : > { %3955 = vperm.xlu0 %20571, %v20844_v12   ;;  %26318 = vst [vmem:[#allocation139_spill] sm:$0xff] %v22066_v29 }
 0x28c   : > { %20408 = vset.pattern.permute.xlu1 %v26157_v33 }
 0x28d   : > { %v22068_v34 = vpop.permute.xlu0 %3854  ;;  %4426 = vperm.xlu1 %20408, %v26317_v21   ;;  %v20847_v21 = vld [vmem:[#allocation2 + $0xc7] sm:$0xff] }
 0x28e   : > { %26319 = vst [vmem:[#allocation187_spill] sm:$0xff] %v22068_v34  ;;  %v4175_v34 = vld [vmem:[#allocation2 + $0xd1] sm:$0xff] }
 0x28f   : > { %4406 = vperm.xlu0 %20571, %v26308_v30   ;;  %v22075_v2 = vpop.permute.xlu1 %2870 }
 0x290   : > { %26321 = vst [vmem:[#allocation189_spill] sm:$0xff] %v22075_v2  ;;  %v20865_v2 = vld [vmem:[#allocation2 + $0xf1] sm:$0xff] }
 0x291   : > { %v22073_v39 = vpop.permute.xlu0 %2052  ;;  %20409 = vset.pattern.permute.xlu1 %v26154_v19 }
 0x292   : > { %26320 = vst [vmem:[#allocation188_spill] sm:$0xff] %v22073_v39  ;;  %2426 = vperm.xlu1 %20409, %v2341_v47  }
 0x293   : > { %4414 = vperm.xlu0 %20571, %v20845_v17   ;;  %v20848_v17 = vld [vmem:[#allocation2 + $0xf0] sm:$0xff] }
 0x294   : > { %v22080_v26 = vpop.permute.xlu1 %3056 }
 0x295   : > { %v22078_v12 = vpop.permute.xlu0 %3864  ;;  %26323 = vst [vmem:[#allocation191_spill] sm:$0xff] %v22080_v26 }
 0x296   : > { %26322 = vst [vmem:[#allocation190_spill] sm:$0xff] %v22078_v12  ;;  %20410 = vset.pattern.permute.xlu1 %v26157_v33 }
 0x297   : > { %1224 = vperm.xlu0 %20571, %v20846_v18   ;;  %2609 = vperm.xlu1 %20410, %v2341_v47  }
 0x299   : > { %v22083_v30 = vpop.permute.xlu0 %2501  ;;  %v22085_v39 = vpop.permute.xlu1 %1498 }
 0x29a   : > { %26324 = vst [vmem:[#allocation192_spill] sm:$0xff] %v22083_v30  ;;  %26325 = vst [vmem:[#allocation193_spill] sm:$0xff] %v22085_v39  ;;  %v20850_v30 = vld [vmem:[#allocation2 + $0xa7] sm:$0xff]  ;;  %v26353_v39 = vld [vmem:[#allocation14_spill] sm:$0xff] }
 0x29b   : > { %805 = vperm.xlu0 %20571, %v20847_v21   ;;  %2613 = vperm.xlu1 %20410, %v20848_v17  }
 0x29d   : > { %v22087_v36 = vpop.permute.xlu0 %4313 }
 0x29e   : > { %26326 = vst [vmem:[#allocation194_spill] sm:$0xff] %v22087_v36  ;;  %v22089_v55 = vpop.permute.xlu1 %1683 }
 0x29f   : > { %3052 = vperm.xlu0 %20571, %v20849_v48   ;;  %26327 = vst [vmem:[#allocation195_spill] sm:$0xff] %v22089_v55  ;;  %20411 = vset.pattern.permute.xlu1 %v26154_v19  ;;  %v26356_v55 = vld [vmem:[#allocation36_spill] sm:$0xff] }
 0x2a0   : > { %4248 = vperm.xlu1 %20411, %v4175_v34  }
 0x2a1   : > { %v22091_v12 = vpop.permute.xlu0 %2511 }
 0x2a2   : > { %26328 = vst [vmem:[#allocation196_spill] sm:$0xff] %v22091_v12  ;;  %v22094_v47 = vpop.permute.xlu1 %1687 }
 0x2a3   : > { %3504 = vperm.xlu0 %20571, %v20850_v30   ;;  %26329 = vst [vmem:[#allocation197_spill] sm:$0xff] %v22094_v47  ;;  %v26349_v47 = vld [vmem:[#allocation9_spill] sm:$0xff] }
 0x2a4   : > { %20412 = vset.pattern.permute.xlu1 %v26157_v33  ;;  %v20309_v0 = vunpack.i.h.bf16 %v26349_v47 }
 0x2a5   : > { %v22096_v5 = vpop.permute.xlu0 %4323  ;;  %4434 = vperm.xlu1 %20412, %v4175_v34  }
 0x2a6   : > { %26330 = vst [vmem:[#allocation198_spill] sm:$0xff] %v22096_v5 }
 0x2a7   : > { %3512 = vperm.xlu0 %20571, %v20847_v21   ;;  %v22101_v36 = vpop.permute.xlu1 %3320  ;;  %v20852_v21 = vld [vmem:[#allocation2 + $0xc9] sm:$0xff] }
 0x2a9   : > { %v22099_v17 = vpop.permute.xlu0 %2960  ;;  %20413 = vset.pattern.permute.xlu1 %v26154_v19 }
 0x2aa   : > { %26331 = vst [vmem:[#allocation199_spill] sm:$0xff] %v22099_v17  ;;  %632 = vperm.xlu1 %20413, %v22004_v22   ;;  %v22118_v17 = vld [vmem:[#allocation2 + $0xf0] sm:$0xff] }
 0x2ab   : > { %3963 = vperm.xlu0 %20571, %v20846_v18   ;;  %26336 = vst [vmem:[#allocation204_spill] sm:$0xff] %v22118_v17 }
 0x2ac   : > { %v22107_v30 = vpop.permute.xlu1 %3508 }
 0x2ad   : > { %v22105_v12 = vpop.permute.xlu0 %2965 }
 0x2ae   : > { %26332 = vst [vmem:[#allocation200_spill] sm:$0xff] %v22105_v12  ;;  %20414 = vset.pattern.permute.xlu1 %v26157_v33 }
 0x2af   : > { %3971 = vperm.xlu0 %20571, %v20851_v9   ;;  %813 = vperm.xlu1 %20414, %v22004_v22   ;;  %v20853_v22 = vld [vmem:[#allocation2 + $0xe8] sm:$0xff] }
 0x2b1   : > { %v22110_v5 = vpop.permute.xlu0 %3420  ;;  %v22113_v34 = vpop.permute.xlu1 %1508 }
 0x2b2   : > { %26333 = vst [vmem:[#allocation201_spill] sm:$0xff] %v22110_v5  ;;  %26334 = vst [vmem:[#allocation202_spill] sm:$0xff] %v22113_v34 }
 0x2b3   : > { %4422 = vperm.xlu0 %20571, %v20849_v48   ;;  %817 = vperm.xlu1 %20414, %v22020_v62   ;;  %v20854_v62 = vld [vmem:[#allocation2 + $0x107] sm:$0xff] }
 0x2b5   : > { %v22115_v18 = vpop.permute.xlu0 %3425 }
 0x2b6   : > { %26335 = vst [vmem:[#allocation203_spill] sm:$0xff] %v22115_v18  ;;  %v22120_v12 = vpop.permute.xlu1 %1691 }
 0x2b7   : > { %4430 = vperm.xlu0 %20571, %v20852_v21   ;;  %26337 = vst [vmem:[#allocation205_spill] sm:$0xff] %v22120_v12  ;;  %20415 = vset.pattern.permute.xlu1 %v26154_v19  ;;  %v22158_v12 = vld [vmem:[#allocation2 + $0x10f] sm:$0xff] }
 0x2b8   : > { %1064 = vperm.xlu1 %20415, %v22118_v17   ;;  %26350 = vst [vmem:[#allocation7_spill] sm:$0xff] %v22158_v12 }
 0x2b9   : > { %v22122_v9 = vpop.permute.xlu0 %3879 }
 0x2ba   : > { %26338 = vst [vmem:[#allocation206_spill] sm:$0xff] %v22122_v9  ;;  %v22126_v48 = vpop.permute.xlu1 %1695  ;;  %v22136_v9 = vld [vmem:[#allocation2 + $0xe9] sm:$0xff] }
 0x2bb   : > { %1240 = vperm.xlu0 %20571, %v20853_v22   ;;  %26339 = vst [vmem:[#allocation207_spill] sm:$0xff] %v22126_v48  ;;  %v725_v48 = vmul.f32 %v20291_v15, %v21793_v23  ;;  %v20290_v15 = vunpack.i.l.bf16 %v26345_v43  ;;  %v20302_v43 = vunpack.i.l.bf16 %v26346_v11 }
 0x2bc   : > { %20416 = vset.pattern.permute.xlu1 %v26157_v33 }
 0x2bd   : > { %v22128_v5 = vpop.permute.xlu0 %3884  ;;  %1244 = vperm.xlu1 %20416, %v22118_v17   ;;  %v26358_v17 = vld [vmem:[#allocation16_spill] sm:$0xff] }
 0x2be   : > { %26340 = vst [vmem:[#allocation208_spill] sm:$0xff] %v22128_v5 }
 0x2bf   : > { %821 = vperm.xlu0 %20571, %v20854_v62   ;;  %v22134_v18 = vpop.permute.xlu1 %3330 }
 0x2c0   : > { %26342 = vst [vmem:[#allocation210_spill] sm:$0xff] %v22134_v18 }
 0x2c1   : > { %v22132_v21 = vpop.permute.xlu0 %4338  ;;  %20417 = vset.pattern.permute.xlu1 %v26154_v19 }
 0x2c2   : > { %26341 = vst [vmem:[#allocation209_spill] sm:$0xff] %v22132_v21  ;;  %2875 = vperm.xlu1 %20417, %v21889_v35   ;;  %v20303_v21 = vunpack.i.h.bf16 %v26346_v11  ;;  %v3152_v11 = vmul.f32 %v21851_v4, %v26356_v55 }
 0x2c3   : > { %3068 = vperm.xlu0 %20571, %v22136_v9  }
 0x2c4   : > { %v22143_v5 = vpop.permute.xlu1 %3516  ;;  %v1316_v29 = vmul.f32 %v20303_v21, %v21778_v42 }
 0x2c5   : > { %v22141_v20 = vpop.permute.xlu0 %4343  ;;  %26344 = vst [vmem:[#allocation212_spill] sm:$0xff] %v22143_v5 }
 0x2c6   : > { %26343 = vst [vmem:[#allocation211_spill] sm:$0xff] %v22141_v20  ;;  %20418 = vset.pattern.permute.xlu1 %v26157_v33 }
 0x2c7   : > { %3520 = vperm.xlu0 %20571, %v20856_v45   ;;  %3060 = vperm.xlu1 %20418, %v21889_v35  }
 0x2c9   : > { %v22151_v20 = vpop.permute.xlu1 %1957 }
 0x2ca   : > { %v20574_v50 = vpop.permute.xlu0 %20573  ;;  %26348 = vst [vmem:[#allocation8_spill] sm:$0xff] %v22151_v20  ;;  %v26351_v20 = vld [vmem:[#allocation10_spill] sm:$0xff] }
 0x2cb   : > { %v20576_v28 = vunpack.i.h.bf16 %v20574_v50  ;;  %3528 = vperm.xlu0 %20571, %v20854_v62   ;;  %3064 = vperm.xlu1 %20418, %v21923_v58   ;;  %v1348_v62 = vadd.f32 %v1316_v29, %v1152_v51  ;;  %v2070_v21 = vmul.f32 %v21816_v27, %v26351_v20  ;;  %v2234_v58 = vmul.f32 %v21819_v7, %v26353_v39  ;;  %v26354_v20 = vld [vmem:[#allocation18_spill] sm:$0xff] }
 0x2cc   : > { %v20575_v60 = vunpack.i.l.bf16 %v20574_v50  ;;  %v2693_v29 = vmul.f32 %v21829_v25, %v26354_v20  ;;  %v724_v50 = vmul.f32 %v20290_v15, %v21793_v23  ;;  %v20308_v39 = vunpack.i.l.bf16 %v26349_v47 }
 0x2cd   : > { %v889_v45 = vmul.f32 %v20576_v28, %v21799_v63  ;;  %v1611_v28 = vmul.f32 %v20309_v0, %v21804_v52  ;;  %v2266_v40 = vadd.f32 %v2234_v58, %v2070_v21  ;;  %v26360_v58 = vld [vmem:[#allocation25_spill] sm:$0xff] }
 0x2ce   : > { %v20579_v35 = vpop.permute.xlu0 %20578  ;;  %v22163_v32 = vpop.permute.xlu1 %2142  ;;  %v1610_v21 = vmul.f32 %v20308_v39, %v21804_v52  ;;  %v22207_v39 = vld [vmem:[#allocation2 + $0x108] sm:$0xff] }
 0x2cf   : > { %v921_v57 = vadd.f32 %v889_v45, %v725_v48  ;;  %v20581_v34 = vunpack.i.h.bf16 %v20579_v35  ;;  %3979 = vperm.xlu0 %20571, %v20853_v22   ;;  %26352 = vst [vmem:[#allocation6_spill] sm:$0xff] %v22163_v32  ;;  %20419 = vset.pattern.permute.xlu1 %v26154_v19  ;;  %v20296_v22 = vunpack.i.l.bf16 %v26347_v16  ;;  %v20580_v32 = vunpack.i.l.bf16 %v20579_v35  ;;  %26363 = vst [vmem:[#allocation10_spill] sm:$0xff] %v22207_v39 }
 0x2d0   : > { %647 = vperm.xlu1 %20419, %v22158_v12   ;;  %v888_v35 = vmul.f32 %v20575_v60, %v21799_v63  ;;  %v3907_v60 = vmul.f32 %v21881_v1, %v26360_v58 }
 0x2d1   : > { %v1775_v48 = vmul.f32 %v20581_v34, %v21785_v14  ;;  %v1380_v45 = vadd.f32 %v1348_v62, %v921_v57  ;;  %v26355_v34 = vld [vmem:[#allocation19_spill] sm:$0xff]  ;;  %v2529_v57 = vmul.f32 %v21844_v49, %v26358_v17  ;;  %v1774_v55 = vmul.f32 %v20580_v32, %v21785_v14 }
 0x2d2   : > { %v2562_v51 = vpop.permute.xlu0 %2561  ;;  %v2988_v16 = vmul.f32 %v21848_v24, %v26355_v34  ;;  %v22181_v3 = vpop.permute.xlu1 %2146  ;;  %v1151_v17 = vmul.f32 %v20296_v22, %v21790_v54  ;;  %v920_v32 = vadd.f32 %v888_v35, %v724_v50  ;;  %v26366_v35 = vld [vmem:[#allocation74_spill] sm:$0xff] }
 0x2d3   : > { %v1807_v0 = vadd.f32 %v1775_v48, %v1611_v28  ;;  %3987 = vperm.xlu0 %20571, %v20857_v8   ;;  %26357 = vst [vmem:[#allocation9_spill] sm:$0xff] %v22181_v3  ;;  %v1315_v8 = vmul.f32 %v20302_v43, %v21778_v42  ;;  %v2725_v47 = vadd.f32 %v2693_v29, %v2529_v57  ;;  %v26359_v28 = vld [vmem:[#allocation49_spill] sm:$0xff] }
 0x2d4   : > { %20420 = vset.pattern.permute.xlu1 %v26157_v33  ;;  %v3612_v48 = vmul.f32 %v21856_v31, %v26359_v28  ;;  %v3184_v43 = vadd.f32 %v3152_v11, %v2988_v16  ;;  %v26364_v28 = vld [vmem:[#allocation76_spill] sm:$0xff]  ;;  %v1806_v11 = vadd.f32 %v1774_v55, %v1610_v21  ;;  %v26368_v55 = vld [vmem:[#allocation11_spill] sm:$0xff] }
 0x2d5   : > { %v1839_v62 = vadd.f32 %v1807_v0, %v1380_v45  ;;  %825 = vperm.xlu1 %20420, %v22158_v12   ;;  %v26361_v45 = vld [vmem:[#allocation47_spill] sm:$0xff]  ;;  %v4530_v16 = vmul.f32 %v21900_v59, %v26364_v28  ;;  %v20858_v3 = vld [vmem:[#allocation2 + $0x109] sm:$0xff]  ;;  %v2069_v21 = vmul.f32 %v21816_v27, %v26368_v55 }
 0x2d6   : > { %v22187_v15 = vpop.permute.xlu0 %1192  ;;  %v3448_v29 = vmul.f32 %v21872_v61, %v26361_v45  ;;  %v26362_v0 = vld [vmem:[#allocation63_spill] sm:$0xff]  ;;  %v26365_v45 = vld [vmem:[#allocation13_spill] sm:$0xff]  ;;  %v20859_v28 = vld [vmem:[#allocation2 + $0x128] sm:$0xff] }
 0x2d7   : > { %v2298_v20 = vadd.f32 %v2266_v40, %v1839_v62  ;;  %4438 = vperm.xlu0 %20571, %v22136_v9   ;;  %v4071_v34 = vmul.f32 %v21876_v56, %v26362_v0  ;;  %v22203_v57 = vpop.permute.xlu1 %3779  ;;  %v1347_v9 = vadd.f32 %v1315_v8, %v1151_v17  ;;  %v2233_v0 = vmul.f32 %v21819_v7, %v26365_v45  ;;  %v22238_v55 = vld [vmem:[#allocation2 + $0x110] sm:$0xff] }
 0x2d8   : > { %v3644_v62 = vadd.f32 %v3612_v48, %v3448_v29  ;;  %v4366_v8 = vmul.f32 %v21897_v46, %v26366_v35  ;;  %v26367_v48 = vld [vmem:[#allocation12_spill] sm:$0xff]  ;;  %26372 = vst [vmem:[#allocation18_spill] sm:$0xff] %v22238_v55 }
 0x2d9   : > { %v2757_v40 = vadd.f32 %v2725_v47, %v2298_v20  ;;  %20421 = vset.pattern.permute.xlu1 %v26154_v19  ;;  %v4103_v50 = vadd.f32 %v4071_v34, %v3907_v60  ;;  %v1379_v47 = vadd.f32 %v1347_v9, %v920_v32  ;;  %v2528_v17 = vmul.f32 %v21844_v49, %v26367_v48  ;;  %v20860_v48 = vld [vmem:[#allocation2 + $0x147] sm:$0xff] }
 0x2da   : > { %v22205_v22 = vpop.permute.xlu0 %1200  ;;  %1069 = vperm.xlu1 %20421, %v22207_v39   ;;  %v4562_v29 = vadd.f32 %v4530_v16, %v4366_v8  ;;  %v2692_v34 = vmul.f32 %v21829_v25, %v2562_v51  ;;  %v2265_v32 = vadd.f32 %v2233_v0, %v2069_v21 }
 0x2db   : > { %v3216_v58 = vadd.f32 %v3184_v43, %v2757_v40  ;;  %4446 = vperm.xlu0 %20571, %v20858_v3   ;;  %v1838_v40 = vadd.f32 %v1806_v11, %v1379_v47  ;;  %v26370_v11 = vld [vmem:[#allocation23_spill] sm:$0xff] }
 0x2dc   : > { %v22223_v43 = vpop.permute.xlu1 %3967  ;;  %v2724_v35 = vadd.f32 %v2692_v34, %v2528_v17  ;;  %v3447_v51 = vmul.f32 %v21872_v61, %v26370_v11  ;;  %v26373_v17 = vld [vmem:[#allocation32_spill] sm:$0xff]  ;;  %v22246_v34 = vld [vmem:[#allocation2 + $0xf1] sm:$0xff] }
 0x2dd   : > { %v3676_v20 = vadd.f32 %v3644_v62, %v3216_v58  ;;  %v2297_v45 = vadd.f32 %v2265_v32, %v1838_v40  ;;  %v2987_v21 = vmul.f32 %v21848_v24, %v26373_v17  ;;  %v20862_v40 = vld [vmem:[#allocation2 + $0x129] sm:$0xff]  ;;  %26375 = vst [vmem:[#allocation36_spill] sm:$0xff] %v22246_v34 }
 0x2de   : > { %v22221_v3 = vpop.permute.xlu0 %1651  ;;  %20422 = vset.pattern.permute.xlu1 %v26157_v33  ;;  %v20863_v17 = vld [vmem:[#allocation2 + $0x127] sm:$0xff] }
 0x2df   : > { %v4135_v60 = vadd.f32 %v4103_v50, %v3676_v20  ;;  %1256 = vperm.xlu0 %20571, %v20859_v28   ;;  %1248 = vperm.xlu1 %20422, %v22207_v39   ;;  %v26371_v50 = vld [vmem:[#allocation34_spill] sm:$0xff] }
 0x2e0   : > { %v3151_v0 = vmul.f32 %v21851_v4, %v26371_v50 }
 0x2e1   : > { %v4594_v9 = vadd.f32 %v4562_v29, %v4135_v60  ;;  %v22229_v16 = vpop.permute.xlu1 %1967  ;;  %v2756_v29 = vadd.f32 %v2724_v35, %v2297_v45  ;;  %v26378_v35 = vld [vmem:[#allocation29_spill] sm:$0xff] }
 0x2e2   : > { %v3481_v62 = vpop.permute.xlu0 %3480  ;;  %26369 = vst [vmem:[#allocation14_spill] sm:$0xff] %v22229_v16  ;;  %v3183_v32 = vadd.f32 %v3151_v0, %v2987_v21  ;;  %v26391_v16 = vld [vmem:[#allocation26_spill] sm:$0xff] }
 0x2e3   : > { %v4633_v58 = vadd.f32 %v21914_v37, %v4594_v9  ;;  %837 = vperm.xlu0 %20571, %v20860_v48   ;;  %v3611_v47 = vmul.f32 %v21856_v31, %v3481_v62  ;;  %1252 = vperm.xlu1 %20422, %v22238_v55   ;;  %v26379_v55 = vld [vmem:[#allocation59_spill] sm:$0xff] }
 0x2e4   : > { %v3215_v50 = vadd.f32 %v3183_v32, %v2756_v29 }
 0x2e5   : > { %v4665_v8 = vmax.f32 %v4633_v58, 0.0  ;;  %v3643_v9 = vadd.f32 %v3611_v47, %v3447_v51  ;;  %v26376_v58 = vld [vmem:[#allocation61_spill] sm:$0xff]  ;;  %v3906_v51 = vmul.f32 %v21881_v1, %v26379_v55 }
 0x2e6   : > { %v22236_v20 = vpop.permute.xlu0 %2118  ;;  %v22244_v60 = vpop.permute.xlu1 %2150  ;;  %v4070_v11 = vmul.f32 %v21876_v56, %v26376_v58 }
 0x2e7   : > { %3084 = vperm.xlu0 %20571, %v20862_v40   ;;  %4698 = vst.msk [vmem:[#allocation2 + $0x30] sm:$0xff] %vm4696_vm1, %v4665_v8  ;;  %26374 = vst [vmem:[#allocation19_spill] sm:$0xff] %v22244_v60  ;;  %20423 = vset.pattern.permute.xlu1 %v26154_v19  ;;  %v4365_v8 = vmul.f32 %v21897_v46, %v26378_v35  ;;  %v3675_v0 = vadd.f32 %v3643_v9, %v3215_v50  ;;  %v1425_v35 = vld [vmem:[#allocation2 + $0xe9] sm:$0xff]  ;;  %v26382_v9 = vld [vmem:[#allocation22_spill] sm:$0xff] }
 0x2e8   : > { %2890 = vperm.xlu1 %20423, %v22246_v34   ;;  %v4102_v21 = vadd.f32 %v4070_v11, %v3906_v51  ;;  %v26385_v51 = vld [vmem:[#allocation15_spill] sm:$0xff] }
 0x2e9   : > { %v26392_v60 = vld [vmem:[#allocation87_spill] sm:$0xff] }
 0x2ea   : > { %v22248_v62 = vpop.permute.xlu0 %2569  ;;  %v22254_v45 = vpop.permute.xlu1 %2154  ;;  %v4134_v29 = vadd.f32 %v4102_v21, %v3675_v0  ;;  %v1153_v0 = vmul.f32 %v21790_v54, %v26385_v51  ;;  %v26387_v21 = vld [vmem:[#allocation17_spill] sm:$0xff]  ;;  %v26390_v51 = vld [vmem:[#allocation24_spill] sm:$0xff] }
 0x2eb   : > { %3536 = vperm.xlu0 %20571, %v20863_v17   ;;  %26377 = vst [vmem:[#allocation16_spill] sm:$0xff] %v22254_v45 }
 0x2ec   : > { %20424 = vset.pattern.permute.xlu1 %v26157_v33 }
 0x2ed   : > { %3072 = vperm.xlu1 %20424, %v22246_v34  }
 0x2ee   : > { %v4399_v47 = vpop.permute.xlu0 %4398 }
 0x2ef   : > { %v4529_v39 = vmul.f32 %v21900_v59, %v4399_v47  ;;  %3544 = vperm.xlu0 %20571, %v20860_v48   ;;  %v22263_v58 = vpop.permute.xlu1 %3789  ;;  %v890_v48 = vmul.f32 %v21799_v63, %v26382_v9  ;;  %v26386_v47 = vld [vmem:[#allocation20_spill] sm:$0xff] }
 0x2f0   : > { %26380 = vst [vmem:[#allocation49_spill] sm:$0xff] %v22263_v58  ;;  %v26389_v9 = vld [vmem:[#allocation28_spill] sm:$0xff] }
 0x2f1   : > { %v4561_v32 = vadd.f32 %v4529_v39, %v4365_v8  ;;  %20425 = vset.pattern.permute.xlu1 %v26154_v19  ;;  %v20864_v8 = vld [vmem:[#allocation2 + $0x148] sm:$0xff]  ;;  %v892_v34 = vmul.f32 %v21799_v63, %v26389_v9  ;;  %v26393_v9 = vld [vmem:[#allocation27_spill] sm:$0xff] }
 0x2f2   : > { %v22265_v17 = vpop.permute.xlu0 %1208  ;;  %1518 = vperm.xlu1 %20425, %v1425_v35   ;;  %v26399_v58 = vld [vmem:[#allocation112_spill] sm:$0xff] }
 0x2f3   : > { %26381 = vst [vmem:[#allocation25_spill] sm:$0xff] %v22265_v17  ;;  %v4593_v45 = vadd.f32 %v4561_v32, %v4134_v29  ;;  %3995 = vperm.xlu0 %20571, %v20859_v28   ;;  %v726_v28 = vmul.f32 %v21793_v23, %v26386_v47  ;;  %v26388_v29 = vld [vmem:[#allocation21_spill] sm:$0xff]  ;;  %v22291_v47 = vmul.f32 %v21816_v27, %v26390_v51 }
 0x2f4   : > { %v22273_v50 = vpop.permute.xlu1 %3975  ;;  %v1612_v32 = vmul.f32 %v21804_v52, %v26388_v29  ;;  %v1322_v29 = vmul.f32 %v21778_v42, %v26392_v60  ;;  %v1776_v51 = vmul.f32 %v21785_v14, %v22221_v3  ;;  %v895_v60 = vmul.f32 %v21799_v63, %v26397_v13  ;;  %v26401_v3 = vld [vmem:[#allocation39_spill] sm:$0xff]  ;;  %v26402_v13 = vld [vmem:[#allocation42_spill] sm:$0xff] }
 0x2f5   : > { %v4632_v55 = vadd.f32 %v21914_v37, %v4593_v45  ;;  %26384 = vst [vmem:[#allocation63_spill] sm:$0xff] %v22273_v50  ;;  %v1155_v45 = vmul.f32 %v21790_v54, %v26387_v21  ;;  %v728_v21 = vmul.f32 %v21793_v23, %v26391_v16  ;;  %v22327_v5 = vmul.f32 %v21872_v61, %v26402_v13 }
 0x2f6   : > { %v22271_v11 = vpop.permute.xlu0 %789  ;;  %20426 = vset.pattern.permute.xlu1 %v26157_v33  ;;  %v1808_v26 = vadd.f32 %v1776_v51, %v1612_v32  ;;  %v3259_v51 = vld [vmem:[#allocation2 + $0xef] sm:$0xff] }
 0x2f7   : > { %26383 = vst [vmem:[#allocation47_spill] sm:$0xff] %v22271_v11  ;;  %v4664_v39 = vmax.f32 %v4632_v55, 0.0  ;;  %4003 = vperm.xlu0 %20571, %v20864_v8   ;;  %v1317_v55 = vmul.f32 %v21778_v42, %v22187_v15  ;;  %v922_v8 = vadd.f32 %v890_v48, %v726_v28  ;;  %1699 = vperm.xlu1 %20426, %v1425_v35   ;;  %v26395_v48 = vld [vmem:[#allocation38_spill] sm:$0xff]  ;;  %v26404_v11 = vld [vmem:[#allocation43_spill] sm:$0xff] }
 0x2f8   : > { %v2530_v15 = vmul.f32 %v21844_v49, %v26393_v9  ;;  %v1617_v28 = vmul.f32 %v21804_v52, %v26395_v48  ;;  %v1158_v35 = vmul.f32 %v21790_v54, %v26398_v6  ;;  %v1781_v9 = vmul.f32 %v21785_v14, %v26399_v58  ;;  %v26400_v48 = vld [vmem:[#allocation37_spill] sm:$0xff] }
 0x2f9   : > { %4697 = vst.msk [vmem:[#allocation2 + $0x28] sm:$0xff] %vm4696_vm1, %v4664_v39  ;;  %v731_v39 = vmul.f32 %v21793_v23, %v26394_v44  ;;  %v22307_v16 = vpop.permute.xlu1 %2416  ;;  %v1319_v44 = vmul.f32 %v21778_v42, %v22205_v22  ;;  %v924_v50 = vadd.f32 %v892_v34, %v728_v21  ;;  %v22319_v18 = vmul.f32 %v21848_v24, %v26400_v48  ;;  %v26403_v6 = vld [vmem:[#allocation41_spill] sm:$0xff]  ;;  %v26405_v48 = vld [vmem:[#allocation44_spill] sm:$0xff] }
 0x2fa   : > { %v22297_v10 = vpop.permute.xlu0 %3036  ;;  %26396 = vst [vmem:[#allocation76_spill] sm:$0xff] %v22307_v16  ;;  %v1349_v16 = vadd.f32 %v1317_v55, %v1153_v0  ;;  %v1614_v58 = vmul.f32 %v21804_v52, %v26403_v6  ;;  %v1778_v22 = vmul.f32 %v21785_v14, %v26404_v11  ;;  %v1354_v34 = vadd.f32 %v1322_v29, %v1158_v35  ;;  %v26407_v55 = vld [vmem:[#allocation131_spill] sm:$0xff]  ;;  %v26408_v6 = vld [vmem:[#allocation53_spill] sm:$0xff] }
 0x2fb   : > { %4454 = vperm.xlu0 %20571, %v20862_v40   ;;  %v22323_v40 = vmul.f32 %v21872_v61, %v26401_v3  ;;  %1703 = vperm.xlu1 %20426, %v20865_v2   ;;  %v2076_v12 = vmul.f32 %v21816_v27, %v26405_v48  ;;  %v26406_v3 = vld [vmem:[#allocation50_spill] sm:$0xff]  ;;  %v2240_v13 = vmul.f32 %v21819_v7, %v26407_v55  ;;  %v4784_v2 = vld [vmem:[#allocation2 + $0x30] sm:$0xff] }
 0x2fc   : > { %v2535_v0 = vmul.f32 %v21844_v49, %v26406_v3  ;;  %v2235_v17 = vmul.f32 %v21819_v7, %v26408_v6  ;;  %v927_v11 = vadd.f32 %v895_v60, %v731_v39  ;;  %v1813_v29 = vadd.f32 %v1781_v9, %v1617_v28  ;;  %v26410_v6 = vld [vmem:[#allocation58_spill] sm:$0xff] }
 0x2fd   : > { %v1351_v35 = vadd.f32 %v1319_v44, %v1155_v45  ;;  %v2699_v48 = vmul.f32 %v21829_v25, %v21858_v53  ;;  %v1381_v3 = vadd.f32 %v1349_v16, %v922_v8  ;;  %v2694_v55 = vmul.f32 %v21829_v25, %v22248_v62  ;;  %v26411_v16 = vld [vmem:[#allocation45_spill] sm:$0xff] }
 0x2fe   : > { %v3489_v21 = vpop.permute.xlu0 %3488  ;;  %v22341_v14 = vpop.permute.xlu1 %2601  ;;  %v2994_v39 = vmul.f32 %v21848_v24, %v26410_v6  ;;  %v1386_v45 = vadd.f32 %v1354_v34, %v927_v11  ;;  %v2237_v28 = vmul.f32 %v21819_v7, %v22236_v20  ;;  %v2272_v53 = vadd.f32 %v2240_v13, %v2076_v12  ;;  %v26412_v12 = vld [vmem:[#allocation68_spill] sm:$0xff]  ;;  %v26414_v6 = vld [vmem:[#allocation91_spill] sm:$0xff] }
 0x2ff   : > { %4462 = vperm.xlu0 %20571, %v20866_v38   ;;  %v26409_v38 = vld [vmem:[#allocation51_spill] sm:$0xff]  ;;  %20427 = vset.pattern.permute.xlu1 %v26154_v19  ;;  %v3158_v8 = vmul.f32 %v21851_v4, %v22029_v41  ;;  %v1840_v62 = vadd.f32 %v1808_v26, %v1381_v3  ;;  %v3908_v9 = vmul.f32 %v21881_v1, %v26411_v16  ;;  %v26413_v3 = vld [vmem:[#allocation70_spill] sm:$0xff] }
 0x300   : > { %v4783_v23 = vld [vmem:[#allocation2 + $0x28] sm:$0xff]  ;;  %v2071_v63 = vmul.f32 %v21816_v27, %v26409_v38  ;;  %v1810_v44 = vadd.f32 %v1778_v22, %v1614_v58  ;;  %v1383_v20 = vadd.f32 %v1351_v35, %v924_v50  ;;  %3340 = vperm.xlu1 %20427, %v3259_v51   ;;  %v2532_v13 = vmul.f32 %v21844_v49, %v26412_v12 }
 0x301   : > { %v4814_v32 = vpack.c.bf16 %v4784_v2, %v4783_v23  ;;  %v22356_v23 = vld [vmem:[#allocation2 + $0x168] sm:$0xff]  ;;  %v1845_v41 = vadd.f32 %v1813_v29, %v1386_v45  ;;  %v2731_v26 = vadd.f32 %v2699_v48, %v2535_v0  ;;  %v2726_v2 = vadd.f32 %v2694_v55, %v2530_v15 }
 0x302   : > { %v3497_v60 = vpop.permute.xlu0 %3496  ;;  %v2267_v34 = vadd.f32 %v2235_v17, %v2071_v63  ;;  %v22362_v11 = vpop.permute.xlu1 %2605  ;;  %v2696_v38 = vmul.f32 %v21829_v25, %v26413_v3  ;;  %v3618_v58 = vmul.f32 %v21856_v31, %v22107_v30  ;;  %v2269_v63 = vadd.f32 %v2237_v28, %v22291_v47  ;;  %v20868_v29 = vld [vmem:[#allocation2 + $0x187] sm:$0xff]  ;;  %v26415_v47 = vld [vmem:[#allocation89_spill] sm:$0xff] }
 0x303   : > { %1272 = vperm.xlu0 %20571, %v22356_v23   ;;  %17708 = vmatmul.mubr.msk.bf16.vlgmr.msra.gmra.mrb[0].mxu0 %vm4696_vm1, %v4814_v32  ;;  %v3153_v32 = vmul.f32 %v21851_v4, %v26414_v6  ;;  %v2304_v50 = vadd.f32 %v2272_v53, %v1845_v41  ;;  %v3190_v22 = vadd.f32 %v3158_v8, %v2994_v39  ;;  %v22390_v12 = vld [vmem:[#allocation2 + $0x169] sm:$0xff] }
 0x304   : > { %v2299_v35 = vadd.f32 %v2267_v34, %v1840_v62  ;;  %v3613_v16 = vmul.f32 %v21856_v31, %v3489_v21  ;;  %v3454_v15 = vmul.f32 %v21872_v61, %v22101_v36  ;;  %v1842_v0 = vadd.f32 %v1810_v44, %v1383_v20  ;;  %20428 = vset.pattern.permute.xlu1 %v26157_v33  ;;  %v26417_v3 = vld [vmem:[#allocation52_spill] sm:$0xff] }
 0x305   : > { %v4077_v48 = vmul.f32 %v21876_v56, %v22223_v43  ;;  %v3155_v30 = vmul.f32 %v21851_v4, %v22297_v10  ;;  %v2989_v55 = vmul.f32 %v21848_v24, %v26415_v47  ;;  %v2763_v39 = vadd.f32 %v2731_v26, %v2304_v50  ;;  %3524 = vperm.xlu1 %20428, %v3259_v51   ;;  %v26416_v10 = vld [vmem:[#allocation48_spill] sm:$0xff] }
 0x306   : > { %v3948_v17 = vpop.permute.xlu0 %3947  ;;  %v2758_v45 = vadd.f32 %v2726_v2, %v2299_v35  ;;  %v3650_v53 = vadd.f32 %v3618_v58, %v3454_v15  ;;  %v3913_v36 = vmul.f32 %v21881_v1, %v22203_v57  ;;  %v2301_v8 = vadd.f32 %v2269_v63, %v1842_v0  ;;  %v22393_v51 = vld [vmem:[#allocation2 + $0x109] sm:$0xff] }
 0x307   : > { %853 = vperm.xlu0 %20571, %v20868_v29   ;;  %v4072_v21 = vmul.f32 %v21876_v56, %v3948_v17  ;;  %v4239_v28 = vpop.permute.xlu1 %4238  ;;  %v3615_v43 = vmul.f32 %v21856_v31, %v3497_v60  ;;  %v3910_v44 = vmul.f32 %v21881_v1, %v26416_v10  ;;  %v3185_v34 = vadd.f32 %v3153_v32, %v2989_v55 }
 0x308   : > { %v3645_v20 = vadd.f32 %v3613_v16, %v22323_v40  ;;  %v2728_v41 = vadd.f32 %v2696_v38, %v2532_v13  ;;  %v3222_v26 = vadd.f32 %v3190_v22, %v2763_v39  ;;  %v4109_v2 = vadd.f32 %v4077_v48, %v3913_v36  ;;  %v20870_v22 = vld [vmem:[#allocation2 + $0x167] sm:$0xff] }
 0x309   : > { %v3187_v57 = vadd.f32 %v3155_v30, %v22319_v18  ;;  %v4367_v60 = vmul.f32 %v21897_v46, %v26417_v3  ;;  %v3217_v6 = vadd.f32 %v3185_v34, %v2758_v45  ;;  %v4104_v58 = vadd.f32 %v4072_v21, %v3908_v9  ;;  %20429 = vset.pattern.permute.xlu1 %v26154_v19  ;;  %v26418_v16 = vld [vmem:[#allocation55_spill] sm:$0xff] }
 0x30a   : > { %v3956_v62 = vpop.permute.xlu0 %3955  ;;  %v3682_v40 = vadd.f32 %v3650_v53, %v3222_v26  ;;  %v2760_v63 = vadd.f32 %v2728_v41, %v2301_v8  ;;  %v3647_v17 = vadd.f32 %v3615_v43, %v22327_v5  ;;  %1528 = vperm.xlu1 %20429, %v22393_v51   ;;  %v4372_v35 = vmul.f32 %v21897_v46, %v4239_v28  ;;  %v26419_v8 = vld [vmem:[#allocation35_spill] sm:$0xff]  ;;  %v26421_v26 = vld [vmem:[#allocation40_spill] sm:$0xff] }
 0x30b   : > { %3100 = vperm.xlu0 %20571, %v22390_v12   ;;  %v4074_v32 = vmul.f32 %v21876_v56, %v3956_v62  ;;  %v3677_v38 = vadd.f32 %v3645_v20, %v3217_v6  ;;  %v4369_v15 = vmul.f32 %v21897_v46, %v26418_v16  ;;  %v1160_v43 = vmul.f32 %v21790_v54, %v26419_v8  ;;  %v26420_v62 = vld [vmem:[#allocation103_spill] sm:$0xff] }
 0x30c   : > { %v4427_v13 = vpop.permute.xlu1 %4426  ;;  %v4141_v0 = vadd.f32 %v4109_v2, %v3682_v40  ;;  %v3219_v48 = vadd.f32 %v3187_v57, %v2760_v63  ;;  %v1324_v10 = vmul.f32 %v21778_v42, %v26420_v62  ;;  %v26422_v2 = vld [vmem:[#allocation97_spill] sm:$0xff]  ;;  %v26423_v57 = vld [vmem:[#allocation150_spill] sm:$0xff]  ;;  %v26425_v6 = vld [vmem:[#allocation147_spill] sm:$0xff] }
 0x30d   : > { %v4536_v9 = vmul.f32 %v21900_v59, %v4427_v13  ;;  %v4136_v30 = vadd.f32 %v4104_v58, %v3677_v38  ;;  %v4106_v5 = vadd.f32 %v4074_v32, %v3910_v44  ;;  %v897_v3 = vmul.f32 %v26423_v57, %v26422_v2  ;;  %v26427_v38 = vld [vmem:[#allocation95_spill] sm:$0xff] }
 0x30e   : > { %v4407_v50 = vpop.permute.xlu0 %4406  ;;  %v3679_v39 = vadd.f32 %v3647_v17, %v3219_v48  ;;  %20430 = vset.pattern.permute.xlu1 %v26157_v33 }
 0x30f   : > { %v4531_v18 = vmul.f32 %v21900_v59, %v4407_v50  ;;  %3552 = vperm.xlu0 %20571, %v20870_v22   ;;  %v4568_v55 = vadd.f32 %v4536_v9, %v4372_v35  ;;  %1707 = vperm.xlu1 %20430, %v22393_v51   ;;  %v22427_v50 = vld [vmem:[#allocation2 + $0x111] sm:$0xff]  ;;  %v1356_v35 = vadd.f32 %v1324_v10, %v1160_v43 }
 0x310   : > { %v4138_v44 = vadd.f32 %v4106_v5, %v3679_v39  ;;  %v26429_v9 = vld [vmem:[#allocation142_spill] sm:$0xff]  ;;  %v22446_v5 = vld [vmem:[%s26051_s2] ss:$0 sm:$0xff] }
 0x311   : > { %v4563_v47 = vadd.f32 %v4531_v18, %v4367_v60  ;;  %v4600_v28 = vadd.f32 %v4568_v55, %v4141_v0  ;;  %v22410_v36 = vpop.permute.xlu1 %2426  ;;  %v26424_v60 = vld [vmem:[#allocation122_spill] sm:$0xff]  ;;  %v26428_v18 = vld [vmem:[#allocation149_spill] sm:$0xff]  ;;  %v2242_v16 = vmul.f32 %v21819_v7, %v26429_v9  ;;  %v26430_v0 = vld [vmem:[#allocation31_spill] sm:$0xff] }
 0x312   : > { %v4415_v45 = vpop.permute.xlu0 %4414  ;;  %v1783_v58 = vmul.f32 %v26425_v6, %v26424_v60  ;;  %v733_v22 = vmul.f32 %v26428_v18, %v26427_v38  ;;  %v1157_v48 = vmul.f32 %v21790_v54, %v26430_v0  ;;  %v26434_v43 = vld [vmem:[#allocation162_spill] sm:$0xff]  ;;  %v26440_v38 = vld [vmem:[#allocation189_spill] sm:$0xff] }
 0x313   : > { %v4595_v21 = vadd.f32 %v4563_v47, %v4136_v30  ;;  %v4533_v53 = vmul.f32 %v21900_v59, %v4415_v45  ;;  %3560 = vperm.xlu0 %20571, %v20868_v29   ;;  %v4639_v41 = vadd.f32 %v21914_v37, %v4600_v28  ;;  %v1619_v29 = vmul.f32 %v21804_v52, %v26421_v26  ;;  %v26433_v28 = vld [vmem:[#allocation80_spill] sm:$0xff] }
 0x314   : > { %1711 = vperm.xlu1 %20430, %v22427_v50   ;;  %v929_v55 = vadd.f32 %v897_v3, %v733_v22  ;;  %v894_v8 = vmul.f32 %v26423_v57, %v26433_v28  ;;  %v2701_v62 = vmul.f32 %v21829_v25, %v26434_v43  ;;  %v26437_v3 = vld [vmem:[#allocation33_spill] sm:$0xff]  ;;  %v2996_v22 = vmul.f32 %v21848_v24, %v26440_v38 }
 0x315   : > { %v4634_v34 = vadd.f32 %v21914_v37, %v4595_v21  ;;  %v4565_v20 = vadd.f32 %v4533_v53, %v4369_v15  ;;  %v4671_v17 = vmax.f32 %v4639_v41, 0.0  ;;  %v26426_v37 = vld [vmem:[#allocation46_spill] sm:$0xff]  ;;  %v1815_v39 = vadd.f32 %v1783_v58, %v1619_v29  ;;  %v26435_v41 = vld [vmem:[#allocation191_spill] sm:$0xff] }
 0x316   : > { %v22424_v32 = vpop.permute.xlu0 %1224  ;;  %v2078_v13 = vmul.f32 %v21816_v27, %v26426_v37  ;;  %v22436_v15 = vpop.permute.xlu1 %2609  ;;  %v26432_v21 = vld [vmem:[#allocation54_spill] sm:$0xff]  ;;  %v3160_v26 = vmul.f32 %v21851_v4, %v26435_v41  ;;  %v26436_v29 = vld [vmem:[#allocation7_spill] sm:$0xff]  ;;  %v732_v60 = vmul.f32 %v26428_v18, %v26437_v3 }
 0x317   : > { %v4666_v40 = vmax.f32 %v4634_v34, 0.0  ;;  %v4597_v63 = vadd.f32 %v4565_v20, %v4138_v44  ;;  %4011 = vperm.xlu0 %20571, %v22356_v23   ;;  %v26431_v23 = vld [vmem:[#allocation25_spill] sm:$0xff]  ;;  %4704 = vst.msk [vmem:[#allocation2 + $0x90] sm:$0xff] %vm4696_vm1, %v4671_v17  ;;  %v2537_v53 = vmul.f32 %v21844_v49, %v26432_v21  ;;  %v20873_v44 = vld [vmem:[#allocation2 + $0x188] sm:$0xff]  ;;  %v1388_v34 = vadd.f32 %v1356_v35, %v929_v55  ;;  %v26438_v58 = vld [vmem:[#allocation78_spill] sm:$0xff] }
 0x318   : > { %v1321_v30 = vmul.f32 %v21778_v42, %v26431_v23  ;;  %20431 = vset.pattern.permute.xlu1 %v26154_v19  ;;  %v2274_v20 = vadd.f32 %v2242_v16, %v2078_v13  ;;  %v26439_v17 = vld [vmem:[#allocation110_spill] sm:$0xff]  ;;  %v26441_v35 = vld [vmem:[#allocation47_spill] sm:$0xff]  ;;  %v26444_v21 = vld [vmem:[#allocation108_spill] sm:$0xff]  ;;  %v3192_v43 = vadd.f32 %v3160_v26, %v2996_v22 }
 0x319   : > { %4699 = vst.msk [vmem:[#allocation2 + $0x48] sm:$0xff] %vm4696_vm1, %v4666_v40  ;;  %v4636_v47 = vadd.f32 %v22446_v5, %v4597_v63  ;;  %3350 = vperm.xlu1 %20431, %v26436_v29   ;;  %v730_v40 = vmul.f32 %v26428_v18, %v26438_v58  ;;  %v1780_v37 = vmul.f32 %v26425_v6, %v26439_v17  ;;  %v26447_v58 = vld [vmem:[#allocation99_spill] sm:$0xff]  ;;  %v26448_v26 = vld [vmem:[#allocation129_spill] sm:$0xff] }
 0x31a   : > { %v22450_v45 = vpop.permute.xlu0 %805  ;;  %v22462_v2 = vpop.permute.xlu1 %2613  ;;  %v1353_v63 = vadd.f32 %v1321_v30, %v1157_v48  ;;  %v1847_v13 = vadd.f32 %v1815_v39, %v1388_v34  ;;  %v896_v9 = vmul.f32 %v26423_v57, %v26441_v35  ;;  %v2733_v23 = vadd.f32 %v2701_v62, %v2537_v53  ;;  %v26443_v48 = vld [vmem:[#allocation101_spill] sm:$0xff]  ;;  %v26445_v34 = vld [vmem:[#allocation210_spill] sm:$0xff]  ;;  %v26446_v62 = vld [vmem:[#allocation63_spill] sm:$0xff] }
 0x31b   : > { %v4668_v10 = vmax.f32 %v4636_v47, 0.0  ;;  %4019 = vperm.xlu0 %20571, %v20873_v44   ;;  %v926_v0 = vadd.f32 %v894_v8, %v730_v40  ;;  %v26442_v47 = vld [vmem:[#allocation212_spill] sm:$0xff]  ;;  %v1323_v30 = vmul.f32 %v21778_v42, %v26443_v48  ;;  %v1616_v39 = vmul.f32 %v21804_v52, %v26444_v21  ;;  %v4786_v44 = vld [vmem:[#allocation2 + $0x50] sm:$0xff] }
 0x31c   : > { %v3620_v55 = vmul.f32 %v21856_v31, %v26442_v47  ;;  %v2306_v28 = vadd.f32 %v2274_v20, %v1847_v13  ;;  %v3456_v53 = vmul.f32 %v21872_v61, %v26445_v34  ;;  %v4079_v41 = vmul.f32 %v21876_v56, %v26446_v62  ;;  %v26449_v47 = vld [vmem:[#allocation49_spill] sm:$0xff]  ;;  %v26450_v21 = vld [vmem:[#allocation120_spill] sm:$0xff] }
 0x31d   : > { %4701 = vst.msk [vmem:[#allocation2 + $0x68] sm:$0xff] %vm4696_vm1, %v4668_v10  ;;  %20432 = vset.pattern.permute.xlu1 %v26157_v33  ;;  %v1385_v8 = vadd.f32 %v1353_v63, %v926_v0  ;;  %v1159_v40 = vmul.f32 %v21790_v54, %v26447_v58  ;;  %v1812_v20 = vadd.f32 %v1780_v37, %v1616_v39  ;;  %v20874_v0 = vld [vmem:[#allocation2 + $0x189] sm:$0xff]  ;;  %v26451_v37 = vld [vmem:[#allocation127_spill] sm:$0xff] }
 0x31e   : > { %v22475_v16 = vpop.permute.xlu0 %3052  ;;  %3532 = vperm.xlu1 %20432, %v26436_v29   ;;  %v2239_v17 = vmul.f32 %v21819_v7, %v26448_v26  ;;  %v928_v13 = vadd.f32 %v896_v9, %v732_v60  ;;  %v2765_v22 = vadd.f32 %v2733_v23, %v2306_v28  ;;  %v3652_v35 = vadd.f32 %v3620_v55, %v3456_v53  ;;  %v1884_v29 = vld [vmem:[#allocation2 + $0x107] sm:$0xff]  ;;  %v4788_v60 = vld [vmem:[#allocation2 + $0x70] sm:$0xff] }
 0x31f   : > { %4470 = vperm.xlu0 %20571, %v22390_v12   ;;  %v4249_v3 = vpop.permute.xlu1 %4248  ;;  %v3915_v63 = vmul.f32 %v21881_v1, %v26449_v47  ;;  %v1355_v48 = vadd.f32 %v1323_v30, %v1159_v40  ;;  %v2075_v39 = vmul.f32 %v21816_v27, %v26451_v37  ;;  %v1844_v23 = vadd.f32 %v1812_v20, %v1385_v8  ;;  %v26452_v34 = vld [vmem:[#allocation117_spill] sm:$0xff]  ;;  %v26454_v20 = vld [vmem:[#allocation140_spill] sm:$0xff] }
 0x320   : > { %v4785_v10 = vld [vmem:[#allocation2 + $0x48] sm:$0xff]  ;;  %v3224_v9 = vadd.f32 %v3192_v43, %v2765_v22  ;;  %v1618_v53 = vmul.f32 %v21804_v52, %v26452_v34  ;;  %v4374_v43 = vmul.f32 %v21897_v46, %v4249_v3 }
 0x321   : > { %v4815_v12 = vpack.c.bf16 %v4786_v44, %v4785_v10  ;;  %v1782_v10 = vmul.f32 %v26425_v6, %v26450_v21  ;;  %v4111_v55 = vadd.f32 %v4079_v41, %v3915_v63  ;;  %v2271_v62 = vadd.f32 %v2239_v17, %v2075_v39  ;;  %v26455_v22 = vld [vmem:[#allocation148_spill] sm:$0xff]  ;;  %v26457_v39 = vld [vmem:[#allocation66_spill] sm:$0xff] }
 0x322   : > { %v3505_v38 = vpop.permute.xlu0 %3504  ;;  %20433 = vset.pattern.permute.xlu1 %v26154_v19  ;;  %v1387_v58 = vadd.f32 %v1355_v48, %v928_v13  ;;  %v3684_v47 = vadd.f32 %v3652_v35, %v3224_v9  ;;  %v2241_v17 = vmul.f32 %v21819_v7, %v26454_v20  ;;  %v2534_v13 = vmul.f32 %v21844_v49, %v26455_v22  ;;  %v26456_v63 = vld [vmem:[#allocation64_spill] sm:$0xff] }
 0x323   : > { %4478 = vperm.xlu0 %20571, %v20874_v0   ;;  %17711 = vmatprep.mubr.msk.bf16.mxu0 %vm4696_vm1, %v4815_v12  ;;  %v26453_v12 = vld [vmem:[#allocation152_spill] sm:$0xff]  ;;  %v1814_v41 = vadd.f32 %v1782_v10, %v1618_v53  ;;  %v2995_v35 = vmul.f32 %v21848_v24, %v26456_v63  ;;  %v2303_v48 = vadd.f32 %v2271_v62, %v1844_v23 }
 0x324   : > { %v4787_v44 = vld [vmem:[#allocation2 + $0x68] sm:$0xff]  ;;  %v2698_v30 = vmul.f32 %v21829_v25, %v26453_v12  ;;  %1977 = vperm.xlu1 %20433, %v1884_v29   ;;  %v4435_v26 = vpop.permute.xlu1 %4434  ;;  %v4143_v21 = vadd.f32 %v4111_v55, %v3684_v47  ;;  %v3617_v12 = vmul.f32 %v21856_v31, %v3505_v38  ;;  %v3159_v20 = vmul.f32 %v21851_v4, %v22475_v16 }
 0x325   : > { %v4816_v28 = vpack.c.bf16 %v4788_v60, %v4787_v44  ;;  %v22506_v0 = vld [vmem:[#allocation2 + $0x1a8] sm:$0xff]  ;;  %v4538_v8 = vmul.f32 %v21900_v59, %v4435_v26  ;;  %v3453_v44 = vmul.f32 %v21872_v61, %v26457_v39  ;;  %v26458_v60 = vld [vmem:[#allocation137_spill] sm:$0xff]  ;;  %v1846_v10 = vadd.f32 %v1814_v41, %v1387_v58 }
 0x326   : > { %v3513_v40 = vpop.permute.xlu0 %3512  ;;  %v2077_v3 = vmul.f32 %v21816_v27, %v26458_v60  ;;  %v2730_v9 = vadd.f32 %v2698_v30, %v2534_v13  ;;  %v26459_v34 = vld [vmem:[#allocation4_spill] sm:$0xff]  ;;  %v26464_v13 = vld [vmem:[#allocation69_spill] sm:$0xff] }
 0x327   : > { %1288 = vperm.xlu0 %20571, %v22506_v0   ;;  %17712 = vmatmul.mubr.msk.bf16.gmra.mrb[4].mxu0 %vm4696_vm1, %v4816_v28  ;;  %v4570_v37 = vadd.f32 %v4538_v8, %v4374_v43  ;;  %v3157_v53 = vmul.f32 %v21851_v4, %v26459_v34  ;;  %v20876_v26 = vld [vmem:[#allocation2 + $0x1c7] sm:$0xff]  ;;  %v3455_v63 = vmul.f32 %v21872_v61, %v26464_v13  ;;  %v20878_v16 = vld [vmem:[#allocation2 + $0x10f] sm:$0xff] }
 0x328   : > { %20434 = vset.pattern.permute.xlu1 %v26157_v33  ;;  %v26461_v62 = vld [vmem:[#allocation72_spill] sm:$0xff]  ;;  %v2273_v43 = vadd.f32 %v2241_v17, %v2077_v3  ;;  %v2762_v38 = vadd.f32 %v2730_v9, %v2303_v48  ;;  %v3649_v3 = vadd.f32 %v3617_v12, %v3453_v44  ;;  %v3619_v34 = vmul.f32 %v21856_v31, %v3513_v40  ;;  %v26466_v48 = vld [vmem:[#allocation75_spill] sm:$0xff] }
 0x329   : > { %v4602_v23 = vadd.f32 %v4570_v37, %v4143_v21  ;;  %2158 = vperm.xlu1 %20434, %v1884_v29   ;;  %v22526_v55 = vpop.permute.xlu1 %632  ;;  %v3912_v47 = vmul.f32 %v21881_v1, %v26461_v62  ;;  %v26462_v30 = vld [vmem:[#allocation160_spill] sm:$0xff]  ;;  %v26465_v21 = vld [vmem:[#allocation158_spill] sm:$0xff]  ;;  %v3914_v9 = vmul.f32 %v21881_v1, %v26466_v48 }
 0x32a   : > { %v3964_v28 = vpop.permute.xlu0 %3963  ;;  %26460 = vst [vmem:[#allocation13_spill] sm:$0xff] %v22526_v55  ;;  %v2700_v58 = vmul.f32 %v21829_v25, %v26462_v30  ;;  %v26463_v8 = vld [vmem:[#allocation176_spill] sm:$0xff]  ;;  %v2536_v17 = vmul.f32 %v21844_v49, %v26465_v21  ;;  %v2305_v37 = vadd.f32 %v2273_v43, %v1846_v10  ;;  %v3651_v13 = vadd.f32 %v3619_v34, %v3455_v63  ;;  %v26526_v55 = vld [vmem:[#allocation9_spill] sm:$0xff] }
 0x32b   : > { %869 = vperm.xlu0 %20571, %v20876_v26   ;;  %v2993_v41 = vmul.f32 %v21848_v24, %v26463_v8  ;;  %v4076_v22 = vmul.f32 %v21876_v56, %v3964_v28  ;;  %v4641_v29 = vadd.f32 %v22446_v5, %v4602_v23  ;;  %v22543_v30 = vld [vmem:[#allocation2 + $0x1a9] sm:$0xff]  ;;  %v26467_v28 = vld [vmem:[#allocation79_spill] sm:$0xff] }
 0x32c   : > { %v4371_v23 = vmul.f32 %v21897_v46, %v26467_v28  ;;  %v2732_v8 = vadd.f32 %v2700_v58, %v2536_v17  ;;  %v26469_v58 = vld [vmem:[#allocation83_spill] sm:$0xff] }
 0x32d   : > { %v3189_v60 = vadd.f32 %v3157_v53, %v2993_v41  ;;  %v4673_v62 = vmax.f32 %v4641_v29, 0.0  ;;  %2162 = vperm.xlu1 %20434, %v20878_v16   ;;  %v3191_v53 = vadd.f32 %v3159_v20, %v2995_v35  ;;  %v4108_v12 = vadd.f32 %v4076_v22, %v3912_v47  ;;  %v20879_v16 = vld [vmem:[#allocation2 + $0x1a7] sm:$0xff] }
 0x32e   : > { %v3972_v39 = vpop.permute.xlu0 %3971  ;;  %v22550_v10 = vpop.permute.xlu1 %813  ;;  %v2764_v43 = vadd.f32 %v2732_v8, %v2305_v37  ;;  %v4373_v17 = vmul.f32 %v21897_v46, %v26469_v58  ;;  %v26470_v35 = vld [vmem:[#allocation204_spill] sm:$0xff] }
 0x32f   : > { %3116 = vperm.xlu0 %20571, %v22543_v30   ;;  %26468 = vst [vmem:[#allocation74_spill] sm:$0xff] %v22550_v10  ;;  %v3221_v44 = vadd.f32 %v3189_v60, %v2762_v38  ;;  %v4078_v40 = vmul.f32 %v21876_v56, %v3972_v39  ;;  %4706 = vst.msk [vmem:[#allocation2 + $0xb0] sm:$0xff] %vm4696_vm1, %v4673_v62 }
 0x330   : > { %v3223_v20 = vadd.f32 %v3191_v53, %v2764_v43  ;;  %v22570_v53 = vld [vmem:[#allocation2 + $0x127] sm:$0xff] }
 0x331   : > { %v3681_v29 = vadd.f32 %v3649_v3, %v3221_v44  ;;  %20435 = vset.pattern.permute.xlu1 %v26154_v19  ;;  %v4110_v22 = vadd.f32 %v4078_v40, %v3914_v9  ;;  %v26474_v44 = vld [vmem:[#allocation57_spill] sm:$0xff] }
 0x332   : > { %v4423_v41 = vpop.permute.xlu0 %4422  ;;  %3799 = vperm.xlu1 %20435, %v26470_v35   ;;  %v22559_v47 = vpop.permute.xlu1 %817  ;;  %v3683_v60 = vadd.f32 %v3651_v13, %v3223_v20  ;;  %v900_v20 = vmul.f32 %v26423_v57, %v22450_v45 }
 0x333   : > { %v4535_v21 = vmul.f32 %v21900_v59, %v4423_v41  ;;  %3568 = vperm.xlu0 %20571, %v20879_v16   ;;  %26471 = vst [vmem:[#allocation12_spill] sm:$0xff] %v22559_v47  ;;  %v4140_v38 = vadd.f32 %v4108_v12, %v3681_v29  ;;  %v1325_v12 = vmul.f32 %v21778_v42, %v22424_v32  ;;  %v26477_v16 = vld [vmem:[#allocation166_spill] sm:$0xff] }
 0x334   : > { %v4142_v34 = vadd.f32 %v4110_v22, %v3683_v60  ;;  %v734_v32 = vmul.f32 %v26428_v18, %v26477_v16  ;;  %v26484_v16 = vld [vmem:[#allocation205_spill] sm:$0xff] }
 0x335   : > { %v4567_v37 = vadd.f32 %v4535_v21, %v4371_v23  ;;  %v20880_v21 = vld [vmem:[#allocation2 + $0x1c8] sm:$0xff] }
 0x336   : > { %v4431_v39 = vpop.permute.xlu0 %4430  ;;  %20436 = vset.pattern.permute.xlu1 %v26157_v33 }
 0x337   : > { %v4599_v63 = vadd.f32 %v4567_v37, %v4140_v38  ;;  %v4537_v3 = vmul.f32 %v21900_v59, %v4431_v39  ;;  %3576 = vperm.xlu0 %20571, %v20876_v26   ;;  %3983 = vperm.xlu1 %20436, %v26470_v35   ;;  %v22565_v28 = vpop.permute.xlu1 %1064  ;;  %v1161_v26 = vmul.f32 %v21790_v54, %v26474_v44  ;;  %v26479_v37 = vld [vmem:[#allocation195_spill] sm:$0xff] }
 0x338   : > { %26472 = vst [vmem:[#allocation11_spill] sm:$0xff] %v22565_v28  ;;  %v1784_v39 = vmul.f32 %v26425_v6, %v26479_v37  ;;  %v26482_v44 = vld [vmem:[#allocation183_spill] sm:$0xff]  ;;  %v26519_v28 = vld [vmem:[#allocation65_spill] sm:$0xff] }
 0x339   : > { %v4638_v62 = vadd.f32 %v22446_v5, %v4599_v63  ;;  %v4569_v48 = vadd.f32 %v4537_v3, %v4373_v17  ;;  %v1357_v58 = vadd.f32 %v1325_v12, %v1161_v26  ;;  %v26478_v17 = vld [vmem:[#allocation60_spill] sm:$0xff]  ;;  %v26480_v63 = vld [vmem:[#allocation185_spill] sm:$0xff]  ;;  %v1163_v26 = vmul.f32 %v21790_v54, %v26482_v44 }
 0x33a   : > { %v22567_v8 = vpop.permute.xlu0 %1240  ;;  %v736_v35 = vmul.f32 %v26428_v18, %v26478_v17  ;;  %v1327_v3 = vmul.f32 %v21778_v42, %v26480_v63  ;;  %v2702_v44 = vmul.f32 %v21829_v25, %v22341_v14  ;;  %v1621_v47 = vmul.f32 %v21804_v52, %v26519_v28 }
 0x33b   : > { %26473 = vst [vmem:[#allocation23_spill] sm:$0xff] %v22567_v8  ;;  %v4670_v9 = vmax.f32 %v4638_v62, 0.0  ;;  %v4601_v23 = vadd.f32 %v4569_v48, %v4142_v34  ;;  %4027 = vperm.xlu0 %20571, %v22506_v0   ;;  %20437 = vset.pattern.permute.xlu1 %v26154_v19  ;;  %v26476_v0 = vld [vmem:[#allocation168_spill] sm:$0xff]  ;;  %v4790_v62 = vld [vmem:[#allocation2 + $0x90] sm:$0xff]  ;;  %v2244_v28 = vmul.f32 %v21819_v7, %v26526_v55 }
 0x33c   : > { %1987 = vperm.xlu1 %20437, %v22570_v53   ;;  %v22582_v41 = vpop.permute.xlu1 %1244  ;;  %v898_v29 = vmul.f32 %v26423_v57, %v26476_v0  ;;  %v26481_v48 = vld [vmem:[#allocation193_spill] sm:$0xff]  ;;  %v932_v12 = vadd.f32 %v900_v20, %v736_v35  ;;  %v26485_v20 = vld [vmem:[#allocation8_spill] sm:$0xff] }
 0x33d   : > { %4703 = vst.msk [vmem:[#allocation2 + $0x88] sm:$0xff] %vm4696_vm1, %v4670_v9  ;;  %v4640_v40 = vadd.f32 %v22446_v5, %v4601_v23  ;;  %26475 = vst [vmem:[#allocation34_spill] sm:$0xff] %v22582_v41  ;;  %v1620_v45 = vmul.f32 %v21804_v52, %v26481_v48  ;;  %v2079_v37 = vmul.f32 %v21816_v27, %v26485_v20  ;;  %v26520_v41 = vld [vmem:[#allocation119_spill] sm:$0xff] }
 0x33e   : > { %v22579_v43 = vpop.permute.xlu0 %821  ;;  %v930_v22 = vadd.f32 %v898_v29, %v734_v32  ;;  %v1786_v32 = vmul.f32 %v26425_v6, %v26484_v16  ;;  %v26487_v16 = vld [vmem:[#allocation19_spill] sm:$0xff] }
 0x33f   : > { %v4672_v13 = vmax.f32 %v4640_v40, 0.0  ;;  %4035 = vperm.xlu0 %20571, %v20880_v21   ;;  %v1816_v0 = vadd.f32 %v1784_v39, %v1620_v45  ;;  %v1359_v21 = vadd.f32 %v1327_v3, %v1163_v26  ;;  %v3720_v45 = vld [vmem:[#allocation2 + $0x110] sm:$0xff] }
 0x340   : > { %20438 = vset.pattern.permute.xlu1 %v26157_v33  ;;  %v1389_v9 = vadd.f32 %v1357_v58, %v930_v22  ;;  %v4792_v58 = vld [vmem:[#allocation2 + $0xb0] sm:$0xff] }
 0x341   : > { %4705 = vst.msk [vmem:[#allocation2 + $0xa8] sm:$0xff] %vm4696_vm1, %v4672_v13  ;;  %2166 = vperm.xlu1 %20438, %v22570_v53   ;;  %v2876_v60 = vpop.permute.xlu1 %2875  ;;  %v20881_v13 = vld [vmem:[#allocation2 + $0x1c9] sm:$0xff]  ;;  %v1391_v48 = vadd.f32 %v1359_v21, %v932_v12 }
 0x342   : > { %v3069_v38 = vpop.permute.xlu0 %3068  ;;  %v22609_v22 = vld [vmem:[#allocation2 + $0x12f] sm:$0xff]  ;;  %v1848_v39 = vadd.f32 %v1816_v0, %v1389_v9  ;;  %v2245_v9 = vmul.f32 %v21819_v7, %v26487_v16  ;;  %v2997_v21 = vmul.f32 %v21848_v24, %v2876_v60 }
 0x343   : > { %4486 = vperm.xlu0 %20571, %v22543_v30   ;;  %v26483_v30 = vld [vmem:[#allocation6_spill] sm:$0xff]  ;;  %v20883_v26 = vld [vmem:[#allocation2 + $0x1e9] sm:$0xff] }
 0x344   : > { %v4789_v34 = vld [vmem:[#allocation2 + $0x88] sm:$0xff]  ;;  %v2243_v29 = vmul.f32 %v21819_v7, %v26483_v30  ;;  %v26491_v16 = vld [vmem:[#allocation93_spill] sm:$0xff] }
 0x345   : > { %v4817_v23 = vpack.c.bf16 %v4790_v62, %v4789_v34  ;;  %2170 = vperm.xlu1 %20438, %v22609_v22   ;;  %v26486_v34 = vld [vmem:[#allocation202_spill] sm:$0xff]  ;;  %v26488_v12 = vld [vmem:[#allocation76_spill] sm:$0xff] }
 0x346   : > { %v3521_v40 = vpop.permute.xlu0 %3520  ;;  %v3061_v35 = vpop.permute.xlu1 %3060  ;;  %v1622_v62 = vmul.f32 %v21804_v52, %v26486_v34 }
 0x347   : > { %4494 = vperm.xlu0 %20571, %v20881_v13   ;;  %17715 = vmatprep.mubr.msk.bf16.mxu0 %vm4696_vm1, %v4817_v23  ;;  %v2275_v23 = vadd.f32 %v2243_v29, %v2079_v37  ;;  %v3161_v30 = vmul.f32 %v21851_v4, %v3061_v35  ;;  %v2538_v29 = vmul.f32 %v21844_v49, %v26488_v12 }
 0x348   : > { %v4791_v17 = vld [vmem:[#allocation2 + $0xa8] sm:$0xff]  ;;  %v1818_v13 = vadd.f32 %v1786_v32, %v1622_v62  ;;  %v3621_v34 = vmul.f32 %v21856_v31, %v3521_v40  ;;  %v2999_v12 = vmul.f32 %v21848_v24, %v26491_v16  ;;  %v26496_v16 = vld [vmem:[#allocation109_spill] sm:$0xff] }
 0x349   : > { %v4818_v63 = vpack.c.bf16 %v4792_v58, %v4791_v17  ;;  %20439 = vset.pattern.permute.xlu1 %v26154_v19  ;;  %v2307_v14 = vadd.f32 %v2275_v23, %v1848_v39  ;;  %v26489_v17 = vld [vmem:[#allocation14_spill] sm:$0xff]  ;;  %v26490_v32 = vld [vmem:[#allocation96_spill] sm:$0xff]  ;;  %v2704_v39 = vmul.f32 %v21829_v25, %v22436_v15 }
 0x34a   : > { %v3529_v3 = vpop.permute.xlu0 %3528  ;;  %v22623_v0 = vpop.permute.xlu1 %3064  ;;  %3809 = vperm.xlu1 %20439, %v3720_v45   ;;  %v2081_v58 = vmul.f32 %v21816_v27, %v26489_v17  ;;  %v1850_v20 = vadd.f32 %v1818_v13, %v1391_v48  ;;  %v3457_v37 = vmul.f32 %v21872_v61, %v26490_v32  ;;  %v20884_v62 = vld [vmem:[#allocation2 + $0x207] sm:$0xff]  ;;  %v3163_v13 = vmul.f32 %v21851_v4, %v3069_v38 }
 0x34b   : > { %3132 = vperm.xlu0 %20571, %v20883_v26   ;;  %17716 = vmatmul.mubr.msk.bf16.gmra.mrb[8].mxu0 %vm4696_vm1, %v4818_v63  ;;  %v2734_v63 = vadd.f32 %v2702_v44, %v2538_v29  ;;  %v3193_v26 = vadd.f32 %v3161_v30, %v2997_v21  ;;  %v26492_v23 = vld [vmem:[#allocation104_spill] sm:$0xff]  ;;  %v2540_v30 = vmul.f32 %v21844_v49, %v22410_v36 }
 0x34c   : > { %v2277_v60 = vadd.f32 %v2245_v9, %v2081_v58  ;;  %v3916_v48 = vmul.f32 %v21881_v1, %v26492_v23  ;;  %v26494_v21 = vld [vmem:[#allocation100_spill] sm:$0xff]  ;;  %v3653_v58 = vadd.f32 %v3621_v34, %v3457_v37  ;;  %v3623_v32 = vmul.f32 %v21856_v31, %v3529_v3 }
 0x34d   : > { %v2766_v44 = vadd.f32 %v2734_v63, %v2307_v14  ;;  %v3459_v15 = vmul.f32 %v21872_v61, %v26494_v21  ;;  %v26495_v14 = vld [vmem:[#allocation106_spill] sm:$0xff]  ;;  %v2736_v63 = vadd.f32 %v2704_v39, %v2540_v30  ;;  %v4375_v23 = vmul.f32 %v21897_v46, %v26496_v16  ;;  %v26499_v30 = vld [vmem:[#allocation113_spill] sm:$0xff] }
 0x34e   : > { %v3980_v35 = vpop.permute.xlu0 %3979  ;;  %20440 = vset.pattern.permute.xlu1 %v26157_v33  ;;  %v2309_v29 = vadd.f32 %v2277_v60, %v1850_v20  ;;  %v3195_v36 = vadd.f32 %v3163_v13, %v2999_v12  ;;  %v4377_v12 = vmul.f32 %v21897_v46, %v26499_v30  ;;  %v4179_v30 = vld [vmem:[#allocation2 + $0x111] sm:$0xff]  ;;  %v3162_v55 = vmul.f32 %v21851_v4, %v22623_v0 }
 0x34f   : > { %3592 = vperm.xlu0 %20571, %v20884_v62   ;;  %v4080_v17 = vmul.f32 %v21876_v56, %v3980_v35  ;;  %v22642_v40 = vpop.permute.xlu1 %647  ;;  %3991 = vperm.xlu1 %20440, %v3720_v45   ;;  %v3225_v38 = vadd.f32 %v3193_v26, %v2766_v44  ;;  %v20885_v62 = vld [vmem:[#allocation2 + $0x208] sm:$0xff]  ;;  %v3918_v35 = vmul.f32 %v21881_v1, %v26495_v14  ;;  %v26497_v44 = vld [vmem:[#allocation10_spill] sm:$0xff] }
 0x350   : > { %26493 = vst [vmem:[#allocation32_spill] sm:$0xff] %v22642_v40  ;;  %v2768_v60 = vadd.f32 %v2736_v63, %v2309_v29  ;;  %v3655_v37 = vadd.f32 %v3623_v32, %v3459_v15  ;;  %v20886_v26 = vld [vmem:[#allocation2 + $0x209] sm:$0xff]  ;;  %v26500_v63 = vld [vmem:[#allocation18_spill] sm:$0xff] }
 0x351   : > { %v4112_v20 = vadd.f32 %v4080_v17, %v3916_v48  ;;  %v3685_v3 = vadd.f32 %v3653_v58, %v3225_v38 }
 0x352   : > { %v3988_v9 = vpop.permute.xlu0 %3987  ;;  %v3227_v48 = vadd.f32 %v3195_v36, %v2768_v60 }
 0x353   : > { %4051 = vperm.xlu0 %20571, %v20885_v62   ;;  %v4082_v45 = vmul.f32 %v21876_v56, %v3988_v9  ;;  %20441 = vset.pattern.permute.xlu1 %v26154_v19  ;;  %v4144_v17 = vadd.f32 %v4112_v20, %v3685_v3  ;;  %v26501_v20 = vld [vmem:[#allocation36_spill] sm:$0xff] }
 0x354   : > { %2436 = vperm.xlu1 %20441, %v26497_v44   ;;  %v22657_v39 = vpop.permute.xlu1 %825  ;;  %v3687_v21 = vadd.f32 %v3655_v37, %v3227_v48  ;;  %v2345_v37 = vld [vmem:[#allocation2 + $0x128] sm:$0xff] }
 0x355   : > { %26498 = vst [vmem:[#allocation61_spill] sm:$0xff] %v22657_v39  ;;  %v4114_v13 = vadd.f32 %v4082_v45, %v3918_v35 }
 0x356   : > { %v4439_v40 = vpop.permute.xlu0 %4438 }
 0x357   : > { %v4539_v34 = vmul.f32 %v21900_v59, %v4439_v40  ;;  %4510 = vperm.xlu0 %20571, %v20886_v26   ;;  %v4146_v58 = vadd.f32 %v4114_v13, %v3687_v21  ;;  %v20887_v26 = vld [vmem:[#allocation2 + $0x130] sm:$0xff] }
 0x358   : > { %20442 = vset.pattern.permute.xlu1 %v26157_v33 }
 0x359   : > { %v4571_v29 = vadd.f32 %v4539_v34, %v4375_v23  ;;  %2617 = vperm.xlu1 %20442, %v26497_v44   ;;  %v22665_v40 = vpop.permute.xlu1 %1069 }
 0x35a   : > { %v4447_v9 = vpop.permute.xlu0 %4446 }
 0x35b   : > { %v4603_v62 = vadd.f32 %v4571_v29, %v4144_v17  ;;  %v4541_v15 = vmul.f32 %v21900_v59, %v4447_v9  ;;  %20585 = vset.pattern.permute.xlu0 %v26154_v19  ;;  %v22707_v9 = vld [vmem:[#allocation2 + $0x130] sm:$0xff] }
 0x35d   : > { %v4642_v32 = vadd.f32 %v22446_v5, %v4603_v62  ;;  %v4573_v38 = vadd.f32 %v4541_v15, %v4377_v12  ;;  %2621 = vperm.xlu1 %20442, %v26500_v63  }
 0x35e   : > { %v22671_v23 = vpop.permute.xlu1 %1248 }
 0x35f   : > { %v4674_v14 = vmax.f32 %v4642_v32, 0.0  ;;  %v4605_v35 = vadd.f32 %v4573_v38, %v4146_v58  ;;  %v22728_v58 = vld [vmem:[#allocation2 + $0x14f] sm:$0xff] }
 0x361   : > { %4707 = vst.msk [vmem:[#allocation2 + $0xc8] sm:$0xff] %vm4696_vm1, %v4674_v14  ;;  %v4644_v16 = vadd.f32 %v22446_v5, %v4605_v35  ;;  %20443 = vset.pattern.permute.xlu1 %v26154_v19  ;;  %v22746_v35 = vld [vmem:[#allocation2 + $0x150] sm:$0xff] }
 0x362   : > { %4258 = vperm.xlu1 %20443, %v26501_v20   ;;  %v22676_v45 = vpop.permute.xlu1 %1252  ;;  %26511 = vst [vmem:[#allocation26_spill] sm:$0xff] %v22746_v35 }
 0x363   : > { %v4676_v36 = vmax.f32 %v4644_v16, 0.0  ;;  %26502 = vst [vmem:[#allocation29_spill] sm:$0xff] %v22676_v45  ;;  %v22751_v16 = vld [vmem:[#allocation2 + $0x131] sm:$0xff] }
 0x364   : > { %26512 = vst [vmem:[#allocation87_spill] sm:$0xff] %v22751_v16 }
 0x365   : > { %4709 = vst.msk [vmem:[#allocation2 + $0xe8] sm:$0xff] %vm4696_vm1, %v4676_v36 }
 0x366   : > { %20444 = vset.pattern.permute.xlu1 %v26157_v33 }
 0x367   : > { %4442 = vperm.xlu1 %20444, %v26501_v20   ;;  %v22680_v60 = vpop.permute.xlu1 %2890  ;;  %v22757_v20 = vpop.permute.xlu0 %1256 }
 0x368   : > { %26514 = vst [vmem:[#allocation30_spill] sm:$0xff] %v22757_v20 }
 0x36b   : > { %20445 = vset.pattern.permute.xlu1 %v26154_v19 }
 0x36c   : > { %2446 = vperm.xlu1 %20445, %v2345_v37   ;;  %v22683_v3 = vpop.permute.xlu1 %3072 }
 0x370   : > { %20446 = vset.pattern.permute.xlu1 %v26157_v33 }
 0x371   : > { %2625 = vperm.xlu1 %20446, %v2345_v37   ;;  %v22686_v34 = vpop.permute.xlu1 %1518 }
 0x372   : > { %26503 = vst [vmem:[#allocation59_spill] sm:$0xff] %v22686_v34 }
 0x375   : > { %2629 = vperm.xlu1 %20446, %v20887_v26   ;;  %v1429_v26 = vld [vmem:[#allocation2 + $0x129] sm:$0xff] }
 0x376   : > { %v22688_v44 = vpop.permute.xlu1 %1699 }
 0x377   : > { %26504 = vst [vmem:[#allocation22_spill] sm:$0xff] %v22688_v44 }
 0x379   : > { %20447 = vset.pattern.permute.xlu1 %v26154_v19 }
 0x37a   : > { %4268 = vperm.xlu1 %20447, %v4179_v30   ;;  %v22691_v12 = vpop.permute.xlu1 %1703 }
 0x37b   : > { %26505 = vst [vmem:[#allocation15_spill] sm:$0xff] %v22691_v12  ;;  %v26518_v12 = vld [vmem:[#allocation56_spill] sm:$0xff] }
 0x37e   : > { %20448 = vset.pattern.permute.xlu1 %v26157_v33 }
 0x37f   : > { %4450 = vperm.xlu1 %20448, %v4179_v30   ;;  %v22694_v48 = vpop.permute.xlu1 %3340  ;;  %v22763_v30 = vpop.permute.xlu0 %837 }
 0x380   : > { %26515 = vst [vmem:[#allocation38_spill] sm:$0xff] %v22763_v30  ;;  %v735_v30 = vmul.f32 %v26428_v18, %v26518_v12 }
 0x383   : > { %20449 = vset.pattern.permute.xlu1 %v26154_v19  ;;  %v22769_v39 = vpop.permute.xlu0 %3084 }
 0x384   : > { %652 = vperm.xlu1 %20449, %v22570_v53   ;;  %v22698_v13 = vpop.permute.xlu1 %3524 }
 0x388   : > { %20450 = vset.pattern.permute.xlu1 %v26157_v33 }
 0x389   : > { %829 = vperm.xlu1 %20450, %v22570_v53   ;;  %v22702_v17 = vpop.permute.xlu1 %1528 }
 0x38d   : > { %833 = vperm.xlu1 %20450, %v22609_v22  }
 0x38e   : > { %v22705_v29 = vpop.permute.xlu1 %1707 }
 0x391   : > { %20451 = vset.pattern.permute.xlu1 %v26154_v19 }
 0x392   : > { %1084 = vperm.xlu1 %20451, %v22707_v9  }
 0x393   : > { %v22711_v21 = vpop.permute.xlu1 %1711 }
 0x394   : > { %26506 = vst [vmem:[#allocation20_spill] sm:$0xff] %v22711_v21 }
 0x396   : > { %20452 = vset.pattern.permute.xlu1 %v26157_v33 }
 0x397   : > { %1260 = vperm.xlu1 %20452, %v22707_v9  }
 0x398   : > { %v22715_v62 = vpop.permute.xlu1 %3350 }
 0x39b   : > { %20453 = vset.pattern.permute.xlu1 %v26154_v19 }
 0x39c   : > { %2895 = vperm.xlu1 %20453, %v22393_v51  }
 0x39d   : > { %v22719_v53 = vpop.permute.xlu1 %3532 }
 0x3a0   : > { %20454 = vset.pattern.permute.xlu1 %v26157_v33 }
 0x3a1   : > { %3076 = vperm.xlu1 %20454, %v22393_v51   ;;  %v22738_v51 = vld [vmem:[#allocation2 + $0x148] sm:$0xff] }
 0x3a2   : > { %26510 = vst [vmem:[#allocation24_spill] sm:$0xff] %v22738_v51 }
 0x3a3   : > { %v22723_v22 = vpop.permute.xlu1 %1977 }
 0x3a4   : > { %26507 = vst [vmem:[#allocation17_spill] sm:$0xff] %v22723_v22  ;;  %v22785_v22 = vpop.permute.xlu0 %3536 }
 0x3a5   : > { %3080 = vperm.xlu1 %20454, %v22427_v50   ;;  %26523 = vst [vmem:[#allocation85_spill] sm:$0xff] %v22785_v22  ;;  %v2703_v22 = vmul.f32 %v21829_v25, %v22362_v11 }
 0x3a8   : > { %v22726_v15 = vpop.permute.xlu1 %2158  ;;  %v22804_v8 = vpop.permute.xlu0 %3544 }
 0x3a9   : > { %26508 = vst [vmem:[#allocation21_spill] sm:$0xff] %v22726_v15  ;;  %20455 = vset.pattern.permute.xlu1 %v26154_v19 }
 0x3aa   : > { %667 = vperm.xlu1 %20455, %v22728_v58  }
 0x3ac   : > { %v22732_v32 = vpop.permute.xlu1 %2162 }
 0x3ad   : > { %26509 = vst [vmem:[#allocation28_spill] sm:$0xff] %v22732_v32  ;;  %v20889_v32 = vld [vmem:[#allocation2 + $0x131] sm:$0xff] }
 0x3ae   : > { %20456 = vset.pattern.permute.xlu1 %v26157_v33 }
 0x3af   : > { %841 = vperm.xlu1 %20456, %v22728_v58  }
 0x3b1   : > { %v22736_v38 = vpop.permute.xlu1 %3799 }
 0x3b3   : > { %20457 = vset.pattern.permute.xlu1 %v26154_v19 }
 0x3b4   : > { %1089 = vperm.xlu1 %20457, %v22738_v51  }
 0x3b6   : > { %v3984_v50 = vpop.permute.xlu1 %3983 }
 0x3b8   : > { %20458 = vset.pattern.permute.xlu1 %v26157_v33 }
 0x3b9   : > { %1264 = vperm.xlu1 %20458, %v22738_v51  }
 0x3bb   : > { %v22744_v14 = vpop.permute.xlu1 %1987 }
 0x3bd   : > { %1268 = vperm.xlu1 %20458, %v22746_v35   ;;  %v26521_v35 = vld [vmem:[#allocation172_spill] sm:$0xff] }
 0x3be   : > { %v1162_v51 = vmul.f32 %v21790_v54, %v26521_v35 }
 0x3c0   : > { %v22749_v63 = vpop.permute.xlu1 %2166 }
 0x3c1   : > { %20459 = vset.pattern.permute.xlu1 %v26154_v19 }
 0x3c2   : > { %2910 = vperm.xlu1 %20459, %v22751_v16  }
 0x3c4   : > { %v22755_v36 = vpop.permute.xlu1 %2170 }
 0x3c5   : > { %26513 = vst [vmem:[#allocation27_spill] sm:$0xff] %v22755_v36  ;;  %v26517_v36 = vld [vmem:[#allocation174_spill] sm:$0xff] }
 0x3c6   : > { %20460 = vset.pattern.permute.xlu1 %v26157_v33  ;;  %v1326_v45 = vmul.f32 %v21778_v42, %v26517_v36  ;;  %v3263_v36 = vld [vmem:[#allocation2 + $0x12f] sm:$0xff] }
 0x3c7   : > { %3088 = vperm.xlu1 %20460, %v22751_v16   ;;  %v899_v16 = vmul.f32 %v26423_v57, %v26520_v41  ;;  %v26527_v41 = vld [vmem:[#allocation77_spill] sm:$0xff] }
 0x3c8   : > { %v1358_v34 = vadd.f32 %v1326_v45, %v1162_v51  ;;  %v2539_v35 = vmul.f32 %v21844_v49, %v26527_v41 }
 0x3c9   : > { %v22761_v37 = vpop.permute.xlu1 %3809  ;;  %v931_v44 = vadd.f32 %v899_v16, %v735_v30  ;;  %v22812_v30 = vld [vmem:[#allocation2 + $0x149] sm:$0xff] }
 0x3ca   : > { %v2735_v16 = vadd.f32 %v2703_v22, %v2539_v35  ;;  %v3917_v22 = vmul.f32 %v21881_v1, %v22736_v38  ;;  %v26530_v35 = vld [vmem:[#allocation90_spill] sm:$0xff] }
 0x3cb   : > { %20461 = vset.pattern.permute.xlu1 %v26154_v19  ;;  %v1390_v45 = vadd.f32 %v1358_v34, %v931_v44  ;;  %v4081_v34 = vmul.f32 %v21876_v56, %v3984_v50  ;;  %v904_v50 = vmul.f32 %v26423_v57, %v22579_v43 }
 0x3cc   : > { %1538 = vperm.xlu1 %20461, %v1429_v26  }
 0x3ce   : > { %v22766_v21 = vpop.permute.xlu1 %3991 }
 0x3d0   : > { %20462 = vset.pattern.permute.xlu1 %v26157_v33 }
 0x3d1   : > { %1715 = vperm.xlu1 %20462, %v1429_v26   ;;  %v26522_v26 = vld [vmem:[#allocation197_spill] sm:$0xff] }
 0x3d3   : > { %v22771_v20 = vpop.permute.xlu1 %2436 }
 0x3d4   : > { %26516 = vst [vmem:[#allocation82_spill] sm:$0xff] %v22771_v20  ;;  %v1785_v20 = vmul.f32 %v26425_v6, %v26522_v26 }
 0x3d5   : > { %1719 = vperm.xlu1 %20462, %v20889_v32   ;;  %v26525_v32 = vld [vmem:[#allocation71_spill] sm:$0xff] }
 0x3d6   : > { %v2080_v12 = vmul.f32 %v21816_v27, %v26525_v32  ;;  %v1817_v26 = vadd.f32 %v1785_v20, %v1621_v47  ;;  %v3622_v47 = vmul.f32 %v21856_v31, %v22698_v13 }
 0x3d8   : > { %v22787_v15 = vpop.permute.xlu1 %2617  ;;  %v2276_v51 = vadd.f32 %v2244_v28, %v2080_v12  ;;  %v1849_v41 = vadd.f32 %v1817_v26, %v1390_v45  ;;  %v22814_v12 = vpop.permute.xlu0 %3995 }
 0x3d9   : > { %26524 = vst [vmem:[#allocation112_spill] sm:$0xff] %v22787_v15  ;;  %20463 = vset.pattern.permute.xlu1 %v26154_v19  ;;  %v26529_v15 = vld [vmem:[#allocation88_spill] sm:$0xff] }
 0x3da   : > { %3360 = vperm.xlu1 %20463, %v3263_v36   ;;  %v2998_v32 = vmul.f32 %v21848_v24, %v26529_v15  ;;  %v2308_v11 = vadd.f32 %v2276_v51, %v1849_v41  ;;  %v3458_v15 = vmul.f32 %v21872_v61, %v22694_v48  ;;  %v740_v48 = vmul.f32 %v26428_v18, %v26530_v35  ;;  %v22845_v35 = vld [vmem:[#allocation2 + $0x151] sm:$0xff] }
 0x3db   : > { %26533 = vst [vmem:[#allocation39_spill] sm:$0xff] %v22845_v35 }
 0x3dc   : > { %v22798_v10 = vpop.permute.xlu1 %2621  ;;  %v3194_v20 = vadd.f32 %v3162_v55, %v2998_v32  ;;  %v2767_v0 = vadd.f32 %v2735_v16, %v2308_v11  ;;  %v3654_v28 = vadd.f32 %v3622_v47, %v3458_v15  ;;  %v1331_v32 = vmul.f32 %v21778_v42, %v22671_v23  ;;  %v4004_v41 = vpop.permute.xlu0 %4003 }
 0x3dd   : > { %26528 = vst [vmem:[#allocation37_spill] sm:$0xff] %v22798_v10  ;;  %v1167_v55 = vmul.f32 %v21790_v54, %v22665_v40  ;;  %v1790_v16 = vmul.f32 %v26425_v6, %v22705_v29  ;;  %v936_v11 = vadd.f32 %v904_v50, %v740_v48  ;;  %v2249_v15 = vmul.f32 %v21819_v7, %v22749_v63  ;;  %v26535_v48 = vld [vmem:[#allocation73_spill] sm:$0xff] }
 0x3de   : > { %20464 = vset.pattern.permute.xlu1 %v26157_v33  ;;  %v3226_v13 = vadd.f32 %v3194_v20, %v2767_v0  ;;  %v1626_v20 = vmul.f32 %v21804_v52, %v22702_v17  ;;  %v26531_v0 = vld [vmem:[#allocation62_spill] sm:$0xff]  ;;  %v26534_v17 = vld [vmem:[#allocation67_spill] sm:$0xff]  ;;  %v2082_v50 = vmul.f32 %v21816_v27, %v26535_v48  ;;  %v26541_v48 = vld [vmem:[#allocation16_spill] sm:$0xff] }
 0x3df   : > { %3540 = vperm.xlu1 %20464, %v3263_v36   ;;  %v4113_v36 = vadd.f32 %v4081_v34, %v3917_v22  ;;  %v1363_v23 = vadd.f32 %v1331_v32, %v1167_v55  ;;  %v1164_v40 = vmul.f32 %v21790_v54, %v26531_v0  ;;  %v1623_v63 = vmul.f32 %v21804_v52, %v26534_v17  ;;  %v26540_v0 = vld [vmem:[#allocation181_spill] sm:$0xff] }
 0x3e0   : > { %v3686_v45 = vadd.f32 %v3654_v28, %v3226_v13  ;;  %v26532_v28 = vld [vmem:[#allocation139_spill] sm:$0xff]  ;;  %v1822_v22 = vadd.f32 %v1790_v16, %v1626_v20  ;;  %v2085_v13 = vmul.f32 %v21816_v27, %v22744_v14  ;;  %v22858_v16 = vpop.permute.xlu0 %4454 }
 0x3e1   : > { %v4259_v44 = vpop.permute.xlu1 %4258  ;;  %v1328_v29 = vmul.f32 %v21778_v42, %v26532_v28  ;;  %v1395_v55 = vadd.f32 %v1363_v23, %v936_v11  ;;  %v26539_v20 = vld [vmem:[#allocation123_spill] sm:$0xff]  ;;  %v737_v28 = vmul.f32 %v26428_v18, %v26540_v0  ;;  %v4086_v0 = vmul.f32 %v21876_v56, %v4004_v41 }
 0x3e2   : > { %v4376_v51 = vmul.f32 %v21897_v46, %v4259_v44  ;;  %v4145_v47 = vadd.f32 %v4113_v36, %v3686_v45  ;;  %v26537_v45 = vld [vmem:[#allocation207_spill] sm:$0xff] }
 0x3e3   : > { %20465 = vset.pattern.permute.xlu1 %v26154_v19  ;;  %v1360_v17 = vadd.f32 %v1328_v29, %v1164_v40 }
 0x3e4   : > { %1548 = vperm.xlu1 %20465, %v22812_v30  }
 0x3e6   : > { %v4443_v26 = vpop.permute.xlu1 %4442 }
 0x3e7   : > { %v4540_v38 = vmul.f32 %v21900_v59, %v4443_v26  ;;  %v26536_v26 = vld [vmem:[#allocation134_spill] sm:$0xff] }
 0x3e8   : > { %20466 = vset.pattern.permute.xlu1 %v26157_v33  ;;  %v901_v32 = vmul.f32 %v26423_v57, %v26536_v26  ;;  %v2246_v26 = vmul.f32 %v21819_v7, %v26541_v48  ;;  %v4463_v48 = vpop.permute.xlu0 %4462 }
 0x3e9   : > { %v4572_v43 = vadd.f32 %v4540_v38, %v4376_v51  ;;  %1723 = vperm.xlu1 %20466, %v22812_v30   ;;  %v1787_v51 = vmul.f32 %v26425_v6, %v26537_v45  ;;  %v26538_v38 = vld [vmem:[#allocation81_spill] sm:$0xff]  ;;  %v3167_v45 = vmul.f32 %v21851_v4, %v22769_v39  ;;  %v26543_v39 = vld [vmem:[#allocation135_spill] sm:$0xff] }
 0x3ea   : > { %v2541_v14 = vmul.f32 %v21844_v49, %v26538_v38  ;;  %v1854_v38 = vadd.f32 %v1822_v22, %v1395_v55  ;;  %v933_v40 = vadd.f32 %v901_v32, %v737_v28  ;;  %v3922_v22 = vmul.f32 %v21881_v1, %v26543_v39 }
 0x3eb   : > { %v4604_v34 = vadd.f32 %v4572_v43, %v4145_v47  ;;  %v2447_v44 = vpop.permute.xlu1 %2446  ;;  %v2281_v47 = vadd.f32 %v2249_v15, %v2085_v13  ;;  %v26542_v15 = vld [vmem:[#allocation128_spill] sm:$0xff]  ;;  %v1819_v29 = vadd.f32 %v1787_v51, %v1623_v63  ;;  %v3164_v63 = vmul.f32 %v21851_v4, %v22683_v3 }
 0x3ec   : > { %v2544_v11 = vmul.f32 %v21844_v49, %v2447_v44  ;;  %v3463_v13 = vmul.f32 %v21872_v61, %v26542_v15  ;;  %v3627_v44 = vmul.f32 %v21856_v31, %v22804_v8  ;;  %v3000_v8 = vmul.f32 %v21848_v24, %v22680_v60 }
 0x3ed   : > { %v4643_v36 = vadd.f32 %v22446_v5, %v4604_v34  ;;  %1727 = vperm.xlu1 %20466, %v22845_v35   ;;  %v3003_v34 = vmul.f32 %v21848_v24, %v26539_v20  ;;  %v2313_v55 = vadd.f32 %v2281_v47, %v1854_v38  ;;  %v2278_v20 = vadd.f32 %v2246_v26, %v2082_v50 }
 0x3ee   : > { %v4545_v50 = vmul.f32 %v21900_v59, %v4463_v48  ;;  %v3659_v41 = vadd.f32 %v3627_v44, %v3463_v13  ;;  %v3624_v3 = vmul.f32 %v21856_v31, %v22719_v53  ;;  %v3196_v26 = vadd.f32 %v3164_v63, %v3000_v8  ;;  %v20891_v48 = vld [vmem:[#allocation2 + $0x14f] sm:$0xff] }
 0x3ef   : > { %v4675_v43 = vmax.f32 %v4643_v36, 0.0  ;;  %v2705_v36 = vmul.f32 %v21829_v25, %v22462_v2  ;;  %v26544_v2 = vld [vmem:[#allocation143_spill] sm:$0xff]  ;;  %v3199_v28 = vadd.f32 %v3167_v45, %v3003_v34  ;;  %v4118_v34 = vadd.f32 %v4086_v0, %v3922_v22  ;;  %v4793_v45 = vld [vmem:[#allocation2 + $0xc8] sm:$0xff] }
 0x3f0   : > { %v2626_v10 = vpop.permute.xlu1 %2625  ;;  %v4381_v51 = vmul.f32 %v21897_v46, %v26544_v2  ;;  %v4083_v60 = vmul.f32 %v21876_v56, %v22766_v21 }
 0x3f1   : > { %4708 = vst.msk [vmem:[#allocation2 + $0xd0] sm:$0xff] %vm4696_vm1, %v4675_v43  ;;  %v2708_v23 = vmul.f32 %v21829_v25, %v2626_v10  ;;  %20467 = vset.pattern.permute.xlu1 %v26154_v19  ;;  %v1392_v43 = vadd.f32 %v1360_v17, %v933_v40  ;;  %v2737_v35 = vadd.f32 %v2705_v36, %v2541_v14  ;;  %v1888_v40 = vld [vmem:[#allocation2 + $0x147] sm:$0xff] }
 0x3f2   : > { %3370 = vperm.xlu1 %20467, %v22728_v58   ;;  %v3460_v14 = vmul.f32 %v21872_v61, %v22715_v62  ;;  %v4577_v53 = vadd.f32 %v4545_v50, %v4381_v51  ;;  %v4795_v50 = vld [vmem:[#allocation2 + $0xe8] sm:$0xff] }
 0x3f3   : > { %v2740_v10 = vadd.f32 %v2708_v23, %v2544_v11  ;;  %v1851_v39 = vadd.f32 %v1819_v29, %v1392_v43 }
 0x3f4   : > { %v22884_v32 = vpop.permute.xlu1 %2629  ;;  %v3656_v36 = vadd.f32 %v3624_v3, %v3460_v14 }
 0x3f5   : > { %v2772_v15 = vadd.f32 %v2740_v10, %v2313_v55  ;;  %v2310_v17 = vadd.f32 %v2278_v20, %v1851_v39 }
 0x3f6   : > { %20468 = vset.pattern.permute.xlu1 %v26157_v33 }
 0x3f7   : > { %v3231_v47 = vadd.f32 %v3199_v28, %v2772_v15  ;;  %3548 = vperm.xlu1 %20468, %v22728_v58   ;;  %v2769_v29 = vadd.f32 %v2737_v35, %v2310_v17  ;;  %v3919_v58 = vmul.f32 %v21881_v1, %v22761_v37  ;;  %v26548_v17 = vld [vmem:[#allocation86_spill] sm:$0xff] }
 0x3f8   : > { %v4794_v38 = vld [vmem:[#allocation2 + $0xd0] sm:$0xff] }
 0x3f9   : > { %v3691_v11 = vadd.f32 %v3659_v41, %v3231_v47  ;;  %v4269_v23 = vpop.permute.xlu1 %4268  ;;  %v4819_v13 = vpack.c.bf16 %v4794_v38, %v4793_v45  ;;  %v3228_v62 = vadd.f32 %v3196_v26, %v2769_v29  ;;  %v4115_v44 = vadd.f32 %v4083_v60, %v3919_v58  ;;  %v22922_v47 = vld [vmem:[#allocation2 + $0x167] sm:$0xff]  ;;  %v26551_v38 = vld [vmem:[#allocation74_spill] sm:$0xff] }
 0x3fa   : > { %v4378_v35 = vmul.f32 %v21897_v46, %v4269_v23  ;;  %v26549_v26 = vld [vmem:[#allocation23_spill] sm:$0xff]  ;;  %v902_v14 = vmul.f32 %v26423_v57, %v26551_v38  ;;  %v26552_v60 = vld [vmem:[#allocation22_spill] sm:$0xff]  ;;  %v26553_v23 = vld [vmem:[#allocation13_spill] sm:$0xff] }
 0x3fb   : > { %v4150_v22 = vadd.f32 %v4118_v34, %v3691_v11  ;;  %20469 = vset.pattern.permute.xlu1 %v26154_v19  ;;  %17719 = vmatprep.mubr.msk.bf16.mxu0 %vm4696_vm1, %v4819_v13  ;;  %v3688_v10 = vadd.f32 %v3656_v36, %v3228_v62  ;;  %v1165_v34 = vmul.f32 %v21790_v54, %v26548_v17  ;;  %v26554_v29 = vld [vmem:[#allocation59_spill] sm:$0xff]  ;;  %v26555_v36 = vld [vmem:[#allocation21_spill] sm:$0xff]  ;;  %v26561_v38 = vld [vmem:[#allocation132_spill] sm:$0xff] }
 0x3fc   : > { %1997 = vperm.xlu1 %20469, %v1888_v40   ;;  %v1329_v45 = vmul.f32 %v21778_v42, %v26549_v26  ;;  %v1788_v11 = vmul.f32 %v26425_v6, %v26552_v60  ;;  %v738_v13 = vmul.f32 %v26428_v18, %v26553_v23  ;;  %v2247_v58 = vmul.f32 %v21819_v7, %v26555_v36 }
 0x3fd   : > { %v4609_v55 = vadd.f32 %v4577_v53, %v4150_v22  ;;  %v4147_v37 = vadd.f32 %v4115_v44, %v3688_v10  ;;  %v1624_v53 = vmul.f32 %v21804_v52, %v26554_v29  ;;  %v26556_v44 = vld [vmem:[#allocation17_spill] sm:$0xff]  ;;  %v4084_v60 = vmul.f32 %v21876_v56, %v22814_v12 }
 0x3fe   : > { %v4451_v21 = vpop.permute.xlu1 %4450  ;;  %v934_v22 = vadd.f32 %v902_v14, %v738_v13  ;;  %v3920_v14 = vmul.f32 %v21881_v1, %v26561_v38  ;;  %v4543_v36 = vmul.f32 %v21900_v59, %v22858_v16 }
 0x3ff   : > { %v4648_v43 = vadd.f32 %v22446_v5, %v4609_v55  ;;  %v4542_v20 = vmul.f32 %v21900_v59, %v4451_v21  ;;  %v1820_v62 = vadd.f32 %v1788_v11, %v1624_v53  ;;  %v2083_v55 = vmul.f32 %v21816_v27, %v26556_v44  ;;  %v26557_v21 = vld [vmem:[#allocation112_spill] sm:$0xff] }
 0x400   : > { %20470 = vset.pattern.permute.xlu1 %v26157_v33  ;;  %v2706_v10 = vmul.f32 %v21829_v25, %v26557_v21 }
 0x401   : > { %v4680_v0 = vmax.f32 %v4648_v43, 0.0  ;;  %v4574_v63 = vadd.f32 %v4542_v20, %v4378_v35  ;;  %2174 = vperm.xlu1 %20470, %v1888_v40   ;;  %v1361_v40 = vadd.f32 %v1329_v45, %v1165_v34  ;;  %v2279_v20 = vadd.f32 %v2247_v58, %v2083_v55 }
 0x403   : > { %4713 = vst.msk [vmem:[#allocation2 + $0x128] sm:$0xff] %vm4696_vm1, %v4680_v0  ;;  %v4606_v2 = vadd.f32 %v4574_v63, %v4147_v37  ;;  %v22908_v51 = vpop.permute.xlu1 %652  ;;  %v1393_v35 = vadd.f32 %v1361_v40, %v934_v22  ;;  %v26558_v37 = vld [vmem:[#allocation82_spill] sm:$0xff]  ;;  %v22951_v63 = vld [vmem:[#allocation2 + $0x16f] sm:$0xff]  ;;  %v4116_v22 = vadd.f32 %v4084_v60, %v3920_v14 }
 0x404   : > { %26545 = vst [vmem:[#allocation42_spill] sm:$0xff] %v22908_v51  ;;  %v2542_v0 = vmul.f32 %v21844_v49, %v26558_v37  ;;  %v26562_v40 = vld [vmem:[#allocation138_spill] sm:$0xff] }
 0x405   : > { %v4645_v28 = vadd.f32 %v22446_v5, %v4606_v2  ;;  %2178 = vperm.xlu1 %20470, %v20891_v48   ;;  %v1852_v2 = vadd.f32 %v1820_v62, %v1393_v35  ;;  %v3724_v48 = vld [vmem:[#allocation2 + $0x150] sm:$0xff]  ;;  %v4379_v29 = vmul.f32 %v21897_v46, %v26562_v40 }
 0x407   : > { %v4677_v15 = vmax.f32 %v4645_v28, 0.0  ;;  %v2738_v28 = vadd.f32 %v2706_v10, %v2542_v0  ;;  %v2311_v34 = vadd.f32 %v2279_v20, %v1852_v2  ;;  %v4575_v44 = vadd.f32 %v4543_v36, %v4379_v29  ;;  %v26564_v10 = vld [vmem:[#allocation24_spill] sm:$0xff]  ;;  %v26566_v0 = vld [vmem:[#allocation26_spill] sm:$0xff] }
 0x408   : > { %v22911_v39 = vpop.permute.xlu1 %829  ;;  %v23044_v36 = vld [vmem:[#allocation2 + $0x18f] sm:$0xff] }
 0x409   : > { %4710 = vst.msk [vmem:[#allocation2 + $0xf0] sm:$0xff] %vm4696_vm1, %v4677_v15  ;;  %20471 = vset.pattern.permute.xlu1 %v26154_v19  ;;  %v26559_v15 = vld [vmem:[#allocation125_spill] sm:$0xff]  ;;  %v2770_v11 = vadd.f32 %v2738_v28, %v2311_v34  ;;  %v26567_v28 = vld [vmem:[#allocation87_spill] sm:$0xff] }
 0x40a   : > { %3819 = vperm.xlu1 %20471, %v22707_v9   ;;  %v4183_v34 = vld [vmem:[#allocation2 + $0x151] sm:$0xff] }
 0x40c   : > { %v22916_v8 = vpop.permute.xlu1 %833 }
 0x40d   : > { %26546 = vst [vmem:[#allocation41_spill] sm:$0xff] %v22916_v8  ;;  %v26588_v8 = vld [vmem:[#allocation11_spill] sm:$0xff] }
 0x40e   : > { %20472 = vset.pattern.permute.xlu1 %v26157_v33 }
 0x40f   : > { %3999 = vperm.xlu1 %20472, %v22707_v9  }
 0x410   : > { %v4796_v41 = vld [vmem:[#allocation2 + $0xf0] sm:$0xff] }
 0x411   : > { %v22920_v5 = vpop.permute.xlu1 %1084  ;;  %v4820_v3 = vpack.c.bf16 %v4796_v41, %v4795_v50  ;;  %v3461_v50 = vmul.f32 %v21872_v61, %v26559_v15 }
 0x412   : > { %26547 = vst [vmem:[#allocation43_spill] sm:$0xff] %v22920_v5 }
 0x413   : > { %20473 = vset.pattern.permute.xlu1 %v26154_v19  ;;  %17720 = vmatmul.mubr.msk.bf16.gmra.mrb[12].mxu0 %vm4696_vm1, %v4820_v3  ;;  %v26560_v3 = vld [vmem:[#allocation85_spill] sm:$0xff] }
 0x414   : > { %2007 = vperm.xlu1 %20473, %v22922_v47   ;;  %v3625_v17 = vmul.f32 %v21856_v31, %v26560_v3 }
 0x416   : > { %v22931_v9 = vpop.permute.xlu1 %1260  ;;  %v3657_v53 = vadd.f32 %v3625_v17, %v3461_v50  ;;  %v2349_v50 = vld [vmem:[#allocation2 + $0x168] sm:$0xff]  ;;  %v20894_v17 = vld [vmem:[#allocation2 + $0x170] sm:$0xff] }
 0x417   : > { %26550 = vst [vmem:[#allocation44_spill] sm:$0xff] %v22931_v9  ;;  %v1166_v9 = vmul.f32 %v21790_v54, %v26588_v8 }
 0x418   : > { %20474 = vset.pattern.permute.xlu1 %v26157_v33 }
 0x419   : > { %2182 = vperm.xlu1 %20474, %v22922_v47  }
 0x41b   : > { %v2896_v43 = vpop.permute.xlu1 %2895 }
 0x41c   : > { %v3001_v26 = vmul.f32 %v21848_v24, %v2896_v43  ;;  %v22979_v43 = vld [vmem:[%s26051_s2] ss:$0 sm:$0xff] }
 0x41d   : > { %2186 = vperm.xlu1 %20474, %v22951_v63  }
 0x420   : > { %v3077_v41 = vpop.permute.xlu1 %3076 }
 0x421   : > { %v3165_v45 = vmul.f32 %v21851_v4, %v3077_v41  ;;  %20475 = vset.pattern.permute.xlu1 %v26154_v19 }
 0x422   : > { %3829 = vperm.xlu1 %20475, %v3724_v48  }
 0x423   : > { %v3197_v23 = vadd.f32 %v3165_v45, %v3001_v26 }
 0x424   : > { %v22965_v13 = vpop.permute.xlu1 %3080 }
 0x425   : > { %v3229_v58 = vadd.f32 %v3197_v23, %v2770_v11  ;;  %v23023_v11 = vld [vmem:[#allocation2 + $0x170] sm:$0xff] }
 0x426   : > { %20476 = vset.pattern.permute.xlu1 %v26157_v33 }
 0x427   : > { %v3689_v62 = vadd.f32 %v3657_v53, %v3229_v58  ;;  %4007 = vperm.xlu1 %20476, %v3724_v48   ;;  %v26574_v53 = vld [vmem:[#allocation39_spill] sm:$0xff] }
 0x429   : > { %v4148_v55 = vadd.f32 %v4116_v22, %v3689_v62  ;;  %v22972_v12 = vpop.permute.xlu1 %667 }
 0x42a   : > { %26563 = vst [vmem:[#allocation50_spill] sm:$0xff] %v22972_v12 }
 0x42b   : > { %v4607_v21 = vadd.f32 %v4575_v44, %v4148_v55  ;;  %20477 = vset.pattern.permute.xlu1 %v26154_v19 }
 0x42c   : > { %2456 = vperm.xlu1 %20477, %v26564_v10  }
 0x42d   : > { %v4646_v16 = vadd.f32 %v22979_v43, %v4607_v21  ;;  %v23064_v21 = vld [vmem:[#allocation2 + $0x190] sm:$0xff] }
 0x42e   : > { %v22982_v35 = vpop.permute.xlu1 %841  ;;  %26578 = vst [vmem:[#allocation52_spill] sm:$0xff] %v23064_v21 }
 0x42f   : > { %26565 = vst [vmem:[#allocation131_spill] sm:$0xff] %v22982_v35  ;;  %v4678_v20 = vmax.f32 %v4646_v16, 0.0  ;;  %v26585_v35 = vld [vmem:[#allocation84_spill] sm:$0xff] }
 0x430   : > { %20478 = vset.pattern.permute.xlu1 %v26157_v33 }
 0x431   : > { %4711 = vst.msk [vmem:[#allocation2 + $0x108] sm:$0xff] %vm4696_vm1, %v4678_v20  ;;  %2633 = vperm.xlu1 %20478, %v26564_v10   ;;  %v23067_v10 = vld [vmem:[#allocation2 + $0x171] sm:$0xff] }
 0x432   : > { %26579 = vst [vmem:[#allocation55_spill] sm:$0xff] %v23067_v10 }
 0x433   : > { %v22987_v37 = vpop.permute.xlu1 %1089 }
 0x435   : > { %2637 = vperm.xlu1 %20478, %v26566_v0   ;;  %v23075_v0 = vpop.permute.xlu0 %1272 }
 0x436   : > { %26581 = vst [vmem:[#allocation103_spill] sm:$0xff] %v23075_v0 }
 0x438   : > { %v22990_v2 = vpop.permute.xlu1 %1264 }
 0x439   : > { %20479 = vset.pattern.permute.xlu1 %v26154_v19 }
 0x43a   : > { %4278 = vperm.xlu1 %20479, %v26567_v28  }
 0x43c   : > { %v22994_v48 = vpop.permute.xlu1 %1268 }
 0x43d   : > { %26568 = vst [vmem:[#allocation53_spill] sm:$0xff] %v22994_v48  ;;  %v739_v48 = vmul.f32 %v26428_v18, %v26585_v35 }
 0x43e   : > { %20480 = vset.pattern.permute.xlu1 %v26157_v33 }
 0x43f   : > { %4458 = vperm.xlu1 %20480, %v26567_v28  }
 0x441   : > { %v22998_v15 = vpop.permute.xlu1 %2910 }
 0x443   : > { %20481 = vset.pattern.permute.xlu1 %v26154_v19 }
 0x444   : > { %2466 = vperm.xlu1 %20481, %v2349_v50  }
 0x446   : > { %v23001_v41 = vpop.permute.xlu1 %3088 }
 0x448   : > { %20482 = vset.pattern.permute.xlu1 %v26157_v33 }
 0x449   : > { %2641 = vperm.xlu1 %20482, %v2349_v50   ;;  %v1433_v50 = vld [vmem:[#allocation2 + $0x169] sm:$0xff] }
 0x44b   : > { %v23004_v3 = vpop.permute.xlu1 %1538 }
 0x44c   : > { %26569 = vst [vmem:[#allocation51_spill] sm:$0xff] %v23004_v3 }
 0x44d   : > { %2645 = vperm.xlu1 %20482, %v20894_v17   ;;  %v23081_v17 = vpop.permute.xlu0 %853 }
 0x44e   : > { %26582 = vst [vmem:[#allocation40_spill] sm:$0xff] %v23081_v17  ;;  %v26586_v17 = vld [vmem:[#allocation94_spill] sm:$0xff] }
 0x450   : > { %v23006_v26 = vpop.permute.xlu1 %1715 }
 0x451   : > { %26570 = vst [vmem:[#allocation58_spill] sm:$0xff] %v23006_v26  ;;  %20483 = vset.pattern.permute.xlu1 %v26154_v19 }
 0x452   : > { %4288 = vperm.xlu1 %20483, %v4183_v34  }
 0x454   : > { %v23009_v45 = vpop.permute.xlu1 %1719 }
 0x455   : > { %26571 = vst [vmem:[#allocation45_spill] sm:$0xff] %v23009_v45  ;;  %v26587_v45 = vld [vmem:[#allocation12_spill] sm:$0xff] }
 0x456   : > { %20484 = vset.pattern.permute.xlu1 %v26157_v33  ;;  %v903_v5 = vmul.f32 %v26423_v57, %v26587_v45 }
 0x457   : > { %4466 = vperm.xlu1 %20484, %v4183_v34  }
 0x458   : > { %v935_v45 = vadd.f32 %v903_v5, %v739_v48 }
 0x459   : > { %v23012_v38 = vpop.permute.xlu1 %3360 }
 0x45b   : > { %20485 = vset.pattern.permute.xlu1 %v26154_v19 }
 0x45c   : > { %672 = vperm.xlu1 %20485, %v22922_v47  }
 0x45e   : > { %v23016_v14 = vpop.permute.xlu1 %3540 }
 0x460   : > { %20486 = vset.pattern.permute.xlu1 %v26157_v33 }
 0x461   : > { %845 = vperm.xlu1 %20486, %v22922_v47  }
 0x463   : > { %v23020_v60 = vpop.permute.xlu1 %1548 }
 0x465   : > { %849 = vperm.xlu1 %20486, %v22951_v63  }
 0x468   : > { %v23025_v23 = vpop.permute.xlu1 %1723 }
 0x469   : > { %20487 = vset.pattern.permute.xlu1 %v26154_v19 }
 0x46a   : > { %1104 = vperm.xlu1 %20487, %v23023_v11  }
 0x46c   : > { %v23029_v40 = vpop.permute.xlu1 %1727 }
 0x46d   : > { %26572 = vst [vmem:[#allocation68_spill] sm:$0xff] %v23029_v40  ;;  %v20896_v40 = vld [vmem:[#allocation2 + $0x171] sm:$0xff] }
 0x46e   : > { %20488 = vset.pattern.permute.xlu1 %v26157_v33 }
 0x46f   : > { %1276 = vperm.xlu1 %20488, %v23023_v11  }
 0x471   : > { %v23033_v29 = vpop.permute.xlu1 %3370 }
 0x473   : > { %20489 = vset.pattern.permute.xlu1 %v26154_v19 }
 0x474   : > { %2915 = vperm.xlu1 %20489, %v22812_v30  }
 0x476   : > { %v23037_v47 = vpop.permute.xlu1 %3548 }
 0x478   : > { %20490 = vset.pattern.permute.xlu1 %v26157_v33 }
 0x479   : > { %3092 = vperm.xlu1 %20490, %v22812_v30   ;;  %v23056_v30 = vld [vmem:[#allocation2 + $0x188] sm:$0xff] }
 0x47a   : > { %26577 = vst [vmem:[#allocation48_spill] sm:$0xff] %v23056_v30 }
 0x47b   : > { %v23041_v63 = vpop.permute.xlu1 %1997 }
 0x47c   : > { %26573 = vst [vmem:[#allocation70_spill] sm:$0xff] %v23041_v63  ;;  %v26593_v63 = vld [vmem:[#allocation28_spill] sm:$0xff] }
 0x47d   : > { %3096 = vperm.xlu1 %20490, %v26574_v53   ;;  %v23087_v53 = vpop.permute.xlu0 %3100 }
 0x480   : > { %v23046_v58 = vpop.permute.xlu1 %2174 }
 0x481   : > { %26575 = vst [vmem:[#allocation91_spill] sm:$0xff] %v23046_v58  ;;  %20491 = vset.pattern.permute.xlu1 %v26154_v19  ;;  %v26594_v58 = vld [vmem:[#allocation37_spill] sm:$0xff] }
 0x482   : > { %687 = vperm.xlu1 %20491, %v23044_v36  }
 0x484   : > { %v23050_v22 = vpop.permute.xlu1 %2178 }
 0x485   : > { %26576 = vst [vmem:[#allocation89_spill] sm:$0xff] %v23050_v22  ;;  %v1625_v22 = vmul.f32 %v21804_v52, %v26586_v17  ;;  %v2248_v17 = vmul.f32 %v21819_v7, %v26593_v63  ;;  %v26597_v63 = vld [vmem:[#allocation116_spill] sm:$0xff] }
 0x486   : > { %20492 = vset.pattern.permute.xlu1 %v26157_v33  ;;  %v3002_v5 = vmul.f32 %v21848_v24, %v26597_v63 }
 0x487   : > { %857 = vperm.xlu1 %20492, %v23044_v36  }
 0x489   : > { %v23054_v62 = vpop.permute.xlu1 %3819 }
 0x48b   : > { %20493 = vset.pattern.permute.xlu1 %v26154_v19 }
 0x48c   : > { %1109 = vperm.xlu1 %20493, %v23056_v30  }
 0x48e   : > { %v4000_v44 = vpop.permute.xlu1 %3999 }
 0x490   : > { %20494 = vset.pattern.permute.xlu1 %v26157_v33 }
 0x491   : > { %1280 = vperm.xlu1 %20494, %v23056_v30  }
 0x493   : > { %v23062_v55 = vpop.permute.xlu1 %2007 }
 0x495   : > { %1284 = vperm.xlu1 %20494, %v23064_v21   ;;  %v23103_v21 = vpop.permute.xlu0 %3552 }
 0x496   : > { %26590 = vst [vmem:[#allocation150_spill] sm:$0xff] %v23103_v21  ;;  %v26596_v21 = vld [vmem:[#allocation107_spill] sm:$0xff] }
 0x498   : > { %v23069_v16 = vpop.permute.xlu1 %2182 }
 0x499   : > { %20495 = vset.pattern.permute.xlu1 %v26154_v19  ;;  %v23118_v51 = vpop.permute.xlu0 %3560 }
 0x49a   : > { %2930 = vperm.xlu1 %20495, %v23067_v10  }
 0x49c   : > { %v23073_v20 = vpop.permute.xlu1 %2186 }
 0x49d   : > { %26580 = vst [vmem:[#allocation35_spill] sm:$0xff] %v23073_v20  ;;  %v26584_v20 = vld [vmem:[#allocation34_spill] sm:$0xff] }
 0x49e   : > { %20496 = vset.pattern.permute.xlu1 %v26157_v33  ;;  %v1330_v12 = vmul.f32 %v21778_v42, %v26584_v20  ;;  %v3267_v20 = vld [vmem:[#allocation2 + $0x16f] sm:$0xff] }
 0x49f   : > { %3104 = vperm.xlu1 %20496, %v23067_v10  }
 0x4a1   : > { %v23079_v28 = vpop.permute.xlu1 %3829 }
 0x4a3   : > { %20497 = vset.pattern.permute.xlu1 %v26154_v19 }
 0x4a4   : > { %1558 = vperm.xlu1 %20497, %v1433_v50  }
 0x4a6   : > { %v23084_v34 = vpop.permute.xlu1 %4007 }
 0x4a8   : > { %20498 = vset.pattern.permute.xlu1 %v26157_v33 }
 0x4a9   : > { %1731 = vperm.xlu1 %20498, %v1433_v50   ;;  %v26589_v50 = vld [vmem:[#allocation15_spill] sm:$0xff] }
 0x4aa   : > { %v1789_v10 = vmul.f32 %v26425_v6, %v26589_v50  ;;  %v2707_v50 = vmul.f32 %v21829_v25, %v26594_v58  ;;  %v3626_v58 = vmul.f32 %v21856_v31, %v23016_v14 }
 0x4ab   : > { %v23089_v0 = vpop.permute.xlu1 %2456 }
 0x4ac   : > { %26583 = vst [vmem:[#allocation97_spill] sm:$0xff] %v23089_v0  ;;  %v1362_v0 = vadd.f32 %v1330_v12, %v1166_v9  ;;  %v1821_v8 = vadd.f32 %v1789_v10, %v1625_v22  ;;  %v3166_v12 = vmul.f32 %v21851_v4, %v22965_v13  ;;  %v23130_v13 = vld [vmem:[#allocation2 + $0x189] sm:$0xff] }
 0x4ad   : > { %1735 = vperm.xlu1 %20498, %v20896_v40   ;;  %v26592_v40 = vld [vmem:[#allocation102_spill] sm:$0xff] }
 0x4ae   : > { %v2084_v35 = vmul.f32 %v21816_v27, %v26592_v40  ;;  %v1394_v26 = vadd.f32 %v1362_v0, %v935_v45  ;;  %v3462_v0 = vmul.f32 %v21872_v61, %v23012_v38  ;;  %v4085_v40 = vmul.f32 %v21876_v56, %v4000_v44 }
 0x4af   : > { %v1335_v38 = vmul.f32 %v21778_v42, %v22990_v2  ;;  %v1794_v2 = vmul.f32 %v26425_v6, %v23025_v23 }
 0x4b0   : > { %v23105_v30 = vpop.permute.xlu1 %2633  ;;  %v2280_v9 = vadd.f32 %v2248_v17, %v2084_v35  ;;  %v1853_v48 = vadd.f32 %v1821_v8, %v1394_v26  ;;  %v23132_v17 = vpop.permute.xlu0 %4011  ;;  %v3658_v63 = vadd.f32 %v3626_v58, %v3462_v0  ;;  %v3921_v26 = vmul.f32 %v21881_v1, %v23054_v62 }
 0x4b1   : > { %26591 = vst [vmem:[#allocation122_spill] sm:$0xff] %v23105_v30  ;;  %20499 = vset.pattern.permute.xlu1 %v26154_v19  ;;  %v2543_v30 = vmul.f32 %v21844_v49, %v26596_v21  ;;  %v3198_v21 = vadd.f32 %v3166_v12, %v3002_v5  ;;  %v26599_v5 = vld [vmem:[#allocation38_spill] sm:$0xff]  ;;  %v1630_v0 = vmul.f32 %v21804_v52, %v23020_v60 }
 0x4b2   : > { %3380 = vperm.xlu1 %20499, %v3267_v20   ;;  %v2312_v10 = vadd.f32 %v2280_v9, %v1853_v48  ;;  %v26598_v9 = vld [vmem:[#allocation118_spill] sm:$0xff]  ;;  %v908_v62 = vmul.f32 %v26423_v57, %v26599_v5 }
 0x4b3   : > { %v2739_v22 = vadd.f32 %v2707_v50, %v2543_v30  ;;  %v4117_v30 = vadd.f32 %v4085_v40, %v3921_v26  ;;  %v744_v12 = vmul.f32 %v26428_v18, %v26598_v9  ;;  %v2253_v40 = vmul.f32 %v21819_v7, %v23069_v16  ;;  %v26603_v60 = vld [vmem:[#allocation98_spill] sm:$0xff]  ;;  %v26605_v9 = vld [vmem:[#allocation61_spill] sm:$0xff] }
 0x4b4   : > { %v23114_v3 = vpop.permute.xlu1 %2637  ;;  %v4020_v48 = vpop.permute.xlu0 %4019  ;;  %v1627_v16 = vmul.f32 %v21804_v52, %v26603_v60  ;;  %v905_v5 = vmul.f32 %v26423_v57, %v26605_v9 }
 0x4b5   : > { %26595 = vst [vmem:[#allocation147_spill] sm:$0xff] %v23114_v3  ;;  %v2771_v45 = vadd.f32 %v2739_v22, %v2312_v10  ;;  %v1171_v22 = vmul.f32 %v21790_v54, %v22987_v37  ;;  %v26601_v37 = vld [vmem:[#allocation29_spill] sm:$0xff]  ;;  %v940_v23 = vadd.f32 %v908_v62, %v744_v12  ;;  %v26606_v12 = vld [vmem:[#allocation20_spill] sm:$0xff]  ;;  %v26610_v3 = vld [vmem:[#allocation27_spill] sm:$0xff] }
 0x4b6   : > { %20500 = vset.pattern.permute.xlu1 %v26157_v33  ;;  %v1791_v62 = vmul.f32 %v26425_v6, %v26606_v12  ;;  %v2250_v9 = vmul.f32 %v21819_v7, %v26610_v3  ;;  %v3171_v12 = vmul.f32 %v21851_v4, %v23087_v53  ;;  %v2709_v3 = vmul.f32 %v21829_v25, %v22884_v32  ;;  %v26612_v53 = vld [vmem:[#allocation165_spill] sm:$0xff]  ;;  %v26613_v32 = vld [vmem:[#allocation170_spill] sm:$0xff] }
 0x4b7   : > { %3556 = vperm.xlu1 %20500, %v3267_v20   ;;  %v3230_v14 = vadd.f32 %v3198_v21, %v2771_v45  ;;  %v1367_v21 = vadd.f32 %v1335_v38, %v1171_v22  ;;  %v26607_v22 = vld [vmem:[#allocation111_spill] sm:$0xff] }
 0x4b9   : > { %v4279_v35 = vpop.permute.xlu1 %4278  ;;  %v3690_v44 = vadd.f32 %v3658_v63, %v3230_v14  ;;  %v26600_v63 = vld [vmem:[#allocation92_spill] sm:$0xff]  ;;  %v1332_v14 = vmul.f32 %v21778_v42, %v26601_v37 }
 0x4ba   : > { %v4380_v8 = vmul.f32 %v21897_v46, %v4279_v35  ;;  %v1168_v26 = vmul.f32 %v21790_v54, %v26600_v63  ;;  %v26609_v37 = vld [vmem:[#allocation32_spill] sm:$0xff] }
 0x4bb   : > { %20501 = vset.pattern.permute.xlu1 %v26154_v19  ;;  %v4149_v58 = vadd.f32 %v4117_v30, %v3690_v44  ;;  %v1826_v30 = vadd.f32 %v1794_v2, %v1630_v0  ;;  %v23163_v44 = vld [vmem:[#allocation2 + $0x191] sm:$0xff]  ;;  %v23176_v2 = vpop.permute.xlu0 %4470  ;;  %v741_v60 = vmul.f32 %v26428_v18, %v26609_v37 }
 0x4bc   : > { %1568 = vperm.xlu1 %20501, %v23130_v13   ;;  %26602 = vst [vmem:[#allocation46_spill] sm:$0xff] %v23163_v44 }
 0x4be   : > { %v4459_v20 = vpop.permute.xlu1 %4458 }
 0x4bf   : > { %v4544_v50 = vmul.f32 %v21900_v59, %v4459_v20  ;;  %v2089_v20 = vmul.f32 %v21816_v27, %v23062_v55  ;;  %v2545_v55 = vmul.f32 %v21844_v49, %v26607_v22 }
 0x4c0   : > { %20502 = vset.pattern.permute.xlu1 %v26157_v33 }
 0x4c1   : > { %v4576_v10 = vadd.f32 %v4544_v50, %v4380_v8  ;;  %1739 = vperm.xlu1 %20502, %v23130_v13   ;;  %v26604_v8 = vld [vmem:[#allocation105_spill] sm:$0xff] }
 0x4c2   : > { %v2086_v50 = vmul.f32 %v21816_v27, %v26604_v8  ;;  %v1364_v8 = vadd.f32 %v1332_v14, %v1168_v26  ;;  %v937_v26 = vadd.f32 %v905_v5, %v741_v60  ;;  %v1823_v14 = vadd.f32 %v1791_v62, %v1627_v16  ;;  %v4479_v60 = vpop.permute.xlu0 %4478 }
 0x4c3   : > { %v4608_v35 = vadd.f32 %v4576_v10, %v4149_v58  ;;  %v2467_v45 = vpop.permute.xlu1 %2466  ;;  %v1399_v58 = vadd.f32 %v1367_v21, %v940_v23  ;;  %v2285_v10 = vadd.f32 %v2253_v40, %v2089_v20  ;;  %v26611_v23 = vld [vmem:[#allocation159_spill] sm:$0xff]  ;;  %v3168_v16 = vmul.f32 %v21851_v4, %v23001_v41 }
 0x4c4   : > { %v2548_v21 = vmul.f32 %v21844_v49, %v2467_v45  ;;  %v3467_v20 = vmul.f32 %v21872_v61, %v26611_v23  ;;  %v3631_v45 = vmul.f32 %v21856_v31, %v23118_v51  ;;  %v4385_v62 = vmul.f32 %v21897_v46, %v26613_v32 }
 0x4c5   : > { %v4647_v38 = vadd.f32 %v22979_v43, %v4608_v35  ;;  %1743 = vperm.xlu1 %20502, %v23163_v44   ;;  %v26608_v35 = vld [vmem:[#allocation154_spill] sm:$0xff]  ;;  %v1858_v22 = vadd.f32 %v1826_v30, %v1399_v58  ;;  %v3926_v30 = vmul.f32 %v21881_v1, %v26612_v53  ;;  %v1396_v58 = vadd.f32 %v1364_v8, %v937_v26 }
 0x4c6   : > { %v3007_v63 = vmul.f32 %v21848_v24, %v26608_v35  ;;  %v2282_v35 = vadd.f32 %v2250_v9, %v2086_v50  ;;  %v4549_v51 = vmul.f32 %v21900_v59, %v4479_v60  ;;  %v3004_v8 = vmul.f32 %v21848_v24, %v22998_v15 }
 0x4c7   : > { %v4679_v0 = vmax.f32 %v4647_v38, 0.0  ;;  %v2317_v38 = vadd.f32 %v2285_v10, %v1858_v22  ;;  %v1855_v53 = vadd.f32 %v1823_v14, %v1396_v58  ;;  %v2741_v10 = vadd.f32 %v2709_v3, %v2545_v55  ;;  %v4797_v22 = vld [vmem:[#allocation2 + $0x108] sm:$0xff] }
 0x4c8   : > { %v2642_v44 = vpop.permute.xlu1 %2641  ;;  %v3203_v37 = vadd.f32 %v3171_v12, %v3007_v63  ;;  %v3628_v41 = vmul.f32 %v21856_v31, %v23037_v47  ;;  %v3200_v12 = vadd.f32 %v3168_v16, %v3004_v8  ;;  %v3464_v55 = vmul.f32 %v21872_v61, %v23033_v29  ;;  %v1892_v14 = vld [vmem:[#allocation2 + $0x187] sm:$0xff] }
 0x4c9   : > { %4712 = vst.msk [vmem:[#allocation2 + $0x110] sm:$0xff] %vm4696_vm1, %v4679_v0  ;;  %v2712_v40 = vmul.f32 %v21829_v25, %v2642_v44  ;;  %20503 = vset.pattern.permute.xlu1 %v26154_v19  ;;  %v4090_v0 = vmul.f32 %v21876_v56, %v4020_v48  ;;  %v3663_v48 = vadd.f32 %v3631_v45, %v3467_v20 }
 0x4ca   : > { %3390 = vperm.xlu1 %20503, %v23044_v36   ;;  %v2314_v63 = vadd.f32 %v2282_v35, %v1855_v53  ;;  %v4087_v15 = vmul.f32 %v21876_v56, %v23084_v34  ;;  %v4581_v3 = vadd.f32 %v4549_v51, %v4385_v62  ;;  %v3660_v45 = vadd.f32 %v3628_v41, %v3464_v55  ;;  %v20898_v53 = vld [vmem:[#allocation2 + $0x18f] sm:$0xff]  ;;  %v26619_v55 = vld [vmem:[#allocation30_spill] sm:$0xff] }
 0x4cb   : > { %v2744_v44 = vadd.f32 %v2712_v40, %v2548_v21  ;;  %v4122_v9 = vadd.f32 %v4090_v0, %v3926_v30 }
 0x4cc   : > { %v23202_v5 = vpop.permute.xlu1 %2645  ;;  %v2773_v47 = vadd.f32 %v2741_v10, %v2314_v63  ;;  %v23240_v63 = vld [vmem:[#allocation2 + $0x1a7] sm:$0xff] }
 0x4cd   : > { %v2776_v23 = vadd.f32 %v2744_v44, %v2317_v38 }
 0x4ce   : > { %20504 = vset.pattern.permute.xlu1 %v26157_v33  ;;  %v3232_v29 = vadd.f32 %v3200_v12, %v2773_v47  ;;  %v906_v12 = vmul.f32 %v26423_v57, %v22911_v39  ;;  %v26622_v47 = vld [vmem:[#allocation51_spill] sm:$0xff] }
 0x4cf   : > { %v3235_v50 = vadd.f32 %v3203_v37, %v2776_v23  ;;  %3564 = vperm.xlu1 %20504, %v23044_v36   ;;  %v3923_v36 = vmul.f32 %v21881_v1, %v23079_v28  ;;  %v1628_v39 = vmul.f32 %v21804_v52, %v26622_v47  ;;  %v26630_v47 = vld [vmem:[#allocation167_spill] sm:$0xff] }
 0x4d0   : > { %v4798_v21 = vld [vmem:[#allocation2 + $0x110] sm:$0xff]  ;;  %v3692_v58 = vadd.f32 %v3660_v45, %v3232_v29  ;;  %v26623_v45 = vld [vmem:[#allocation91_spill] sm:$0xff] }
 0x4d1   : > { %v3695_v40 = vadd.f32 %v3663_v48, %v3235_v50  ;;  %v4289_v26 = vpop.permute.xlu1 %4288  ;;  %v4821_v20 = vpack.c.bf16 %v4798_v21, %v4797_v22  ;;  %v4119_v38 = vadd.f32 %v4087_v15, %v3923_v36  ;;  %v4799_v48 = vld [vmem:[#allocation2 + $0x128] sm:$0xff]  ;;  %v26618_v21 = vld [vmem:[#allocation115_spill] sm:$0xff]  ;;  %v1333_v15 = vmul.f32 %v21778_v42, %v26619_v55 }
 0x4d2   : > { %v4382_v35 = vmul.f32 %v21897_v46, %v4289_v26  ;;  %v2251_v36 = vmul.f32 %v21819_v7, %v26623_v45 }
 0x4d3   : > { %v4154_v30 = vadd.f32 %v4122_v9, %v3695_v40  ;;  %20505 = vset.pattern.permute.xlu1 %v26154_v19  ;;  %17723 = vmatprep.mubr.msk.bf16.mxu0 %vm4696_vm1, %v4821_v20  ;;  %v4151_v28 = vadd.f32 %v4119_v38, %v3692_v58  ;;  %v26620_v40 = vld [vmem:[#allocation42_spill] sm:$0xff] }
 0x4d4   : > { %2017 = vperm.xlu1 %20505, %v1892_v14   ;;  %v742_v26 = vmul.f32 %v26428_v18, %v26620_v40  ;;  %v26621_v20 = vld [vmem:[#allocation58_spill] sm:$0xff] }
 0x4d5   : > { %v4613_v44 = vadd.f32 %v4581_v3, %v4154_v30  ;;  %v26624_v38 = vld [vmem:[#allocation70_spill] sm:$0xff] }
 0x4d6   : > { %v4467_v34 = vpop.permute.xlu1 %4466  ;;  %v938_v3 = vadd.f32 %v906_v12, %v742_v26  ;;  %v4088_v26 = vmul.f32 %v21876_v56, %v23132_v17 }
 0x4d7   : > { %v4652_v0 = vadd.f32 %v22979_v43, %v4613_v44  ;;  %v4546_v16 = vmul.f32 %v21900_v59, %v4467_v34  ;;  %v2087_v44 = vmul.f32 %v21816_v27, %v26624_v38  ;;  %v26625_v34 = vld [vmem:[#allocation122_spill] sm:$0xff] }
 0x4d8   : > { %20506 = vset.pattern.permute.xlu1 %v26157_v33  ;;  %v2710_v58 = vmul.f32 %v21829_v25, %v26625_v34 }
 0x4d9   : > { %v4684_v32 = vmax.f32 %v4652_v0, 0.0  ;;  %v4578_v62 = vadd.f32 %v4546_v16, %v4382_v35  ;;  %2190 = vperm.xlu1 %20506, %v1892_v14   ;;  %v1792_v14 = vmul.f32 %v26425_v6, %v26621_v20  ;;  %v2283_v16 = vadd.f32 %v2251_v36, %v2087_v44 }
 0x4da   : > { %v4547_v36 = vmul.f32 %v21900_v59, %v23176_v2 }
 0x4db   : > { %4717 = vst.msk [vmem:[#allocation2 + $0x168] sm:$0xff] %vm4696_vm1, %v4684_v32  ;;  %v4610_v37 = vadd.f32 %v4578_v62, %v4151_v28  ;;  %v23226_v60 = vpop.permute.xlu1 %672  ;;  %v1824_v29 = vadd.f32 %v1792_v14, %v1628_v39  ;;  %v26626_v28 = vld [vmem:[#allocation97_spill] sm:$0xff]  ;;  %v4383_v39 = vmul.f32 %v21897_v46, %v26630_v47 }
 0x4dc   : > { %26614 = vst [vmem:[#allocation95_spill] sm:$0xff] %v23226_v60  ;;  %v2546_v32 = vmul.f32 %v21844_v49, %v26626_v28  ;;  %v23269_v62 = vld [vmem:[#allocation2 + $0x1af] sm:$0xff] }
 0x4dd   : > { %v4649_v23 = vadd.f32 %v22979_v43, %v4610_v37  ;;  %2194 = vperm.xlu1 %20506, %v20898_v53   ;;  %v3728_v53 = vld [vmem:[#allocation2 + $0x190] sm:$0xff]  ;;  %v4579_v44 = vadd.f32 %v4547_v36, %v4383_v39 }
 0x4de   : > { %v23357_v36 = vld [vmem:[#allocation2 + $0x1cf] sm:$0xff] }
 0x4df   : > { %v4681_v51 = vmax.f32 %v4649_v23, 0.0  ;;  %v2742_v23 = vadd.f32 %v2710_v58, %v2546_v32  ;;  %v26634_v32 = vld [vmem:[#allocation52_spill] sm:$0xff] }
 0x4e0   : > { %v23229_v10 = vpop.permute.xlu1 %845 }
 0x4e1   : > { %4714 = vst.msk [vmem:[#allocation2 + $0x130] sm:$0xff] %vm4696_vm1, %v4681_v51  ;;  %20507 = vset.pattern.permute.xlu1 %v26154_v19  ;;  %v26627_v51 = vld [vmem:[#allocation156_spill] sm:$0xff] }
 0x4e2   : > { %3839 = vperm.xlu1 %20507, %v23023_v11  }
 0x4e4   : > { %v23234_v8 = vpop.permute.xlu1 %849 }
 0x4e5   : > { %26615 = vst [vmem:[#allocation149_spill] sm:$0xff] %v23234_v8  ;;  %v26656_v8 = vld [vmem:[#allocation45_spill] sm:$0xff] }
 0x4e6   : > { %20508 = vset.pattern.permute.xlu1 %v26157_v33 }
 0x4e7   : > { %4015 = vperm.xlu1 %20508, %v23023_v11   ;;  %v1169_v11 = vmul.f32 %v21790_v54, %v26618_v21 }
 0x4e8   : > { %v4800_v41 = vld [vmem:[#allocation2 + $0x130] sm:$0xff] }
 0x4e9   : > { %v23238_v50 = vpop.permute.xlu1 %1104  ;;  %v4822_v9 = vpack.c.bf16 %v4800_v41, %v4799_v48  ;;  %v1365_v30 = vadd.f32 %v1333_v15, %v1169_v11  ;;  %v3465_v48 = vmul.f32 %v21872_v61, %v26627_v51  ;;  %v26629_v15 = vld [vmem:[#allocation163_spill] sm:$0xff] }
 0x4ea   : > { %26616 = vst [vmem:[#allocation142_spill] sm:$0xff] %v23238_v50  ;;  %v3924_v40 = vmul.f32 %v21881_v1, %v26629_v15 }
 0x4eb   : > { %20509 = vset.pattern.permute.xlu1 %v26154_v19  ;;  %17724 = vmatmul.mubr.msk.bf16.gmra.mrb[16].mxu0 %vm4696_vm1, %v4822_v9  ;;  %v1397_v35 = vadd.f32 %v1365_v30, %v938_v3  ;;  %v26628_v9 = vld [vmem:[#allocation150_spill] sm:$0xff] }
 0x4ec   : > { %2027 = vperm.xlu1 %20509, %v23240_v63   ;;  %v3629_v12 = vmul.f32 %v21856_v31, %v26628_v9 }
 0x4ed   : > { %v1856_v37 = vadd.f32 %v1824_v29, %v1397_v35  ;;  %v4120_v29 = vadd.f32 %v4088_v26, %v3924_v40 }
 0x4ee   : > { %v23247_v22 = vpop.permute.xlu1 %1276  ;;  %v3661_v45 = vadd.f32 %v3629_v12, %v3465_v48  ;;  %v2353_v48 = vld [vmem:[#allocation2 + $0x1a8] sm:$0xff]  ;;  %v20900_v12 = vld [vmem:[#allocation2 + $0x1b0] sm:$0xff] }
 0x4ef   : > { %26617 = vst [vmem:[#allocation31_spill] sm:$0xff] %v23247_v22  ;;  %v2315_v21 = vadd.f32 %v2283_v16, %v1856_v37  ;;  %v1793_v22 = vmul.f32 %v26425_v6, %v26656_v8 }
 0x4f0   : > { %20510 = vset.pattern.permute.xlu1 %v26157_v33 }
 0x4f1   : > { %2198 = vperm.xlu1 %20510, %v23240_v63   ;;  %v2774_v20 = vadd.f32 %v2742_v23, %v2315_v21  ;;  %v26635_v23 = vld [vmem:[#allocation55_spill] sm:$0xff]  ;;  %v4187_v21 = vld [vmem:[#allocation2 + $0x191] sm:$0xff] }
 0x4f3   : > { %v2916_v0 = vpop.permute.xlu1 %2915 }
 0x4f4   : > { %v3005_v11 = vmul.f32 %v21848_v24, %v2916_v0  ;;  %v26632_v0 = vld [vmem:[#allocation48_spill] sm:$0xff] }
 0x4f5   : > { %2202 = vperm.xlu1 %20510, %v23269_v62  }
 0x4f8   : > { %v3093_v41 = vpop.permute.xlu1 %3092 }
 0x4f9   : > { %v3169_v55 = vmul.f32 %v21851_v4, %v3093_v41  ;;  %20511 = vset.pattern.permute.xlu1 %v26154_v19 }
 0x4fa   : > { %3849 = vperm.xlu1 %20511, %v3728_v53  }
 0x4fb   : > { %v3201_v14 = vadd.f32 %v3169_v55, %v3005_v11 }
 0x4fc   : > { %v23283_v3 = vpop.permute.xlu1 %3096 }
 0x4fd   : > { %v3233_v30 = vadd.f32 %v3201_v14, %v2774_v20  ;;  %v23336_v20 = vld [vmem:[#allocation2 + $0x1b0] sm:$0xff] }
 0x4fe   : > { %20512 = vset.pattern.permute.xlu1 %v26157_v33 }
 0x4ff   : > { %v3693_v38 = vadd.f32 %v3661_v45, %v3233_v30  ;;  %4023 = vperm.xlu1 %20512, %v3728_v53   ;;  %v26642_v45 = vld [vmem:[#allocation46_spill] sm:$0xff] }
 0x501   : > { %v4152_v34 = vadd.f32 %v4120_v29, %v3693_v38  ;;  %v23290_v17 = vpop.permute.xlu1 %687 }
 0x502   : > { %26631 = vst [vmem:[#allocation25_spill] sm:$0xff] %v23290_v17 }
 0x503   : > { %v4611_v58 = vadd.f32 %v4579_v44, %v4152_v34  ;;  %20513 = vset.pattern.permute.xlu1 %v26154_v19 }
 0x504   : > { %2476 = vperm.xlu1 %20513, %v26632_v0  }
 0x505   : > { %v4650_v35 = vadd.f32 %v22979_v43, %v4611_v58  ;;  %v23377_v58 = vld [vmem:[#allocation2 + $0x1d0] sm:$0xff] }
 0x506   : > { %v23295_v16 = vpop.permute.xlu1 %857  ;;  %26646 = vst [vmem:[#allocation212_spill] sm:$0xff] %v23377_v58 }
 0x507   : > { %26633 = vst [vmem:[#allocation54_spill] sm:$0xff] %v23295_v16  ;;  %v4682_v2 = vmax.f32 %v4650_v35, 0.0 }
 0x508   : > { %20514 = vset.pattern.permute.xlu1 %v26157_v33 }
 0x509   : > { %4715 = vst.msk [vmem:[#allocation2 + $0x148] sm:$0xff] %vm4696_vm1, %v4682_v2  ;;  %2649 = vperm.xlu1 %20514, %v26632_v0   ;;  %v23380_v0 = vld [vmem:[#allocation2 + $0x1b1] sm:$0xff]  ;;  %v23386_v2 = vpop.permute.xlu0 %1288 }
 0x50a   : > { %26647 = vst [vmem:[#allocation101_spill] sm:$0xff] %v23380_v0  ;;  %26648 = vst [vmem:[#allocation108_spill] sm:$0xff] %v23386_v2  ;;  %v3271_v2 = vld [vmem:[#allocation2 + $0x1af] sm:$0xff] }
 0x50b   : > { %v23300_v28 = vpop.permute.xlu1 %1109 }
 0x50d   : > { %2653 = vperm.xlu1 %20514, %v26634_v32  }
 0x510   : > { %v23303_v37 = vpop.permute.xlu1 %1280 }
 0x511   : > { %20515 = vset.pattern.permute.xlu1 %v26154_v19 }
 0x512   : > { %4298 = vperm.xlu1 %20515, %v26635_v23  }
 0x514   : > { %v23307_v53 = vpop.permute.xlu1 %1284 }
 0x515   : > { %26636 = vst [vmem:[#allocation80_spill] sm:$0xff] %v23307_v53  ;;  %v20902_v53 = vld [vmem:[#allocation2 + $0x1b1] sm:$0xff] }
 0x516   : > { %20516 = vset.pattern.permute.xlu1 %v26157_v33 }
 0x517   : > { %4474 = vperm.xlu1 %20516, %v26635_v23   ;;  %v23392_v23 = vpop.permute.xlu0 %869 }
 0x518   : > { %26650 = vst [vmem:[#allocation63_spill] sm:$0xff] %v23392_v23  ;;  %v26654_v23 = vld [vmem:[#allocation41_spill] sm:$0xff] }
 0x519   : > { %v23311_v51 = vpop.permute.xlu1 %2930 }
 0x51b   : > { %20517 = vset.pattern.permute.xlu1 %v26154_v19 }
 0x51c   : > { %2486 = vperm.xlu1 %20517, %v2353_v48  }
 0x51e   : > { %v23314_v41 = vpop.permute.xlu1 %3104 }
 0x520   : > { %20518 = vset.pattern.permute.xlu1 %v26157_v33 }
 0x521   : > { %2657 = vperm.xlu1 %20518, %v2353_v48  }
 0x523   : > { %v23317_v9 = vpop.permute.xlu1 %1558 }
 0x524   : > { %26637 = vst [vmem:[#allocation162_spill] sm:$0xff] %v23317_v9 }
 0x525   : > { %2661 = vperm.xlu1 %20518, %v20900_v12   ;;  %v1437_v12 = vld [vmem:[#allocation2 + $0x1a9] sm:$0xff] }
 0x528   : > { %v23319_v11 = vpop.permute.xlu1 %1731 }
 0x529   : > { %26638 = vst [vmem:[#allocation191_spill] sm:$0xff] %v23319_v11  ;;  %20519 = vset.pattern.permute.xlu1 %v26154_v19  ;;  %v3170_v11 = vmul.f32 %v21851_v4, %v23283_v3 }
 0x52a   : > { %4308 = vperm.xlu1 %20519, %v4187_v21  }
 0x52c   : > { %v23322_v55 = vpop.permute.xlu1 %1735 }
 0x52d   : > { %26639 = vst [vmem:[#allocation7_spill] sm:$0xff] %v23322_v55  ;;  %v26655_v55 = vld [vmem:[#allocation43_spill] sm:$0xff] }
 0x52e   : > { %20520 = vset.pattern.permute.xlu1 %v26157_v33  ;;  %v1170_v50 = vmul.f32 %v21790_v54, %v26655_v55  ;;  %v26661_v55 = vld [vmem:[#allocation130_spill] sm:$0xff] }
 0x52f   : > { %4482 = vperm.xlu1 %20520, %v4187_v21  }
 0x531   : > { %v23325_v15 = vpop.permute.xlu1 %3380 }
 0x533   : > { %20521 = vset.pattern.permute.xlu1 %v26154_v19 }
 0x534   : > { %692 = vperm.xlu1 %20521, %v23240_v63  }
 0x536   : > { %v23329_v40 = vpop.permute.xlu1 %3556 }
 0x538   : > { %20522 = vset.pattern.permute.xlu1 %v26157_v33 }
 0x539   : > { %861 = vperm.xlu1 %20522, %v23240_v63  }
 0x53b   : > { %v23333_v26 = vpop.permute.xlu1 %1568 }
 0x53d   : > { %865 = vperm.xlu1 %20522, %v23269_v62  }
 0x540   : > { %v23338_v14 = vpop.permute.xlu1 %1739 }
 0x541   : > { %20523 = vset.pattern.permute.xlu1 %v26154_v19 }
 0x542   : > { %1124 = vperm.xlu1 %20523, %v23336_v20  }
 0x544   : > { %v23342_v47 = vpop.permute.xlu1 %1743 }
 0x545   : > { %26640 = vst [vmem:[#allocation33_spill] sm:$0xff] %v23342_v47  ;;  %v26653_v47 = vld [vmem:[#allocation44_spill] sm:$0xff] }
 0x546   : > { %20524 = vset.pattern.permute.xlu1 %v26157_v33  ;;  %v1334_v16 = vmul.f32 %v21778_v42, %v26653_v47 }
 0x547   : > { %1292 = vperm.xlu1 %20524, %v23336_v20  }
 0x549   : > { %v23346_v39 = vpop.permute.xlu1 %3390 }
 0x54b   : > { %20525 = vset.pattern.permute.xlu1 %v26154_v19 }
 0x54c   : > { %2935 = vperm.xlu1 %20525, %v23130_v13  }
 0x54e   : > { %v23350_v63 = vpop.permute.xlu1 %3564 }
 0x550   : > { %20526 = vset.pattern.permute.xlu1 %v26157_v33 }
 0x551   : > { %3108 = vperm.xlu1 %20526, %v23130_v13   ;;  %v23369_v13 = vld [vmem:[#allocation2 + $0x1c8] sm:$0xff] }
 0x552   : > { %26645 = vst [vmem:[#allocation47_spill] sm:$0xff] %v23369_v13 }
 0x553   : > { %v23354_v62 = vpop.permute.xlu1 %2017 }
 0x554   : > { %26641 = vst [vmem:[#allocation78_spill] sm:$0xff] %v23354_v62 }
 0x555   : > { %3112 = vperm.xlu1 %20526, %v26642_v45   ;;  %v23399_v45 = vpop.permute.xlu0 %3116 }
 0x558   : > { %v23359_v30 = vpop.permute.xlu1 %2190 }
 0x559   : > { %26643 = vst [vmem:[#allocation110_spill] sm:$0xff] %v23359_v30  ;;  %20527 = vset.pattern.permute.xlu1 %v26154_v19  ;;  %v23404_v17 = vpop.permute.xlu0 %3568  ;;  %v26662_v30 = vld [vmem:[#allocation147_spill] sm:$0xff] }
 0x55a   : > { %707 = vperm.xlu1 %20527, %v23357_v36   ;;  %26652 = vst [vmem:[#allocation129_spill] sm:$0xff] %v23404_v17  ;;  %v1366_v17 = vadd.f32 %v1334_v16, %v1170_v50 }
 0x55c   : > { %v23363_v29 = vpop.permute.xlu1 %2194 }
 0x55d   : > { %26644 = vst [vmem:[#allocation189_spill] sm:$0xff] %v23363_v29  ;;  %v907_v29 = vmul.f32 %v26423_v57, %v26654_v23  ;;  %v2088_v23 = vmul.f32 %v21816_v27, %v26661_v55  ;;  %v23425_v8 = vpop.permute.xlu0 %3576  ;;  %v26665_v55 = vld [vmem:[#allocation146_spill] sm:$0xff] }
 0x55e   : > { %20528 = vset.pattern.permute.xlu1 %v26157_v33  ;;  %v3006_v60 = vmul.f32 %v21848_v24, %v26665_v55 }
 0x55f   : > { %873 = vperm.xlu1 %20528, %v23357_v36  }
 0x561   : > { %v23367_v38 = vpop.permute.xlu1 %3839 }
 0x563   : > { %20529 = vset.pattern.permute.xlu1 %v26154_v19 }
 0x564   : > { %1129 = vperm.xlu1 %20529, %v23369_v13  }
 0x566   : > { %v4016_v44 = vpop.permute.xlu1 %4015 }
 0x567   : > { %v4089_v3 = vmul.f32 %v21876_v56, %v4016_v44 }
 0x568   : > { %20530 = vset.pattern.permute.xlu1 %v26157_v33 }
 0x569   : > { %1296 = vperm.xlu1 %20530, %v23369_v13   ;;  %v26659_v13 = vld [vmem:[#allocation124_spill] sm:$0xff] }
 0x56a   : > { %v1629_v47 = vmul.f32 %v21804_v52, %v26659_v13  ;;  %v26664_v13 = vld [vmem:[#allocation136_spill] sm:$0xff] }
 0x56b   : > { %v23375_v34 = vpop.permute.xlu1 %2027  ;;  %v2547_v50 = vmul.f32 %v21844_v49, %v26664_v13  ;;  %v3202_v13 = vadd.f32 %v3170_v11, %v3006_v60 }
 0x56d   : > { %1300 = vperm.xlu1 %20530, %v23377_v58  }
 0x570   : > { %v23382_v35 = vpop.permute.xlu1 %2198 }
 0x571   : > { %20531 = vset.pattern.permute.xlu1 %v26154_v19 }
 0x572   : > { %2950 = vperm.xlu1 %20531, %v23380_v0  }
 0x574   : > { %v23388_v32 = vpop.permute.xlu1 %2202 }
 0x575   : > { %26649 = vst [vmem:[#allocation210_spill] sm:$0xff] %v23388_v32 }
 0x576   : > { %20532 = vset.pattern.permute.xlu1 %v26157_v33 }
 0x577   : > { %3120 = vperm.xlu1 %20532, %v23380_v0   ;;  %v26658_v0 = vld [vmem:[#allocation114_spill] sm:$0xff] }
 0x578   : > { %v743_v58 = vmul.f32 %v26428_v18, %v26658_v0  ;;  %v2711_v0 = vmul.f32 %v21829_v25, %v26662_v30  ;;  %v3630_v30 = vmul.f32 %v21856_v31, %v23329_v40 }
 0x579   : > { %v23394_v48 = vpop.permute.xlu1 %3849 }
 0x57a   : > { %v939_v62 = vadd.f32 %v907_v29, %v743_v58  ;;  %v23440_v58 = vpop.permute.xlu0 %4027 }
 0x57b   : > { %20533 = vset.pattern.permute.xlu1 %v26154_v19 }
 0x57c   : > { %1578 = vperm.xlu1 %20533, %v1437_v12   ;;  %v1398_v16 = vadd.f32 %v1366_v17, %v939_v62  ;;  %v3466_v17 = vmul.f32 %v21872_v61, %v23325_v15  ;;  %v1339_v15 = vmul.f32 %v21778_v42, %v23303_v37 }
 0x57e   : > { %v23397_v21 = vpop.permute.xlu1 %4023  ;;  %v3662_v55 = vadd.f32 %v3630_v30, %v3466_v17  ;;  %v4036_v11 = vpop.permute.xlu0 %4035  ;;  %v1798_v30 = vmul.f32 %v26425_v6, %v23338_v14  ;;  %v1634_v17 = vmul.f32 %v21804_v52, %v23333_v26 }
 0x580   : > { %20534 = vset.pattern.permute.xlu1 %v26157_v33 }
 0x581   : > { %1747 = vperm.xlu1 %20534, %v1437_v12  }
 0x583   : > { %v23402_v32 = vpop.permute.xlu1 %2476 }
 0x584   : > { %26651 = vst [vmem:[#allocation99_spill] sm:$0xff] %v23402_v32 }
 0x585   : > { %1751 = vperm.xlu1 %20534, %v20902_v53   ;;  %v26660_v53 = vld [vmem:[#allocation89_spill] sm:$0xff] }
 0x586   : > { %v2252_v32 = vmul.f32 %v21819_v7, %v26660_v53 }
 0x588   : > { %v23414_v12 = vpop.permute.xlu1 %2649  ;;  %v2284_v53 = vadd.f32 %v2252_v32, %v2088_v23  ;;  %v23445_v32 = vld [vmem:[#allocation2 + $0x1c9] sm:$0xff] }
 0x589   : > { %26657 = vst [vmem:[#allocation49_spill] sm:$0xff] %v23414_v12  ;;  %20535 = vset.pattern.permute.xlu1 %v26154_v19  ;;  %v1825_v12 = vadd.f32 %v1793_v22, %v1629_v47  ;;  %v2743_v22 = vadd.f32 %v2711_v0, %v2547_v50 }
 0x58a   : > { %3400 = vperm.xlu1 %20535, %v3271_v2  }
 0x58b   : > { %v1857_v29 = vadd.f32 %v1825_v12, %v1398_v16  ;;  %v3925_v12 = vmul.f32 %v21881_v1, %v23367_v38  ;;  %v26666_v16 = vld [vmem:[#allocation151_spill] sm:$0xff]  ;;  %v26667_v38 = vld [vmem:[#allocation40_spill] sm:$0xff] }
 0x58c   : > { %v23429_v9 = vpop.permute.xlu1 %2653 }
 0x58d   : > { %26663 = vst [vmem:[#allocation120_spill] sm:$0xff] %v23429_v9  ;;  %v2316_v47 = vadd.f32 %v2284_v53, %v1857_v29  ;;  %v748_v53 = vmul.f32 %v26428_v18, %v26666_v16  ;;  %v912_v29 = vmul.f32 %v26423_v57, %v26667_v38  ;;  %v26673_v38 = vld [vmem:[#allocation131_spill] sm:$0xff] }
 0x58e   : > { %20536 = vset.pattern.permute.xlu1 %v26157_v33 }
 0x58f   : > { %3572 = vperm.xlu1 %20536, %v3271_v2   ;;  %v2775_v23 = vadd.f32 %v2743_v22, %v2316_v47  ;;  %v4121_v2 = vadd.f32 %v4089_v3, %v3925_v12  ;;  %v1175_v22 = vmul.f32 %v21790_v54, %v23300_v28  ;;  %v2257_v3 = vmul.f32 %v21819_v7, %v23382_v35  ;;  %v26669_v28 = vld [vmem:[#allocation53_spill] sm:$0xff]  ;;  %v26671_v35 = vld [vmem:[#allocation126_spill] sm:$0xff] }
 0x590   : > { %v944_v14 = vadd.f32 %v912_v29, %v748_v53  ;;  %v909_v53 = vmul.f32 %v26423_v57, %v26673_v38  ;;  %v26674_v29 = vld [vmem:[#allocation68_spill] sm:$0xff] }
 0x591   : > { %v4299_v62 = vpop.permute.xlu1 %4298  ;;  %v3234_v40 = vadd.f32 %v3202_v13, %v2775_v23  ;;  %v1371_v13 = vadd.f32 %v1339_v15, %v1175_v22  ;;  %v2093_v15 = vmul.f32 %v21816_v27, %v23375_v34  ;;  %v1795_v22 = vmul.f32 %v26425_v6, %v26674_v29 }
 0x592   : > { %v4384_v0 = vmul.f32 %v21897_v46, %v4299_v62  ;;  %v3175_v29 = vmul.f32 %v21851_v4, %v23399_v45  ;;  %v26680_v45 = vld [vmem:[#allocation190_spill] sm:$0xff] }
 0x593   : > { %20537 = vset.pattern.permute.xlu1 %v26154_v19  ;;  %v3694_v44 = vadd.f32 %v3662_v55, %v3234_v40  ;;  %v26668_v55 = vld [vmem:[#allocation121_spill] sm:$0xff]  ;;  %v1336_v40 = vmul.f32 %v21778_v42, %v26669_v28 }
 0x594   : > { %1588 = vperm.xlu1 %20537, %v23445_v32   ;;  %v1172_v12 = vmul.f32 %v21790_v54, %v26668_v55  ;;  %v26677_v55 = vld [vmem:[#allocation50_spill] sm:$0xff] }
 0x595   : > { %v4153_v37 = vadd.f32 %v4121_v2, %v3694_v44  ;;  %v23473_v2 = vpop.permute.xlu0 %4486  ;;  %v23478_v44 = vld [vmem:[#allocation2 + $0x1d1] sm:$0xff]  ;;  %v745_v28 = vmul.f32 %v26428_v18, %v26677_v55 }
 0x596   : > { %v4475_v60 = vpop.permute.xlu1 %4474  ;;  %26670 = vst [vmem:[#allocation127_spill] sm:$0xff] %v23478_v44 }
 0x597   : > { %v4548_v50 = vmul.f32 %v21900_v59, %v4475_v60  ;;  %v1830_v60 = vadd.f32 %v1798_v30, %v1634_v17  ;;  %v26675_v30 = vld [vmem:[#allocation141_spill] sm:$0xff]  ;;  %v26676_v17 = vld [vmem:[#allocation179_spill] sm:$0xff] }
 0x598   : > { %20538 = vset.pattern.permute.xlu1 %v26157_v33  ;;  %v2549_v34 = vmul.f32 %v21844_v49, %v26675_v30 }
 0x599   : > { %v4580_v47 = vadd.f32 %v4548_v50, %v4384_v0  ;;  %1755 = vperm.xlu1 %20538, %v23445_v32   ;;  %v1631_v0 = vmul.f32 %v21804_v52, %v26671_v35  ;;  %v26672_v50 = vld [vmem:[#allocation133_spill] sm:$0xff]  ;;  %v1368_v35 = vadd.f32 %v1336_v40, %v1172_v12  ;;  %v941_v12 = vadd.f32 %v909_v53, %v745_v28  ;;  %v4495_v30 = vpop.permute.xlu0 %4494 }
 0x59a   : > { %v2090_v16 = vmul.f32 %v21816_v27, %v26672_v50  ;;  %v26678_v50 = vld [vmem:[#allocation35_spill] sm:$0xff] }
 0x59b   : > { %v4612_v62 = vadd.f32 %v4580_v47, %v4153_v37  ;;  %v2487_v23 = vpop.permute.xlu1 %2486  ;;  %v2289_v37 = vadd.f32 %v2257_v3, %v2093_v15  ;;  %v2254_v9 = vmul.f32 %v21819_v7, %v26678_v50  ;;  %v1827_v40 = vadd.f32 %v1795_v22, %v1631_v0 }
 0x59c   : > { %v1400_v55 = vadd.f32 %v1368_v35, %v941_v12  ;;  %v3172_v0 = vmul.f32 %v21851_v4, %v23314_v41  ;;  %v3632_v41 = vmul.f32 %v21856_v31, %v23350_v63  ;;  %v4801_v35 = vld [vmem:[#allocation2 + $0x148] sm:$0xff] }
 0x59d   : > { %v4651_v26 = vadd.f32 %v22979_v43, %v4612_v62  ;;  %1759 = vperm.xlu1 %20538, %v23478_v44   ;;  %v1403_v43 = vadd.f32 %v1371_v13, %v944_v14  ;;  %v3011_v62 = vmul.f32 %v21848_v24, %v26676_v17  ;;  %v2552_v13 = vmul.f32 %v21844_v49, %v2487_v23  ;;  %v26679_v14 = vld [vmem:[#allocation184_spill] sm:$0xff] }
 0x59e   : > { %v3471_v15 = vmul.f32 %v21872_v61, %v26679_v14  ;;  %v3635_v23 = vmul.f32 %v21856_v31, %v23425_v8  ;;  %v4094_v17 = vmul.f32 %v21876_v56, %v4036_v11  ;;  %v2286_v50 = vadd.f32 %v2254_v9, %v2090_v16  ;;  %v1896_v12 = vld [vmem:[#allocation2 + $0x1c7] sm:$0xff] }
 0x59f   : > { %v4683_v47 = vmax.f32 %v4651_v26, 0.0  ;;  %v1862_v44 = vadd.f32 %v1830_v60, %v1403_v43  ;;  %v2713_v26 = vmul.f32 %v21829_v25, %v23202_v5  ;;  %v3930_v60 = vmul.f32 %v21881_v1, %v26680_v45  ;;  %v26681_v5 = vld [vmem:[#allocation198_spill] sm:$0xff] }
 0x5a0   : > { %v2658_v38 = vpop.permute.xlu1 %2657  ;;  %v4389_v22 = vmul.f32 %v21897_v46, %v26681_v5  ;;  %v3207_v28 = vadd.f32 %v3175_v29, %v3011_v62  ;;  %v4553_v14 = vmul.f32 %v21900_v59, %v4495_v30  ;;  %v1859_v8 = vadd.f32 %v1827_v40, %v1400_v55 }
 0x5a1   : > { %4716 = vst.msk [vmem:[#allocation2 + $0x150] sm:$0xff] %vm4696_vm1, %v4683_v47  ;;  %v2716_v3 = vmul.f32 %v21829_v25, %v2658_v38  ;;  %20539 = vset.pattern.permute.xlu1 %v26154_v19  ;;  %v2321_v43 = vadd.f32 %v2289_v37, %v1862_v44  ;;  %v2745_v45 = vadd.f32 %v2713_v26, %v2549_v34 }
 0x5a2   : > { %3410 = vperm.xlu1 %20539, %v23357_v36   ;;  %v3008_v44 = vmul.f32 %v21848_v24, %v23311_v51  ;;  %v3667_v9 = vadd.f32 %v3635_v23, %v3471_v15  ;;  %v4126_v16 = vadd.f32 %v4094_v17, %v3930_v60  ;;  %v2318_v37 = vadd.f32 %v2286_v50, %v1859_v8 }
 0x5a3   : > { %v2748_v47 = vadd.f32 %v2716_v3, %v2552_v13  ;;  %v3468_v34 = vmul.f32 %v21872_v61, %v23346_v39  ;;  %v4091_v51 = vmul.f32 %v21876_v56, %v23397_v21  ;;  %v4585_v40 = vadd.f32 %v4553_v14, %v4389_v22  ;;  %v20905_v14 = vld [vmem:[#allocation2 + $0x1cf] sm:$0xff] }
 0x5a4   : > { %v23515_v53 = vpop.permute.xlu1 %2661  ;;  %v3204_v62 = vadd.f32 %v3172_v0, %v3008_v44  ;;  %v2777_v63 = vadd.f32 %v2745_v45, %v2318_v37  ;;  %v23558_v37 = vld [vmem:[#allocation2 + $0x1e7] sm:$0xff] }
 0x5a5   : > { %v2780_v38 = vadd.f32 %v2748_v47, %v2321_v43  ;;  %v3664_v26 = vadd.f32 %v3632_v41, %v3468_v34  ;;  %v23537_v47 = vld [vmem:[%s26051_s2] ss:$0 sm:$0xff] }
 0x5a6   : > { %20540 = vset.pattern.permute.xlu1 %v26157_v33  ;;  %v3236_v39 = vadd.f32 %v3204_v62, %v2777_v63  ;;  %v910_v62 = vmul.f32 %v26423_v57, %v23229_v10  ;;  %v26686_v34 = vld [vmem:[#allocation103_spill] sm:$0xff]  ;;  %v26689_v63 = vld [vmem:[#allocation162_spill] sm:$0xff] }
 0x5a7   : > { %v3239_v11 = vadd.f32 %v3207_v28, %v2780_v38  ;;  %3580 = vperm.xlu1 %20540, %v23357_v36   ;;  %v3927_v36 = vmul.f32 %v21881_v1, %v23394_v48  ;;  %v1632_v10 = vmul.f32 %v21804_v52, %v26689_v63  ;;  %v26697_v63 = vld [vmem:[#allocation194_spill] sm:$0xff] }
 0x5a8   : > { %v4802_v29 = vld [vmem:[#allocation2 + $0x150] sm:$0xff]  ;;  %v3696_v43 = vadd.f32 %v3664_v26, %v3236_v39  ;;  %v26690_v26 = vld [vmem:[#allocation110_spill] sm:$0xff] }
 0x5a9   : > { %v3699_v13 = vadd.f32 %v3667_v9, %v3239_v11  ;;  %v4309_v3 = vpop.permute.xlu1 %4308  ;;  %v4823_v15 = vpack.c.bf16 %v4802_v29, %v4801_v35  ;;  %v4123_v23 = vadd.f32 %v4091_v51, %v3927_v36  ;;  %v4803_v9 = vld [vmem:[#allocation2 + $0x168] sm:$0xff]  ;;  %v26685_v29 = vld [vmem:[#allocation145_spill] sm:$0xff]  ;;  %v1337_v51 = vmul.f32 %v21778_v42, %v26686_v34 }
 0x5aa   : > { %v4386_v48 = vmul.f32 %v21897_v46, %v4309_v3  ;;  %v2255_v36 = vmul.f32 %v21819_v7, %v26690_v26 }
 0x5ab   : > { %v4158_v60 = vadd.f32 %v4126_v16, %v3699_v13  ;;  %20541 = vset.pattern.permute.xlu1 %v26154_v19  ;;  %17727 = vmatprep.mubr.msk.bf16.mxu0 %vm4696_vm1, %v4823_v15  ;;  %v4155_v50 = vadd.f32 %v4123_v23, %v3696_v43  ;;  %v26687_v13 = vld [vmem:[#allocation95_spill] sm:$0xff]  ;;  %v26691_v23 = vld [vmem:[#allocation78_spill] sm:$0xff] }
 0x5ac   : > { %2037 = vperm.xlu1 %20541, %v1896_v12   ;;  %v746_v3 = vmul.f32 %v26428_v18, %v26687_v13  ;;  %v26688_v15 = vld [vmem:[#allocation191_spill] sm:$0xff] }
 0x5ad   : > { %v4617_v30 = vadd.f32 %v4585_v40, %v4158_v60 }
 0x5ae   : > { %v4483_v21 = vpop.permute.xlu1 %4482  ;;  %v942_v40 = vadd.f32 %v910_v62, %v746_v3  ;;  %v4092_v3 = vmul.f32 %v21876_v56, %v23440_v58 }
 0x5af   : > { %v4656_v17 = vadd.f32 %v23537_v47, %v4617_v30  ;;  %v4550_v55 = vmul.f32 %v21900_v59, %v4483_v21  ;;  %v2091_v30 = vmul.f32 %v21816_v27, %v26691_v23  ;;  %v26692_v21 = vld [vmem:[#allocation49_spill] sm:$0xff] }
 0x5b0   : > { %20542 = vset.pattern.permute.xlu1 %v26157_v33  ;;  %v2714_v43 = vmul.f32 %v21829_v25, %v26692_v21 }
 0x5b1   : > { %v4688_v0 = vmax.f32 %v4656_v17, 0.0  ;;  %v4582_v5 = vadd.f32 %v4550_v55, %v4386_v48  ;;  %2206 = vperm.xlu1 %20542, %v1896_v12   ;;  %v1796_v12 = vmul.f32 %v26425_v6, %v26688_v15  ;;  %v2287_v55 = vadd.f32 %v2255_v36, %v2091_v30 }
 0x5b2   : > { %v4551_v36 = vmul.f32 %v21900_v59, %v23473_v2 }
 0x5b3   : > { %4721 = vst.msk [vmem:[#allocation2 + $0x1a8] sm:$0xff] %vm4696_vm1, %v4688_v0  ;;  %v4614_v22 = vadd.f32 %v4582_v5, %v4155_v50  ;;  %v23544_v28 = vpop.permute.xlu1 %692  ;;  %v1828_v39 = vadd.f32 %v1796_v12, %v1632_v10  ;;  %v26693_v50 = vld [vmem:[#allocation99_spill] sm:$0xff]  ;;  %v23587_v5 = vld [vmem:[#allocation2 + $0x1ef] sm:$0xff]  ;;  %v4387_v10 = vmul.f32 %v21897_v46, %v26697_v63 }
 0x5b4   : > { %v2550_v0 = vmul.f32 %v21844_v49, %v26693_v50  ;;  %v26706_v63 = vld [vmem:[#allocation127_spill] sm:$0xff] }
 0x5b5   : > { %v4653_v38 = vadd.f32 %v23537_v47, %v4614_v22  ;;  %2210 = vperm.xlu1 %20542, %v20905_v14   ;;  %v3732_v14 = vld [vmem:[#allocation2 + $0x1d0] sm:$0xff]  ;;  %v4583_v30 = vadd.f32 %v4551_v36, %v4387_v10 }
 0x5b7   : > { %v4685_v8 = vmax.f32 %v4653_v38, 0.0  ;;  %v2746_v38 = vadd.f32 %v2714_v43, %v2550_v0  ;;  %v26701_v0 = vld [vmem:[#allocation212_spill] sm:$0xff] }
 0x5b8   : > { %v23547_v45 = vpop.permute.xlu1 %861 }
 0x5b9   : > { %4718 = vst.msk [vmem:[#allocation2 + $0x170] sm:$0xff] %vm4696_vm1, %v4685_v8  ;;  %20543 = vset.pattern.permute.xlu1 %v26154_v19  ;;  %v26694_v8 = vld [vmem:[#allocation5_spill] sm:$0xff] }
 0x5ba   : > { %3859 = vperm.xlu1 %20543, %v23336_v20  }
 0x5bc   : > { %v23552_v44 = vpop.permute.xlu1 %865 }
 0x5bd   : > { %26682 = vst [vmem:[#allocation117_spill] sm:$0xff] %v23552_v44 }
 0x5be   : > { %20544 = vset.pattern.permute.xlu1 %v26157_v33 }
 0x5bf   : > { %4031 = vperm.xlu1 %20544, %v23336_v20   ;;  %v1173_v20 = vmul.f32 %v21790_v54, %v26685_v29 }
 0x5c0   : > { %v4804_v41 = vld [vmem:[#allocation2 + $0x170] sm:$0xff] }
 0x5c1   : > { %v23556_v11 = vpop.permute.xlu1 %1124  ;;  %v4824_v16 = vpack.c.bf16 %v4804_v41, %v4803_v9  ;;  %v1369_v60 = vadd.f32 %v1337_v51, %v1173_v20  ;;  %v3469_v9 = vmul.f32 %v21872_v61, %v26694_v8  ;;  %v26696_v51 = vld [vmem:[#allocation187_spill] sm:$0xff] }
 0x5c2   : > { %26683 = vst [vmem:[#allocation152_spill] sm:$0xff] %v23556_v11  ;;  %v3928_v13 = vmul.f32 %v21881_v1, %v26696_v51  ;;  %v20908_v11 = vld [vmem:[#allocation2 + $0x8] sm:$0xff] }
 0x5c3   : > { %20545 = vset.pattern.permute.xlu1 %v26154_v19  ;;  %17728 = vmatmul.mubr.msk.bf16.gmra.mrb[20].mxu0 %vm4696_vm1, %v4824_v16  ;;  %v1401_v48 = vadd.f32 %v1369_v60, %v942_v40  ;;  %v26695_v16 = vld [vmem:[#allocation129_spill] sm:$0xff]  ;;  %v23742_v44 = vpack.i.bf16 %v20908_v11, %v20908_v11 }
 0x5c4   : > { %2047 = vperm.xlu1 %20545, %v23558_v37   ;;  %v3633_v62 = vmul.f32 %v21856_v31, %v26695_v16 }
 0x5c5   : > { %v1860_v22 = vadd.f32 %v1828_v39, %v1401_v48  ;;  %v4124_v39 = vadd.f32 %v4092_v3, %v3928_v13  ;;  %v23649_v13 = vld [vmem:[#allocation2 + $0x1ef] sm:$0xff]  ;;  %26719 = vst [vmem:[#allocation168_spill] sm:$0xff] %v23742_v44 }
 0x5c6   : > { %v23565_v35 = vpop.permute.xlu1 %1292  ;;  %v3665_v26 = vadd.f32 %v3633_v62, %v3469_v9  ;;  %v23631_v9 = vld [vmem:[#allocation2 + $0x1e8] sm:$0xff]  ;;  %v20907_v62 = vld [vmem:[#allocation2 + $0x1f0] sm:$0xff]  ;;  %717 = vperm.xlu0 %20585, %v23649_v13  }
 0x5c7   : > { %26684 = vst [vmem:[#allocation140_spill] sm:$0xff] %v23565_v35  ;;  %v2319_v29 = vadd.f32 %v2287_v55, %v1860_v22 }
 0x5c8   : > { %20546 = vset.pattern.permute.xlu1 %v26157_v33 }
 0x5c9   : > { %2214 = vperm.xlu1 %20546, %v23558_v37   ;;  %v2778_v15 = vadd.f32 %v2746_v38, %v2319_v29  ;;  %v26702_v38 = vld [vmem:[#allocation101_spill] sm:$0xff] }
 0x5ca   : > { %v4191_v29 = vld [vmem:[#allocation2 + $0x1d1] sm:$0xff]  ;;  %1139 = vperm.xlu0 %20585, %v23631_v9  }
 0x5cb   : > { %v2936_v17 = vpop.permute.xlu1 %2935 }
 0x5cc   : > { %v3009_v20 = vmul.f32 %v21848_v24, %v2936_v17  ;;  %v26699_v17 = vld [vmem:[#allocation47_spill] sm:$0xff] }
 0x5cd   : > { %2218 = vperm.xlu1 %20546, %v23587_v5  }
 0x5d0   : > { %v3109_v41 = vpop.permute.xlu1 %3108 }
 0x5d1   : > { %v3173_v34 = vmul.f32 %v21851_v4, %v3109_v41  ;;  %20547 = vset.pattern.permute.xlu1 %v26154_v19 }
 0x5d2   : > { %3869 = vperm.xlu1 %20547, %v3732_v14  }
 0x5d3   : > { %v3205_v12 = vadd.f32 %v3173_v34, %v3009_v20 }
 0x5d4   : > { %v23601_v40 = vpop.permute.xlu1 %3112 }
 0x5d5   : > { %v3237_v60 = vadd.f32 %v3205_v12, %v2778_v15  ;;  %v23659_v15 = vld [vmem:[#allocation2 + $0x1f1] sm:$0xff] }
 0x5d6   : > { %20548 = vset.pattern.permute.xlu1 %v26157_v33  ;;  %26705 = vst [vmem:[#allocation4_spill] sm:$0xff] %v23659_v15  ;;  %1603 = vperm.xlu0 %20585, %v23659_v15  }
 0x5d7   : > { %v3697_v23 = vadd.f32 %v3665_v26, %v3237_v60  ;;  %4039 = vperm.xlu1 %20548, %v3732_v14  }
 0x5d9   : > { %v4156_v21 = vadd.f32 %v4124_v39, %v3697_v23  ;;  %v23608_v58 = vpop.permute.xlu1 %707  ;;  %v23682_v39 = vld [vmem:[#allocation2 + $0x20f] sm:$0xff] }
 0x5da   : > { %26698 = vst [vmem:[#allocation148_spill] sm:$0xff] %v23608_v58  ;;  %26709 = vst [vmem:[#allocation176_spill] sm:$0xff] %v23682_v39  ;;  %v3279_v58 = vld [vmem:[#allocation2 + $0x22f] sm:$0xff] }
 0x5db   : > { %v4615_v43 = vadd.f32 %v4583_v30, %v4156_v21  ;;  %20549 = vset.pattern.permute.xlu1 %v26154_v19 }
 0x5dc   : > { %2496 = vperm.xlu1 %20549, %v26699_v17  }
 0x5dd   : > { %v4654_v48 = vadd.f32 %v23537_v47, %v4615_v43 }
 0x5de   : > { %v23613_v55 = vpop.permute.xlu1 %873 }
 0x5df   : > { %26700 = vst [vmem:[#allocation64_spill] sm:$0xff] %v23613_v55  ;;  %v4686_v2 = vmax.f32 %v4654_v48, 0.0  ;;  %v26717_v55 = vld [vmem:[#allocation173_spill] sm:$0xff] }
 0x5e0   : > { %20550 = vset.pattern.permute.xlu1 %v26157_v33 }
 0x5e1   : > { %4719 = vst.msk [vmem:[#allocation2 + $0x188] sm:$0xff] %vm4696_vm1, %v4686_v2  ;;  %2665 = vperm.xlu1 %20550, %v26699_v17   ;;  %v23697_v17 = vld [vmem:[#allocation2 + $0x210] sm:$0xff]  ;;  %v20631_v2 = vld [vmem:[%s26052_s3] sm:$0xff]  }
 0x5e2   : > { %26711 = vst [vmem:[#allocation158_spill] sm:$0xff] %v23697_v17  ;;  %17739 = vmatprep.subr.bf16.mxu0 %v20631_v2 }
 0x5e3   : > { %v23618_v50 = vpop.permute.xlu1 %1129  ;;  %17740 = vmatpush3.bf16.msra.mxu0 %v20631_v2 }
 0x5e5   : > { %2669 = vperm.xlu1 %20550, %v26701_v0   ;;  %v2818_v0 = vld [vmem:[#allocation2 + $0x209] sm:$0xff] }
 0x5e8   : > { %v23621_v22 = vpop.permute.xlu1 %1296 }
 0x5e9   : > { %20551 = vset.pattern.permute.xlu1 %v26154_v19 }
 0x5ea   : > { %4318 = vperm.xlu1 %20551, %v26702_v38  }
 0x5ec   : > { %v23625_v14 = vpop.permute.xlu1 %1300 }
 0x5ed   : > { %26703 = vst [vmem:[#allocation66_spill] sm:$0xff] %v23625_v14  ;;  %v1177_v14 = vmul.f32 %v21790_v54, %v26717_v55 }
 0x5ee   : > { %20552 = vset.pattern.permute.xlu1 %v26157_v33 }
 0x5ef   : > { %4490 = vperm.xlu1 %20552, %v26702_v38  }
 0x5f1   : > { %v23629_v8 = vpop.permute.xlu1 %2950 }
 0x5f3   : > { %20553 = vset.pattern.permute.xlu1 %v26154_v19 }
 0x5f4   : > { %2506 = vperm.xlu1 %20553, %v23631_v9  }
 0x5f6   : > { %v23635_v41 = vpop.permute.xlu1 %3120 }
 0x5f8   : > { %20554 = vset.pattern.permute.xlu1 %v26157_v33 }
 0x5f9   : > { %2673 = vperm.xlu1 %20554, %v23631_v9  }
 0x5fb   : > { %v23639_v16 = vpop.permute.xlu1 %1578 }
 0x5fd   : > { %2677 = vperm.xlu1 %20554, %v20907_v62  }
 0x600   : > { %v23641_v20 = vpop.permute.xlu1 %1747 }
 0x601   : > { %20555 = vset.pattern.permute.xlu1 %v26154_v19 }
 0x602   : > { %4328 = vperm.xlu1 %20555, %v4191_v29  }
 0x604   : > { %v23644_v34 = vpop.permute.xlu1 %1751 }
 0x605   : > { %26704 = vst [vmem:[#allocation137_spill] sm:$0xff] %v23644_v34  ;;  %v1800_v34 = vmul.f32 %v26425_v6, %v23641_v20 }
 0x606   : > { %20556 = vset.pattern.permute.xlu1 %v26157_v33 }
 0x607   : > { %4498 = vperm.xlu1 %20556, %v4191_v29  }
 0x609   : > { %v23647_v51 = vpop.permute.xlu1 %3400 }
 0x60b   : > { %20557 = vset.pattern.permute.xlu1 %v26154_v19 }
 0x60c   : > { %2955 = vperm.xlu1 %20557, %v23445_v32  }
 0x60e   : > { %v23654_v3 = vpop.permute.xlu1 %3572 }
 0x610   : > { %20558 = vset.pattern.permute.xlu1 %v26157_v33 }
 0x611   : > { %3124 = vperm.xlu1 %20558, %v23445_v32  }
 0x613   : > { %v23661_v12 = vpop.permute.xlu1 %1588 }
 0x615   : > { %3128 = vperm.xlu1 %20558, %v26706_v63   ;;  %v23718_v63 = vld [vmem:[#allocation2 + $0x1e9] sm:$0xff] }
 0x616   : > { %26714 = vst [vmem:[#allocation83_spill] sm:$0xff] %v23718_v63 }
 0x618   : > { %v23665_v10 = vpop.permute.xlu1 %1755 }
 0x619   : > { %20559 = vset.pattern.permute.xlu1 %v26154_v19 }
 0x61a   : > { %2970 = vperm.xlu1 %20559, %v23659_v15  }
 0x61c   : > { %v23669_v26 = vpop.permute.xlu1 %1759 }
 0x61d   : > { %26707 = vst [vmem:[#allocation72_spill] sm:$0xff] %v23669_v26 }
 0x61e   : > { %20560 = vset.pattern.permute.xlu1 %v26157_v33 }
 0x61f   : > { %3136 = vperm.xlu1 %20560, %v23659_v15   ;;  %v4196_v15 = vld [vmem:[#allocation2 + $0x229] sm:$0xff] }
 0x621   : > { %v23673_v32 = vpop.permute.xlu1 %3410 }
 0x622   : > { %26708 = vst [vmem:[#allocation160_spill] sm:$0xff] %v23673_v32 }
 0x623   : > { %20561 = vset.pattern.permute.xlu1 %v26154_v19 }
 0x624   : > { %3415 = vperm.xlu1 %20561, %v23558_v37  }
 0x626   : > { %v23677_v36 = vpop.permute.xlu1 %3580 }
 0x628   : > { %20562 = vset.pattern.permute.xlu1 %v26157_v33 }
 0x629   : > { %3584 = vperm.xlu1 %20562, %v23558_v37  }
 0x62b   : > { %v2038_v60 = vpop.permute.xlu1 %2037 }
 0x62c   : > { %v2095_v20 = vmul.f32 %v21816_v27, %v2038_v60 }
 0x62d   : > { %3588 = vperm.xlu1 %20562, %v23587_v5   ;;  %v1900_v5 = vld [vmem:[#allocation2 + $0x207] sm:$0xff] }
 0x62e   : > { %2057 = vperm.xlu0 %20585, %v1900_v5  }
 0x630   : > { %v2207_v23 = vpop.permute.xlu1 %2206 }
 0x631   : > { %20563 = vset.pattern.permute.xlu1 %v26154_v19  ;;  %v2259_v55 = vmul.f32 %v21819_v7, %v2207_v23 }
 0x632   : > { %3430 = vperm.xlu1 %20563, %v23682_v39   ;;  %2521 = vperm.xlu0 %20585, %v23697_v17  }
 0x634   : > { %v23686_v30 = vpop.permute.xlu1 %2210 }
 0x635   : > { %26710 = vst [vmem:[#allocation69_spill] sm:$0xff] %v23686_v30 }
 0x636   : > { %20564 = vset.pattern.permute.xlu1 %v26157_v33  ;;  %2975 = vperm.xlu0 %20585, %v2818_v0  }
 0x637   : > { %3596 = vperm.xlu1 %20564, %v23682_v39   ;;  %v20909_v39 = vld [vmem:[#allocation2 + $0x1f1] sm:$0xff] }
 0x639   : > { %v23690_v21 = vpop.permute.xlu1 %3859 }
 0x63a   : > { %20595 = vset.pattern.permute.xlu0 %v26157_v33 }
 0x63b   : > { %20565 = vset.pattern.permute.xlu1 %v26154_v19  ;;  %1304 = vperm.xlu0 %20595, %v23631_v9  }
 0x63c   : > { %3874 = vperm.xlu1 %20565, %v23631_v9  }
 0x63e   : > { %v23694_v43 = vpop.permute.xlu1 %4031 }
 0x63f   : > { %2222 = vperm.xlu0 %20595, %v1900_v5   ;;  %v26718_v5 = vld [vmem:[#allocation108_spill] sm:$0xff] }
 0x640   : > { %20566 = vset.pattern.permute.xlu1 %v26157_v33  ;;  %v1341_v30 = vmul.f32 %v21778_v42, %v26718_v5  ;;  %v26720_v5 = vld [vmem:[#allocation31_spill] sm:$0xff] }
 0x641   : > { %4043 = vperm.xlu1 %20566, %v23631_v9   ;;  %v914_v9 = vmul.f32 %v26423_v57, %v23547_v45 }
 0x642   : > { %v1373_v35 = vadd.f32 %v1341_v30, %v1177_v14  ;;  %v2291_v14 = vadd.f32 %v2259_v55, %v2095_v20 }
 0x643   : > { %v23701_v48 = vpop.permute.xlu1 %2047  ;;  %3140 = vperm.xlu0 %20595, %v2818_v0   ;;  %v750_v0 = vmul.f32 %v26428_v18, %v23544_v28  ;;  %v1338_v28 = vmul.f32 %v21778_v42, %v26720_v5 }
 0x645   : > { %4047 = vperm.xlu1 %20566, %v20907_v62   ;;  %v946_v45 = vadd.f32 %v914_v9, %v750_v0  ;;  %v26721_v9 = vld [vmem:[#allocation149_spill] sm:$0xff]  ;;  %v26722_v0 = vld [vmem:[#allocation142_spill] sm:$0xff] }
 0x646   : > { %v1174_v23 = vmul.f32 %v21790_v54, %v26722_v0 }
 0x647   : > { %v1405_v5 = vadd.f32 %v1373_v35, %v946_v45 }
 0x648   : > { %v23706_v38 = vpop.permute.xlu1 %2214 }
 0x649   : > { %20567 = vset.pattern.permute.xlu1 %v26154_v19 }
 0x64a   : > { %3889 = vperm.xlu1 %20567, %v23697_v17  }
 0x64c   : > { %v23710_v29 = vpop.permute.xlu1 %2218 }
 0x64d   : > { %26712 = vst [vmem:[#allocation75_spill] sm:$0xff] %v23710_v29  ;;  %v3278_v29 = vld [vmem:[#allocation2 + $0x227] sm:$0xff] }
 0x64e   : > { %20568 = vset.pattern.permute.xlu1 %v26157_v33  ;;  %v23726_v26 = vpack.i.bf16 %v3279_v58, %v3278_v29  ;;  %v1636_v58 = vmul.f32 %v21804_v52, %v23639_v16  ;;  %v911_v16 = vmul.f32 %v26423_v57, %v26721_v9 }
 0x64f   : > { %4055 = vperm.xlu1 %20568, %v23697_v17  }
 0x650   : > { %26716 = vst [vmem:[#allocation57_spill] sm:$0xff] %v23726_v26  ;;  %20605 = vperm.xlu0 %20595, %v23726_v26   ;;  %v1832_v17 = vadd.f32 %v1800_v34, %v1636_v58  ;;  %v26723_v26 = vld [vmem:[#allocation7_spill] sm:$0xff]  ;;  %v23754_v34 = vld [vmem:[#allocation2 + $0x211] sm:$0xff] }
 0x651   : > { %v23716_v62 = vpop.permute.xlu1 %3869  ;;  %v1797_v11 = vmul.f32 %v26425_v6, %v26723_v26  ;;  %v26725_v58 = vld [vmem:[#allocation155_spill] sm:$0xff] }
 0x652   : > { %26713 = vst [vmem:[#allocation79_spill] sm:$0xff] %v23716_v62  ;;  %v1633_v9 = vmul.f32 %v21804_v52, %v26725_v58  ;;  %v26726_v62 = vld [vmem:[#allocation189_spill] sm:$0xff]  ;;  %v1864_v26 = vadd.f32 %v1832_v17, %v1405_v5  ;;  %v3174_v58 = vmul.f32 %v21851_v4, %v23601_v40 }
 0x653   : > { %20569 = vset.pattern.permute.xlu1 %v26154_v19  ;;  %v2256_v0 = vmul.f32 %v21819_v7, %v26726_v62 }
 0x654   : > { %4333 = vperm.xlu1 %20569, %v23718_v63   ;;  %20615 = vperm.xlu0 %20595, %v23742_v44   ;;  %v1370_v44 = vadd.f32 %v1338_v28, %v1174_v23  ;;  %v1829_v55 = vadd.f32 %v1797_v11, %v1633_v9  ;;  %v26728_v28 = vld [vmem:[#allocation120_spill] sm:$0xff]  ;;  %v2323_v20 = vadd.f32 %v2291_v14, %v1864_v26  ;;  %v26729_v23 = vld [vmem:[#allocation3_spill] sm:$0xff]  ;;  %v3133_v9 = vpop.permute.xlu0 %3132 }
 0x655   : > { %v2715_v62 = vmul.f32 %v21829_v25, %v26728_v28  ;;  %v3470_v26 = vmul.f32 %v21872_v61, %v23647_v51  ;;  %v1343_v51 = vmul.f32 %v21778_v42, %v23621_v22 }
 0x656   : > { %v23722_v2 = vpop.permute.xlu1 %4039 }
 0x657   : > { %26715 = vst [vmem:[#allocation204_spill] sm:$0xff] %v23722_v2 }
 0x658   : > { %20570 = vset.pattern.permute.xlu1 %v26157_v33 }
 0x659   : > { %4502 = vperm.xlu1 %20570, %v23718_v63   ;;  %v4197_v63 = vld [vmem:[#allocation2 + $0x231] sm:$0xff] }
 0x65a   : > { %v23756_v60 = vpack.i.bf16 %v4197_v63, %v4196_v15  ;;  %v26727_v15 = vld [vmem:[#allocation161_spill] sm:$0xff] }
 0x65b   : > { %v2497_v29 = vpop.permute.xlu1 %2496  ;;  %v2092_v63 = vmul.f32 %v21816_v27, %v26727_v15 }
 0x65c   : > { %v2554_v32 = vmul.f32 %v21844_v49, %v2497_v29  ;;  %20625 = vperm.xlu0 %20595, %v23756_v60   ;;  %v2551_v29 = vmul.f32 %v21844_v49, %v26729_v23 }
 0x65d   : > { %4506 = vperm.xlu1 %20570, %v20909_v39   ;;  %v26724_v39 = vld [vmem:[#allocation144_spill] sm:$0xff] }
 0x65e   : > { %v747_v30 = vmul.f32 %v26428_v18, %v26724_v39  ;;  %v2288_v39 = vadd.f32 %v2256_v0, %v2092_v63  ;;  %v2747_v14 = vadd.f32 %v2715_v62, %v2551_v29 }
 0x660   : > { %v2666_v2 = vpop.permute.xlu1 %2665  ;;  %v943_v45 = vadd.f32 %v911_v16, %v747_v30  ;;  %v26730_v16 = vld [vmem:[#allocation175_spill] sm:$0xff] }
 0x661   : > { %v2718_v35 = vmul.f32 %v21829_v25, %v2666_v2  ;;  %20582 = vset.pattern.permute.xlu1 %v26154_v19  ;;  %v3010_v11 = vmul.f32 %v21848_v24, %v26730_v16  ;;  %v1179_v16 = vmul.f32 %v21790_v54, %v23618_v50 }
 0x662   : > { %4348 = vperm.xlu1 %20582, %v23754_v34   ;;  %v1402_v5 = vadd.f32 %v1370_v44, %v943_v45  ;;  %v20632_v44 = vld [vmem:[%s26052_s3 + $0x8] sm:$0xff]  }
 0x663   : > { %v2750_v17 = vadd.f32 %v2718_v35, %v2554_v32  ;;  %v3634_v32 = vmul.f32 %v21856_v31, %v23654_v3  ;;  %v3206_v0 = vadd.f32 %v3174_v58, %v3010_v11  ;;  %v4093_v35 = vmul.f32 %v21876_v56, %v23694_v43  ;;  %17741 = vmatprep.subr.bf16.mxu0 %v20632_v44 }
 0x664   : > { %v23775_v2 = vpop.permute.xlu1 %2669  ;;  %v1861_v30 = vadd.f32 %v1829_v55, %v1402_v5  ;;  %17742 = vmatpush3.bf16.msra.mxu0 %v20632_v44  ;;  %v3929_v55 = vmul.f32 %v21881_v1, %v23690_v21  ;;  %v26731_v5 = vld [vmem:[#allocation177_spill] sm:$0xff]  ;;  %v26732_v21 = vld [vmem:[#allocation63_spill] sm:$0xff]  ;;  %v1802_v11 = vmul.f32 %v26425_v6, %v23665_v10  ;;  %v2261_v44 = vmul.f32 %v21819_v7, %v23706_v38 }
 0x665   : > { %v23779_v15 = vadd.f32 %v2750_v17, %v2323_v20  ;;  %v3666_v3 = vadd.f32 %v3634_v32, %v3470_v26  ;;  %v3593_v20 = vpop.permute.xlu0 %3592  ;;  %v916_v58 = vmul.f32 %v26423_v57, %v26732_v21  ;;  %v1638_v32 = vmul.f32 %v21804_v52, %v23661_v12 }
 0x666   : > { %20583 = vset.pattern.permute.xlu1 %v26157_v33  ;;  %v2320_v40 = vadd.f32 %v2288_v39, %v1861_v30  ;;  %v4125_v62 = vadd.f32 %v4093_v35, %v3929_v55  ;;  %v752_v39 = vmul.f32 %v26428_v18, %v26731_v5  ;;  %v26733_v35 = vld [vmem:[#allocation80_spill] sm:$0xff]  ;;  %v2097_v10 = vmul.f32 %v21816_v27, %v23701_v48  ;;  %v26735_v55 = vld [vmem:[#allocation157_spill] sm:$0xff] }
 0x667   : > { %4514 = vperm.xlu1 %20583, %v23754_v34   ;;  %v1340_v50 = vmul.f32 %v21778_v42, %v26733_v35  ;;  %v1635_v38 = vmul.f32 %v21804_v52, %v26735_v55  ;;  %v3639_v55 = vmul.f32 %v21856_v31, %v3593_v20 }
 0x668   : > { %v2779_v45 = vadd.f32 %v2747_v14, %v2320_v40  ;;  %v1375_v14 = vadd.f32 %v1343_v51, %v1179_v16 }
 0x669   : > { %v4319_v63 = vpop.permute.xlu1 %4318  ;;  %v4052_v26 = vpop.permute.xlu0 %4051 }
 0x66a   : > { %v3238_v28 = vadd.f32 %v3206_v0, %v2779_v45  ;;  %v4388_v23 = vmul.f32 %v21897_v46, %v4319_v63  ;;  %v948_v63 = vadd.f32 %v916_v58, %v752_v39  ;;  %v1834_v45 = vadd.f32 %v1802_v11, %v1638_v32  ;;  %v983_v39 = vld [vmem:[#allocation2 + $0x1f0] sm:$0xff] }
 0x66b   : > { %20584 = vset.pattern.permute.xlu1 %v26154_v19  ;;  %v26740_v58 = vld [vmem:[#allocation25_spill] sm:$0xff] }
 0x66c   : > { %712 = vperm.xlu1 %20584, %v23558_v37   ;;  %v3698_v43 = vadd.f32 %v3666_v3, %v3238_v28  ;;  %v26734_v3 = vld [vmem:[#allocation153_spill] sm:$0xff]  ;;  %v26736_v28 = vld [vmem:[#allocation54_spill] sm:$0xff]  ;;  %v1407_v48 = vadd.f32 %v1375_v14, %v948_v63  ;;  %v749_v16 = vmul.f32 %v26428_v18, %v26740_v58  ;;  %v26742_v63 = vld [vmem:[#allocation200_spill] sm:$0xff] }
 0x66d   : > { %v1176_v12 = vmul.f32 %v21790_v54, %v26734_v3 }
 0x66e   : > { %v4491_v17 = vpop.permute.xlu1 %4490  ;;  %v4157_v22 = vadd.f32 %v4125_v62, %v3698_v43  ;;  %v913_v62 = vmul.f32 %v26423_v57, %v26736_v28  ;;  %v26738_v43 = vld [vmem:[#allocation164_spill] sm:$0xff]  ;;  %v1866_v35 = vadd.f32 %v1834_v45, %v1407_v48 }
 0x66f   : > { %v4552_v29 = vmul.f32 %v21900_v59, %v4491_v17  ;;  %v26737_v17 = vld [vmem:[#allocation33_spill] sm:$0xff]  ;;  %v1372_v11 = vadd.f32 %v1340_v50, %v1176_v12  ;;  %v2717_v12 = vmul.f32 %v21829_v25, %v23515_v53  ;;  %v23858_v53 = vld [vmem:[%s26052_s3 + $0x20] sm:$0xff]  }
 0x670   : > { %20586 = vset.pattern.permute.xlu1 %v26157_v33  ;;  %v1799_v51 = vmul.f32 %v26425_v6, %v26737_v17  ;;  %v945_v50 = vadd.f32 %v913_v62, %v749_v16  ;;  %v4098_v17 = vmul.f32 %v21876_v56, %v4052_v26  ;;  %17775 = vmatprep.subr.bf16.mxu0 %v23858_v53 }
 0x671   : > { %v4584_v30 = vadd.f32 %v4552_v29, %v4388_v23  ;;  %877 = vperm.xlu1 %20586, %v23558_v37   ;;  %v2094_v23 = vmul.f32 %v21816_v27, %v26738_v43  ;;  %v2293_v29 = vadd.f32 %v2261_v44, %v2097_v10  ;;  %v3015_v10 = vmul.f32 %v21848_v24, %v26742_v63  ;;  %v26747_v63 = vld [vmem:[#allocation204_spill] sm:$0xff] }
 0x672   : > { %v1831_v3 = vadd.f32 %v1799_v51, %v1635_v38  ;;  %v1404_v43 = vadd.f32 %v1372_v11, %v945_v50  ;;  %v26744_v38 = vld [vmem:[#allocation208_spill] sm:$0xff]  ;;  %v3636_v16 = vmul.f32 %v21856_v31, %v23677_v36 }
 0x673   : > { %v4616_v40 = vadd.f32 %v4584_v30, %v4157_v22  ;;  %v2507_v0 = vpop.permute.xlu1 %2506  ;;  %v26741_v22 = vld [vmem:[#allocation210_spill] sm:$0xff]  ;;  %v3934_v51 = vmul.f32 %v21881_v1, %v26744_v38 }
 0x674   : > { %v2258_v30 = vmul.f32 %v21819_v7, %v26741_v22  ;;  %v2556_v14 = vmul.f32 %v21844_v49, %v2507_v0  ;;  %v2325_v0 = vadd.f32 %v2293_v29, %v1866_v35  ;;  %v1863_v26 = vadd.f32 %v1831_v3, %v1404_v43  ;;  %v26745_v22 = vld [vmem:[#allocation211_spill] sm:$0xff] }
 0x675   : > { %v4655_v37 = vadd.f32 %v23537_v47, %v4616_v40  ;;  %881 = vperm.xlu1 %20586, %v23649_v13   ;;  %v26739_v13 = vld [vmem:[#allocation169_spill] sm:$0xff]  ;;  %v3179_v40 = vmul.f32 %v21851_v4, %v3133_v9  ;;  %v26743_v9 = vld [vmem:[#allocation203_spill] sm:$0xff] }
 0x676   : > { %v2553_v21 = vmul.f32 %v21844_v49, %v26739_v13  ;;  %v3475_v45 = vmul.f32 %v21872_v61, %v26743_v9  ;;  %v2290_v48 = vadd.f32 %v2258_v30, %v2094_v23  ;;  %v3012_v23 = vmul.f32 %v21848_v24, %v23629_v8  ;;  %v26748_v9 = vld [vmem:[#allocation79_spill] sm:$0xff] }
 0x677   : > { %v4687_v5 = vmax.f32 %v4655_v37, 0.0  ;;  %v4511_v37 = vpop.permute.xlu0 %4510  ;;  %v3211_v20 = vadd.f32 %v3179_v40, %v3015_v10  ;;  %v4393_v30 = vmul.f32 %v21897_v46, %v26745_v22  ;;  %v4095_v10 = vmul.f32 %v21876_v56, %v26747_v63 }
 0x678   : > { %v2674_v32 = vpop.permute.xlu1 %2673  ;;  %v4557_v29 = vmul.f32 %v21900_v59, %v4511_v37  ;;  %v2749_v58 = vadd.f32 %v2717_v12, %v2553_v21  ;;  %v2322_v40 = vadd.f32 %v2290_v48, %v1863_v26  ;;  %v4805_v21 = vld [vmem:[#allocation2 + $0x188] sm:$0xff] }
 0x679   : > { %4720 = vst.msk [vmem:[#allocation2 + $0x190] sm:$0xff] %vm4696_vm1, %v4687_v5  ;;  %v2720_v44 = vmul.f32 %v21829_v25, %v2674_v32  ;;  %20587 = vset.pattern.permute.xlu1 %v26154_v19  ;;  %v3176_v5 = vmul.f32 %v21851_v4, %v23635_v41  ;;  %v3671_v41 = vadd.f32 %v3639_v55, %v3475_v45 }
 0x67a   : > { %1144 = vperm.xlu1 %20587, %v983_v39   ;;  %v4130_v32 = vadd.f32 %v4098_v17, %v3934_v51  ;;  %v4589_v36 = vadd.f32 %v4557_v29, %v4393_v30  ;;  %v2781_v12 = vadd.f32 %v2749_v58, %v2322_v40  ;;  %v3931_v45 = vmul.f32 %v21881_v1, %v26748_v9  ;;  %v26751_v30 = vld [vmem:[#allocation176_spill] sm:$0xff] }
 0x67b   : > { %v2752_v28 = vadd.f32 %v2720_v44, %v2556_v14  ;;  %v3208_v35 = vadd.f32 %v3176_v5, %v3012_v23  ;;  %v26746_v44 = vld [vmem:[#allocation160_spill] sm:$0xff] }
 0x67c   : > { %v23853_v62 = vpop.permute.xlu1 %2677  ;;  %v3472_v8 = vmul.f32 %v21872_v61, %v26746_v44  ;;  %v4127_v17 = vadd.f32 %v4095_v10, %v3931_v45  ;;  %v4807_v40 = vld [vmem:[#allocation2 + $0x1a8] sm:$0xff]  ;;  %v26752_v10 = vld [vmem:[#allocation158_spill] sm:$0xff] }
 0x67d   : > { %v2784_v13 = vadd.f32 %v2752_v28, %v2325_v0  ;;  %v26749_v0 = vld [vmem:[#allocation83_spill] sm:$0xff]  ;;  %v3240_v28 = vadd.f32 %v3208_v35, %v2781_v12  ;;  %v2359_v44 = vld [vmem:[#allocation2 + $0x208] sm:$0xff] }
 0x67e   : > { %20588 = vset.pattern.permute.xlu1 %v26157_v33 }
 0x67f   : > { %v3243_v11 = vadd.f32 %v3211_v20, %v2784_v13  ;;  %1308 = vperm.xlu1 %20588, %v983_v39   ;;  %v3668_v39 = vadd.f32 %v3636_v16, %v3472_v8  ;;  %v26750_v16 = vld [vmem:[#allocation4_spill] sm:$0xff] }
 0x680   : > { %v4806_v14 = vld [vmem:[#allocation2 + $0x190] sm:$0xff] }
 0x681   : > { %v3703_v37 = vadd.f32 %v3671_v41, %v3243_v11  ;;  %v4329_v50 = vpop.permute.xlu1 %4328  ;;  %v4825_v3 = vpack.c.bf16 %v4806_v14, %v4805_v21  ;;  %v3700_v5 = vadd.f32 %v3668_v39, %v3240_v28  ;;  %v26754_v39 = vld [vmem:[#allocation168_spill] sm:$0xff]  ;;  %v26756_v28 = vld [vmem:[#allocation117_spill] sm:$0xff] }
 0x682   : > { %v4390_v51 = vmul.f32 %v21897_v46, %v4329_v50 }
 0x683   : > { %v4162_v55 = vadd.f32 %v4130_v32, %v3703_v37  ;;  %17731 = vmatprep.mubr.msk.bf16.mxu0 %vm4696_vm1, %v4825_v3  ;;  %20589 = vset.pattern.permute.xlu1 %v26154_v19  ;;  %v4159_v29 = vadd.f32 %v4127_v17, %v3700_v5  ;;  %v915_v17 = vmul.f32 %v26423_v57, %v26756_v28 }
 0x684   : > { %1598 = vperm.xlu1 %20589, %v26749_v0  }
 0x685   : > { %v4621_v43 = vadd.f32 %v4589_v36, %v4162_v55  ;;  %v26753_v36 = vld [vmem:[#allocation57_spill] sm:$0xff] }
 0x686   : > { %v4499_v48 = vpop.permute.xlu1 %4498 }
 0x687   : > { %v4660_v38 = vadd.f32 %v23537_v47, %v4621_v43  ;;  %v4554_v20 = vmul.f32 %v21900_v59, %v4499_v48  ;;  %v26758_v48 = vld [vmem:[#allocation137_spill] sm:$0xff] }
 0x688   : > { %20590 = vset.pattern.permute.xlu1 %v26157_v33  ;;  %v1801_v5 = vmul.f32 %v26425_v6, %v26758_v48 }
 0x689   : > { %v4692_v13 = vmax.f32 %v4660_v38, 0.0  ;;  %v4586_v26 = vadd.f32 %v4554_v20, %v4390_v51  ;;  %1763 = vperm.xlu1 %20590, %v26749_v0   ;;  %v26759_v38 = vld [vmem:[#allocation171_spill] sm:$0xff] }
 0x68a   : > { %v751_v51 = vmul.f32 %v26428_v18, %v26759_v38  ;;  %v26766_v38 = vld [vmem:[#allocation199_spill] sm:$0xff] }
 0x68b   : > { %v4618_v58 = vadd.f32 %v4586_v26, %v4159_v29  ;;  %v2956_v23 = vpop.permute.xlu1 %2955  ;;  %4725 = vst.msk [vmem:[#allocation2 + $0x1e8] sm:$0xff] %vm4696_vm1, %v4692_v13  ;;  %v26761_v13 = vld [vmem:[#allocation69_spill] sm:$0xff] }
 0x68c   : > { %v2260_v26 = vmul.f32 %v21819_v7, %v26761_v13  ;;  %v26768_v13 = vld [vmem:[#allocation201_spill] sm:$0xff] }
 0x68d   : > { %v4657_v41 = vadd.f32 %v23537_v47, %v4618_v58  ;;  %1767 = vperm.xlu1 %20590, %v26750_v16   ;;  %v26762_v16 = vld [vmem:[#allocation186_spill] sm:$0xff] }
 0x68f   : > { %v4689_v11 = vmax.f32 %v4657_v41, 0.0 }
 0x690   : > { %v3125_v22 = vpop.permute.xlu1 %3124 }
 0x691   : > { %4722 = vst.msk [vmem:[#allocation2 + $0x1b0] sm:$0xff] %vm4696_vm1, %v4689_v11  ;;  %20591 = vset.pattern.permute.xlu1 %v26154_v19  ;;  %v3177_v41 = vmul.f32 %v21851_v4, %v3125_v22  ;;  %v2096_v11 = vmul.f32 %v21816_v27, %v26762_v16  ;;  %v26770_v16 = vld [vmem:[#allocation64_spill] sm:$0xff] }
 0x692   : > { %2062 = vperm.xlu1 %20591, %v26751_v30  }
 0x694   : > { %v3129_v32 = vpop.permute.xlu1 %3128 }
 0x696   : > { %20592 = vset.pattern.permute.xlu1 %v26157_v33 }
 0x697   : > { %2226 = vperm.xlu1 %20592, %v26751_v30   ;;  %v947_v30 = vadd.f32 %v915_v17, %v751_v51 }
 0x698   : > { %v4808_v35 = vld [vmem:[#allocation2 + $0x1b0] sm:$0xff] }
 0x699   : > { %v23893_v21 = vpop.permute.xlu1 %2970  ;;  %v4826_v14 = vpack.c.bf16 %v4808_v35, %v4807_v40  ;;  %v2719_v35 = vmul.f32 %v21829_v25, %v23775_v2 }
 0x69b   : > { %17732 = vmatmul.mubr.msk.bf16.gmra.mrb[24].mxu0 %vm4696_vm1, %v4826_v14  ;;  %20593 = vset.pattern.permute.xlu1 %v26154_v19  ;;  %v26763_v14 = vld [vmem:[#allocation178_spill] sm:$0xff] }
 0x69c   : > { %2516 = vperm.xlu1 %20593, %v2359_v44  }
 0x69e   : > { %v23897_v8 = vpop.permute.xlu1 %3136 }
 0x6a0   : > { %20594 = vset.pattern.permute.xlu1 %v26157_v33 }
 0x6a1   : > { %2681 = vperm.xlu1 %20594, %v2359_v44   ;;  %v1180_v44 = vmul.f32 %v21790_v54, %v26763_v14 }
 0x6a3   : > { %v3416_v63 = vpop.permute.xlu1 %3415 }
 0x6a4   : > { %v3473_v2 = vmul.f32 %v21872_v61, %v3416_v63  ;;  %v26769_v63 = vld [vmem:[#allocation206_spill] sm:$0xff] }
 0x6a5   : > { %2685 = vperm.xlu1 %20594, %v26752_v10   ;;  %v3013_v10 = vmul.f32 %v21848_v24, %v2956_v23  ;;  %v3014_v23 = vmul.f32 %v21848_v24, %v26766_v38 }
 0x6a7   : > { %v3209_v17 = vadd.f32 %v3177_v41, %v3013_v10 }
 0x6a8   : > { %v3585_v37 = vpop.permute.xlu1 %3584 }
 0x6a9   : > { %20596 = vset.pattern.permute.xlu1 %v26154_v19 }
 0x6aa   : > { %2980 = vperm.xlu1 %20596, %v23754_v34  }
 0x6ac   : > { %v3589_v50 = vpop.permute.xlu1 %3588 }
 0x6ad   : > { %v3638_v41 = vmul.f32 %v21856_v31, %v3589_v50 }
 0x6ae   : > { %20597 = vset.pattern.permute.xlu1 %v26157_v33  ;;  %v26755_v33 = vld [vmem:[#allocation140_spill] sm:$0xff] }
 0x6af   : > { %3144 = vperm.xlu1 %20597, %v23754_v34   ;;  %v1342_v34 = vmul.f32 %v21778_v42, %v26755_v33 }
 0x6b1   : > { %v23905_v3 = vpop.permute.xlu1 %3430 }
 0x6b3   : > { %20598 = vset.pattern.permute.xlu1 %v26154_v19  ;;  %v26757_v19 = vld [vmem:[#allocation152_spill] sm:$0xff] }
 0x6b4   : > { %20600 = vperm.xlu1 %20598, %v26753_v36   ;;  %v1178_v43 = vmul.f32 %v21790_v54, %v26757_v19  ;;  %v3637_v36 = vmul.f32 %v21856_v31, %v3585_v37  ;;  %v2292_v19 = vadd.f32 %v2260_v26, %v2096_v11  ;;  %v26767_v37 = vld [vmem:[#allocation66_spill] sm:$0xff]  ;;  %v917_v11 = vmul.f32 %v26423_v57, %v26770_v16  ;;  %v26776_v16 = vld [vmem:[#allocation209_spill] sm:$0xff] }
 0x6b5   : > { %v1344_v51 = vmul.f32 %v21778_v42, %v26767_v37 }
 0x6b6   : > { %v23909_v12 = vpop.permute.xlu1 %3596  ;;  %v1374_v29 = vadd.f32 %v1342_v34, %v1178_v43  ;;  %v26765_v34 = vld [vmem:[#allocation192_spill] sm:$0xff]  ;;  %v3178_v43 = vmul.f32 %v21851_v4, %v3129_v32  ;;  %v3669_v26 = vadd.f32 %v3637_v36, %v3473_v2 }
 0x6b7   : > { %v2555_v22 = vmul.f32 %v21844_v49, %v26765_v34  ;;  %v26772_v34 = vld [vmem:[#allocation148_spill] sm:$0xff] }
 0x6b8   : > { %20610 = vperm.xlu1 %20598, %v26754_v39   ;;  %v26764_v39 = vld [vmem:[#allocation182_spill] sm:$0xff]  ;;  %v1406_v28 = vadd.f32 %v1374_v29, %v947_v30  ;;  %v3474_v29 = vmul.f32 %v21872_v61, %v26768_v13  ;;  %v26771_v30 = vld [vmem:[#allocation72_spill] sm:$0xff]  ;;  %v753_v50 = vmul.f32 %v26428_v18, %v26772_v34 }
 0x6b9   : > { %v1639_v33 = vmul.f32 %v21804_v52, %v26764_v39  ;;  %v1803_v14 = vmul.f32 %v26425_v6, %v26771_v30 }
 0x6ba   : > { %v3670_v13 = vadd.f32 %v3638_v41, %v3474_v29 }
 0x6bb   : > { %v3875_v9 = vpop.permute.xlu1 %3874 }
 0x6bc   : > { %20620 = vperm.xlu1 %20598, %v23756_v60   ;;  %v26760_v60 = vld [vmem:[#allocation180_spill] sm:$0xff]  ;;  %v3932_v32 = vmul.f32 %v21881_v1, %v3875_v9  ;;  %v1376_v9 = vadd.f32 %v1344_v51, %v1180_v44 }
 0x6bd   : > { %v1637_v20 = vmul.f32 %v21804_v52, %v26760_v60 }
 0x6bf   : > { %v1833_v40 = vadd.f32 %v1801_v5, %v1637_v20  ;;  %v2751_v20 = vadd.f32 %v2719_v35, %v2555_v22  ;;  %v3210_v35 = vadd.f32 %v3178_v43, %v3014_v23  ;;  %v26773_v22 = vld [vmem:[#allocation75_spill] sm:$0xff]  ;;  %v949_v43 = vadd.f32 %v917_v11, %v753_v50 }
 0x6c0   : > { %v4044_v45 = vpop.permute.xlu1 %4043  ;;  %v4392_v11 = vmul.f32 %v21897_v46, %v26776_v16  ;;  %v3476_v50 = vmul.f32 %v21872_v61, %v23905_v3  ;;  %v4811_v16 = vld [vmem:[#allocation2 + $0x1e8] sm:$0xff] }
 0x6c1   : > { %v4096_v48 = vmul.f32 %v21876_v56, %v4044_v45  ;;  %v1865_v60 = vadd.f32 %v1833_v40, %v1406_v28  ;;  %v3933_v45 = vmul.f32 %v21881_v1, %v26769_v63  ;;  %v3241_v40 = vadd.f32 %v3209_v17, %v23779_v15  ;;  %v26774_v15 = vld [vmem:[#allocation188_spill] sm:$0xff] }
 0x6c2   : > { %v2262_v28 = vmul.f32 %v21819_v7, %v26773_v22  ;;  %v2098_v17 = vmul.f32 %v21816_v27, %v26774_v15  ;;  %v1408_v29 = vadd.f32 %v1376_v9, %v949_v43 }
 0x6c3   : > { %v2324_v10 = vadd.f32 %v2292_v19, %v1865_v60  ;;  %v4128_v39 = vadd.f32 %v4096_v48, %v3932_v32  ;;  %v3701_v37 = vadd.f32 %v3669_v26, %v3241_v40  ;;  %v2721_v48 = vmul.f32 %v21829_v25, %v23853_v62 }
 0x6c4   : > { %v4048_v55 = vpop.permute.xlu1 %4047  ;;  %v2294_v41 = vadd.f32 %v2262_v28, %v2098_v17  ;;  %v3640_v40 = vmul.f32 %v21856_v31, %v23909_v12 }
 0x6c5   : > { %v4097_v36 = vmul.f32 %v21876_v56, %v4048_v55  ;;  %v2783_v2 = vadd.f32 %v2751_v20, %v2324_v10  ;;  %v1835_v55 = vadd.f32 %v1803_v14, %v1639_v33  ;;  %v4160_v23 = vadd.f32 %v4128_v39, %v3701_v37  ;;  %v26775_v20 = vld [vmem:[#allocation196_spill] sm:$0xff] }
 0x6c6   : > { %v2557_v26 = vmul.f32 %v21844_v49, %v26775_v20 }
 0x6c7   : > { %v3242_v44 = vadd.f32 %v3210_v35, %v2783_v2  ;;  %v4129_v51 = vadd.f32 %v4097_v36, %v3933_v45  ;;  %v1867_v14 = vadd.f32 %v1835_v55, %v1408_v29  ;;  %v3016_v45 = vmul.f32 %v21848_v24, %v23893_v21  ;;  %v718_v29 = vpop.permute.xlu0 %717 }
 0x6c8   : > { %v2753_v10 = vadd.f32 %v2721_v48, %v2557_v26  ;;  %v3672_v21 = vadd.f32 %v3640_v40, %v3476_v50 }
 0x6c9   : > { %v23913_v0 = vpop.permute.xlu1 %3889  ;;  %v3702_v33 = vadd.f32 %v3670_v13, %v3242_v44  ;;  %v2326_v36 = vadd.f32 %v2294_v41, %v1867_v14  ;;  %v4731_v14 = vld [vmem:[#allocation2 + $0x27] sm:$0xff] }
 0x6ca   : > { %v3935_v12 = vmul.f32 %v21881_v1, %v23913_v0 }
 0x6cb   : > { %v4161_v35 = vadd.f32 %v4129_v51, %v3702_v33  ;;  %v1140_v33 = vpop.permute.xlu0 %1139 }
 0x6ce   : > { %v23929_v58 = vpop.permute.xlu1 %4055 }
 0x6cf   : > { %v4099_v9 = vmul.f32 %v21876_v56, %v23929_v58  ;;  %v1604_v40 = vpop.permute.xlu0 %1603 }
 0x6d3   : > { %v4334_v5 = vpop.permute.xlu1 %4333 }
 0x6d4   : > { %v4391_v63 = vmul.f32 %v21897_v46, %v4334_v5  ;;  %v3180_v5 = vmul.f32 %v21851_v4, %v23897_v8 }
 0x6d6   : > { %v3212_v34 = vadd.f32 %v3180_v5, %v3016_v45  ;;  %v4729_v5 = vld [vmem:[#allocation2 + $0x7] sm:$0xff] }
 0x6d8   : > { %v4503_v38 = vpop.permute.xlu1 %4502 }
 0x6d9   : > { %v4555_v19 = vmul.f32 %v21900_v59, %v4503_v38  ;;  %v2785_v38 = vadd.f32 %v2753_v10, %v2326_v36  ;;  %v4732_v10 = vld [vmem:[#allocation2 + $0x2f] sm:$0xff] }
 0x6da   : > { %v20634_v36 = vld [vmem:[%s26052_s3 + $0x28] sm:$0xff]  }
 0x6db   : > { %v4587_v60 = vadd.f32 %v4555_v19, %v4391_v63  ;;  %v3244_v13 = vadd.f32 %v3212_v34, %v2785_v38  ;;  %v4131_v63 = vadd.f32 %v4099_v9, %v3935_v12  ;;  %v24025_v9 = vpop.permute.xlu0 %2057  ;;  %v4737_v38 = vld [vmem:[#allocation2 + $0x87] sm:$0xff] }
 0x6dc   : > { %v4507_v32 = vpop.permute.xlu1 %4506 }
 0x6dd   : > { %v4619_v30 = vadd.f32 %v4587_v60, %v4160_v23  ;;  %v4556_v62 = vmul.f32 %v21900_v59, %v4507_v32  ;;  %v3704_v3 = vadd.f32 %v3672_v21, %v3244_v13  ;;  %v4730_v32 = vld [vmem:[#allocation2 + $0xf] sm:$0xff] }
 0x6de   : > { %v4738_v21 = vld [vmem:[#allocation2 + $0x8f] sm:$0xff] }
 0x6df   : > { %v4658_v39 = vadd.f32 %v23537_v47, %v4619_v30  ;;  %v4588_v8 = vadd.f32 %v4556_v62, %v4392_v11  ;;  %v4163_v43 = vadd.f32 %v4131_v63, %v3704_v3  ;;  %v24037_v13 = vpop.permute.xlu0 %2521  ;;  %v4742_v3 = vld [vmem:[#allocation2 + $0xcf] sm:$0xff] }
 0x6e1   : > { %v4690_v22 = vmax.f32 %v4658_v39, 0.0  ;;  %v4620_v28 = vadd.f32 %v4588_v8, %v4161_v35  ;;  %v4349_v2 = vpop.permute.xlu1 %4348  ;;  %v4733_v35 = vld [vmem:[#allocation2 + $0x47] sm:$0xff]  ;;  %v4734_v39 = vld [vmem:[#allocation2 + $0x4f] sm:$0xff]  ;;  %v24013_v8 = vpack.c.bf16 %v4732_v10, %v4731_v14  ;;  %v1181_v14 = vmul.f32 %v21790_v54, %v1140_v33 }
 0x6e2   : > { %v4394_v58 = vmul.f32 %v21897_v46, %v4349_v2  ;;  %v24018_v34 = vpack.c.bf16 %v4734_v39, %v4733_v35  ;;  %v4736_v2 = vld [vmem:[#allocation2 + $0x6f] sm:$0xff] }
 0x6e3   : > { %4723 = vst.msk [vmem:[#allocation2 + $0x1c8] sm:$0xff] %vm4696_vm1, %v4690_v22  ;;  %v4659_v37 = vadd.f32 %v23537_v47, %v4620_v28  ;;  %v24030_v22 = vld [vmem:[%s26052_s3 + $0x30] sm:$0xff]   ;;  %v4735_v28 = vld [vmem:[#allocation2 + $0x67] sm:$0xff] }
 0x6e5   : > { %v4691_v19 = vmax.f32 %v4659_v37, 0.0  ;;  %v24032_v37 = vpack.c.bf16 %v4736_v2, %v4735_v28 }
 0x6e6   : > { %v4515_v15 = vpop.permute.xlu1 %4514 }
 0x6e7   : > { %4724 = vst.msk [vmem:[#allocation2 + $0x1d0] sm:$0xff] %vm4696_vm1, %v4691_v19  ;;  %v4558_v17 = vmul.f32 %v21900_v59, %v4515_v15  ;;  %v4739_v19 = vld [vmem:[#allocation2 + $0xa7] sm:$0xff]  ;;  %v4740_v15 = vld [vmem:[#allocation2 + $0xaf] sm:$0xff] }
 0x6e9   : > { %v4590_v55 = vadd.f32 %v4558_v17, %v4394_v58  ;;  %v24043_v58 = vpop.permute.xlu0 %2975  ;;  %v24045_v17 = vpack.c.bf16 %v4740_v15, %v4739_v19  ;;  %v4750_v15 = vld [vmem:[#allocation2 + $0x14f] sm:$0xff] }
 0x6ea   : > { %v4809_v23 = vld [vmem:[#allocation2 + $0x1c8] sm:$0xff] }
 0x6eb   : > { %v4622_v48 = vadd.f32 %v4590_v55, %v4163_v43  ;;  %v23996_v44 = vpop.permute.xlu1 %712  ;;  %v4741_v43 = vld [vmem:[#allocation2 + $0xc7] sm:$0xff] }
 0x6ec   : > { %v754_v35 = vmul.f32 %v26428_v18, %v23996_v44  ;;  %v1641_v44 = vmul.f32 %v21804_v52, %v1604_v40 }
 0x6ed   : > { %v4661_v0 = vadd.f32 %v23537_v47, %v4622_v48  ;;  %v4761_v47 = vpack.c.bf16 %v4730_v32, %v4729_v5  ;;  %v24047_v48 = vpack.c.bf16 %v4742_v3, %v4741_v43  ;;  %v4743_v5 = vld [vmem:[#allocation2 + $0xe7] sm:$0xff] }
 0x6ee   : > { %v4810_v51 = vld [vmem:[#allocation2 + $0x1d0] sm:$0xff] }
 0x6ef   : > { %v4693_v60 = vmax.f32 %v4661_v0, 0.0  ;;  %v23999_v20 = vpack.c.bf16 %v4810_v51, %v4809_v23  ;;  %v4744_v0 = vld [vmem:[#allocation2 + $0xef] sm:$0xff]  ;;  %v1305_v51 = vpop.permute.xlu0 %1304 }
 0x6f0   : > { %v24001_v26 = vpop.permute.xlu1 %877  ;;  %v24053_v32 = vpack.c.bf16 %v4744_v0, %v4743_v5  ;;  %v1345_v2 = vmul.f32 %v21778_v42, %v1305_v51  ;;  %v4749_v0 = vld [vmem:[#allocation2 + $0x147] sm:$0xff] }
 0x6f1   : > { %4726 = vst.msk [vmem:[#allocation2 + $0x1f0] sm:$0xff] %vm4696_vm1, %v4693_v60  ;;  %17735 = vmatprep.mubr.msk.bf16.mxu0 %vm4696_vm1, %v23999_v20  ;;  %v4746_v60 = vld [vmem:[#allocation2 + $0x10f] sm:$0xff]  ;;  %v918_v39 = vmul.f32 %v26423_v57, %v24001_v26 }
 0x6f2   : > { %v1377_v43 = vadd.f32 %v1345_v2, %v1181_v14  ;;  %v4751_v14 = vld [vmem:[#allocation2 + $0x167] sm:$0xff]  ;;  %v2559_v2 = vmul.f32 %v21844_v49, %v24037_v13 }
 0x6f3   : > { %v950_v3 = vadd.f32 %v918_v39, %v754_v35  ;;  %v4753_v35 = vld [vmem:[#allocation2 + $0x187] sm:$0xff] }
 0x6f4   : > { %v24006_v41 = vpop.permute.xlu1 %881 }
 0x6f5   : > { %v919_v28 = vmul.f32 %v26423_v57, %v24006_v41 }
 0x6f8   : > { %v4812_v11 = vld [vmem:[#allocation2 + $0x1f0] sm:$0xff] }
 0x6f9   : > { %v24008_v30 = vpack.c.bf16 %v4812_v11, %v4811_v16  ;;  %v1145_v62 = vpop.permute.xlu1 %1144  ;;  %v4745_v16 = vld [vmem:[#allocation2 + $0x107] sm:$0xff] }
 0x6fa   : > { %v24055_v11 = vpack.c.bf16 %v4746_v60, %v4745_v16 }
 0x6fb   : > { %17736 = vmatmul.mubr.msk.bf16.gmra.mrb[28].mxu0 %vm4696_vm1, %v24008_v30 }
 0x6fc   : > { %17743 = vmatprep.mubr.msk.bf16.mxu0 %vm4696_vm1, %v4761_v47  ;;  %v755_v47 = vmul.f32 %v26428_v18, %v718_v29  ;;  %v1182_v29 = vmul.f32 %v21790_v54, %v1145_v62  ;;  %v24078_v62 = vpack.c.bf16 %v4750_v15, %v4749_v0 }
 0x6fe   : > { %v1309_v45 = vpop.permute.xlu1 %1308  ;;  %v951_v18 = vadd.f32 %v919_v28, %v755_v47 }
 0x6ff   : > { %v1346_v33 = vmul.f32 %v21778_v42, %v1309_v45  ;;  %v2099_v45 = vmul.f32 %v21816_v27, %v24025_v9 }
 0x701   : > { %v1378_v60 = vadd.f32 %v1346_v33, %v1182_v29 }
 0x703   : > { %17744 = vmatmul.mubr.msk.bf16.vlgmr.msra.gmra.mrb[0].mxu0 %vm4696_vm1, %v24013_v8  ;;  %v1599_v50 = vpop.permute.xlu1 %1598 }
 0x704   : > { %17776 = vmatpush3.bf16.msra.mxu0 %v23858_v53  ;;  %17747 = vmatprep.mubr.msk.bf16.mxu0 %vm4696_vm1, %v24018_v34  ;;  %v24035_v53 = vpack.c.bf16 %v4738_v21, %v4737_v38  ;;  %v2223_v38 = vpop.permute.xlu0 %2222  ;;  %v4747_v21 = vld [vmem:[#allocation2 + $0x127] sm:$0xff]  ;;  %v1640_v57 = vmul.f32 %v21804_v52, %v1599_v50  ;;  %v4752_v52 = vld [vmem:[#allocation2 + $0x16f] sm:$0xff] }
 0x705   : > { %17777 = vmatprep.subr.bf16.mxu0 %v20634_v36  ;;  %v2263_v51 = vmul.f32 %v21819_v7, %v2223_v38  ;;  %v4754_v50 = vld [vmem:[#allocation2 + $0x18f] sm:$0xff]  ;;  %v24089_v39 = vpack.c.bf16 %v4752_v52, %v4751_v14 }
 0x707   : > { %v2295_v29 = vadd.f32 %v2263_v51, %v2099_v45  ;;  %v5277_v51 = vld [vmem:[#allocation2 + $0x11] sm:$0xff] }
 0x708   : > { %17778 = vmatpush3.bf16.msra.mxu0 %v20634_v36  ;;  %v1764_v12 = vpop.permute.xlu1 %1763  ;;  %v4748_v36 = vld [vmem:[#allocation2 + $0x12f] sm:$0xff]  ;;  %v3141_v42 = vpop.permute.xlu0 %3140 }
 0x709   : > { %17811 = vmatprep.subr.bf16.mxu0 %v24030_v22  ;;  %v24072_v19 = vpack.c.bf16 %v4748_v36, %v4747_v21  ;;  %v1804_v41 = vmul.f32 %v26425_v6, %v1764_v12  ;;  %v1410_v12 = vadd.f32 %v1378_v60, %v951_v18  ;;  %v24091_v36 = vpack.c.bf16 %v4754_v50, %v4753_v35  ;;  %v4755_v60 = vld [vmem:[#allocation2 + $0x1a7] sm:$0xff] }
 0x70b   : > { %17748 = vmatmul.mubr.msk.bf16.gmra.mrb[4].mxu0 %vm4696_vm1, %v24032_v37  ;;  %v1836_v5 = vadd.f32 %v1804_v41, %v1640_v57 }
 0x70c   : > { %17751 = vmatprep.mubr.msk.bf16.mxu0 %vm4696_vm1, %v24035_v53  ;;  %v1768_v63 = vpop.permute.xlu1 %1767  ;;  %v20606_v9 = vpop.permute.xlu0 %20605 }
 0x70d   : > { %v1805_v54 = vmul.f32 %v26425_v6, %v1768_v63  ;;  %v1409_v63 = vadd.f32 %v1377_v43, %v950_v3  ;;  %v4756_v3 = vld [vmem:[#allocation2 + $0x1af] sm:$0xff]  ;;  %v20608_v57 = vunpack.i.h.bf16 %v20606_v9  ;;  %v20607_v41 = vunpack.i.l.bf16 %v20606_v9 }
 0x70e   : > { %v4758_v43 = vld [vmem:[#allocation2 + $0x1cf] sm:$0xff] }
 0x70f   : > { %v1837_v6 = vadd.f32 %v1805_v54, %v1641_v44  ;;  %v1868_v38 = vadd.f32 %v1836_v5, %v1409_v63  ;;  %v24107_v54 = vpack.c.bf16 %v4756_v3, %v4755_v60  ;;  %v3641_v63 = vmul.f32 %v20607_v41, %v21856_v31  ;;  %v4760_v9 = vld [vmem:[#allocation2 + $0x1ef] sm:$0xff] }
 0x710   : > { %v5278_v41 = vld [vmem:[#allocation2 + $0x29] sm:$0xff] }
 0x711   : > { %v2063_v55 = vpop.permute.xlu1 %2062  ;;  %v1869_v28 = vadd.f32 %v1837_v6, %v1410_v12  ;;  %v2327_v13 = vadd.f32 %v2295_v29, %v1868_v38  ;;  %v3642_v6 = vmul.f32 %v20608_v57, %v21856_v31 }
 0x712   : > { %v2100_v16 = vmul.f32 %v21816_v27, %v2063_v55  ;;  %v3017_v55 = vmul.f32 %v21848_v24, %v24043_v58  ;;  %v4757_v58 = vld [vmem:[#allocation2 + $0x1c7] sm:$0xff] }
 0x713   : > { %17752 = vmatmul.mubr.msk.bf16.gmra.mrb[8].mxu0 %vm4696_vm1, %v24045_v17 }
 0x714   : > { %17755 = vmatprep.mubr.msk.bf16.mxu0 %vm4696_vm1, %v24047_v48 }
 0x716   : > { %v2227_v23 = vpop.permute.xlu1 %2226 }
 0x717   : > { %v2264_v47 = vmul.f32 %v21819_v7, %v2227_v23  ;;  %v3181_v23 = vmul.f32 %v21851_v4, %v3141_v42  ;;  %v5276_v42 = vld [vmem:[#allocation2 + $0x9] sm:$0xff] }
 0x718   : > { %v5308_v35 = vpack.c.bf16 %v5277_v51, %v5276_v42  ;;  %v5280_v51 = vld [vmem:[#allocation2 + $0x49] sm:$0xff] }
 0x719   : > { %v2296_v21 = vadd.f32 %v2264_v47, %v2100_v16  ;;  %v3213_v45 = vadd.f32 %v3181_v23, %v3017_v55  ;;  %v4759_v55 = vld [vmem:[#allocation2 + $0x1e7] sm:$0xff] }
 0x71b   : > { %17756 = vmatmul.mubr.msk.bf16.gmra.mrb[12].mxu0 %vm4696_vm1, %v24053_v32  ;;  %v2517_v10 = vpop.permute.xlu1 %2516  ;;  %v2328_v18 = vadd.f32 %v2296_v21, %v1869_v28 }
 0x71c   : > { %17759 = vmatprep.mubr.msk.bf16.mxu0 %vm4696_vm1, %v24055_v11  ;;  %v2558_v15 = vmul.f32 %v21844_v49, %v2517_v10 }
 0x720   : > { %v2682_v26 = vpop.permute.xlu1 %2681 }
 0x721   : > { %v2722_v27 = vmul.f32 %v21829_v25, %v2682_v26 }
 0x723   : > { %17760 = vmatmul.mubr.msk.bf16.gmra.mrb[16].mxu0 %vm4696_vm1, %v24072_v19  ;;  %v2754_v44 = vadd.f32 %v2722_v27, %v2558_v15 }
 0x724   : > { %17763 = vmatprep.mubr.msk.bf16.mxu0 %vm4696_vm1, %v24078_v62  ;;  %v2686_v40 = vpop.permute.xlu1 %2685 }
 0x725   : > { %v2723_v7 = vmul.f32 %v21829_v25, %v2686_v40  ;;  %v20616_v25 = vpop.permute.xlu0 %20615  ;;  %v24109_v40 = vpack.c.bf16 %v4758_v43, %v4757_v58  ;;  %v2786_v50 = vadd.f32 %v2754_v44, %v2327_v13 }
 0x726   : > { %v20618_v5 = vunpack.i.h.bf16 %v20616_v25 }
 0x727   : > { %v2755_v49 = vadd.f32 %v2723_v7, %v2559_v2  ;;  %v3245_v28 = vadd.f32 %v3213_v45, %v2786_v50 }
 0x729   : > { %v2981_v33 = vpop.permute.xlu1 %2980  ;;  %v2787_v52 = vadd.f32 %v2755_v49, %v2328_v18  ;;  %v20626_v14 = vpop.permute.xlu0 %20625  ;;  %v24121_v18 = vpack.c.bf16 %v4760_v9, %v4759_v55 }
 0x72a   : > { %v3018_v10 = vmul.f32 %v21848_v24, %v2981_v33  ;;  %v4101_v33 = vmul.f32 %v20618_v5, %v21876_v56  ;;  %v20628_v27 = vunpack.i.h.bf16 %v20626_v14  ;;  %v20627_v7 = vunpack.i.l.bf16 %v20626_v14  ;;  %v20636_v5 = vld [vmem:[%s26052_s3 + $0x38] sm:$0xff]   ;;  %v20637_v14 = vld [vmem:[%s26052_s3 + $0x40] sm:$0xff]  }
 0x72b   : > { %17764 = vmatmul.mubr.msk.bf16.gmra.mrb[20].mxu0 %vm4696_vm1, %v24089_v39 }
 0x72c   : > { %17767 = vmatprep.mubr.msk.bf16.mxu0 %vm4696_vm1, %v24091_v36 }
 0x72e   : > { %v3145_v26 = vpop.permute.xlu1 %3144 }
 0x72f   : > { %v3182_v0 = vmul.f32 %v21851_v4, %v3145_v26  ;;  %v20617_v4 = vunpack.i.l.bf16 %v20616_v25  ;;  %v4559_v26 = vmul.f32 %v20627_v7, %v21900_v59  ;;  %v5287_v7 = vld [vmem:[#allocation2 + $0xb1] sm:$0xff] }
 0x731   : > { %v3214_v12 = vadd.f32 %v3182_v0, %v3018_v10  ;;  %v4100_v21 = vmul.f32 %v20617_v4, %v21876_v56  ;;  %v4560_v56 = vmul.f32 %v20628_v27, %v21900_v59  ;;  %v5281_v59 = vld [vmem:[#allocation2 + $0x51] sm:$0xff] }
 0x732   : > { %v24137_v4 = vpack.c.bf16 %v5281_v59, %v5280_v51  ;;  %v5289_v27 = vld [vmem:[#allocation2 + $0xd1] sm:$0xff] }
 0x733   : > { %17768 = vmatmul.mubr.msk.bf16.gmra.mrb[24].mxu0 %vm4696_vm1, %v24107_v54  ;;  %v20601_v24 = vpop.permute.xlu1 %20600  ;;  %v3246_v2 = vadd.f32 %v3214_v12, %v2787_v52  ;;  %v5279_v52 = vld [vmem:[#allocation2 + $0x31] sm:$0xff] }
 0x734   : > { %17771 = vmatprep.mubr.msk.bf16.mxu0 %vm4696_vm1, %v24109_v40  ;;  %v20603_v16 = vunpack.i.h.bf16 %v20601_v24  ;;  %v20602_v47 = vunpack.i.l.bf16 %v20601_v24  ;;  %v24132_v24 = vpack.c.bf16 %v5279_v52, %v5278_v41  ;;  %v5300_v41 = vld [vmem:[#allocation2 + $0x189] sm:$0xff]  ;;  %v5303_v51 = vld [vmem:[#allocation2 + $0x1b1] sm:$0xff] }
 0x735   : > { %v5304_v52 = vld [vmem:[#allocation2 + $0x1c9] sm:$0xff] }
 0x736   : > { %v3478_v38 = vmul.f32 %v20603_v16, %v21872_v61  ;;  %v3477_v29 = vmul.f32 %v20602_v47, %v21872_v61 }
 0x737   : > { %v20611_v15 = vpop.permute.xlu1 %20610 }
 0x738   : > { %v3674_v31 = vadd.f32 %v3642_v6, %v3478_v38  ;;  %v3673_v13 = vadd.f32 %v3641_v63, %v3477_v29  ;;  %v20613_v23 = vunpack.i.h.bf16 %v20611_v15  ;;  %v20612_v3 = vunpack.i.l.bf16 %v20611_v15  ;;  %v5283_v38 = vld [vmem:[#allocation2 + $0x71] sm:$0xff]  ;;  %v5288_v15 = vld [vmem:[#allocation2 + $0xc9] sm:$0xff] }
 0x739   : > { %v5285_v29 = vld [vmem:[#allocation2 + $0x91] sm:$0xff] }
 0x73a   : > { %v3706_v44 = vadd.f32 %v3674_v31, %v3246_v2  ;;  %v3705_v49 = vadd.f32 %v3673_v13, %v3245_v28  ;;  %v3937_v10 = vmul.f32 %v20613_v23, %v21881_v1  ;;  %v3936_v61 = vmul.f32 %v20612_v3, %v21881_v1  ;;  %v5284_v2 = vld [vmem:[#allocation2 + $0x89] sm:$0xff]  ;;  %v5291_v23 = vld [vmem:[#allocation2 + $0xf1] sm:$0xff] }
 0x73b   : > { %17772 = vmatmul.mubr.msk.bf16.gmra.mrb[28].mxu0 %vm4696_vm1, %v24121_v18  ;;  %v20621_v25 = vpop.permute.xlu1 %20620  ;;  %v24162_v31 = vpack.c.bf16 %v5289_v27, %v5288_v15  ;;  %v5290_v13 = vld [vmem:[#allocation2 + $0xe9] sm:$0xff]  ;;  %v20640_v27 = vld [vmem:[%s26052_s3 + $0x58] sm:$0xff]  }
 0x73c   : > { %17779 = vmatprep.mubr.msk.bf16.mxu0 %vm4696_vm1, %v5308_v35  ;;  %v4133_v43 = vadd.f32 %v4101_v33, %v3937_v10  ;;  %v4132_v0 = vadd.f32 %v4100_v21, %v3936_v61  ;;  %v20623_v60 = vunpack.i.h.bf16 %v20621_v25  ;;  %v20622_v57 = vunpack.i.l.bf16 %v20621_v25  ;;  %v5282_v35 = vld [vmem:[#allocation2 + $0x69] sm:$0xff]  ;;  %v5297_v25 = vld [vmem:[#allocation2 + $0x151] sm:$0xff] }
 0x73d   : > { %v24154_v33 = vpack.c.bf16 %v5285_v29, %v5284_v2  ;;  %v5286_v21 = vld [vmem:[#allocation2 + $0xa9] sm:$0xff] }
 0x73e   : > { %v4164_v58 = vadd.f32 %v4132_v0, %v3705_v49  ;;  %v4165_v45 = vadd.f32 %v4133_v43, %v3706_v44  ;;  %v4396_v42 = vmul.f32 %v20623_v60, %v21897_v46  ;;  %v4395_v1 = vmul.f32 %v20622_v57, %v21897_v46  ;;  %v20910_v46 = vld [vmem:[%s26051_s2] ss:$0 sm:$0xff]  ;;  %v5292_v3 = vld [vmem:[#allocation2 + $0x109] sm:$0xff]  ;;  %v5293_v44 = vld [vmem:[#allocation2 + $0x111] sm:$0xff] }
 0x73f   : > { %v24160_v55 = vpack.c.bf16 %v5287_v7, %v5286_v21  ;;  %v24168_v49 = vpack.c.bf16 %v5291_v23, %v5290_v13  ;;  %v24170_v10 = vpack.c.bf16 %v5293_v44, %v5292_v3  ;;  %v5294_v61 = vld [vmem:[#allocation2 + $0x129] sm:$0xff]  ;;  %v5299_v57 = vld [vmem:[#allocation2 + $0x171] sm:$0xff]  ;;  %v20641_v13 = vld [vmem:[%s26052_s3 + $0x60] sm:$0xff]  }
 0x740   : > { %v4592_v50 = vadd.f32 %v4560_v56, %v4396_v42  ;;  %v4591_v12 = vadd.f32 %v4559_v26, %v4395_v1  ;;  %v5295_v56 = vld [vmem:[#allocation2 + $0x131] sm:$0xff]  ;;  %v5296_v26 = vld [vmem:[#allocation2 + $0x149] sm:$0xff] }
 0x741   : > { %v24176_v43 = vpack.c.bf16 %v5295_v56, %v5294_v61  ;;  %v24178_v0 = vpack.c.bf16 %v5297_v25, %v5296_v26  ;;  %v5298_v60 = vld [vmem:[#allocation2 + $0x169] sm:$0xff] }
 0x742   : > { %v4623_v6 = vadd.f32 %v4591_v12, %v4164_v58  ;;  %v4624_v63 = vadd.f32 %v4592_v50, %v4165_v45  ;;  %v5301_v58 = vld [vmem:[#allocation2 + $0x191] sm:$0xff]  ;;  %v24184_v45 = vpack.c.bf16 %v5299_v57, %v5298_v60  ;;  %v5302_v1 = vld [vmem:[#allocation2 + $0x1a9] sm:$0xff] }
 0x743   : > { %17780 = vmatmul.mubr.msk.bf16.vlgmr.msra.gmra.mrb[0].mxu0 %vm4696_vm1, %v24132_v24  ;;  %v24186_v42 = vpack.c.bf16 %v5301_v58, %v5300_v41  ;;  %v5305_v50 = vld [vmem:[#allocation2 + $0x1d1] sm:$0xff]  ;;  %v24192_v12 = vpack.c.bf16 %v5303_v51, %v5302_v1  ;;  %v5890_v2 = vld [vmem:[#allocation2 + $0x48] sm:$0xff] }
 0x744   : > { %17812 = vmatpush3.bf16.msra.mxu0 %v24030_v22  ;;  %17783 = vmatprep.mubr.msk.bf16.mxu0 %vm4696_vm1, %v24137_v4  ;;  %v4662_v16 = vadd.f32 %v20910_v46, %v4623_v6  ;;  %v4663_v47 = vadd.f32 %v20910_v46, %v4624_v63  ;;  %v24152_v22 = vpack.c.bf16 %v5283_v38, %v5282_v35  ;;  %v5307_v6 = vld [vmem:[#allocation2 + $0x1f1] sm:$0xff]  ;;  %v20638_v46 = vld [vmem:[%s26052_s3 + $0x48] sm:$0xff]  }
 0x745   : > { %17813 = vmatprep.subr.bf16.mxu0 %v20636_v5  ;;  %v24194_v59 = vpack.c.bf16 %v5305_v50, %v5304_v52  ;;  %v5892_v38 = vld [vmem:[#allocation2 + $0x68] sm:$0xff]  ;;  %v5891_v29 = vld [vmem:[#allocation2 + $0x50] sm:$0xff] }
 0x746   : > { %v4694_v9 = vmax.f32 %v4662_v16, 0.0  ;;  %v4695_v28 = vmax.f32 %v4663_v47, 0.0  ;;  %v20639_v16 = vld [vmem:[%s26052_s3 + $0x50] sm:$0xff]   ;;  %v24245_v21 = vpack.c.bf16 %v5891_v29, %v5890_v2  ;;  %v5894_v23 = vld [vmem:[#allocation2 + $0x88] sm:$0xff] }
 0x747   : > { %v5893_v15 = vld [vmem:[#allocation2 + $0x70] sm:$0xff]  ;;  %v5896_v3 = vld [vmem:[#allocation2 + $0xa8] sm:$0xff] }
 0x748   : > { %4727 = vst.msk [vmem:[#allocation2 + $0x208] sm:$0xff] %vm4696_vm1, %v4694_v9  ;;  %4728 = vst.msk [vmem:[#allocation2 + $0x210] sm:$0xff] %vm4696_vm1, %v4695_v28  ;;  %17814 = vmatpush3.bf16.msra.mxu0 %v20636_v5  ;;  %v5306_v5 = vld [vmem:[#allocation2 + $0x1e9] sm:$0xff]  ;;  %v24250_v7 = vpack.c.bf16 %v5893_v15, %v5892_v38 }
 0x749   : > { %17847 = vmatprep.subr.bf16.mxu0 %v20637_v14  ;;  %v24200_v63 = vpack.c.bf16 %v5307_v6, %v5306_v5  ;;  %v5889_v9 = vld [vmem:[#allocation2 + $0x30] sm:$0xff]  ;;  %v5898_v57 = vld [vmem:[#allocation2 + $0xc8] sm:$0xff] }
 0x74a   : > { %v5895_v44 = vld [vmem:[#allocation2 + $0x90] sm:$0xff]  ;;  %v5900_v58 = vld [vmem:[#allocation2 + $0xe8] sm:$0xff] }
 0x74b   : > { %17784 = vmatmul.mubr.msk.bf16.gmra.mrb[4].mxu0 %vm4696_vm1, %v24152_v22  ;;  %v24259_v61 = vpack.c.bf16 %v5895_v44, %v5894_v23  ;;  %v5897_v56 = vld [vmem:[#allocation2 + $0xb0] sm:$0xff]  ;;  %v5902_v50 = vld [vmem:[#allocation2 + $0x108] sm:$0xff] }
 0x74c   : > { %17787 = vmatprep.mubr.msk.bf16.mxu0 %vm4696_vm1, %v24154_v33  ;;  %v24261_v26 = vpack.c.bf16 %v5897_v56, %v5896_v3  ;;  %v5899_v25 = vld [vmem:[#allocation2 + $0xd0] sm:$0xff]  ;;  %v5904_v6 = vld [vmem:[#allocation2 + $0x128] sm:$0xff] }
 0x74d   : > { %v5901_v60 = vld [vmem:[#allocation2 + $0xf0] sm:$0xff]  ;;  %v24267_v41 = vpack.c.bf16 %v5899_v25, %v5898_v57  ;;  %v5910_v29 = vld [vmem:[#allocation2 + $0x188] sm:$0xff]  ;;  %v20645_v57 = vld [vmem:[%s26052_s3 + $0x80] sm:$0xff]  }
 0x74e   : > { %v24269_v1 = vpack.c.bf16 %v5901_v60, %v5900_v58  ;;  %v5903_v51 = vld [vmem:[#allocation2 + $0x110] sm:$0xff]  ;;  %v20642_v25 = vld [vmem:[%s26052_s3 + $0x68] sm:$0xff]   ;;  %v20644_v60 = vld [vmem:[%s26052_s3 + $0x78] sm:$0xff]  }
 0x74f   : > { %v5613_v47 = vld [vmem:[#allocation2 + $0x20f] sm:$0xff]  ;;  %v24275_v5 = vpack.c.bf16 %v5903_v51, %v5902_v50 }
 0x750   : > { %v5905_v52 = vld [vmem:[#allocation2 + $0x130] sm:$0xff]  ;;  %v5918_v3 = vld [vmem:[#allocation2 + $0x208] sm:$0xff] }
 0x751   : > { %v5911_v2 = vld [vmem:[#allocation2 + $0x190] sm:$0xff] }
 0x752   : > { %v5913_v38 = vld [vmem:[#allocation2 + $0x1b0] sm:$0xff]  ;;  %v24291_v15 = vpack.c.bf16 %v5911_v2, %v5910_v29 }
 0x753   : > { %17788 = vmatmul.mubr.msk.bf16.gmra.mrb[8].mxu0 %vm4696_vm1, %v24160_v55  ;;  %v5919_v44 = vld [vmem:[#allocation2 + $0x210] sm:$0xff] }
 0x754   : > { %17791 = vmatprep.mubr.msk.bf16.mxu0 %vm4696_vm1, %v24162_v31  ;;  %v24303_v56 = vpack.c.bf16 %v5919_v44, %v5918_v3 }
 0x75b   : > { %17792 = vmatmul.mubr.msk.bf16.gmra.mrb[12].mxu0 %vm4696_vm1, %v24168_v49 }
 0x75c   : > { %17795 = vmatprep.mubr.msk.bf16.mxu0 %vm4696_vm1, %v24170_v10 }
 0x763   : > { %17796 = vmatmul.mubr.msk.bf16.gmra.mrb[16].mxu0 %vm4696_vm1, %v24176_v43 }
 0x764   : > { %17799 = vmatprep.mubr.msk.bf16.mxu0 %vm4696_vm1, %v24178_v0 }
 0x76b   : > { %17800 = vmatmul.mubr.msk.bf16.gmra.mrb[20].mxu0 %vm4696_vm1, %v24184_v45 }
 0x76c   : > { %17803 = vmatprep.mubr.msk.bf16.mxu0 %vm4696_vm1, %v24186_v42 }
 0x773   : > { %17804 = vmatmul.mubr.msk.bf16.gmra.mrb[24].mxu0 %vm4696_vm1, %v24192_v12 }
 0x774   : > { %17807 = vmatprep.mubr.msk.bf16.mxu0 %vm4696_vm1, %v24194_v59 }
 0x77b   : > { %17808 = vmatmul.mubr.msk.bf16.gmra.mrb[28].mxu0 %vm4696_vm1, %v24200_v63 }
 0x77c   : > { %17815 = vmatprep.mubr.msk.bf16.mxu0 %vm4696_vm1, %v24013_v8  ;;  %v5612_v8 = vld [vmem:[#allocation2 + $0x207] sm:$0xff] }
 0x77d   : > { %v24240_v35 = vpack.c.bf16 %v5613_v47, %v5612_v8  ;;  %v5909_v8 = vld [vmem:[#allocation2 + $0x170] sm:$0xff]  ;;  %v5906_v47 = vld [vmem:[#allocation2 + $0x148] sm:$0xff] }
 0x783   : > { %17816 = vmatmul.mubr.msk.bf16.vlgmr.msra.gmra.mrb[0].mxu0 %vm4696_vm1, %v24018_v34 }
 0x784   : > { %17848 = vmatpush3.bf16.msra.mxu0 %v20637_v14  ;;  %17819 = vmatprep.mubr.msk.bf16.mxu0 %vm4696_vm1, %v24032_v37  ;;  %v5888_v14 = vld [vmem:[#allocation2 + $0x28] sm:$0xff] }
 0x785   : > { %17849 = vmatprep.subr.bf16.mxu0 %v20638_v46  ;;  %v5920_v28 = vpack.c.bf16 %v5889_v9, %v5888_v14  ;;  %v5908_v9 = vld [vmem:[#allocation2 + $0x168] sm:$0xff] }
 0x788   : > { %17850 = vmatpush3.bf16.msra.mxu0 %v20638_v46  ;;  %v24277_v46 = vpack.c.bf16 %v5905_v52, %v5904_v6 }
 0x789   : > { %17883 = vmatprep.subr.bf16.mxu0 %v20639_v16 }
 0x78b   : > { %17820 = vmatmul.mubr.msk.bf16.gmra.mrb[4].mxu0 %vm4696_vm1, %v24035_v53 }
 0x78c   : > { %17823 = vmatprep.mubr.msk.bf16.mxu0 %vm4696_vm1, %v24045_v17 }
 0x793   : > { %17824 = vmatmul.mubr.msk.bf16.gmra.mrb[8].mxu0 %vm4696_vm1, %v24047_v48 }
 0x794   : > { %17827 = vmatprep.mubr.msk.bf16.mxu0 %vm4696_vm1, %v24053_v32 }
 0x79b   : > { %17828 = vmatmul.mubr.msk.bf16.gmra.mrb[12].mxu0 %vm4696_vm1, %v24055_v11 }
 0x79c   : > { %17831 = vmatprep.mubr.msk.bf16.mxu0 %vm4696_vm1, %v24072_v19 }
 0x7a3   : > { %17832 = vmatmul.mubr.msk.bf16.gmra.mrb[16].mxu0 %vm4696_vm1, %v24078_v62 }
 0x7a4   : > { %17835 = vmatprep.mubr.msk.bf16.mxu0 %vm4696_vm1, %v24089_v39 }
 0x7ab   : > { %17836 = vmatmul.mubr.msk.bf16.gmra.mrb[20].mxu0 %vm4696_vm1, %v24091_v36 }
 0x7ac   : > { %17839 = vmatprep.mubr.msk.bf16.mxu0 %vm4696_vm1, %v24107_v54 }
 0x7b3   : > { %17840 = vmatmul.mubr.msk.bf16.gmra.mrb[24].mxu0 %vm4696_vm1, %v24109_v40 }
 0x7b4   : > { %17843 = vmatprep.mubr.msk.bf16.mxu0 %vm4696_vm1, %v24121_v18 }
 0x7bb   : > { %17844 = vmatmul.mubr.msk.bf16.gmra.mrb[28].mxu0 %vm4696_vm1, %v24240_v35 }
 0x7bc   : > { %17851 = vmatprep.mubr.msk.bf16.mxu0 %vm4696_vm1, %v5920_v28  ;;  %v24285_v28 = vpack.c.bf16 %v5909_v8, %v5908_v9 }
 0x7c3   : > { %17852 = vmatmul.mubr.msk.bf16.vlgmr.msra.gmra.mrb[0].mxu0 %vm4696_vm1, %v24245_v21 }
 0x7c4   : > { %17884 = vmatpush3.bf16.msra.mxu0 %v20639_v16  ;;  %17855 = vmatprep.mubr.msk.bf16.mxu0 %vm4696_vm1, %v24250_v7  ;;  %v5907_v16 = vld [vmem:[#allocation2 + $0x150] sm:$0xff] }
 0x7c5   : > { %17885 = vmatprep.subr.bf16.mxu0 %v20640_v27  ;;  %v24283_v14 = vpack.c.bf16 %v5907_v16, %v5906_v47 }
 0x7c8   : > { %17886 = vmatpush3.bf16.msra.mxu0 %v20640_v27  ;;  %v5912_v27 = vld [vmem:[#allocation2 + $0x1a8] sm:$0xff] }
 0x7c9   : > { %17919 = vmatprep.subr.bf16.mxu0 %v20641_v13  ;;  %v24293_v23 = vpack.c.bf16 %v5913_v38, %v5912_v27 }
 0x7cb   : > { %17856 = vmatmul.mubr.msk.bf16.gmra.mrb[4].mxu0 %vm4696_vm1, %v24259_v61 }
 0x7cc   : > { %17859 = vmatprep.mubr.msk.bf16.mxu0 %vm4696_vm1, %v24261_v26 }
 0x7d3   : > { %17860 = vmatmul.mubr.msk.bf16.gmra.mrb[8].mxu0 %vm4696_vm1, %v24267_v41 }
 0x7d4   : > { %17863 = vmatprep.mubr.msk.bf16.mxu0 %vm4696_vm1, %v24269_v1 }
 0x7db   : > { %17864 = vmatmul.mubr.msk.bf16.gmra.mrb[12].mxu0 %vm4696_vm1, %v24275_v5 }
 0x7dc   : > { %17867 = vmatprep.mubr.msk.bf16.mxu0 %vm4696_vm1, %v24277_v46 }
 0x7e3   : > { %17868 = vmatmul.mubr.msk.bf16.gmra.mrb[16].mxu0 %vm4696_vm1, %v24283_v14 }
 0x7e4   : > { %17871 = vmatprep.mubr.msk.bf16.mxu0 %vm4696_vm1, %v24285_v28 }
 0x7eb   : > { %17872 = vmatmul.mubr.msk.bf16.gmra.mrb[20].mxu0 %vm4696_vm1, %v24291_v15 }
 0x7ec   : > { %17875 = vmatprep.mubr.msk.bf16.mxu0 %vm4696_vm1, %v24293_v23 }
 0x7f3   : > { %17876 = vmatmul.mubr.msk.bf16.gmra.mrb[24].mxu0 %vm4696_vm1, %v23999_v20  ;;  %v20643_v20 = vld [vmem:[%s26052_s3 + $0x70] sm:$0xff]  }
 0x7f4   : > { %17879 = vmatprep.mubr.msk.bf16.mxu0 %vm4696_vm1, %v24008_v30  ;;  %v6224_v30 = vld [vmem:[#allocation2 + $0x209] sm:$0xff] }
 0x7fb   : > { %17880 = vmatmul.mubr.msk.bf16.gmra.mrb[28].mxu0 %vm4696_vm1, %v24303_v56 }
 0x7fc   : > { %17887 = vmatprep.mubr.msk.bf16.mxu0 %vm4696_vm1, %v24132_v24  ;;  %v6225_v24 = vld [vmem:[#allocation2 + $0x211] sm:$0xff] }
 0x803   : > { %17888 = vmatmul.mubr.msk.bf16.vlgmr.msra.gmra.mrb[0].mxu0 %vm4696_vm1, %v24137_v4 }
 0x804   : > { %17920 = vmatpush3.bf16.msra.mxu0 %v20641_v13  ;;  %17891 = vmatprep.mubr.msk.bf16.mxu0 %vm4696_vm1, %v24152_v22  ;;  %v24343_v13 = vpack.c.bf16 %v6225_v24, %v6224_v30 }
 0x805   : > { %17921 = vmatprep.subr.bf16.mxu0 %v20642_v25 }
 0x808   : > { %17922 = vmatpush3.bf16.msra.mxu0 %v20642_v25 }
 0x809   : > { %17955 = vmatprep.subr.bf16.mxu0 %v20643_v20 }
 0x80b   : > { %17892 = vmatmul.mubr.msk.bf16.gmra.mrb[4].mxu0 %vm4696_vm1, %v24154_v33 }
 0x80c   : > { %17895 = vmatprep.mubr.msk.bf16.mxu0 %vm4696_vm1, %v24160_v55 }
 0x813   : > { %17896 = vmatmul.mubr.msk.bf16.gmra.mrb[8].mxu0 %vm4696_vm1, %v24162_v31 }
 0x814   : > { %17899 = vmatprep.mubr.msk.bf16.mxu0 %vm4696_vm1, %v24168_v49 }
 0x81b   : > { %17900 = vmatmul.mubr.msk.bf16.gmra.mrb[12].mxu0 %vm4696_vm1, %v24170_v10 }
 0x81c   : > { %17903 = vmatprep.mubr.msk.bf16.mxu0 %vm4696_vm1, %v24176_v43 }
 0x823   : > { %17904 = vmatmul.mubr.msk.bf16.gmra.mrb[16].mxu0 %vm4696_vm1, %v24178_v0 }
 0x824   : > { %17907 = vmatprep.mubr.msk.bf16.mxu0 %vm4696_vm1, %v24184_v45 }
 0x82b   : > { %17908 = vmatmul.mubr.msk.bf16.gmra.mrb[20].mxu0 %vm4696_vm1, %v24186_v42 }
 0x82c   : > { %17911 = vmatprep.mubr.msk.bf16.mxu0 %vm4696_vm1, %v24192_v12 }
 0x833   : > { %17912 = vmatmul.mubr.msk.bf16.gmra.mrb[24].mxu0 %vm4696_vm1, %v24194_v59 }
 0x834   : > { %17915 = vmatprep.mubr.msk.bf16.mxu0 %vm4696_vm1, %v24200_v63 }
 0x83b   : > { %17916 = vmatmul.mubr.msk.bf16.gmra.mrb[28].mxu0 %vm4696_vm1, %v24343_v13 }
 0x83c   : > { %17923 = vmatprep.mubr.msk.bf16.mxu0 %vm4696_vm1, %v24018_v34  ;;  %v6530_v34 = vld [vmem:[#allocation2 + $0x227] sm:$0xff] }
 0x843   : > { %17924 = vmatmul.mubr.msk.bf16.vlgmr.msra.gmra.mrb[0].mxu0 %vm4696_vm1, %v24032_v37  ;;  %v6531_v37 = vld [vmem:[#allocation2 + $0x22f] sm:$0xff] }
 0x844   : > { %17956 = vmatpush3.bf16.msra.mxu0 %v20643_v20  ;;  %17927 = vmatprep.mubr.msk.bf16.mxu0 %vm4696_vm1, %v24035_v53  ;;  %v6547_v53 = vpack.c.bf16 %v6531_v37, %v6530_v34 }
 0x845   : > { %17957 = vmatprep.subr.bf16.mxu0 %v20644_v60 }
 0x848   : > { %17958 = vmatpush3.bf16.msra.mxu0 %v20644_v60  ;;  %v20653_v60 = vld [vmem:[%s26054_s5 + $0x10] sm:$0xff]  }
 0x849   : > { %17991 = vmatprep.subr.bf16.mxu0 %v20645_v57 }
 0x84b   : > { %17928 = vmatmul.mubr.msk.bf16.gmra.mrb[4].mxu0 %vm4696_vm1, %v24045_v17  ;;  %v20646_v17 = vld [vmem:[%s26052_s3 + $0x88] sm:$0xff]  }
 0x84c   : > { %17931 = vmatprep.mubr.msk.bf16.mxu0 %vm4696_vm1, %v24047_v48  ;;  %v6831_v48 = vld [vmem:[#allocation2 + $0x1d0] sm:$0xff] }
 0x853   : > { %17932 = vmatmul.mubr.msk.bf16.gmra.mrb[8].mxu0 %vm4696_vm1, %v24053_v32  ;;  %v6830_v32 = vld [vmem:[#allocation2 + $0x1c8] sm:$0xff] }
 0x854   : > { %17935 = vmatprep.mubr.msk.bf16.mxu0 %vm4696_vm1, %v24055_v11  ;;  %v6850_v11 = vpack.c.bf16 %v6831_v48, %v6830_v32 }
 0x85b   : > { %17936 = vmatmul.mubr.msk.bf16.gmra.mrb[12].mxu0 %vm4696_vm1, %v24072_v19  ;;  %v6833_v19 = vld [vmem:[#allocation2 + $0x1f0] sm:$0xff] }
 0x85c   : > { %17939 = vmatprep.mubr.msk.bf16.mxu0 %vm4696_vm1, %v24078_v62  ;;  %v6832_v62 = vld [vmem:[#allocation2 + $0x1e8] sm:$0xff] }
 0x863   : > { %17940 = vmatmul.mubr.msk.bf16.gmra.mrb[16].mxu0 %vm4696_vm1, %v24089_v39  ;;  %v6851_v39 = vpack.c.bf16 %v6833_v19, %v6832_v62  ;;  %v20654_v19 = vld [vmem:[%s26054_s5 + $0x18] sm:$0xff]  }
 0x864   : > { %17943 = vmatprep.mubr.msk.bf16.mxu0 %vm4696_vm1, %v24091_v36  ;;  %v20911_v36 = vld [vmem:[#allocation2 + $0x8] sm:$0xff] }
 0x86b   : > { %17944 = vmatmul.mubr.msk.bf16.gmra.mrb[20].mxu0 %vm4696_vm1, %v24107_v54  ;;  %v24415_v54 = vpack.c.bf16 %v20911_v36, %v20911_v36 }
 0x86c   : > { %17947 = vmatprep.mubr.msk.bf16.mxu0 %vm4696_vm1, %v24109_v40  ;;  %v7142_v40 = vld [vmem:[#allocation2 + $0x229] sm:$0xff] }
 0x86d   : > { %18035 = vmatprep.mubr.msk.bf16.mxu1 %vm7489_vm2, %v24415_v54 }
 0x873   : > { %17948 = vmatmul.mubr.msk.bf16.gmra.mrb[24].mxu0 %vm4696_vm1, %v24121_v18  ;;  %v7143_v18 = vld [vmem:[#allocation2 + $0x231] sm:$0xff] }
 0x874   : > { %17951 = vmatprep.mubr.msk.bf16.mxu0 %vm4696_vm1, %v24240_v35 }
 0x87b   : > { %17952 = vmatmul.mubr.msk.bf16.gmra.mrb[28].mxu0 %vm4696_vm1, %v6547_v53 }
 0x87c   : > { %17959 = vmatprep.mubr.msk.bf16.mxu0 %vm4696_vm1, %v24245_v21 }
 0x883   : > { %17960 = vmatmul.mubr.msk.bf16.vlgmr.msra.gmra.mrb[0].mxu0 %vm4696_vm1, %v24250_v7 }
 0x884   : > { %17992 = vmatpush3.bf16.msra.mxu0 %v20645_v57  ;;  %17963 = vmatprep.mubr.msk.bf16.mxu0 %vm4696_vm1, %v24259_v61 }
 0x885   : > { %17993 = vmatprep.subr.bf16.mxu0 %v20646_v17 }
 0x888   : > { %17994 = vmatpush3.bf16.msra.mxu0 %v20646_v17 }
 0x88b   : > { %17964 = vmatmul.mubr.msk.bf16.gmra.mrb[4].mxu0 %vm4696_vm1, %v24261_v26 }
 0x88c   : > { %17967 = vmatprep.mubr.msk.bf16.mxu0 %vm4696_vm1, %v24267_v41 }
 0x893   : > { %17968 = vmatmul.mubr.msk.bf16.gmra.mrb[8].mxu0 %vm4696_vm1, %v24269_v1 }
 0x894   : > { %17971 = vmatprep.mubr.msk.bf16.mxu0 %vm4696_vm1, %v24275_v5 }
 0x89b   : > { %17972 = vmatmul.mubr.msk.bf16.gmra.mrb[12].mxu0 %vm4696_vm1, %v24277_v46 }
 0x89c   : > { %17975 = vmatprep.mubr.msk.bf16.mxu0 %vm4696_vm1, %v24283_v14 }
 0x8a3   : > { %17976 = vmatmul.mubr.msk.bf16.gmra.mrb[16].mxu0 %vm4696_vm1, %v24285_v28 }
 0x8a4   : > { %17979 = vmatprep.mubr.msk.bf16.mxu0 %vm4696_vm1, %v24291_v15  ;;  %v20652_v15 = vld [vmem:[%s26054_s5 + $0x8] sm:$0xff]  }
 0x8ab   : > { %17980 = vmatmul.mubr.msk.bf16.gmra.mrb[20].mxu0 %vm4696_vm1, %v24293_v23 }
 0x8ac   : > { %17983 = vmatprep.mubr.msk.bf16.mxu0 %vm4696_vm1, %v6850_v11 }
 0x8b3   : > { %17984 = vmatmul.mubr.msk.bf16.gmra.mrb[24].mxu0 %vm4696_vm1, %v6851_v39 }
 0x8b4   : > { %17987 = vmatprep.mubr.msk.bf16.mxu0 %vm4696_vm1, %v24303_v56 }
 0x8bb   : > { %17988 = vmatmul.mubr.msk.bf16.gmra.mrb[28].mxu0 %vm4696_vm1, %v24415_v54 }
 0x8bc   : > { %17995 = vmatprep.mubr.msk.bf16.mxu0 %vm4696_vm1, %v24137_v4  ;;  %v7159_v4 = vpack.c.bf16 %v7143_v18, %v7142_v40 }
 0x8c3   : > { %17996 = vmatmul.mubr.msk.bf16.vlgmr.msra.gmra.mrb[0].mxu0 %vm4696_vm1, %v24152_v22  ;;  %v20647_v22 = vld [vmem:[%s26054_s5 + $0x20] sm:$0xff]  }
 0x8c4   : > { %17999 = vmatprep.mubr.msk.bf16.mxu0 %vm4696_vm1, %v24154_v33  ;;  %18027 = vmatprep.subr.bf16.mxu1 %v20647_v22  ;;  %v20648_v33 = vld [vmem:[%s26054_s5 + $0x28] sm:$0xff]  }
 0x8c5   : > { %18028 = vmatpush3.bf16.msra.mxu1 %v20647_v22 }
 0x8c6   : > { %18029 = vmatprep.subr.bf16.mxu1 %v20648_v33 }
 0x8c9   : > { %18030 = vmatpush3.bf16.msra.mxu1 %v20648_v33 }
 0x8cb   : > { %18000 = vmatmul.mubr.msk.bf16.gmra.mrb[4].mxu0 %vm4696_vm1, %v24160_v55  ;;  %v20649_v55 = vld [vmem:[%s26054_s5 + $0x30] sm:$0xff]  }
 0x8cc   : > { %18003 = vmatprep.mubr.msk.bf16.mxu0 %vm4696_vm1, %v24162_v31  ;;  %18031 = vmatprep.subr.bf16.mxu1 %v20649_v55  ;;  %v20650_v31 = vld [vmem:[%s26054_s5 + $0x38] sm:$0xff]  }
 0x8cd   : > { %18032 = vmatpush3.bf16.msra.mxu1 %v20649_v55 }
 0x8ce   : > { %18033 = vmatprep.subr.bf16.mxu1 %v20650_v31 }
 0x8d1   : > { %18034 = vmatpush3.bf16.msra.mxu1 %v20650_v31 }
 0x8d3   : > { %18004 = vmatmul.mubr.msk.bf16.gmra.mrb[8].mxu0 %vm4696_vm1, %v24168_v49  ;;  %v20651_v49 = vld [vmem:[%s26054_s5] sm:$0xff]  }
 0x8d4   : > { %18007 = vmatprep.mubr.msk.bf16.mxu0 %vm4696_vm1, %v24170_v10  ;;  %18067 = vmatprep.subr.bf16.mxu1 %v20651_v49  ;;  %v24470_v10 = vld [vmem:[%s26053_s4] ss:$0 sm:$0xff] }
 0x8db   : > { %18008 = vmatmul.mubr.msk.bf16.gmra.mrb[12].mxu0 %vm4696_vm1, %v24176_v43 }
 0x8dc   : > { %18011 = vmatprep.mubr.msk.bf16.mxu0 %vm4696_vm1, %v24178_v0 }
 0x8e3   : > { %18012 = vmatmul.mubr.msk.bf16.gmra.mrb[16].mxu0 %vm4696_vm1, %v24184_v45 }
 0x8e4   : > { %18015 = vmatprep.mubr.msk.bf16.mxu0 %vm4696_vm1, %v24186_v42 }
 0x8eb   : > { %18016 = vmatmul.mubr.msk.bf16.gmra.mrb[20].mxu0 %vm4696_vm1, %v24192_v12 }
 0x8ec   : > { %18019 = vmatprep.mubr.msk.bf16.mxu0 %vm4696_vm1, %v24194_v59 }
 0x8f3   : > { %18020 = vmatmul.mubr.msk.bf16.gmra.mrb[24].mxu0 %vm4696_vm1, %v24200_v63 }
 0x8f4   : > { %18023 = vmatprep.mubr.msk.bf16.mxu0 %vm4696_vm1, %v24343_v13 }
 0x8fb   : > { %18024 = vmatmul.mubr.msk.bf16.gmra.mrb[28].mxu0 %vm4696_vm1, %v7159_v4 }
 0x8fc   : > { %18403 = vmatprep.mubr.bf16.mxu0 %v24415_v54 }
 0x996   : > { %v17997_v43 = vpop.f32.mrb[0].mxu0 }
 0x997   : > { %v7427_v0 = vadd.f32 %v17997_v43, %v24470_v10  ;;  %v7259_v45 = vpop.f32.mrb[1].mxu0 }
 0x998   : > { %v7425_v42 = vadd.f32 %v24470_v10, %v7259_v45  ;;  %v17998_v12 = vpop.f32.mrb[2].mxu0 }
 0x999   : > { %v7459_v59 = vmax.f32 %v7427_v0, 0.0  ;;  %v7428_v63 = vadd.f32 %v17998_v12, %v24470_v10  ;;  %v7262_v35 = vpop.f32.mrb[3].mxu0 }
 0x99a   : > { %v7457_v21 = vmax.f32 %v7425_v42, 0.0  ;;  %v7426_v7 = vadd.f32 %v24470_v10, %v7262_v35 }
 0x99b   : > { %v7460_v61 = vmax.f32 %v7428_v63, 0.0  ;;  %7492 = vst.msk [vmem:[#allocation2 + $0x48] sm:$0xff] %vm7489_vm2, %v7459_v59 }
 0x99c   : > { %v7458_v26 = vmax.f32 %v7426_v7, 0.0  ;;  %7490 = vst.msk [vmem:[#allocation2 + $0x28] sm:$0xff] %vm7489_vm2, %v7457_v21 }
 0x99d   : > { %7493 = vst.msk [vmem:[#allocation2 + $0x50] sm:$0xff] %vm7489_vm2, %v7460_v61 }
 0x99e   : > { %v18001_v41 = vpop.f32.mrb[4].mxu0  ;;  %7491 = vst.msk [vmem:[#allocation2 + $0x30] sm:$0xff] %vm7489_vm2, %v7458_v26 }
 0x99f   : > { %v7431_v58 = vadd.f32 %v18001_v41, %v24470_v10  ;;  %v7275_v1 = vpop.f32.mrb[5].mxu0 }
 0x9a0   : > { %v7429_v51 = vadd.f32 %v24470_v10, %v7275_v1  ;;  %v18002_v52 = vpop.f32.mrb[6].mxu0 }
 0x9a1   : > { %v7463_v50 = vmax.f32 %v7431_v58, 0.0  ;;  %v7432_v5 = vadd.f32 %v18002_v52, %v24470_v10  ;;  %v7278_v6 = vpop.f32.mrb[7].mxu0 }
 0x9a2   : > { %v7461_v46 = vmax.f32 %v7429_v51, 0.0  ;;  %v7430_v16 = vadd.f32 %v24470_v10, %v7278_v6  ;;  %v7582_v29 = vld [vmem:[#allocation2 + $0x48] sm:$0xff] }
 0x9a3   : > { %v7464_v8 = vmax.f32 %v7432_v5, 0.0  ;;  %7496 = vst.msk [vmem:[#allocation2 + $0x88] sm:$0xff] %vm7489_vm2, %v7463_v50  ;;  %v7580_v9 = vld [vmem:[#allocation2 + $0x28] sm:$0xff] }
 0x9a4   : > { %v7462_v47 = vmax.f32 %v7430_v16, 0.0  ;;  %7494 = vst.msk [vmem:[#allocation2 + $0x68] sm:$0xff] %vm7489_vm2, %v7461_v46  ;;  %v7583_v14 = vld [vmem:[#allocation2 + $0x50] sm:$0xff] }
 0x9a5   : > { %7497 = vst.msk [vmem:[#allocation2 + $0x90] sm:$0xff] %vm7489_vm2, %v7464_v8  ;;  %v7581_v28 = vld [vmem:[#allocation2 + $0x30] sm:$0xff]  ;;  %v24494_v3 = vpack.c.bf16 %v7583_v14, %v7582_v29 }
 0x9a6   : > { %v18005_v2 = vpop.f32.mrb[8].mxu0  ;;  %7495 = vst.msk [vmem:[#allocation2 + $0x70] sm:$0xff] %vm7489_vm2, %v7462_v47  ;;  %v24488_v38 = vpack.c.bf16 %v7581_v28, %v7580_v9 }
 0x9a7   : > { %v7435_v27 = vadd.f32 %v18005_v2, %v24470_v10  ;;  %v7291_v23 = vpop.f32.mrb[9].mxu0 }
 0x9a8   : > { %v7433_v44 = vadd.f32 %v24470_v10, %v7291_v23  ;;  %v18006_v56 = vpop.f32.mrb[10].mxu0  ;;  %18036 = vmatmul.mubr.msk.bf16.vlgmr.msra.gmra.mrb[0].mxu1 %vm7489_vm2, %v24488_v38 }
 0x9a9   : > { %v7467_v25 = vmax.f32 %v7435_v27, 0.0  ;;  %v7436_v20 = vadd.f32 %v18006_v56, %v24470_v10  ;;  %18068 = vmatpush3.bf16.msra.mxu1 %v20651_v49  ;;  %v7294_v30 = vpop.f32.mrb[11].mxu0  ;;  %18039 = vmatprep.mubr.msk.bf16.mxu1 %vm7489_vm2, %v24494_v3  ;;  %v24528_v49 = vld [vmem:[%s26054_s5 + $0x40] sm:$0xff]  }
 0x9aa   : > { %v7465_v24 = vmax.f32 %v7433_v44, 0.0  ;;  %v7434_v13 = vadd.f32 %v24470_v10, %v7294_v30  ;;  %18069 = vmatprep.subr.bf16.mxu1 %v20652_v15  ;;  %v7586_v11 = vld [vmem:[#allocation2 + $0x88] sm:$0xff] }
 0x9ab   : > { %7500 = vst.msk [vmem:[#allocation2 + $0xc8] sm:$0xff] %vm7489_vm2, %v7467_v25  ;;  %v7468_v57 = vmax.f32 %v7436_v20, 0.0  ;;  %v7584_v53 = vld [vmem:[#allocation2 + $0x68] sm:$0xff] }
 0x9ac   : > { %7498 = vst.msk [vmem:[#allocation2 + $0xa8] sm:$0xff] %vm7489_vm2, %v7465_v24  ;;  %v7466_v34 = vmax.f32 %v7434_v13, 0.0  ;;  %v7587_v37 = vld [vmem:[#allocation2 + $0x90] sm:$0xff] }
 0x9ad   : > { %7501 = vst.msk [vmem:[#allocation2 + $0xd0] sm:$0xff] %vm7489_vm2, %v7468_v57  ;;  %v7585_v17 = vld [vmem:[#allocation2 + $0x70] sm:$0xff]  ;;  %18070 = vmatpush3.bf16.msra.mxu1 %v20652_v15  ;;  %v24516_v36 = vpack.c.bf16 %v7587_v37, %v7586_v11 }
 0x9ae   : > { %7499 = vst.msk [vmem:[#allocation2 + $0xb0] sm:$0xff] %vm7489_vm2, %v7466_v34  ;;  %v18009_v48 = vpop.f32.mrb[12].mxu0  ;;  %v24510_v32 = vpack.c.bf16 %v7585_v17, %v7584_v53  ;;  %18071 = vmatprep.subr.bf16.mxu1 %v20653_v60 }
 0x9af   : > { %v7439_v62 = vadd.f32 %v18009_v48, %v24470_v10  ;;  %v7307_v39 = vpop.f32.mrb[13].mxu0 }
 0x9b0   : > { %v7437_v40 = vadd.f32 %v24470_v10, %v7307_v39  ;;  %v18010_v18 = vpop.f32.mrb[14].mxu0  ;;  %18040 = vmatmul.mubr.msk.bf16.gmra.mrb[4].mxu1 %vm7489_vm2, %v24510_v32 }
 0x9b1   : > { %v7471_v4 = vmax.f32 %v7439_v62, 0.0  ;;  %v7440_v22 = vadd.f32 %v18010_v18, %v24470_v10  ;;  %v7310_v33 = vpop.f32.mrb[15].mxu0  ;;  %18043 = vmatprep.mubr.msk.bf16.mxu1 %vm7489_vm2, %v24516_v36  ;;  %18072 = vmatpush3.bf16.msra.mxu1 %v20653_v60 }
 0x9b2   : > { %v7469_v55 = vmax.f32 %v7437_v40, 0.0  ;;  %v7438_v31 = vadd.f32 %v24470_v10, %v7310_v33  ;;  %18073 = vmatprep.subr.bf16.mxu1 %v20654_v19  ;;  %v7590_v35 = vld [vmem:[#allocation2 + $0xc8] sm:$0xff] }
 0x9b3   : > { %7504 = vst.msk [vmem:[#allocation2 + $0x108] sm:$0xff] %vm7489_vm2, %v7471_v4  ;;  %v7472_v43 = vmax.f32 %v7440_v22, 0.0  ;;  %v7588_v42 = vld [vmem:[#allocation2 + $0xa8] sm:$0xff] }
 0x9b4   : > { %7502 = vst.msk [vmem:[#allocation2 + $0xe8] sm:$0xff] %vm7489_vm2, %v7469_v55  ;;  %v7470_v0 = vmax.f32 %v7438_v31, 0.0  ;;  %v7591_v45 = vld [vmem:[#allocation2 + $0xd0] sm:$0xff] }
 0x9b5   : > { %7505 = vst.msk [vmem:[#allocation2 + $0x110] sm:$0xff] %vm7489_vm2, %v7472_v43  ;;  %v7589_v12 = vld [vmem:[#allocation2 + $0xb0] sm:$0xff]  ;;  %18074 = vmatpush3.bf16.msra.mxu1 %v20654_v19  ;;  %v24538_v61 = vpack.c.bf16 %v7591_v45, %v7590_v35 }
 0x9b6   : > { %7503 = vst.msk [vmem:[#allocation2 + $0xf0] sm:$0xff] %vm7489_vm2, %v7470_v0  ;;  %v18013_v59 = vpop.f32.mrb[16].mxu0  ;;  %v24534_v63 = vpack.c.bf16 %v7589_v12, %v7588_v42  ;;  %18107 = vmatprep.subr.bf16.mxu1 %v24528_v49 }
 0x9b7   : > { %v7443_v21 = vadd.f32 %v18013_v59, %v24470_v10  ;;  %v7323_v7 = vpop.f32.mrb[17].mxu0 }
 0x9b8   : > { %v7441_v26 = vadd.f32 %v24470_v10, %v7323_v7  ;;  %v18014_v41 = vpop.f32.mrb[18].mxu0  ;;  %18044 = vmatmul.mubr.msk.bf16.gmra.mrb[8].mxu1 %vm7489_vm2, %v24534_v63 }
 0x9b9   : > { %v7475_v58 = vmax.f32 %v7443_v21, 0.0  ;;  %v7444_v1 = vadd.f32 %v18014_v41, %v24470_v10  ;;  %v7326_v51 = vpop.f32.mrb[19].mxu0  ;;  %18047 = vmatprep.mubr.msk.bf16.mxu1 %vm7489_vm2, %v24538_v61 }
 0x9ba   : > { %v7473_v52 = vmax.f32 %v7441_v26, 0.0  ;;  %v7442_v50 = vadd.f32 %v24470_v10, %v7326_v51  ;;  %v7594_v9 = vld [vmem:[#allocation2 + $0x108] sm:$0xff] }
 0x9bb   : > { %7508 = vst.msk [vmem:[#allocation2 + $0x148] sm:$0xff] %vm7489_vm2, %v7475_v58  ;;  %v7476_v5 = vmax.f32 %v7444_v1, 0.0  ;;  %v7592_v16 = vld [vmem:[#allocation2 + $0xe8] sm:$0xff] }
 0x9bc   : > { %7506 = vst.msk [vmem:[#allocation2 + $0x128] sm:$0xff] %vm7489_vm2, %v7473_v52  ;;  %v7474_v6 = vmax.f32 %v7442_v50, 0.0  ;;  %v7595_v46 = vld [vmem:[#allocation2 + $0x110] sm:$0xff] }
 0x9bd   : > { %7509 = vst.msk [vmem:[#allocation2 + $0x150] sm:$0xff] %vm7489_vm2, %v7476_v5  ;;  %v7593_v8 = vld [vmem:[#allocation2 + $0xf0] sm:$0xff]  ;;  %v24554_v29 = vpack.c.bf16 %v7595_v46, %v7594_v9 }
 0x9be   : > { %7507 = vst.msk [vmem:[#allocation2 + $0x130] sm:$0xff] %vm7489_vm2, %v7474_v6  ;;  %v18017_v47 = vpop.f32.mrb[20].mxu0  ;;  %v24551_v14 = vpack.c.bf16 %v7593_v8, %v7592_v16 }
 0x9bf   : > { %v7447_v28 = vadd.f32 %v18017_v47, %v24470_v10  ;;  %v7339_v2 = vpop.f32.mrb[21].mxu0 }
 0x9c0   : > { %v7445_v15 = vadd.f32 %v24470_v10, %v7339_v2  ;;  %v18018_v27 = vpop.f32.mrb[22].mxu0  ;;  %18048 = vmatmul.mubr.msk.bf16.gmra.mrb[12].mxu1 %vm7489_vm2, %v24551_v14 }
 0x9c1   : > { %v7479_v23 = vmax.f32 %v7447_v28, 0.0  ;;  %v7448_v44 = vadd.f32 %v18018_v27, %v24470_v10  ;;  %v7342_v56 = vpop.f32.mrb[23].mxu0  ;;  %18051 = vmatprep.mubr.msk.bf16.mxu1 %vm7489_vm2, %v24554_v29  ;;  %v7523_v28 = vld [vmem:[#allocation2 + $0xf] sm:$0xff] }
 0x9c2   : > { %v7477_v25 = vmax.f32 %v7445_v15, 0.0  ;;  %v7446_v20 = vadd.f32 %v24470_v10, %v7342_v56  ;;  %v7598_v53 = vld [vmem:[#allocation2 + $0x148] sm:$0xff] }
 0x9c3   : > { %7512 = vst.msk [vmem:[#allocation2 + $0x188] sm:$0xff] %vm7489_vm2, %v7479_v23  ;;  %v7480_v30 = vmax.f32 %v7448_v44, 0.0  ;;  %v7596_v60 = vld [vmem:[#allocation2 + $0x128] sm:$0xff] }
 0x9c4   : > { %7510 = vst.msk [vmem:[#allocation2 + $0x168] sm:$0xff] %vm7489_vm2, %v7477_v25  ;;  %v7478_v24 = vmax.f32 %v7446_v20, 0.0  ;;  %v7599_v13 = vld [vmem:[#allocation2 + $0x150] sm:$0xff]  ;;  %v7524_v25 = vld [vmem:[#allocation2 + $0x27] sm:$0xff] }
 0x9c5   : > { %7513 = vst.msk [vmem:[#allocation2 + $0x190] sm:$0xff] %vm7489_vm2, %v7480_v30  ;;  %v7597_v57 = vld [vmem:[#allocation2 + $0x130] sm:$0xff]  ;;  %v24570_v11 = vpack.c.bf16 %v7599_v13, %v7598_v53  ;;  %v7526_v30 = vld [vmem:[#allocation2 + $0x47] sm:$0xff] }
 0x9c6   : > { %7511 = vst.msk [vmem:[#allocation2 + $0x170] sm:$0xff] %vm7489_vm2, %v7478_v24  ;;  %v18021_v34 = vpop.f32.mrb[24].mxu0  ;;  %v24567_v37 = vpack.c.bf16 %v7597_v57, %v7596_v60  ;;  %v7525_v44 = vld [vmem:[#allocation2 + $0x2f] sm:$0xff]  ;;  %v7528_v53 = vld [vmem:[#allocation2 + $0x67] sm:$0xff] }
 0x9c7   : > { %v7451_v17 = vadd.f32 %v18021_v34, %v24470_v10  ;;  %v7355_v48 = vpop.f32.mrb[25].mxu0  ;;  %v7527_v56 = vld [vmem:[#allocation2 + $0x4f] sm:$0xff]  ;;  %v24612_v20 = vpack.c.bf16 %v7525_v44, %v7524_v25 }
 0x9c8   : > { %v7449_v19 = vadd.f32 %v24470_v10, %v7355_v48  ;;  %v18022_v62 = vpop.f32.mrb[26].mxu0  ;;  %18052 = vmatmul.mubr.msk.bf16.gmra.mrb[16].mxu1 %vm7489_vm2, %v24567_v37  ;;  %v20656_v24 = vld [vmem:[%s26054_s5 + $0x48] sm:$0xff]   ;;  %v24617_v13 = vpack.c.bf16 %v7527_v56, %v7526_v30  ;;  %v20657_v60 = vld [vmem:[%s26054_s5 + $0x50] sm:$0xff]  }
 0x9c9   : > { %v7483_v39 = vmax.f32 %v7451_v17, 0.0  ;;  %v7452_v40 = vadd.f32 %v18022_v62, %v24470_v10  ;;  %v7358_v18 = vpop.f32.mrb[27].mxu0  ;;  %18055 = vmatprep.mubr.msk.bf16.mxu1 %vm7489_vm2, %v24570_v11  ;;  %v7529_v57 = vld [vmem:[#allocation2 + $0x6f] sm:$0xff]  ;;  %v7530_v48 = vld [vmem:[#allocation2 + $0x87] sm:$0xff] }
 0x9ca   : > { %v7481_v4 = vmax.f32 %v7449_v19, 0.0  ;;  %v7450_v22 = vadd.f32 %v24470_v10, %v7358_v18  ;;  %v7602_v12 = vld [vmem:[#allocation2 + $0x188] sm:$0xff]  ;;  %v24627_v17 = vpack.c.bf16 %v7529_v57, %v7528_v53  ;;  %v20659_v62 = vld [vmem:[%s26054_s5 + $0x60] sm:$0xff]  }
 0x9cb   : > { %7516 = vst.msk [vmem:[#allocation2 + $0x1c8] sm:$0xff] %vm7489_vm2, %v7483_v39  ;;  %v7484_v33 = vmax.f32 %v7452_v40, 0.0  ;;  %v7600_v43 = vld [vmem:[#allocation2 + $0x168] sm:$0xff] }
 0x9cc   : > { %7514 = vst.msk [vmem:[#allocation2 + $0x1a8] sm:$0xff] %vm7489_vm2, %v7481_v4  ;;  %v7482_v55 = vmax.f32 %v7450_v22, 0.0  ;;  %v7603_v31 = vld [vmem:[#allocation2 + $0x190] sm:$0xff]  ;;  %v7532_v18 = vld [vmem:[#allocation2 + $0xa7] sm:$0xff] }
 0x9cd   : > { %7517 = vst.msk [vmem:[#allocation2 + $0x1d0] sm:$0xff] %vm7489_vm2, %v7484_v33  ;;  %v7601_v0 = vld [vmem:[#allocation2 + $0x170] sm:$0xff]  ;;  %v24586_v21 = vpack.c.bf16 %v7603_v31, %v7602_v12  ;;  %v7534_v22 = vld [vmem:[#allocation2 + $0xc7] sm:$0xff] }
 0x9ce   : > { %7515 = vst.msk [vmem:[#allocation2 + $0x1b0] sm:$0xff] %vm7489_vm2, %v7482_v55  ;;  %v18025_v45 = vpop.f32.mrb[28].mxu0  ;;  %v24583_v42 = vpack.c.bf16 %v7601_v0, %v7600_v43  ;;  %v7531_v34 = vld [vmem:[#allocation2 + $0x8f] sm:$0xff]  ;;  %v7536_v43 = vld [vmem:[#allocation2 + $0xe7] sm:$0xff] }
 0x9cf   : > { %v7455_v59 = vadd.f32 %v18025_v45, %v24470_v10  ;;  %v7371_v35 = vpop.f32.mrb[29].mxu0  ;;  %v24632_v19 = vpack.c.bf16 %v7531_v34, %v7530_v48  ;;  %v7533_v39 = vld [vmem:[#allocation2 + $0xaf] sm:$0xff]  ;;  %v7538_v45 = vld [vmem:[#allocation2 + $0x107] sm:$0xff] }
 0x9d0   : > { %v7453_v7 = vadd.f32 %v24470_v10, %v7371_v35  ;;  %v18026_v26 = vpop.f32.mrb[30].mxu0  ;;  %18056 = vmatmul.mubr.msk.bf16.gmra.mrb[20].mxu1 %vm7489_vm2, %v24583_v42  ;;  %v7535_v40 = vld [vmem:[#allocation2 + $0xcf] sm:$0xff]  ;;  %v24641_v4 = vpack.c.bf16 %v7533_v39, %v7532_v18 }
 0x9d1   : > { %v7487_v41 = vmax.f32 %v7455_v59, 0.0  ;;  %v7456_v58 = vadd.f32 %v18026_v26, %v24470_v10  ;;  %v7374_v1 = vpop.f32.mrb[31].mxu0  ;;  %18059 = vmatprep.mubr.msk.bf16.mxu1 %vm7489_vm2, %v24586_v21  ;;  %v24643_v33 = vpack.c.bf16 %v7535_v40, %v7534_v22  ;;  %v7537_v55 = vld [vmem:[#allocation2 + $0xef] sm:$0xff] }
 0x9d2   : > { %v7485_v51 = vmax.f32 %v7453_v7, 0.0  ;;  %v7454_v52 = vadd.f32 %v24470_v10, %v7374_v1  ;;  %v7606_v47 = vld [vmem:[#allocation2 + $0x1c8] sm:$0xff]  ;;  %v24649_v0 = vpack.c.bf16 %v7537_v55, %v7536_v43  ;;  %v8106_v34 = vld [vmem:[#allocation2 + $0x51] sm:$0xff] }
 0x9d3   : > { %7520 = vst.msk [vmem:[#allocation2 + $0x208] sm:$0xff] %vm7489_vm2, %v7487_v41  ;;  %v7488_v50 = vmax.f32 %v7456_v58, 0.0  ;;  %v7604_v46 = vld [vmem:[#allocation2 + $0x1a8] sm:$0xff]  ;;  %v20661_v39 = vld [vmem:[%s26054_s5 + $0x70] sm:$0xff]  }
 0x9d4   : > { %7518 = vst.msk [vmem:[#allocation2 + $0x1e8] sm:$0xff] %vm7489_vm2, %v7485_v51  ;;  %v7486_v5 = vmax.f32 %v7454_v52, 0.0  ;;  %v7607_v6 = vld [vmem:[#allocation2 + $0x1d0] sm:$0xff]  ;;  %v7522_v10 = vld [vmem:[#allocation2 + $0x7] sm:$0xff] }
 0x9d5   : > { %7521 = vst.msk [vmem:[#allocation2 + $0x210] sm:$0xff] %vm7489_vm2, %v7488_v50  ;;  %v7605_v16 = vld [vmem:[#allocation2 + $0x1b0] sm:$0xff]  ;;  %v24601_v9 = vpack.c.bf16 %v7607_v6, %v7606_v47  ;;  %v7554_v27 = vpack.c.bf16 %v7523_v28, %v7522_v10  ;;  %v7540_v7 = vld [vmem:[#allocation2 + $0x127] sm:$0xff] }
 0x9d6   : > { %7519 = vst.msk [vmem:[#allocation2 + $0x1f0] sm:$0xff] %vm7489_vm2, %v7486_v5  ;;  %v24599_v8 = vpack.c.bf16 %v7605_v16, %v7604_v46  ;;  %v7539_v31 = vld [vmem:[#allocation2 + $0x10f] sm:$0xff]  ;;  %v7542_v41 = vld [vmem:[#allocation2 + $0x147] sm:$0xff] }
 0x9d7   : > { %v24651_v12 = vpack.c.bf16 %v7539_v31, %v7538_v45  ;;  %v7541_v59 = vld [vmem:[#allocation2 + $0x12f] sm:$0xff]  ;;  %v7544_v52 = vld [vmem:[#allocation2 + $0x167] sm:$0xff] }
 0x9d8   : > { %18060 = vmatmul.mubr.msk.bf16.gmra.mrb[24].mxu1 %vm7489_vm2, %v24599_v8  ;;  %v7543_v35 = vld [vmem:[#allocation2 + $0x14f] sm:$0xff]  ;;  %v24657_v26 = vpack.c.bf16 %v7541_v59, %v7540_v7  ;;  %v7546_v5 = vld [vmem:[#allocation2 + $0x187] sm:$0xff] }
 0x9d9   : > { %18063 = vmatprep.mubr.msk.bf16.mxu1 %vm7489_vm2, %v24601_v9  ;;  %v24659_v58 = vpack.c.bf16 %v7543_v35, %v7542_v41  ;;  %v7545_v1 = vld [vmem:[#allocation2 + $0x16f] sm:$0xff]  ;;  %v7548_v47 = vld [vmem:[#allocation2 + $0x1a7] sm:$0xff] }
 0x9da   : > { %v7547_v51 = vld [vmem:[#allocation2 + $0x18f] sm:$0xff]  ;;  %v24665_v50 = vpack.c.bf16 %v7545_v1, %v7544_v52  ;;  %v7550_v28 = vld [vmem:[#allocation2 + $0x1c7] sm:$0xff] }
 0x9db   : > { %v7608_v2 = vld [vmem:[#allocation2 + $0x1e8] sm:$0xff]  ;;  %v24667_v6 = vpack.c.bf16 %v7547_v51, %v7546_v5  ;;  %v8108_v18 = vld [vmem:[#allocation2 + $0x71] sm:$0xff]  ;;  %v20663_v45 = vld [vmem:[%s26054_s5 + $0x80] sm:$0xff]  }
 0x9dc   : > { %v7549_v46 = vld [vmem:[#allocation2 + $0x1af] sm:$0xff]  ;;  %v7552_v56 = vld [vmem:[#allocation2 + $0x1e7] sm:$0xff] }
 0x9dd   : > { %v7609_v15 = vld [vmem:[#allocation2 + $0x1f0] sm:$0xff]  ;;  %v24673_v10 = vpack.c.bf16 %v7549_v46, %v7548_v47  ;;  %v20660_v48 = vld [vmem:[%s26054_s5 + $0x68] sm:$0xff]  }
 0x9de   : > { %v24607_v23 = vpack.c.bf16 %v7609_v15, %v7608_v2  ;;  %v7551_v16 = vld [vmem:[#allocation2 + $0x1cf] sm:$0xff] }
 0x9df   : > { %v24675_v2 = vpack.c.bf16 %v7551_v16, %v7550_v28  ;;  %v8101_v15 = vld [vmem:[#allocation2 + $0x9] sm:$0xff]  ;;  %v8110_v55 = vld [vmem:[#allocation2 + $0x91] sm:$0xff] }
 0x9e0   : > { %18064 = vmatmul.mubr.msk.bf16.gmra.mrb[28].mxu1 %vm7489_vm2, %v24607_v23  ;;  %v7553_v44 = vld [vmem:[#allocation2 + $0x1ef] sm:$0xff] }
 0x9e1   : > { %18075 = vmatprep.mubr.msk.bf16.mxu1 %vm7489_vm2, %v7554_v27  ;;  %v8102_v27 = vld [vmem:[#allocation2 + $0x11] sm:$0xff]  ;;  %v24681_v30 = vpack.c.bf16 %v7553_v44, %v7552_v56  ;;  %v8105_v57 = vld [vmem:[#allocation2 + $0x49] sm:$0xff] }
 0x9e2   : > { %v8133_v25 = vpack.c.bf16 %v8102_v27, %v8101_v15  ;;  %v8107_v40 = vld [vmem:[#allocation2 + $0x69] sm:$0xff]  ;;  %v8112_v35 = vld [vmem:[#allocation2 + $0xb1] sm:$0xff] }
 0x9e3   : > { %v8109_v22 = vld [vmem:[#allocation2 + $0x89] sm:$0xff]  ;;  %v24700_v31 = vpack.c.bf16 %v8108_v18, %v8107_v40  ;;  %v8114_v41 = vld [vmem:[#allocation2 + $0xd1] sm:$0xff] }
 0x9e4   : > { %v24705_v43 = vpack.c.bf16 %v8110_v55, %v8109_v22  ;;  %v8111_v59 = vld [vmem:[#allocation2 + $0xa9] sm:$0xff]  ;;  %v8116_v5 = vld [vmem:[#allocation2 + $0xf1] sm:$0xff] }
 0x9e5   : > { %v8113_v7 = vld [vmem:[#allocation2 + $0xc9] sm:$0xff]  ;;  %v24714_v1 = vpack.c.bf16 %v8112_v35, %v8111_v59  ;;  %v8118_v16 = vld [vmem:[#allocation2 + $0x111] sm:$0xff] }
 0x9e6   : > { %v24716_v51 = vpack.c.bf16 %v8114_v41, %v8113_v7  ;;  %v8115_v52 = vld [vmem:[#allocation2 + $0xe9] sm:$0xff]  ;;  %v8120_v27 = vld [vmem:[#allocation2 + $0x131] sm:$0xff] }
 0x9e7   : > { %v8117_v46 = vld [vmem:[#allocation2 + $0x109] sm:$0xff]  ;;  %v24722_v47 = vpack.c.bf16 %v8116_v5, %v8115_v52  ;;  %v8122_v56 = vld [vmem:[#allocation2 + $0x151] sm:$0xff] }
 0x9e8   : > { %18076 = vmatmul.mubr.msk.bf16.vlgmr.msra.gmra.mrb[0].mxu1 %vm7489_vm2, %v24612_v20  ;;  %v24724_v28 = vpack.c.bf16 %v8118_v16, %v8117_v46  ;;  %v8119_v15 = vld [vmem:[#allocation2 + $0x129] sm:$0xff]  ;;  %v8128_v22 = vld [vmem:[#allocation2 + $0x1b1] sm:$0xff] }
 0x9e9   : > { %18108 = vmatpush3.bf16.msra.mxu1 %v24528_v49  ;;  %18079 = vmatprep.mubr.msk.bf16.mxu1 %vm7489_vm2, %v24617_v13  ;;  %v20658_v49 = vld [vmem:[%s26054_s5 + $0x58] sm:$0xff]   ;;  %v8121_v44 = vld [vmem:[#allocation2 + $0x149] sm:$0xff] }
 0x9ea   : > { %18109 = vmatprep.subr.bf16.mxu1 %v20656_v24  ;;  %v8127_v18 = vld [vmem:[#allocation2 + $0x1a9] sm:$0xff]  ;;  %v8132_v41 = vld [vmem:[#allocation2 + $0x1f1] sm:$0xff] }
 0x9eb   : > { %v8129_v55 = vld [vmem:[#allocation2 + $0x1c9] sm:$0xff]  ;;  %v24746_v59 = vpack.c.bf16 %v8128_v22, %v8127_v18 }
 0x9ec   : > { %v8131_v7 = vld [vmem:[#allocation2 + $0x1e9] sm:$0xff] }
 0x9ed   : > { %18110 = vmatpush3.bf16.msra.mxu1 %v20656_v24  ;;  %v8103_v24 = vld [vmem:[#allocation2 + $0x29] sm:$0xff]  ;;  %v24754_v52 = vpack.c.bf16 %v8132_v41, %v8131_v7 }
 0x9ee   : > { %18111 = vmatprep.subr.bf16.mxu1 %v20657_v60  ;;  %v20664_v5 = vld [vmem:[%s26054_s5 + $0x88] sm:$0xff]   ;;  %v20665_v46 = vld [vmem:[%s26054_s5 + $0x90] sm:$0xff]  }
 0x9ef   : > { %v8454_v16 = vld [vmem:[#allocation2 + $0x20f] sm:$0xff] }
 0x9f0   : > { %18080 = vmatmul.mubr.msk.bf16.gmra.mrb[4].mxu1 %vm7489_vm2, %v24627_v17  ;;  %v9718_v18 = vld [vmem:[#allocation2 + $0xb0] sm:$0xff]  ;;  %v9719_v41 = vld [vmem:[#allocation2 + $0xc8] sm:$0xff] }
 0x9f1   : > { %18083 = vmatprep.mubr.msk.bf16.mxu1 %vm7489_vm2, %v24632_v19  ;;  %18112 = vmatpush3.bf16.msra.mxu1 %v20657_v60  ;;  %v8104_v60 = vld [vmem:[#allocation2 + $0x31] sm:$0xff] }
 0x9f2   : > { %18113 = vmatprep.subr.bf16.mxu1 %v20658_v49  ;;  %v24686_v53 = vpack.c.bf16 %v8104_v60, %v8103_v24  ;;  %v24732_v24 = vpack.c.bf16 %v8122_v56, %v8121_v44  ;;  %v8123_v60 = vld [vmem:[#allocation2 + $0x169] sm:$0xff] }
 0x9f3   : > { %v20668_v44 = vld [vmem:[%s26054_s5 + $0xa8] sm:$0xff]   ;;  %v20669_v56 = vld [vmem:[%s26054_s5 + $0xb0] sm:$0xff]  }
 0x9f4   : > { %v9720_v22 = vld [vmem:[#allocation2 + $0xd0] sm:$0xff] }
 0x9f5   : > { %18114 = vmatpush3.bf16.msra.mxu1 %v20658_v49  ;;  %v24691_v49 = vpack.c.bf16 %v8106_v34, %v8105_v57  ;;  %v8124_v57 = vld [vmem:[#allocation2 + $0x171] sm:$0xff]  ;;  %v8125_v34 = vld [vmem:[#allocation2 + $0x189] sm:$0xff] }
 0x9f6   : > { %18147 = vmatprep.subr.bf16.mxu1 %v20659_v62 }
 0x9f8   : > { %18084 = vmatmul.mubr.msk.bf16.gmra.mrb[8].mxu1 %vm7489_vm2, %v24641_v4 }
 0x9f9   : > { %18087 = vmatprep.mubr.msk.bf16.mxu1 %vm7489_vm2, %v24643_v33 }
 0xa00   : > { %18088 = vmatmul.mubr.msk.bf16.gmra.mrb[12].mxu1 %vm7489_vm2, %v24649_v0 }
 0xa01   : > { %18091 = vmatprep.mubr.msk.bf16.mxu1 %vm7489_vm2, %v24651_v12 }
 0xa08   : > { %18092 = vmatmul.mubr.msk.bf16.gmra.mrb[16].mxu1 %vm7489_vm2, %v24657_v26 }
 0xa09   : > { %18095 = vmatprep.mubr.msk.bf16.mxu1 %vm7489_vm2, %v24659_v58 }
 0xa10   : > { %18096 = vmatmul.mubr.msk.bf16.gmra.mrb[20].mxu1 %vm7489_vm2, %v24665_v50 }
 0xa11   : > { %18099 = vmatprep.mubr.msk.bf16.mxu1 %vm7489_vm2, %v24667_v6 }
 0xa18   : > { %18100 = vmatmul.mubr.msk.bf16.gmra.mrb[24].mxu1 %vm7489_vm2, %v24673_v10 }
 0xa19   : > { %18103 = vmatprep.mubr.msk.bf16.mxu1 %vm7489_vm2, %v24675_v2 }
 0xa20   : > { %18104 = vmatmul.mubr.msk.bf16.gmra.mrb[28].mxu1 %vm7489_vm2, %v24681_v30 }
 0xa21   : > { %18115 = vmatprep.mubr.msk.bf16.mxu1 %vm7489_vm2, %v8133_v25  ;;  %v24730_v25 = vpack.c.bf16 %v8120_v27, %v8119_v15  ;;  %v8453_v15 = vld [vmem:[#allocation2 + $0x207] sm:$0xff] }
 0xa22   : > { %v24800_v27 = vpack.c.bf16 %v8454_v16, %v8453_v15  ;;  %v9724_v16 = vld [vmem:[#allocation2 + $0x110] sm:$0xff]  ;;  %v9721_v15 = vld [vmem:[#allocation2 + $0xe8] sm:$0xff] }
 0xa28   : > { %18116 = vmatmul.mubr.msk.bf16.vlgmr.msra.gmra.mrb[0].mxu1 %vm7489_vm2, %v24686_v53 }
 0xa29   : > { %18148 = vmatpush3.bf16.msra.mxu1 %v20659_v62  ;;  %18119 = vmatprep.mubr.msk.bf16.mxu1 %vm7489_vm2, %v24691_v49  ;;  %v20662_v62 = vld [vmem:[%s26054_s5 + $0x78] sm:$0xff]  }
 0xa2a   : > { %18149 = vmatprep.subr.bf16.mxu1 %v20660_v48 }
 0xa2d   : > { %18150 = vmatpush3.bf16.msra.mxu1 %v20660_v48  ;;  %v8126_v48 = vld [vmem:[#allocation2 + $0x191] sm:$0xff] }
 0xa2e   : > { %18151 = vmatprep.subr.bf16.mxu1 %v20661_v39  ;;  %v24740_v40 = vpack.c.bf16 %v8126_v48, %v8125_v34  ;;  %v20686_v34 = vld [vmem:[%s26056_s7 + $0x58] sm:$0xff]   ;;  %v20681_v48 = vld [vmem:[%s26054_s5 + $0x110] sm:$0xff]  }
 0xa30   : > { %18120 = vmatmul.mubr.msk.bf16.gmra.mrb[4].mxu1 %vm7489_vm2, %v24700_v31 }
 0xa31   : > { %18123 = vmatprep.mubr.msk.bf16.mxu1 %vm7489_vm2, %v24705_v43  ;;  %18152 = vmatpush3.bf16.msra.mxu1 %v20661_v39  ;;  %v24738_v39 = vpack.c.bf16 %v8124_v57, %v8123_v60  ;;  %v20680_v60 = vld [vmem:[%s26054_s5 + $0x108] sm:$0xff]  }
 0xa32   : > { %18153 = vmatprep.subr.bf16.mxu1 %v20662_v62 }
 0xa35   : > { %18154 = vmatpush3.bf16.msra.mxu1 %v20662_v62  ;;  %v8130_v62 = vld [vmem:[#allocation2 + $0x1d1] sm:$0xff] }
 0xa36   : > { %18187 = vmatprep.subr.bf16.mxu1 %v20663_v45  ;;  %v24748_v35 = vpack.c.bf16 %v8130_v62, %v8129_v55  ;;  %v20687_v55 = vld [vmem:[%s26056_s7 + $0x60] sm:$0xff]   ;;  %v9717_v62 = vld [vmem:[#allocation2 + $0xa8] sm:$0xff] }
 0xa37   : > { %v9746_v7 = vpack.c.bf16 %v9718_v18, %v9717_v62 }
 0xa38   : > { %18124 = vmatmul.mubr.msk.bf16.gmra.mrb[8].mxu1 %vm7489_vm2, %v24714_v1 }
 0xa39   : > { %18127 = vmatprep.mubr.msk.bf16.mxu1 %vm7489_vm2, %v24716_v51 }
 0xa40   : > { %18128 = vmatmul.mubr.msk.bf16.gmra.mrb[12].mxu1 %vm7489_vm2, %v24722_v47 }
 0xa41   : > { %18131 = vmatprep.mubr.msk.bf16.mxu1 %vm7489_vm2, %v24724_v28 }
 0xa48   : > { %18132 = vmatmul.mubr.msk.bf16.gmra.mrb[16].mxu1 %vm7489_vm2, %v24730_v25 }
 0xa49   : > { %18135 = vmatprep.mubr.msk.bf16.mxu1 %vm7489_vm2, %v24732_v24 }
 0xa50   : > { %18136 = vmatmul.mubr.msk.bf16.gmra.mrb[20].mxu1 %vm7489_vm2, %v24738_v39 }
 0xa51   : > { %18139 = vmatprep.mubr.msk.bf16.mxu1 %vm7489_vm2, %v24740_v40 }
 0xa58   : > { %18140 = vmatmul.mubr.msk.bf16.gmra.mrb[24].mxu1 %vm7489_vm2, %v24746_v59 }
 0xa59   : > { %18143 = vmatprep.mubr.msk.bf16.mxu1 %vm7489_vm2, %v24748_v35 }
 0xa60   : > { %18144 = vmatmul.mubr.msk.bf16.gmra.mrb[28].mxu1 %vm7489_vm2, %v24754_v52 }
 0xa61   : > { %18155 = vmatprep.mubr.msk.bf16.mxu1 %vm7489_vm2, %v24612_v20  ;;  %v20666_v20 = vld [vmem:[%s26054_s5 + $0x98] sm:$0xff]  }
 0xa68   : > { %18156 = vmatmul.mubr.msk.bf16.vlgmr.msra.gmra.mrb[0].mxu1 %vm7489_vm2, %v24617_v13 }
 0xa69   : > { %18188 = vmatpush3.bf16.msra.mxu1 %v20663_v45  ;;  %18159 = vmatprep.mubr.msk.bf16.mxu1 %vm7489_vm2, %v24627_v17  ;;  %v20667_v45 = vld [vmem:[%s26054_s5 + $0xa0] sm:$0xff]  }
 0xa6a   : > { %18189 = vmatprep.subr.bf16.mxu1 %v20664_v5 }
 0xa6d   : > { %18190 = vmatpush3.bf16.msra.mxu1 %v20664_v5  ;;  %v20682_v5 = vld [vmem:[%s26054_s5 + $0x118] sm:$0xff]  }
 0xa6e   : > { %18191 = vmatprep.subr.bf16.mxu1 %v20665_v46 }
 0xa70   : > { %18160 = vmatmul.mubr.msk.bf16.gmra.mrb[4].mxu1 %vm7489_vm2, %v24632_v19 }
 0xa71   : > { %18163 = vmatprep.mubr.msk.bf16.mxu1 %vm7489_vm2, %v24641_v4  ;;  %18192 = vmatpush3.bf16.msra.mxu1 %v20665_v46  ;;  %v9747_v46 = vpack.c.bf16 %v9720_v22, %v9719_v41 }
 0xa72   : > { %18193 = vmatprep.subr.bf16.mxu1 %v20666_v20 }
 0xa75   : > { %18194 = vmatpush3.bf16.msra.mxu1 %v20666_v20  ;;  %v20688_v20 = vld [vmem:[%s26056_s7 + $0x68] sm:$0xff]  }
 0xa76   : > { %18227 = vmatprep.subr.bf16.mxu1 %v20667_v45 }
 0xa78   : > { %18164 = vmatmul.mubr.msk.bf16.gmra.mrb[8].mxu1 %vm7489_vm2, %v24643_v33 }
 0xa79   : > { %18167 = vmatprep.mubr.msk.bf16.mxu1 %vm7489_vm2, %v24649_v0 }
 0xa80   : > { %18168 = vmatmul.mubr.msk.bf16.gmra.mrb[12].mxu1 %vm7489_vm2, %v24651_v12 }
 0xa81   : > { %18171 = vmatprep.mubr.msk.bf16.mxu1 %vm7489_vm2, %v24657_v26 }
 0xa88   : > { %18172 = vmatmul.mubr.msk.bf16.gmra.mrb[16].mxu1 %vm7489_vm2, %v24659_v58 }
 0xa89   : > { %18175 = vmatprep.mubr.msk.bf16.mxu1 %vm7489_vm2, %v24665_v50 }
 0xa90   : > { %18176 = vmatmul.mubr.msk.bf16.gmra.mrb[20].mxu1 %vm7489_vm2, %v24667_v6 }
 0xa91   : > { %18179 = vmatprep.mubr.msk.bf16.mxu1 %vm7489_vm2, %v24673_v10 }
 0xa98   : > { %18180 = vmatmul.mubr.msk.bf16.gmra.mrb[24].mxu1 %vm7489_vm2, %v24675_v2 }
 0xa99   : > { %18183 = vmatprep.mubr.msk.bf16.mxu1 %vm7489_vm2, %v24681_v30 }
 0xaa0   : > { %18184 = vmatmul.mubr.msk.bf16.gmra.mrb[28].mxu1 %vm7489_vm2, %v24800_v27 }
 0xaa1   : > { %18195 = vmatprep.mubr.msk.bf16.mxu1 %vm7489_vm2, %v24488_v38  ;;  %v20670_v38 = vld [vmem:[%s26054_s5 + $0xb8] sm:$0xff]  }
 0xaa8   : > { %18196 = vmatmul.mubr.msk.bf16.vlgmr.msra.gmra.mrb[0].mxu1 %vm7489_vm2, %v24494_v3  ;;  %v20671_v3 = vld [vmem:[%s26054_s5 + $0xc0] sm:$0xff]  }
 0xaa9   : > { %18228 = vmatpush3.bf16.msra.mxu1 %v20667_v45  ;;  %18199 = vmatprep.mubr.msk.bf16.mxu1 %vm7489_vm2, %v24510_v32  ;;  %v8776_v32 = vld [vmem:[#allocation2 + $0x210] sm:$0xff] }
 0xaaa   : > { %18229 = vmatprep.subr.bf16.mxu1 %v20668_v44  ;;  %v9722_v45 = vld [vmem:[#allocation2 + $0xf0] sm:$0xff] }
 0xaad   : > { %18230 = vmatpush3.bf16.msra.mxu1 %v20668_v44  ;;  %v9723_v44 = vld [vmem:[#allocation2 + $0x108] sm:$0xff] }
 0xaae   : > { %18231 = vmatprep.subr.bf16.mxu1 %v20669_v56 }
 0xab0   : > { %18200 = vmatmul.mubr.msk.bf16.gmra.mrb[4].mxu1 %vm7489_vm2, %v24516_v36  ;;  %v8775_v36 = vld [vmem:[#allocation2 + $0x208] sm:$0xff] }
 0xab1   : > { %18203 = vmatprep.mubr.msk.bf16.mxu1 %vm7489_vm2, %v24534_v63  ;;  %18232 = vmatpush3.bf16.msra.mxu1 %v20669_v56  ;;  %v24846_v63 = vpack.c.bf16 %v8776_v32, %v8775_v36  ;;  %v9749_v56 = vpack.c.bf16 %v9724_v16, %v9723_v44  ;;  %v9725_v32 = vld [vmem:[#allocation2 + $0x128] sm:$0xff]  ;;  %v20694_v16 = vld [vmem:[%s26056_s7 + $0x18] sm:$0xff]  }
 0xab2   : > { %18233 = vmatprep.subr.bf16.mxu1 %v20670_v38 }
 0xab5   : > { %18234 = vmatpush3.bf16.msra.mxu1 %v20670_v38  ;;  %v9726_v38 = vld [vmem:[#allocation2 + $0x130] sm:$0xff] }
 0xab6   : > { %18267 = vmatprep.subr.bf16.mxu1 %v20671_v3  ;;  %v9750_v36 = vpack.c.bf16 %v9726_v38, %v9725_v32 }
 0xab8   : > { %18204 = vmatmul.mubr.msk.bf16.gmra.mrb[8].mxu1 %vm7489_vm2, %v24538_v61  ;;  %v20672_v61 = vld [vmem:[%s26054_s5 + $0xc8] sm:$0xff]  }
 0xab9   : > { %18207 = vmatprep.mubr.msk.bf16.mxu1 %vm7489_vm2, %v24551_v14  ;;  %v20673_v14 = vld [vmem:[%s26054_s5 + $0xd0] sm:$0xff]  }
 0xac0   : > { %18208 = vmatmul.mubr.msk.bf16.gmra.mrb[12].mxu1 %vm7489_vm2, %v24554_v29  ;;  %v20674_v29 = vld [vmem:[%s26054_s5 + $0xd8] sm:$0xff]  }
 0xac1   : > { %18211 = vmatprep.mubr.msk.bf16.mxu1 %vm7489_vm2, %v24567_v37  ;;  %v20675_v37 = vld [vmem:[%s26054_s5 + $0xe0] sm:$0xff]  }
 0xac8   : > { %18212 = vmatmul.mubr.msk.bf16.gmra.mrb[16].mxu1 %vm7489_vm2, %v24570_v11  ;;  %v9097_v11 = vld [vmem:[#allocation2 + $0x209] sm:$0xff] }
 0xac9   : > { %18215 = vmatprep.mubr.msk.bf16.mxu1 %vm7489_vm2, %v24583_v42  ;;  %v9098_v42 = vld [vmem:[#allocation2 + $0x211] sm:$0xff] }
 0xad0   : > { %18216 = vmatmul.mubr.msk.bf16.gmra.mrb[20].mxu1 %vm7489_vm2, %v24586_v21  ;;  %v24893_v21 = vpack.c.bf16 %v9098_v42, %v9097_v11  ;;  %v9729_v11 = vld [vmem:[#allocation2 + $0x168] sm:$0xff] }
 0xad1   : > { %18219 = vmatprep.mubr.msk.bf16.mxu1 %vm7489_vm2, %v24599_v8  ;;  %v20676_v8 = vld [vmem:[%s26054_s5 + $0xe8] sm:$0xff]  }
 0xad8   : > { %18220 = vmatmul.mubr.msk.bf16.gmra.mrb[24].mxu1 %vm7489_vm2, %v24601_v9  ;;  %v20677_v9 = vld [vmem:[%s26054_s5 + $0xf0] sm:$0xff]  }
 0xad9   : > { %18223 = vmatprep.mubr.msk.bf16.mxu1 %vm7489_vm2, %v24607_v23  ;;  %v20678_v23 = vld [vmem:[%s26054_s5 + $0xf8] sm:$0xff]  }
 0xae0   : > { %18224 = vmatmul.mubr.msk.bf16.gmra.mrb[28].mxu1 %vm7489_vm2, %v24846_v63 }
 0xae1   : > { %18235 = vmatprep.mubr.msk.bf16.mxu1 %vm7489_vm2, %v24686_v53  ;;  %v9715_v53 = vld [vmem:[#allocation2 + $0x88] sm:$0xff] }
 0xae8   : > { %18236 = vmatmul.mubr.msk.bf16.vlgmr.msra.gmra.mrb[0].mxu1 %vm7489_vm2, %v24691_v49 }
 0xae9   : > { %18268 = vmatpush3.bf16.msra.mxu1 %v20671_v3  ;;  %18239 = vmatprep.mubr.msk.bf16.mxu1 %vm7489_vm2, %v24700_v31  ;;  %v9728_v3 = vld [vmem:[#allocation2 + $0x150] sm:$0xff] }
 0xaea   : > { %18269 = vmatprep.subr.bf16.mxu1 %v20672_v61 }
 0xaed   : > { %18270 = vmatpush3.bf16.msra.mxu1 %v20672_v61  ;;  %v9727_v61 = vld [vmem:[#allocation2 + $0x148] sm:$0xff] }
 0xaee   : > { %18271 = vmatprep.subr.bf16.mxu1 %v20673_v14 }
 0xaf0   : > { %18240 = vmatmul.mubr.msk.bf16.gmra.mrb[4].mxu1 %vm7489_vm2, %v24705_v43 }
 0xaf1   : > { %18243 = vmatprep.mubr.msk.bf16.mxu1 %vm7489_vm2, %v24714_v1  ;;  %18272 = vmatpush3.bf16.msra.mxu1 %v20673_v14  ;;  %v9751_v14 = vpack.c.bf16 %v9728_v3, %v9727_v61 }
 0xaf2   : > { %18273 = vmatprep.subr.bf16.mxu1 %v20674_v29 }
 0xaf5   : > { %18274 = vmatpush3.bf16.msra.mxu1 %v20674_v29  ;;  %v9730_v29 = vld [vmem:[#allocation2 + $0x170] sm:$0xff] }
 0xaf6   : > { %18307 = vmatprep.subr.bf16.mxu1 %v20675_v37  ;;  %v9752_v42 = vpack.c.bf16 %v9730_v29, %v9729_v11 }
 0xaf8   : > { %18244 = vmatmul.mubr.msk.bf16.gmra.mrb[8].mxu1 %vm7489_vm2, %v24716_v51 }
 0xaf9   : > { %18247 = vmatprep.mubr.msk.bf16.mxu1 %vm7489_vm2, %v24722_v47 }
 0xb00   : > { %18248 = vmatmul.mubr.msk.bf16.gmra.mrb[12].mxu1 %vm7489_vm2, %v24724_v28 }
 0xb01   : > { %18251 = vmatprep.mubr.msk.bf16.mxu1 %vm7489_vm2, %v24730_v25 }
 0xb08   : > { %18252 = vmatmul.mubr.msk.bf16.gmra.mrb[16].mxu1 %vm7489_vm2, %v24732_v24 }
 0xb09   : > { %18255 = vmatprep.mubr.msk.bf16.mxu1 %vm7489_vm2, %v24738_v39 }
 0xb10   : > { %18256 = vmatmul.mubr.msk.bf16.gmra.mrb[20].mxu1 %vm7489_vm2, %v24740_v40 }
 0xb11   : > { %18259 = vmatprep.mubr.msk.bf16.mxu1 %vm7489_vm2, %v24746_v59 }
 0xb18   : > { %18260 = vmatmul.mubr.msk.bf16.gmra.mrb[24].mxu1 %vm7489_vm2, %v24748_v35 }
 0xb19   : > { %18263 = vmatprep.mubr.msk.bf16.mxu1 %vm7489_vm2, %v24754_v52 }
 0xb20   : > { %18264 = vmatmul.mubr.msk.bf16.gmra.mrb[28].mxu1 %vm7489_vm2, %v24893_v21 }
 0xb21   : > { %18275 = vmatprep.mubr.msk.bf16.mxu1 %vm7489_vm2, %v24617_v13  ;;  %v20679_v13 = vld [vmem:[%s26054_s5 + $0x100] sm:$0xff]  }
 0xb28   : > { %18276 = vmatmul.mubr.msk.bf16.vlgmr.msra.gmra.mrb[0].mxu1 %vm7489_vm2, %v24627_v17  ;;  %v9419_v17 = vld [vmem:[#allocation2 + $0x227] sm:$0xff] }
 0xb29   : > { %18308 = vmatpush3.bf16.msra.mxu1 %v20675_v37  ;;  %18279 = vmatprep.mubr.msk.bf16.mxu1 %vm7489_vm2, %v24632_v19  ;;  %v9420_v19 = vld [vmem:[#allocation2 + $0x22f] sm:$0xff] }
 0xb2a   : > { %18309 = vmatprep.subr.bf16.mxu1 %v20676_v8  ;;  %v9732_v37 = vld [vmem:[#allocation2 + $0x190] sm:$0xff] }
 0xb2d   : > { %18310 = vmatpush3.bf16.msra.mxu1 %v20676_v8  ;;  %v9731_v8 = vld [vmem:[#allocation2 + $0x188] sm:$0xff] }
 0xb2e   : > { %18311 = vmatprep.subr.bf16.mxu1 %v20677_v9 }
 0xb30   : > { %18280 = vmatmul.mubr.msk.bf16.gmra.mrb[4].mxu1 %vm7489_vm2, %v24641_v4  ;;  %v9436_v4 = vpack.c.bf16 %v9420_v19, %v9419_v17  ;;  %v9733_v17 = vld [vmem:[#allocation2 + $0x1a8] sm:$0xff] }
 0xb31   : > { %18283 = vmatprep.mubr.msk.bf16.mxu1 %vm7489_vm2, %v24643_v33  ;;  %18312 = vmatpush3.bf16.msra.mxu1 %v20677_v9  ;;  %v9712_v33 = vld [vmem:[#allocation2 + $0x50] sm:$0xff]  ;;  %v9753_v9 = vpack.c.bf16 %v9732_v37, %v9731_v8 }
 0xb32   : > { %18313 = vmatprep.subr.bf16.mxu1 %v20678_v23 }
 0xb35   : > { %18314 = vmatpush3.bf16.msra.mxu1 %v20678_v23  ;;  %v9734_v23 = vld [vmem:[#allocation2 + $0x1b0] sm:$0xff] }
 0xb36   : > { %18347 = vmatprep.subr.bf16.mxu1 %v20679_v13  ;;  %v9754_v19 = vpack.c.bf16 %v9734_v23, %v9733_v17 }
 0xb38   : > { %18284 = vmatmul.mubr.msk.bf16.gmra.mrb[8].mxu1 %vm7489_vm2, %v24649_v0  ;;  %v9711_v0 = vld [vmem:[#allocation2 + $0x48] sm:$0xff] }
 0xb39   : > { %18287 = vmatprep.mubr.msk.bf16.mxu1 %vm7489_vm2, %v24651_v12  ;;  %v9743_v12 = vpack.c.bf16 %v9712_v33, %v9711_v0  ;;  %v9738_v0 = vld [vmem:[#allocation2 + $0x1f0] sm:$0xff] }
 0xb40   : > { %18288 = vmatmul.mubr.msk.bf16.gmra.mrb[12].mxu1 %vm7489_vm2, %v24657_v26  ;;  %v20683_v26 = vld [vmem:[%s26056_s7 + $0x40] sm:$0xff]  }
 0xb41   : > { %18291 = vmatprep.mubr.msk.bf16.mxu1 %vm7489_vm2, %v24659_v58  ;;  %v20684_v58 = vld [vmem:[%s26056_s7 + $0x48] sm:$0xff]   ;;  %18387 = vmatprep.subr.bf16.mxu0 %v20683_v26 }
 0xb42   : > { %18388 = vmatpush3.bf16.msra.mxu0 %v20683_v26 }
 0xb43   : > { %18389 = vmatprep.subr.bf16.mxu0 %v20684_v58 }
 0xb46   : > { %18390 = vmatpush3.bf16.msra.mxu0 %v20684_v58 }
 0xb48   : > { %18292 = vmatmul.mubr.msk.bf16.gmra.mrb[16].mxu1 %vm7489_vm2, %v24665_v50  ;;  %v9714_v50 = vld [vmem:[#allocation2 + $0x70] sm:$0xff] }
 0xb49   : > { %18295 = vmatprep.mubr.msk.bf16.mxu1 %vm7489_vm2, %v24667_v6  ;;  %v9716_v6 = vld [vmem:[#allocation2 + $0x90] sm:$0xff] }
 0xb4a   : > { %v9745_v57 = vpack.c.bf16 %v9716_v6, %v9715_v53 }
 0xb50   : > { %18296 = vmatmul.mubr.msk.bf16.gmra.mrb[20].mxu1 %vm7489_vm2, %v24673_v10  ;;  %v20685_v10 = vld [vmem:[%s26056_s7 + $0x50] sm:$0xff]  }
 0xb51   : > { %18299 = vmatprep.mubr.msk.bf16.mxu1 %vm7489_vm2, %v24675_v2  ;;  %v9713_v2 = vld [vmem:[#allocation2 + $0x68] sm:$0xff]  ;;  %18391 = vmatprep.subr.bf16.mxu0 %v20685_v10 }
 0xb52   : > { %18392 = vmatpush3.bf16.msra.mxu0 %v20685_v10 }
 0xb53   : > { %18393 = vmatprep.subr.bf16.mxu0 %v20686_v34 }
 0xb56   : > { %18394 = vmatpush3.bf16.msra.mxu0 %v20686_v34 }
 0xb57   : > { %18395 = vmatprep.subr.bf16.mxu0 %v20687_v55 }
 0xb58   : > { %18300 = vmatmul.mubr.msk.bf16.gmra.mrb[24].mxu1 %vm7489_vm2, %v24681_v30  ;;  %v9744_v30 = vpack.c.bf16 %v9714_v50, %v9713_v2 }
 0xb59   : > { %18303 = vmatprep.mubr.msk.bf16.mxu1 %vm7489_vm2, %v24800_v27  ;;  %v9748_v27 = vpack.c.bf16 %v9722_v45, %v9721_v15 }
 0xb5a   : > { %18396 = vmatpush3.bf16.msra.mxu0 %v20687_v55 }
 0xb5b   : > { %18397 = vmatprep.subr.bf16.mxu0 %v20688_v20 }
 0xb5e   : > { %18398 = vmatpush3.bf16.msra.mxu0 %v20688_v20 }
 0xb60   : > { %18304 = vmatmul.mubr.msk.bf16.gmra.mrb[28].mxu1 %vm7489_vm2, %v9436_v4  ;;  %v9735_v4 = vld [vmem:[#allocation2 + $0x1c8] sm:$0xff] }
 0xb61   : > { %18315 = vmatprep.mubr.msk.bf16.mxu1 %vm7489_vm2, %v9743_v12  ;;  %v9737_v12 = vld [vmem:[#allocation2 + $0x1e8] sm:$0xff] }
 0xb62   : > { %v9756_v26 = vpack.c.bf16 %v9738_v0, %v9737_v12 }
 0xb68   : > { %18316 = vmatmul.mubr.msk.bf16.vlgmr.msra.gmra.mrb[0].mxu1 %vm7489_vm2, %v9744_v30  ;;  %v20692_v30 = vld [vmem:[%s26056_s7 + $0x8] sm:$0xff]  }
 0xb69   : > { %18348 = vmatpush3.bf16.msra.mxu1 %v20679_v13  ;;  %18319 = vmatprep.mubr.msk.bf16.mxu1 %vm7489_vm2, %v9745_v57  ;;  %v9736_v13 = vld [vmem:[#allocation2 + $0x1d0] sm:$0xff] }
 0xb6a   : > { %18349 = vmatprep.subr.bf16.mxu1 %v20680_v60  ;;  %v9755_v33 = vpack.c.bf16 %v9736_v13, %v9735_v4 }
 0xb6d   : > { %18350 = vmatpush3.bf16.msra.mxu1 %v20680_v60 }
 0xb6e   : > { %18351 = vmatprep.subr.bf16.mxu1 %v20681_v48 }
 0xb70   : > { %18320 = vmatmul.mubr.msk.bf16.gmra.mrb[4].mxu1 %vm7489_vm2, %v9746_v7  ;;  %v20693_v7 = vld [vmem:[%s26056_s7 + $0x10] sm:$0xff]  }
 0xb71   : > { %18323 = vmatprep.mubr.msk.bf16.mxu1 %vm7489_vm2, %v9747_v46  ;;  %18352 = vmatpush3.bf16.msra.mxu1 %v20681_v48 }
 0xb72   : > { %18353 = vmatprep.subr.bf16.mxu1 %v20682_v5 }
 0xb75   : > { %18354 = vmatpush3.bf16.msra.mxu1 %v20682_v5 }
 0xb78   : > { %18324 = vmatmul.mubr.msk.bf16.gmra.mrb[8].mxu1 %vm7489_vm2, %v9748_v27 }
 0xb79   : > { %18327 = vmatprep.mubr.msk.bf16.mxu1 %vm7489_vm2, %v9749_v56 }
 0xb80   : > { %18328 = vmatmul.mubr.msk.bf16.gmra.mrb[12].mxu1 %vm7489_vm2, %v9750_v36 }
 0xb81   : > { %18331 = vmatprep.mubr.msk.bf16.mxu1 %vm7489_vm2, %v9751_v14  ;;  %v20695_v14 = vld [vmem:[%s26056_s7 + $0x20] sm:$0xff]  }
 0xb88   : > { %18332 = vmatmul.mubr.msk.bf16.gmra.mrb[16].mxu1 %vm7489_vm2, %v9752_v42 }
 0xb89   : > { %18335 = vmatprep.mubr.msk.bf16.mxu1 %vm7489_vm2, %v9753_v9  ;;  %v20696_v9 = vld [vmem:[%s26056_s7 + $0x28] sm:$0xff]  }
 0xb90   : > { %18336 = vmatmul.mubr.msk.bf16.gmra.mrb[20].mxu1 %vm7489_vm2, %v9754_v19 }
 0xb91   : > { %18339 = vmatprep.mubr.msk.bf16.mxu1 %vm7489_vm2, %v9755_v33 }
 0xb98   : > { %18340 = vmatmul.mubr.msk.bf16.gmra.mrb[24].mxu1 %vm7489_vm2, %v9756_v26 }
 0xb99   : > { %18343 = vmatprep.mubr.msk.bf16.mxu1 %vm7489_vm2, %v24846_v63 }
 0xba0   : > { %18344 = vmatmul.mubr.msk.bf16.gmra.mrb[28].mxu1 %vm7489_vm2, %v24415_v54  ;;  %v10063_v54 = vld [vmem:[#allocation2 + $0x229] sm:$0xff] }
 0xba1   : > { %18355 = vmatprep.mubr.msk.bf16.mxu1 %vm7489_vm2, %v24691_v49  ;;  %v10064_v49 = vld [vmem:[#allocation2 + $0x231] sm:$0xff] }
 0xba8   : > { %18356 = vmatmul.mubr.msk.bf16.vlgmr.msra.gmra.mrb[0].mxu1 %vm7489_vm2, %v24700_v31  ;;  %v10080_v31 = vpack.c.bf16 %v10064_v49, %v10063_v54  ;;  %v20697_v54 = vld [vmem:[%s26056_s7 + $0x30] sm:$0xff]  }
 0xba9   : > { %18359 = vmatprep.mubr.msk.bf16.mxu1 %vm7489_vm2, %v24705_v43  ;;  %v20689_v43 = vld [vmem:[%s26056_s7 + $0x70] sm:$0xff]  }
 0xbaa   : > { %18399 = vmatprep.subr.bf16.mxu0 %v20689_v43 }
 0xbab   : > { %18400 = vmatpush3.bf16.msra.mxu0 %v20689_v43 }
 0xbb0   : > { %18360 = vmatmul.mubr.msk.bf16.gmra.mrb[4].mxu1 %vm7489_vm2, %v24714_v1  ;;  %v20690_v1 = vld [vmem:[%s26056_s7 + $0x78] sm:$0xff]  }
 0xbb1   : > { %18363 = vmatprep.mubr.msk.bf16.mxu1 %vm7489_vm2, %v24716_v51  ;;  %18401 = vmatprep.subr.bf16.mxu0 %v20690_v1  ;;  %v20691_v51 = vld [vmem:[%s26056_s7] sm:$0xff]  }
 0xbb2   : > { %18402 = vmatpush3.bf16.msra.mxu0 %v20690_v1 }
 0xbb3   : > { %18435 = vmatprep.subr.bf16.mxu0 %v20691_v51 }
 0xbb8   : > { %18364 = vmatmul.mubr.msk.bf16.gmra.mrb[8].mxu1 %vm7489_vm2, %v24722_v47  ;;  %v25028_v47 = vld [vmem:[%s26055_s6] ss:$0 sm:$0xff] }
 0xbb9   : > { %18367 = vmatprep.mubr.msk.bf16.mxu1 %vm7489_vm2, %v24724_v28 }
 0xbc0   : > { %18368 = vmatmul.mubr.msk.bf16.gmra.mrb[12].mxu1 %vm7489_vm2, %v24730_v25 }
 0xbc1   : > { %18371 = vmatprep.mubr.msk.bf16.mxu1 %vm7489_vm2, %v24732_v24 }
 0xbc8   : > { %18372 = vmatmul.mubr.msk.bf16.gmra.mrb[16].mxu1 %vm7489_vm2, %v24738_v39 }
 0xbc9   : > { %18375 = vmatprep.mubr.msk.bf16.mxu1 %vm7489_vm2, %v24740_v40 }
 0xbd0   : > { %18376 = vmatmul.mubr.msk.bf16.gmra.mrb[20].mxu1 %vm7489_vm2, %v24746_v59 }
 0xbd1   : > { %18379 = vmatprep.mubr.msk.bf16.mxu1 %vm7489_vm2, %v24748_v35 }
 0xbd8   : > { %18380 = vmatmul.mubr.msk.bf16.gmra.mrb[24].mxu1 %vm7489_vm2, %v24754_v52 }
 0xbd9   : > { %18383 = vmatprep.mubr.msk.bf16.mxu1 %vm7489_vm2, %v24893_v21 }
 0xbe0   : > { %18384 = vmatmul.mubr.msk.bf16.gmra.mrb[28].mxu1 %vm7489_vm2, %v10080_v31 }
 0xc7b   : > { %v18357_v28 = vpop.f32.mrb[0].mxu1 }
 0xc7c   : > { %v10364_v25 = vadd.f32 %v18357_v28, %v25028_v47  ;;  %v10196_v24 = vpop.f32.mrb[1].mxu1  ;;  %v20698_v28 = vld [vmem:[%s26056_s7 + $0x38] sm:$0xff]  }
 0xc7d   : > { %v10362_v39 = vadd.f32 %v25028_v47, %v10196_v24  ;;  %v18358_v40 = vpop.f32.mrb[2].mxu1 }
 0xc7e   : > { %v10396_v59 = vmax.f32 %v10364_v25, 0.0  ;;  %v10365_v35 = vadd.f32 %v18358_v40, %v25028_v47  ;;  %v10199_v52 = vpop.f32.mrb[3].mxu1 }
 0xc7f   : > { %v10394_v63 = vmax.f32 %v10362_v39, 0.0  ;;  %v10363_v21 = vadd.f32 %v25028_v47, %v10199_v52 }
 0xc80   : > { %10428 = vst [vmem:[#allocation2 + $0x48] sm:$0xff] %v10396_v59  ;;  %v10397_v58 = vmax.f32 %v10365_v35, 0.0 }
 0xc81   : > { %10426 = vst [vmem:[#allocation2 + $0x28] sm:$0xff] %v10394_v63  ;;  %v10395_v50 = vmax.f32 %v10363_v21, 0.0 }
 0xc82   : > { %10429 = vst [vmem:[#allocation2 + $0x50] sm:$0xff] %v10397_v58  ;;  %v10556_v6 = vpack.c.bf16 %v10397_v58, %v10396_v59  ;;  %v25085_v58 = vld [vmem:[%s26056_s7 + $0x80] sm:$0xff]  }
 0xc83   : > { %10427 = vst [vmem:[#allocation2 + $0x30] sm:$0xff] %v10395_v50  ;;  %v18361_v10 = vpop.f32.mrb[4].mxu1  ;;  %v10555_v2 = vpack.c.bf16 %v10395_v50, %v10394_v63 }
 0xc84   : > { %v10368_v53 = vadd.f32 %v18361_v10, %v25028_v47  ;;  %v10212_v60 = vpop.f32.mrb[5].mxu1 }
 0xc85   : > { %v10366_v57 = vadd.f32 %v25028_v47, %v10212_v60  ;;  %v18362_v34 = vpop.f32.mrb[6].mxu1  ;;  %18404 = vmatmul.mubr.bf16.vlgmr.msra.gmra.mrb[32].mxu0 %v10555_v2 }
 0xc86   : > { %v10400_v48 = vmax.f32 %v10368_v53, 0.0  ;;  %v10369_v18 = vadd.f32 %v18362_v34, %v25028_v47  ;;  %v10215_v22 = vpop.f32.mrb[7].mxu1  ;;  %18436 = vmatpush3.bf16.msra.mxu0 %v20691_v51  ;;  %18407 = vmatprep.mubr.bf16.mxu0 %v10556_v6 }
 0xc87   : > { %v10398_v55 = vmax.f32 %v10366_v57, 0.0  ;;  %v10367_v62 = vadd.f32 %v25028_v47, %v10215_v22  ;;  %18437 = vmatprep.subr.bf16.mxu0 %v20692_v30 }
 0xc88   : > { %10432 = vst [vmem:[#allocation2 + $0x88] sm:$0xff] %v10400_v48  ;;  %v10401_v41 = vmax.f32 %v10369_v18, 0.0 }
 0xc89   : > { %10430 = vst [vmem:[#allocation2 + $0x68] sm:$0xff] %v10398_v55  ;;  %v10399_v5 = vmax.f32 %v10367_v62, 0.0 }
 0xc8a   : > { %10433 = vst [vmem:[#allocation2 + $0x90] sm:$0xff] %v10401_v41  ;;  %18438 = vmatpush3.bf16.msra.mxu0 %v20692_v30  ;;  %v10558_v46 = vpack.c.bf16 %v10401_v41, %v10400_v48 }
 0xc8b   : > { %10431 = vst [vmem:[#allocation2 + $0x70] sm:$0xff] %v10399_v5  ;;  %v18365_v20 = vpop.f32.mrb[8].mxu1  ;;  %v10557_v45 = vpack.c.bf16 %v10399_v5, %v10398_v55  ;;  %18439 = vmatprep.subr.bf16.mxu0 %v20693_v7 }
 0xc8c   : > { %v10372_v15 = vadd.f32 %v18365_v20, %v25028_v47  ;;  %v10228_v27 = vpop.f32.mrb[9].mxu1 }
 0xc8d   : > { %v10370_v44 = vadd.f32 %v25028_v47, %v10228_v27  ;;  %v18366_v56 = vpop.f32.mrb[10].mxu1  ;;  %18408 = vmatmul.mubr.bf16.gmra.mrb[36].mxu0 %v10557_v45 }
 0xc8e   : > { %v10404_v38 = vmax.f32 %v10372_v15, 0.0  ;;  %v10373_v3 = vadd.f32 %v18366_v56, %v25028_v47  ;;  %v10231_v32 = vpop.f32.mrb[11].mxu1  ;;  %18411 = vmatprep.mubr.bf16.mxu0 %v10558_v46  ;;  %18440 = vmatpush3.bf16.msra.mxu0 %v20693_v7 }
 0xc8f   : > { %v10402_v36 = vmax.f32 %v10370_v44, 0.0  ;;  %v10371_v61 = vadd.f32 %v25028_v47, %v10231_v32  ;;  %18441 = vmatprep.subr.bf16.mxu0 %v20694_v16 }
 0xc90   : > { %10436 = vst [vmem:[#allocation2 + $0xc8] sm:$0xff] %v10404_v38  ;;  %v10405_v29 = vmax.f32 %v10373_v3, 0.0 }
 0xc91   : > { %10434 = vst [vmem:[#allocation2 + $0xa8] sm:$0xff] %v10402_v36  ;;  %v25054_v37 = vmax.f32 %v10371_v61, 0.0 }
 0xc92   : > { %10437 = vst [vmem:[#allocation2 + $0xd0] sm:$0xff] %v10405_v29  ;;  %v10560_v11 = vpack.c.bf16 %v10405_v29, %v10404_v38  ;;  %18442 = vmatpush3.bf16.msra.mxu0 %v20694_v16 }
 0xc93   : > { %10435 = vst [vmem:[#allocation2 + $0xb0] sm:$0xff] %v25054_v37  ;;  %v18369_v42 = vpop.f32.mrb[12].mxu1  ;;  %v10559_v8 = vpack.c.bf16 %v25054_v37, %v10402_v36  ;;  %18443 = vmatprep.subr.bf16.mxu0 %v20695_v14 }
 0xc94   : > { %v10376_v23 = vadd.f32 %v18369_v42, %v25028_v47  ;;  %v10244_v13 = vpop.f32.mrb[13].mxu1 }
 0xc95   : > { %v10374_v17 = vadd.f32 %v25028_v47, %v10244_v13  ;;  %v18370_v19 = vpop.f32.mrb[14].mxu1  ;;  %18412 = vmatmul.mubr.bf16.gmra.mrb[40].mxu0 %v10559_v8 }
 0xc96   : > { %v10408_v4 = vmax.f32 %v10376_v23, 0.0  ;;  %v10377_v33 = vadd.f32 %v18370_v19, %v25028_v47  ;;  %v10247_v0 = vpop.f32.mrb[15].mxu1  ;;  %18415 = vmatprep.mubr.bf16.mxu0 %v10560_v11  ;;  %18444 = vmatpush3.bf16.msra.mxu0 %v20695_v14 }
 0xc97   : > { %v10406_v12 = vmax.f32 %v10374_v17, 0.0  ;;  %v10375_v26 = vadd.f32 %v25028_v47, %v10247_v0  ;;  %18445 = vmatprep.subr.bf16.mxu0 %v20696_v9  ;;  %v10458_v0 = vld [vmem:[#allocation2 + $0x7] sm:$0xff] }
 0xc98   : > { %10440 = vst [vmem:[#allocation2 + $0x108] sm:$0xff] %v10408_v4  ;;  %v25068_v49 = vmax.f32 %v10377_v33, 0.0 }
 0xc99   : > { %10438 = vst [vmem:[#allocation2 + $0xe8] sm:$0xff] %v10406_v12  ;;  %v10407_v31 = vmax.f32 %v10375_v26, 0.0 }
 0xc9a   : > { %10441 = vst [vmem:[#allocation2 + $0x110] sm:$0xff] %v25068_v49  ;;  %v10562_v43 = vpack.c.bf16 %v25068_v49, %v10408_v4  ;;  %18446 = vmatpush3.bf16.msra.mxu0 %v20696_v9 }
 0xc9b   : > { %10439 = vst [vmem:[#allocation2 + $0xf0] sm:$0xff] %v10407_v31  ;;  %v18373_v1 = vpop.f32.mrb[16].mxu1  ;;  %v25072_v51 = vpack.c.bf16 %v10407_v31, %v10406_v12  ;;  %18447 = vmatprep.subr.bf16.mxu0 %v20697_v54  ;;  %v10459_v12 = vld [vmem:[#allocation2 + $0xf] sm:$0xff] }
 0xc9c   : > { %v10380_v25 = vadd.f32 %v18373_v1, %v25028_v47  ;;  %v10260_v24 = vpop.f32.mrb[17].mxu1  ;;  %v10490_v31 = vpack.c.bf16 %v10459_v12, %v10458_v0 }
 0xc9d   : > { %v10378_v39 = vadd.f32 %v25028_v47, %v10260_v24  ;;  %v18374_v40 = vpop.f32.mrb[18].mxu1  ;;  %18416 = vmatmul.mubr.bf16.gmra.mrb[44].mxu0 %v25072_v51  ;;  %v10460_v24 = vld [vmem:[#allocation2 + $0x27] sm:$0xff] }
 0xc9e   : > { %v10412_v59 = vmax.f32 %v10380_v25, 0.0  ;;  %v10381_v35 = vadd.f32 %v18374_v40, %v25028_v47  ;;  %v10263_v52 = vpop.f32.mrb[19].mxu1  ;;  %18419 = vmatprep.mubr.bf16.mxu0 %v10562_v43  ;;  %18448 = vmatpush3.bf16.msra.mxu0 %v20697_v54  ;;  %v10463_v25 = vld [vmem:[#allocation2 + $0x4f] sm:$0xff] }
 0xc9f   : > { %v10410_v63 = vmax.f32 %v10378_v39, 0.0  ;;  %v10379_v21 = vadd.f32 %v25028_v47, %v10263_v52  ;;  %18449 = vmatprep.subr.bf16.mxu0 %v20698_v28  ;;  %v10462_v39 = vld [vmem:[#allocation2 + $0x47] sm:$0xff]  ;;  %v10465_v52 = vld [vmem:[#allocation2 + $0x6f] sm:$0xff] }
 0xca0   : > { %10444 = vst [vmem:[#allocation2 + $0x148] sm:$0xff] %v10412_v59  ;;  %v10413_v50 = vmax.f32 %v10381_v35, 0.0  ;;  %v20700_v40 = vld [vmem:[%s26056_s7 + $0x88] sm:$0xff]   ;;  %v20701_v35 = vld [vmem:[%s26056_s7 + $0x90] sm:$0xff]  }
 0xca1   : > { %10442 = vst [vmem:[#allocation2 + $0x128] sm:$0xff] %v10410_v63  ;;  %v10411_v6 = vmax.f32 %v10379_v21, 0.0  ;;  %v10464_v21 = vld [vmem:[#allocation2 + $0x67] sm:$0xff] }
 0xca2   : > { %10445 = vst [vmem:[#allocation2 + $0x150] sm:$0xff] %v10413_v50  ;;  %v25087_v10 = vpack.c.bf16 %v10413_v50, %v10412_v59  ;;  %18450 = vmatpush3.bf16.msra.mxu0 %v20698_v28  ;;  %v10461_v28 = vld [vmem:[#allocation2 + $0x2f] sm:$0xff]  ;;  %v25128_v59 = vpack.c.bf16 %v10463_v25, %v10462_v39  ;;  %v25136_v50 = vpack.c.bf16 %v10465_v52, %v10464_v21 }
 0xca3   : > { %10443 = vst [vmem:[#allocation2 + $0x130] sm:$0xff] %v10411_v6  ;;  %v18377_v2 = vpop.f32.mrb[20].mxu1  ;;  %v25089_v30 = vpack.c.bf16 %v10411_v6, %v10410_v63  ;;  %18483 = vmatprep.subr.bf16.mxu0 %v25085_v58  ;;  %v10467_v63 = vld [vmem:[#allocation2 + $0x8f] sm:$0xff]  ;;  %v10466_v6 = vld [vmem:[#allocation2 + $0x87] sm:$0xff] }
 0xca4   : > { %v10384_v53 = vadd.f32 %v18377_v2, %v25028_v47  ;;  %v10276_v60 = vpop.f32.mrb[21].mxu1  ;;  %v20702_v2 = vld [vmem:[%s26056_s7 + $0x98] sm:$0xff]   ;;  %v11007_v39 = vld [vmem:[#allocation2 + $0x29] sm:$0xff] }
 0xca5   : > { %v10382_v57 = vadd.f32 %v25028_v47, %v10276_v60  ;;  %v18378_v34 = vpop.f32.mrb[22].mxu1  ;;  %18420 = vmatmul.mubr.bf16.gmra.mrb[48].mxu0 %v25089_v30  ;;  %v10469_v60 = vld [vmem:[#allocation2 + $0xaf] sm:$0xff] }
 0xca6   : > { %v10416_v48 = vmax.f32 %v10384_v53, 0.0  ;;  %v10385_v18 = vadd.f32 %v18378_v34, %v25028_v47  ;;  %v10279_v22 = vpop.f32.mrb[23].mxu1  ;;  %18423 = vmatprep.mubr.bf16.mxu0 %v25087_v10  ;;  %v20703_v53 = vld [vmem:[%s26056_s7 + $0xa0] sm:$0xff]   ;;  %v11010_v52 = vld [vmem:[#allocation2 + $0x51] sm:$0xff]  ;;  %v20708_v21 = vld [vmem:[%s26056_s7 + $0xc8] sm:$0xff]  }
 0xca7   : > { %v10414_v55 = vmax.f32 %v10382_v57, 0.0  ;;  %v10383_v62 = vadd.f32 %v25028_v47, %v10279_v22  ;;  %v10471_v57 = vld [vmem:[#allocation2 + $0xcf] sm:$0xff]  ;;  %v10468_v34 = vld [vmem:[#allocation2 + $0xa7] sm:$0xff] }
 0xca8   : > { %10448 = vst [vmem:[#allocation2 + $0x188] sm:$0xff] %v10416_v48  ;;  %v10417_v7 = vmax.f32 %v10385_v18, 0.0  ;;  %v10470_v18 = vld [vmem:[#allocation2 + $0xc7] sm:$0xff] }
 0xca9   : > { %10446 = vst [vmem:[#allocation2 + $0x168] sm:$0xff] %v10414_v55  ;;  %v10415_v41 = vmax.f32 %v10383_v62, 0.0  ;;  %v20704_v22 = vld [vmem:[%s26056_s7 + $0xa8] sm:$0xff]   ;;  %v20705_v62 = vld [vmem:[%s26056_s7 + $0xb0] sm:$0xff]  }
 0xcaa   : > { %10449 = vst [vmem:[#allocation2 + $0x190] sm:$0xff] %v10417_v7  ;;  %v25098_v5 = vpack.c.bf16 %v10417_v7, %v10416_v48  ;;  %v25148_v48 = vpack.c.bf16 %v10469_v60, %v10468_v34  ;;  %v10473_v7 = vld [vmem:[#allocation2 + $0xef] sm:$0xff] }
 0xcab   : > { %10447 = vst [vmem:[#allocation2 + $0x170] sm:$0xff] %v10415_v41  ;;  %v18381_v46 = vpop.f32.mrb[24].mxu1  ;;  %v25100_v20 = vpack.c.bf16 %v10415_v41, %v10414_v55  ;;  %v25153_v55 = vpack.c.bf16 %v10471_v57, %v10470_v18  ;;  %v10475_v41 = vld [vmem:[#allocation2 + $0x10f] sm:$0xff] }
 0xcac   : > { %v10388_v45 = vadd.f32 %v18381_v46, %v25028_v47  ;;  %v10292_v16 = vpop.f32.mrb[25].mxu1  ;;  %v10472_v46 = vld [vmem:[#allocation2 + $0xe7] sm:$0xff]  ;;  %v11012_v60 = vld [vmem:[#allocation2 + $0x71] sm:$0xff] }
 0xcad   : > { %v10386_v15 = vadd.f32 %v25028_v47, %v10292_v16  ;;  %v18382_v27 = vpop.f32.mrb[26].mxu1  ;;  %18424 = vmatmul.mubr.bf16.gmra.mrb[52].mxu0 %v25100_v20  ;;  %v10474_v16 = vld [vmem:[#allocation2 + $0x107] sm:$0xff]  ;;  %v11014_v34 = vld [vmem:[#allocation2 + $0x91] sm:$0xff] }
 0xcae   : > { %v10420_v44 = vmax.f32 %v10388_v45, 0.0  ;;  %v10389_v56 = vadd.f32 %v18382_v27, %v25028_v47  ;;  %v10295_v38 = vpop.f32.mrb[27].mxu1  ;;  %18427 = vmatprep.mubr.bf16.mxu0 %v25098_v5  ;;  %v25160_v45 = vpack.c.bf16 %v10473_v7, %v10472_v46  ;;  %v25165_v27 = vpack.c.bf16 %v10475_v41, %v10474_v16  ;;  %v11013_v57 = vld [vmem:[#allocation2 + $0x89] sm:$0xff]  ;;  %v20711_v7 = vld [vmem:[%s26056_s7 + $0xe0] sm:$0xff]   ;;  %v11016_v46 = vld [vmem:[#allocation2 + $0xb1] sm:$0xff] }
 0xcaf   : > { %v10418_v3 = vmax.f32 %v10386_v15, 0.0  ;;  %v10387_v32 = vadd.f32 %v25028_v47, %v10295_v38  ;;  %v20706_v15 = vld [vmem:[%s26056_s7 + $0xb8] sm:$0xff]   ;;  %v10479_v38 = vld [vmem:[#allocation2 + $0x14f] sm:$0xff] }
 0xcb0   : > { %10452 = vst [vmem:[#allocation2 + $0x1c8] sm:$0xff] %v10420_v44  ;;  %v10421_v36 = vmax.f32 %v10389_v56, 0.0  ;;  %v10477_v56 = vld [vmem:[#allocation2 + $0x12f] sm:$0xff] }
 0xcb1   : > { %10450 = vst [vmem:[#allocation2 + $0x1a8] sm:$0xff] %v10418_v3  ;;  %v10419_v61 = vmax.f32 %v10387_v32, 0.0  ;;  %v11015_v41 = vld [vmem:[#allocation2 + $0xa9] sm:$0xff] }
 0xcb2   : > { %10453 = vst [vmem:[#allocation2 + $0x1d0] sm:$0xff] %v10421_v36  ;;  %v25108_v14 = vpack.c.bf16 %v10421_v36, %v10420_v44  ;;  %v20707_v44 = vld [vmem:[%s26056_s7 + $0xc0] sm:$0xff]   ;;  %v11017_v16 = vld [vmem:[#allocation2 + $0xc9] sm:$0xff] }
 0xcb3   : > { %10451 = vst [vmem:[#allocation2 + $0x1b0] sm:$0xff] %v10419_v61  ;;  %v18385_v29 = vpop.f32.mrb[28].mxu1  ;;  %v25110_v11 = vpack.c.bf16 %v10419_v61, %v10418_v3  ;;  %v10476_v3 = vld [vmem:[#allocation2 + $0x127] sm:$0xff] }
 0xcb4   : > { %v10392_v42 = vadd.f32 %v18385_v29, %v25028_v47  ;;  %v10308_v8 = vpop.f32.mrb[29].mxu1  ;;  %v25172_v32 = vpack.c.bf16 %v10477_v56, %v10476_v3  ;;  %v10478_v36 = vld [vmem:[#allocation2 + $0x147] sm:$0xff]  ;;  %v10481_v29 = vld [vmem:[#allocation2 + $0x16f] sm:$0xff] }
 0xcb5   : > { %v10390_v9 = vadd.f32 %v25028_v47, %v10308_v8  ;;  %v18386_v23 = vpop.f32.mrb[30].mxu1  ;;  %18428 = vmatmul.mubr.bf16.gmra.mrb[56].mxu0 %v25110_v11  ;;  %v25174_v61 = vpack.c.bf16 %v10479_v38, %v10478_v36  ;;  %v10480_v8 = vld [vmem:[#allocation2 + $0x167] sm:$0xff]  ;;  %v20713_v3 = vld [vmem:[%s26056_s7 + $0xf0] sm:$0xff]  }
 0xcb6   : > { %v10424_v13 = vmax.f32 %v10392_v42, 0.0  ;;  %v10393_v17 = vadd.f32 %v18386_v23, %v25028_v47  ;;  %v10311_v19 = vpop.f32.mrb[31].mxu1  ;;  %18431 = vmatprep.mubr.bf16.mxu0 %v25108_v14  ;;  %v10483_v42 = vld [vmem:[#allocation2 + $0x18f] sm:$0xff]  ;;  %v10482_v23 = vld [vmem:[#allocation2 + $0x187] sm:$0xff] }
 0xcb7   : > { %v10422_v4 = vmax.f32 %v10390_v9, 0.0  ;;  %v10391_v33 = vadd.f32 %v25028_v47, %v10311_v19  ;;  %v25123_v47 = vpack.c.bf16 %v10461_v28, %v10460_v24  ;;  %v25178_v9 = vpack.c.bf16 %v10481_v29, %v10480_v8  ;;  %v10486_v0 = vld [vmem:[#allocation2 + $0x1c7] sm:$0xff]  ;;  %v11020_v29 = vld [vmem:[#allocation2 + $0xf1] sm:$0xff] }
 0xcb8   : > { %10456 = vst [vmem:[#allocation2 + $0x208] sm:$0xff] %v10424_v13  ;;  %v10425_v26 = vmax.f32 %v10393_v17, 0.0  ;;  %v20712_v56 = vld [vmem:[%s26056_s7 + $0xe8] sm:$0xff]   ;;  %v11022_v8 = vld [vmem:[#allocation2 + $0x111] sm:$0xff] }
 0xcb9   : > { %10454 = vst [vmem:[#allocation2 + $0x1e8] sm:$0xff] %v10422_v4  ;;  %v10423_v54 = vmax.f32 %v10391_v33, 0.0  ;;  %v10487_v19 = vld [vmem:[#allocation2 + $0x1cf] sm:$0xff] }
 0xcba   : > { %10457 = vst [vmem:[#allocation2 + $0x210] sm:$0xff] %v10425_v26  ;;  %v25118_v43 = vpack.c.bf16 %v10425_v26, %v10424_v13  ;;  %v25180_v13 = vpack.c.bf16 %v10483_v42, %v10482_v23  ;;  %v10485_v17 = vld [vmem:[#allocation2 + $0x1af] sm:$0xff]  ;;  %v25186_v12 = vpack.c.bf16 %v10487_v19, %v10486_v0 }
 0xcbb   : > { %10455 = vst [vmem:[#allocation2 + $0x1f0] sm:$0xff] %v10423_v54  ;;  %v25120_v1 = vpack.c.bf16 %v10423_v54, %v10422_v4  ;;  %v10484_v4 = vld [vmem:[#allocation2 + $0x1a7] sm:$0xff]  ;;  %v11006_v54 = vld [vmem:[#allocation2 + $0x11] sm:$0xff] }
 0xcbc   : > { %v25184_v33 = vpack.c.bf16 %v10485_v17, %v10484_v4  ;;  %v11005_v26 = vld [vmem:[#allocation2 + $0x9] sm:$0xff]  ;;  %v20714_v17 = vld [vmem:[%s26056_s7 + $0xf8] sm:$0xff]   ;;  %v20715_v4 = vld [vmem:[%s26056_s7 + $0x100] sm:$0xff]  }
 0xcbd   : > { %18432 = vmatmul.mubr.bf16.gmra.mrb[60].mxu0 %v25120_v1  ;;  %v11037_v25 = vpack.c.bf16 %v11006_v54, %v11005_v26  ;;  %v11019_v36 = vld [vmem:[#allocation2 + $0xe9] sm:$0xff]  ;;  %v11024_v26 = vld [vmem:[#allocation2 + $0x131] sm:$0xff] }
 0xcbe   : > { %18451 = vmatprep.mubr.bf16.mxu0 %v10490_v31  ;;  %v11021_v42 = vld [vmem:[#allocation2 + $0x109] sm:$0xff]  ;;  %v25229_v23 = vpack.c.bf16 %v11020_v29, %v11019_v36 }
 0xcbf   : > { %v25234_v19 = vpack.c.bf16 %v11022_v8, %v11021_v42  ;;  %v11023_v0 = vld [vmem:[#allocation2 + $0x129] sm:$0xff]  ;;  %v20722_v42 = vld [vmem:[%s26056_s7 + $0x138] sm:$0xff]   ;;  %v20723_v8 = vld [vmem:[%s26056_s7 + $0x140] sm:$0xff]  }
 0xcc0   : > { %v10488_v28 = vld [vmem:[#allocation2 + $0x1e7] sm:$0xff]  ;;  %v20721_v29 = vld [vmem:[%s26056_s7 + $0x130] sm:$0xff]  }
 0xcc1   : > { %v11025_v54 = vld [vmem:[#allocation2 + $0x149] sm:$0xff] }
 0xcc2   : > { %v10489_v31 = vld [vmem:[#allocation2 + $0x1ef] sm:$0xff] }
 0xcc3   : > { %v25190_v24 = vpack.c.bf16 %v10489_v31, %v10488_v28  ;;  %v11026_v31 = vld [vmem:[#allocation2 + $0x151] sm:$0xff]  ;;  %v25241_v28 = vpack.c.bf16 %v11024_v26, %v11023_v0  ;;  %v20720_v36 = vld [vmem:[%s26056_s7 + $0x128] sm:$0xff]  }
 0xcc4   : > { %v11341_v0 = vld [vmem:[#allocation2 + $0x207] sm:$0xff] }
 0xcc5   : > { %18452 = vmatmul.mubr.bf16.vlgmr.msra.gmra.mrb[32].mxu0 %v25123_v47 }
 0xcc6   : > { %18484 = vmatpush3.bf16.msra.mxu0 %v25085_v58  ;;  %18455 = vmatprep.mubr.bf16.mxu0 %v25128_v59  ;;  %v25141_v58 = vpack.c.bf16 %v10467_v63, %v10466_v6 }
 0xcc7   : > { %18485 = vmatprep.subr.bf16.mxu0 %v20700_v40 }
 0xcca   : > { %18486 = vmatpush3.bf16.msra.mxu0 %v20700_v40  ;;  %v11008_v40 = vld [vmem:[#allocation2 + $0x31] sm:$0xff] }
 0xccb   : > { %18487 = vmatprep.subr.bf16.mxu0 %v20701_v35  ;;  %v25193_v63 = vpack.c.bf16 %v11008_v40, %v11007_v39  ;;  %v11027_v39 = vld [vmem:[#allocation2 + $0x169] sm:$0xff]  ;;  %v11028_v40 = vld [vmem:[#allocation2 + $0x171] sm:$0xff] }
 0xccd   : > { %18456 = vmatmul.mubr.bf16.gmra.mrb[36].mxu0 %v25136_v50 }
 0xcce   : > { %18459 = vmatprep.mubr.bf16.mxu0 %v25141_v58  ;;  %18488 = vmatpush3.bf16.msra.mxu0 %v20701_v35  ;;  %v11009_v35 = vld [vmem:[#allocation2 + $0x49] sm:$0xff] }
 0xccf   : > { %18489 = vmatprep.subr.bf16.mxu0 %v20702_v2  ;;  %v25198_v6 = vpack.c.bf16 %v11010_v52, %v11009_v35  ;;  %v11029_v35 = vld [vmem:[#allocation2 + $0x189] sm:$0xff]  ;;  %v11030_v52 = vld [vmem:[#allocation2 + $0x191] sm:$0xff] }
 0xcd2   : > { %18490 = vmatpush3.bf16.msra.mxu0 %v20702_v2  ;;  %v20709_v2 = vld [vmem:[%s26056_s7 + $0xd0] sm:$0xff]  }
 0xcd3   : > { %18491 = vmatprep.subr.bf16.mxu0 %v20703_v53 }
 0xcd5   : > { %18460 = vmatmul.mubr.bf16.gmra.mrb[40].mxu0 %v25148_v48 }
 0xcd6   : > { %18463 = vmatprep.mubr.bf16.mxu0 %v25153_v55  ;;  %18492 = vmatpush3.bf16.msra.mxu0 %v20703_v53  ;;  %v11011_v53 = vld [vmem:[#allocation2 + $0x69] sm:$0xff] }
 0xcd7   : > { %18493 = vmatprep.subr.bf16.mxu0 %v20704_v22  ;;  %v25205_v18 = vpack.c.bf16 %v11012_v60, %v11011_v53  ;;  %v11031_v53 = vld [vmem:[#allocation2 + $0x1a9] sm:$0xff]  ;;  %v11032_v60 = vld [vmem:[#allocation2 + $0x1b1] sm:$0xff] }
 0xcda   : > { %18494 = vmatpush3.bf16.msra.mxu0 %v20704_v22  ;;  %v20710_v22 = vld [vmem:[%s26056_s7 + $0xd8] sm:$0xff]  }
 0xcdb   : > { %18495 = vmatprep.subr.bf16.mxu0 %v20705_v62 }
 0xcdd   : > { %18464 = vmatmul.mubr.bf16.gmra.mrb[44].mxu0 %v25160_v45 }
 0xcde   : > { %18467 = vmatprep.mubr.bf16.mxu0 %v25165_v27  ;;  %18496 = vmatpush3.bf16.msra.mxu0 %v20705_v62  ;;  %v25210_v62 = vpack.c.bf16 %v11014_v34, %v11013_v57  ;;  %v11033_v57 = vld [vmem:[#allocation2 + $0x1c9] sm:$0xff]  ;;  %v11034_v34 = vld [vmem:[#allocation2 + $0x1d1] sm:$0xff] }
 0xcdf   : > { %18497 = vmatprep.subr.bf16.mxu0 %v20706_v15 }
 0xce2   : > { %18498 = vmatpush3.bf16.msra.mxu0 %v20706_v15  ;;  %v11018_v15 = vld [vmem:[#allocation2 + $0xd1] sm:$0xff] }
 0xce3   : > { %18531 = vmatprep.subr.bf16.mxu0 %v20707_v44  ;;  %v25222_v38 = vpack.c.bf16 %v11018_v15, %v11017_v16  ;;  %v20716_v15 = vld [vmem:[%s26056_s7 + $0x108] sm:$0xff]  }
 0xce5   : > { %18468 = vmatmul.mubr.bf16.gmra.mrb[48].mxu0 %v25172_v32 }
 0xce6   : > { %18471 = vmatprep.mubr.bf16.mxu0 %v25174_v61 }
 0xced   : > { %18472 = vmatmul.mubr.bf16.gmra.mrb[52].mxu0 %v25178_v9 }
 0xcee   : > { %18475 = vmatprep.mubr.bf16.mxu0 %v25180_v13 }
 0xcf5   : > { %18476 = vmatmul.mubr.bf16.gmra.mrb[56].mxu0 %v25184_v33 }
 0xcf6   : > { %18479 = vmatprep.mubr.bf16.mxu0 %v25186_v12 }
 0xcfd   : > { %18480 = vmatmul.mubr.bf16.gmra.mrb[60].mxu0 %v25190_v24 }
 0xcfe   : > { %18499 = vmatprep.mubr.bf16.mxu0 %v11037_v25  ;;  %v25243_v25 = vpack.c.bf16 %v11026_v31, %v11025_v54  ;;  %v11617_v54 = vld [vmem:[#allocation2 + $0x28] sm:$0xff] }
 0xd05   : > { %18500 = vmatmul.mubr.bf16.vlgmr.msra.gmra.mrb[32].mxu0 %v25193_v63 }
 0xd06   : > { %18532 = vmatpush3.bf16.msra.mxu0 %v20707_v44  ;;  %18503 = vmatprep.mubr.bf16.mxu0 %v25198_v6  ;;  %v25217_v44 = vpack.c.bf16 %v11016_v46, %v11015_v41  ;;  %v11035_v41 = vld [vmem:[#allocation2 + $0x1e9] sm:$0xff]  ;;  %v11036_v46 = vld [vmem:[#allocation2 + $0x1f1] sm:$0xff] }
 0xd07   : > { %18533 = vmatprep.subr.bf16.mxu0 %v20708_v21  ;;  %v25259_v16 = vpack.c.bf16 %v11036_v46, %v11035_v41  ;;  %v11624_v41 = vld [vmem:[#allocation2 + $0x90] sm:$0xff]  ;;  %v25316_v46 = vld [vmem:[#allocation2 + $0xa8] sm:$0xff] }
 0xd0a   : > { %18534 = vmatpush3.bf16.msra.mxu0 %v20708_v21  ;;  %v25247_v21 = vpack.c.bf16 %v11028_v40, %v11027_v39  ;;  %v11620_v39 = vld [vmem:[#allocation2 + $0x50] sm:$0xff] }
 0xd0b   : > { %18535 = vmatprep.subr.bf16.mxu0 %v20709_v2  ;;  %v11622_v40 = vld [vmem:[#allocation2 + $0x70] sm:$0xff] }
 0xd0d   : > { %18504 = vmatmul.mubr.bf16.gmra.mrb[36].mxu0 %v25205_v18 }
 0xd0e   : > { %18507 = vmatprep.mubr.bf16.mxu0 %v25210_v62  ;;  %18536 = vmatpush3.bf16.msra.mxu0 %v20709_v2  ;;  %v25249_v2 = vpack.c.bf16 %v11030_v52, %v11029_v35  ;;  %v11619_v35 = vld [vmem:[#allocation2 + $0x48] sm:$0xff] }
 0xd0f   : > { %18537 = vmatprep.subr.bf16.mxu0 %v20710_v22  ;;  %v25304_v52 = vpack.c.bf16 %v11620_v39, %v11619_v35  ;;  %v20752_v39 = vld [vmem:[%s26056_s7 + $0x228] sm:$0xff]   ;;  %v20753_v35 = vld [vmem:[%s26056_s7 + $0x230] sm:$0xff]  }
 0xd12   : > { %18538 = vmatpush3.bf16.msra.mxu0 %v20710_v22  ;;  %v25253_v22 = vpack.c.bf16 %v11032_v60, %v11031_v53  ;;  %v11621_v53 = vld [vmem:[#allocation2 + $0x68] sm:$0xff] }
 0xd13   : > { %18539 = vmatprep.subr.bf16.mxu0 %v20711_v7  ;;  %v20724_v60 = vld [vmem:[%s26056_s7 + $0x148] sm:$0xff]  }
 0xd15   : > { %18508 = vmatmul.mubr.bf16.gmra.mrb[40].mxu0 %v25217_v44 }
 0xd16   : > { %18511 = vmatprep.mubr.bf16.mxu0 %v25222_v38  ;;  %18540 = vmatpush3.bf16.msra.mxu0 %v20711_v7  ;;  %v25255_v7 = vpack.c.bf16 %v11034_v34, %v11033_v57  ;;  %v25309_v57 = vpack.c.bf16 %v11622_v40, %v11621_v53  ;;  %v20725_v34 = vld [vmem:[%s26056_s7 + $0x150] sm:$0xff]  }
 0xd17   : > { %18541 = vmatprep.subr.bf16.mxu0 %v20712_v56  ;;  %v12552_v53 = vld [vmem:[#allocation2 + $0x150] sm:$0xff] }
 0xd1a   : > { %18542 = vmatpush3.bf16.msra.mxu0 %v20712_v56  ;;  %v20717_v56 = vld [vmem:[%s26056_s7 + $0x110] sm:$0xff]  }
 0xd1b   : > { %18543 = vmatprep.subr.bf16.mxu0 %v20713_v3 }
 0xd1d   : > { %18512 = vmatmul.mubr.bf16.gmra.mrb[44].mxu0 %v25229_v23 }
 0xd1e   : > { %18515 = vmatprep.mubr.bf16.mxu0 %v25234_v19  ;;  %18544 = vmatpush3.bf16.msra.mxu0 %v20713_v3  ;;  %v20719_v3 = vld [vmem:[%s26056_s7 + $0x120] sm:$0xff]  }
 0xd1f   : > { %18545 = vmatprep.subr.bf16.mxu0 %v20714_v17 }
 0xd22   : > { %18546 = vmatpush3.bf16.msra.mxu0 %v20714_v17  ;;  %v11342_v17 = vld [vmem:[#allocation2 + $0x20f] sm:$0xff] }
 0xd23   : > { %18579 = vmatprep.subr.bf16.mxu0 %v20715_v4  ;;  %v25301_v26 = vpack.c.bf16 %v11342_v17, %v11341_v0  ;;  %v20728_v17 = vld [vmem:[%s26056_s7 + $0x168] sm:$0xff]  }
 0xd25   : > { %18516 = vmatmul.mubr.bf16.gmra.mrb[48].mxu0 %v25241_v28 }
 0xd26   : > { %18519 = vmatprep.mubr.bf16.mxu0 %v25243_v25 }
 0xd2d   : > { %18520 = vmatmul.mubr.bf16.gmra.mrb[52].mxu0 %v25247_v21 }
 0xd2e   : > { %18523 = vmatprep.mubr.bf16.mxu0 %v25249_v2 }
 0xd35   : > { %18524 = vmatmul.mubr.bf16.gmra.mrb[56].mxu0 %v25253_v22 }
 0xd36   : > { %18527 = vmatprep.mubr.bf16.mxu0 %v25255_v7 }
 0xd3d   : > { %18528 = vmatmul.mubr.bf16.gmra.mrb[60].mxu0 %v25259_v16 }
 0xd3e   : > { %18547 = vmatprep.mubr.bf16.mxu0 %v25123_v47  ;;  %v20718_v47 = vld [vmem:[%s26056_s7 + $0x118] sm:$0xff]  }
 0xd45   : > { %18548 = vmatmul.mubr.bf16.vlgmr.msra.gmra.mrb[32].mxu0 %v25128_v59 }
 0xd46   : > { %18580 = vmatpush3.bf16.msra.mxu0 %v20715_v4  ;;  %18551 = vmatprep.mubr.bf16.mxu0 %v25136_v50  ;;  %v11618_v4 = vld [vmem:[#allocation2 + $0x30] sm:$0xff] }
 0xd47   : > { %18581 = vmatprep.subr.bf16.mxu0 %v20716_v15  ;;  %v11649_v31 = vpack.c.bf16 %v11618_v4, %v11617_v54  ;;  %v25339_v4 = vld [vmem:[#allocation2 + $0x108] sm:$0xff]  ;;  %v20730_v54 = vld [vmem:[%s26056_s7 + $0x178] sm:$0xff]  }
 0xd48   : > { %v11656_v0 = vpack.c.bf16 %v25068_v49, %v25339_v4  ;;  %v20732_v49 = vld [vmem:[%s26056_s7 + $0x188] sm:$0xff]  }
 0xd4a   : > { %18582 = vmatpush3.bf16.msra.mxu0 %v20716_v15  ;;  %v11623_v15 = vld [vmem:[#allocation2 + $0x88] sm:$0xff] }
 0xd4b   : > { %18583 = vmatprep.subr.bf16.mxu0 %v20717_v56 }
 0xd4d   : > { %18552 = vmatmul.mubr.bf16.gmra.mrb[36].mxu0 %v25141_v58 }
 0xd4e   : > { %18555 = vmatprep.mubr.bf16.mxu0 %v25148_v48  ;;  %18584 = vmatpush3.bf16.msra.mxu0 %v20717_v56  ;;  %v25318_v56 = vpack.c.bf16 %v11624_v41, %v11623_v15  ;;  %v20754_v41 = vld [vmem:[%s26056_s7 + $0x238] sm:$0xff]   ;;  %v12554_v15 = vld [vmem:[#allocation2 + $0x170] sm:$0xff] }
 0xd4f   : > { %18585 = vmatprep.subr.bf16.mxu0 %v20718_v47 }
 0xd52   : > { %18586 = vmatpush3.bf16.msra.mxu0 %v20718_v47  ;;  %v20726_v47 = vld [vmem:[%s26056_s7 + $0x158] sm:$0xff]  }
 0xd53   : > { %18587 = vmatprep.subr.bf16.mxu0 %v20719_v3 }
 0xd55   : > { %18556 = vmatmul.mubr.bf16.gmra.mrb[40].mxu0 %v25153_v55 }
 0xd56   : > { %18559 = vmatprep.mubr.bf16.mxu0 %v25160_v45  ;;  %18588 = vmatpush3.bf16.msra.mxu0 %v20719_v3  ;;  %v11653_v3 = vpack.c.bf16 %v25054_v37, %v25316_v46  ;;  %v20729_v37 = vld [vmem:[%s26056_s7 + $0x170] sm:$0xff]  }
 0xd57   : > { %18589 = vmatprep.subr.bf16.mxu0 %v20720_v36 }
 0xd5a   : > { %18590 = vmatpush3.bf16.msra.mxu0 %v20720_v36  ;;  %v20727_v36 = vld [vmem:[%s26056_s7 + $0x160] sm:$0xff]  }
 0xd5b   : > { %18591 = vmatprep.subr.bf16.mxu0 %v20721_v29 }
 0xd5d   : > { %18560 = vmatmul.mubr.bf16.gmra.mrb[44].mxu0 %v25165_v27 }
 0xd5e   : > { %18563 = vmatprep.mubr.bf16.mxu0 %v25172_v32  ;;  %18592 = vmatpush3.bf16.msra.mxu0 %v20721_v29  ;;  %v11628_v29 = vld [vmem:[#allocation2 + $0xd0] sm:$0xff] }
 0xd5f   : > { %18593 = vmatprep.subr.bf16.mxu0 %v20722_v42 }
 0xd62   : > { %18594 = vmatpush3.bf16.msra.mxu0 %v20722_v42  ;;  %v11627_v42 = vld [vmem:[#allocation2 + $0xc8] sm:$0xff] }
 0xd63   : > { %18627 = vmatprep.subr.bf16.mxu0 %v20723_v8 }
 0xd65   : > { %18564 = vmatmul.mubr.bf16.gmra.mrb[48].mxu0 %v25174_v61 }
 0xd66   : > { %18567 = vmatprep.mubr.bf16.mxu0 %v25178_v9 }
 0xd6d   : > { %18568 = vmatmul.mubr.bf16.gmra.mrb[52].mxu0 %v25180_v13 }
 0xd6e   : > { %18571 = vmatprep.mubr.bf16.mxu0 %v25184_v33 }
 0xd75   : > { %18572 = vmatmul.mubr.bf16.gmra.mrb[56].mxu0 %v25186_v12 }
 0xd76   : > { %18575 = vmatprep.mubr.bf16.mxu0 %v25190_v24 }
 0xd7d   : > { %18576 = vmatmul.mubr.bf16.gmra.mrb[60].mxu0 %v25301_v26 }
 0xd7e   : > { %18595 = vmatprep.mubr.bf16.mxu0 %v11649_v31 }
 0xd85   : > { %18596 = vmatmul.mubr.bf16.vlgmr.msra.gmra.mrb[32].mxu0 %v25304_v52 }
 0xd86   : > { %18628 = vmatpush3.bf16.msra.mxu0 %v20723_v8  ;;  %18599 = vmatprep.mubr.bf16.mxu0 %v25309_v57  ;;  %v25329_v8 = vpack.c.bf16 %v11628_v29, %v11627_v42  ;;  %v12558_v42 = vld [vmem:[#allocation2 + $0x1b0] sm:$0xff] }
 0xd87   : > { %18629 = vmatprep.subr.bf16.mxu0 %v20724_v60 }
 0xd8a   : > { %18630 = vmatpush3.bf16.msra.mxu0 %v20724_v60  ;;  %v12549_v60 = vld [vmem:[#allocation2 + $0x128] sm:$0xff] }
 0xd8b   : > { %18631 = vmatprep.subr.bf16.mxu0 %v20725_v34 }
 0xd8d   : > { %18600 = vmatmul.mubr.bf16.gmra.mrb[36].mxu0 %v25318_v56 }
 0xd8e   : > { %18603 = vmatprep.mubr.bf16.mxu0 %v11653_v3  ;;  %18632 = vmatpush3.bf16.msra.mxu0 %v20725_v34  ;;  %v12551_v34 = vld [vmem:[#allocation2 + $0x148] sm:$0xff] }
 0xd8f   : > { %18633 = vmatprep.subr.bf16.mxu0 %v20726_v47 }
 0xd92   : > { %18634 = vmatpush3.bf16.msra.mxu0 %v20726_v47  ;;  %v12553_v47 = vld [vmem:[#allocation2 + $0x168] sm:$0xff] }
 0xd93   : > { %18635 = vmatprep.subr.bf16.mxu0 %v20727_v36  ;;  %v12576_v3 = vpack.c.bf16 %v12554_v15, %v12553_v47  ;;  %v20761_v15 = vld [vmem:[%s26058_s9 + $0x70] sm:$0xff]   ;;  %v25500_v47 = vld [vmem:[%s26057_s8] ss:$0 sm:$0xff] }
 0xd95   : > { %18604 = vmatmul.mubr.bf16.gmra.mrb[40].mxu0 %v25329_v8 }
 0xd96   : > { %18607 = vmatprep.mubr.bf16.mxu0 %v25072_v51  ;;  %18636 = vmatpush3.bf16.msra.mxu0 %v20727_v36  ;;  %v20731_v51 = vld [vmem:[%s26056_s7 + $0x180] sm:$0xff]   ;;  %v12555_v36 = vld [vmem:[#allocation2 + $0x188] sm:$0xff] }
 0xd97   : > { %18637 = vmatprep.subr.bf16.mxu0 %v20728_v17 }
 0xd9a   : > { %18638 = vmatpush3.bf16.msra.mxu0 %v20728_v17  ;;  %v12557_v17 = vld [vmem:[#allocation2 + $0x1a8] sm:$0xff] }
 0xd9b   : > { %18639 = vmatprep.subr.bf16.mxu0 %v20729_v37 }
 0xd9d   : > { %18608 = vmatmul.mubr.bf16.gmra.mrb[44].mxu0 %v11656_v0 }
 0xd9e   : > { %18611 = vmatprep.mubr.bf16.mxu0 %v25089_v30  ;;  %18640 = vmatpush3.bf16.msra.mxu0 %v20729_v37  ;;  %v20734_v30 = vld [vmem:[%s26056_s7 + $0x198] sm:$0xff]   ;;  %v12578_v37 = vpack.c.bf16 %v12558_v42, %v12557_v17 }
 0xd9f   : > { %18641 = vmatprep.subr.bf16.mxu0 %v20730_v54 }
 0xda2   : > { %18642 = vmatpush3.bf16.msra.mxu0 %v20730_v54  ;;  %v12562_v54 = vld [vmem:[#allocation2 + $0x1f0] sm:$0xff] }
 0xda3   : > { %18675 = vmatprep.subr.bf16.mxu0 %v20731_v51 }
 0xda5   : > { %18612 = vmatmul.mubr.bf16.gmra.mrb[48].mxu0 %v25087_v10  ;;  %v20733_v10 = vld [vmem:[%s26056_s7 + $0x190] sm:$0xff]  }
 0xda6   : > { %18615 = vmatprep.mubr.bf16.mxu0 %v25100_v20  ;;  %v20736_v20 = vld [vmem:[%s26056_s7 + $0x1a8] sm:$0xff]  }
 0xdad   : > { %18616 = vmatmul.mubr.bf16.gmra.mrb[52].mxu0 %v25098_v5  ;;  %v20735_v5 = vld [vmem:[%s26056_s7 + $0x1a0] sm:$0xff]  }
 0xdae   : > { %18619 = vmatprep.mubr.bf16.mxu0 %v25110_v11  ;;  %v20738_v11 = vld [vmem:[%s26056_s7 + $0x1b8] sm:$0xff]  }
 0xdb5   : > { %18620 = vmatmul.mubr.bf16.gmra.mrb[56].mxu0 %v25108_v14  ;;  %v20737_v14 = vld [vmem:[%s26056_s7 + $0x1b0] sm:$0xff]  }
 0xdb6   : > { %18623 = vmatprep.mubr.bf16.mxu0 %v25120_v1  ;;  %v20912_v1 = vld [vmem:[#allocation2 + $0x8] sm:$0xff] }
 0xdbd   : > { %18624 = vmatmul.mubr.bf16.gmra.mrb[60].mxu0 %v25118_v43  ;;  %v20739_v43 = vld [vmem:[%s26056_s7 + $0x1c0] sm:$0xff]  }
 0xdbe   : > { %18643 = vmatprep.mubr.bf16.mxu0 %v25193_v63  ;;  %v25396_v63 = vpack.c.bf16 %v20912_v1, %v20912_v1  ;;  %v12844_v1 = vld [vmem:[#allocation2 + $0x71] sm:$0xff] }
 0xdc0   : > { %18835 = vmatprep.mubr.bf16.mxu1 %v25396_v63 }
 0xdc5   : > { %18644 = vmatmul.mubr.bf16.vlgmr.msra.gmra.mrb[32].mxu0 %v25198_v6  ;;  %v11953_v6 = vld [vmem:[#allocation2 + $0x209] sm:$0xff] }
 0xdc6   : > { %18676 = vmatpush3.bf16.msra.mxu0 %v20731_v51  ;;  %18647 = vmatprep.mubr.bf16.mxu0 %v25205_v18  ;;  %v11954_v18 = vld [vmem:[#allocation2 + $0x211] sm:$0xff] }
 0xdc7   : > { %18677 = vmatprep.subr.bf16.mxu0 %v20732_v49  ;;  %v12564_v51 = vld [vmem:[#allocation2 + $0x210] sm:$0xff] }
 0xdca   : > { %18678 = vmatpush3.bf16.msra.mxu0 %v20732_v49  ;;  %v12561_v49 = vld [vmem:[#allocation2 + $0x1e8] sm:$0xff] }
 0xdcb   : > { %18679 = vmatprep.subr.bf16.mxu0 %v20733_v10 }
 0xdcd   : > { %18648 = vmatmul.mubr.bf16.gmra.mrb[36].mxu0 %v25210_v62  ;;  %v25399_v62 = vpack.c.bf16 %v11954_v18, %v11953_v6  ;;  %v12845_v6 = vld [vmem:[#allocation2 + $0x89] sm:$0xff]  ;;  %v12846_v18 = vld [vmem:[#allocation2 + $0x91] sm:$0xff] }
 0xdce   : > { %18651 = vmatprep.mubr.bf16.mxu0 %v25217_v44  ;;  %18680 = vmatpush3.bf16.msra.mxu0 %v20733_v10  ;;  %v20740_v44 = vld [vmem:[%s26056_s7 + $0x1c8] sm:$0xff]   ;;  %v12580_v10 = vpack.c.bf16 %v12562_v54, %v12561_v49 }
 0xdcf   : > { %18681 = vmatprep.subr.bf16.mxu0 %v20734_v30 }
 0xdd2   : > { %18682 = vmatpush3.bf16.msra.mxu0 %v20734_v30  ;;  %v12563_v30 = vld [vmem:[#allocation2 + $0x208] sm:$0xff] }
 0xdd3   : > { %18683 = vmatprep.subr.bf16.mxu0 %v20735_v5 }
 0xdd5   : > { %18652 = vmatmul.mubr.bf16.gmra.mrb[40].mxu0 %v25222_v38  ;;  %v20741_v38 = vld [vmem:[%s26056_s7 + $0x1d0] sm:$0xff]  }
 0xdd6   : > { %18655 = vmatprep.mubr.bf16.mxu0 %v25229_v23  ;;  %18684 = vmatpush3.bf16.msra.mxu0 %v20735_v5  ;;  %v20755_v23 = vld [vmem:[%s26058_s9 + $0x40] sm:$0xff]   ;;  %v12581_v5 = vpack.c.bf16 %v12564_v51, %v12563_v30 }
 0xdd7   : > { %18685 = vmatprep.subr.bf16.mxu0 %v20736_v20  ;;  %18819 = vmatprep.subr.bf16.mxu1 %v20755_v23 }
 0xdd8   : > { %18820 = vmatpush3.bf16.msra.mxu1 %v20755_v23 }
 0xdda   : > { %18686 = vmatpush3.bf16.msra.mxu0 %v20736_v20  ;;  %v12841_v20 = vld [vmem:[#allocation2 + $0x49] sm:$0xff] }
 0xddb   : > { %18687 = vmatprep.subr.bf16.mxu0 %v20737_v14 }
 0xddd   : > { %18656 = vmatmul.mubr.bf16.gmra.mrb[44].mxu0 %v25234_v19  ;;  %v12542_v19 = vld [vmem:[#allocation2 + $0xb0] sm:$0xff] }
 0xdde   : > { %18659 = vmatprep.mubr.bf16.mxu0 %v25241_v28  ;;  %18688 = vmatpush3.bf16.msra.mxu0 %v20737_v14  ;;  %v20759_v28 = vld [vmem:[%s26058_s9 + $0x60] sm:$0xff]   ;;  %v12842_v14 = vld [vmem:[#allocation2 + $0x51] sm:$0xff] }
 0xddf   : > { %18689 = vmatprep.subr.bf16.mxu0 %v20738_v11 }
 0xde2   : > { %18690 = vmatpush3.bf16.msra.mxu0 %v20738_v11  ;;  %v12873_v11 = vpack.c.bf16 %v12842_v14, %v12841_v20  ;;  %v20764_v20 = vld [vmem:[%s26058_s9 + $0x8] sm:$0xff]  }
 0xde3   : > { %18723 = vmatprep.subr.bf16.mxu0 %v20739_v43 }
 0xde5   : > { %18660 = vmatmul.mubr.bf16.gmra.mrb[48].mxu0 %v25243_v25  ;;  %v12570_v25 = vpack.c.bf16 %v12542_v19, %v25316_v46  ;;  %v12575_v46 = vpack.c.bf16 %v12552_v53, %v12551_v34  ;;  %v12867_v53 = vld [vmem:[#allocation2 + $0x1e9] sm:$0xff] }
 0xde6   : > { %18663 = vmatprep.mubr.bf16.mxu0 %v25247_v21  ;;  %v20750_v21 = vld [vmem:[%s26056_s7 + $0x218] sm:$0xff]   ;;  %v12871_v34 = vld [vmem:[#allocation2 + $0x229] sm:$0xff] }
 0xded   : > { %18664 = vmatmul.mubr.bf16.gmra.mrb[52].mxu0 %v25249_v2  ;;  %v20760_v2 = vld [vmem:[%s26058_s9 + $0x68] sm:$0xff]  }
 0xdee   : > { %18667 = vmatprep.mubr.bf16.mxu0 %v25253_v22  ;;  %v20751_v22 = vld [vmem:[%s26056_s7 + $0x220] sm:$0xff]  }
 0xdf5   : > { %18668 = vmatmul.mubr.bf16.gmra.mrb[56].mxu0 %v25255_v7  ;;  %v12546_v7 = vld [vmem:[#allocation2 + $0xf0] sm:$0xff] }
 0xdf6   : > { %18671 = vmatprep.mubr.bf16.mxu0 %v25259_v16  ;;  %v12548_v16 = vld [vmem:[#allocation2 + $0x110] sm:$0xff] }
 0xdf7   : > { %v12573_v40 = vpack.c.bf16 %v12548_v16, %v25339_v4  ;;  %v12559_v4 = vld [vmem:[#allocation2 + $0x1c8] sm:$0xff] }
 0xdfd   : > { %18672 = vmatmul.mubr.bf16.gmra.mrb[60].mxu0 %v25399_v62 }
 0xdfe   : > { %18691 = vmatprep.mubr.bf16.mxu0 %v25128_v59  ;;  %v20742_v59 = vld [vmem:[%s26056_s7 + $0x1d8] sm:$0xff]  }
 0xe05   : > { %18692 = vmatmul.mubr.bf16.vlgmr.msra.gmra.mrb[32].mxu0 %v25136_v50  ;;  %v20743_v50 = vld [vmem:[%s26056_s7 + $0x1e0] sm:$0xff]  }
 0xe06   : > { %18724 = vmatpush3.bf16.msra.mxu0 %v20739_v43  ;;  %18695 = vmatprep.mubr.bf16.mxu0 %v25141_v58  ;;  %v20744_v58 = vld [vmem:[%s26056_s7 + $0x1e8] sm:$0xff]  }
 0xe07   : > { %18725 = vmatprep.subr.bf16.mxu0 %v20740_v44  ;;  %v12843_v43 = vld [vmem:[#allocation2 + $0x69] sm:$0xff] }
 0xe0a   : > { %18726 = vmatpush3.bf16.msra.mxu0 %v20740_v44  ;;  %v12874_v44 = vpack.c.bf16 %v12844_v1, %v12843_v43 }
 0xe0b   : > { %18727 = vmatprep.subr.bf16.mxu0 %v20741_v38 }
 0xe0d   : > { %18696 = vmatmul.mubr.bf16.gmra.mrb[36].mxu0 %v25148_v48  ;;  %v20745_v48 = vld [vmem:[%s26056_s7 + $0x1f0] sm:$0xff]  }
 0xe0e   : > { %18699 = vmatprep.mubr.bf16.mxu0 %v25153_v55  ;;  %18728 = vmatpush3.bf16.msra.mxu0 %v20741_v38  ;;  %v20746_v55 = vld [vmem:[%s26056_s7 + $0x1f8] sm:$0xff]   ;;  %v12875_v38 = vpack.c.bf16 %v12846_v18, %v12845_v6 }
 0xe0f   : > { %18729 = vmatprep.subr.bf16.mxu0 %v20742_v59 }
 0xe12   : > { %18730 = vmatpush3.bf16.msra.mxu0 %v20742_v59  ;;  %v12847_v59 = vld [vmem:[#allocation2 + $0xa9] sm:$0xff] }
 0xe13   : > { %18731 = vmatprep.subr.bf16.mxu0 %v20743_v50 }
 0xe15   : > { %18700 = vmatmul.mubr.bf16.gmra.mrb[40].mxu0 %v25160_v45  ;;  %v20747_v45 = vld [vmem:[%s26056_s7 + $0x200] sm:$0xff]  }
 0xe16   : > { %18703 = vmatprep.mubr.bf16.mxu0 %v25165_v27  ;;  %18732 = vmatpush3.bf16.msra.mxu0 %v20743_v50  ;;  %v12259_v27 = vld [vmem:[#allocation2 + $0x227] sm:$0xff]  ;;  %v12848_v50 = vld [vmem:[#allocation2 + $0xb1] sm:$0xff] }
 0xe17   : > { %18733 = vmatprep.subr.bf16.mxu0 %v20744_v58 }
 0xe1a   : > { %18734 = vmatpush3.bf16.msra.mxu0 %v20744_v58  ;;  %v12849_v58 = vld [vmem:[#allocation2 + $0xc9] sm:$0xff] }
 0xe1b   : > { %18735 = vmatprep.subr.bf16.mxu0 %v20745_v48 }
 0xe1d   : > { %18704 = vmatmul.mubr.bf16.gmra.mrb[44].mxu0 %v25172_v32  ;;  %v12260_v32 = vld [vmem:[#allocation2 + $0x22f] sm:$0xff] }
 0xe1e   : > { %18707 = vmatprep.mubr.bf16.mxu0 %v25174_v61  ;;  %18736 = vmatpush3.bf16.msra.mxu0 %v20745_v48  ;;  %v12276_v61 = vpack.c.bf16 %v12260_v32, %v12259_v27  ;;  %v12850_v48 = vld [vmem:[#allocation2 + $0xd1] sm:$0xff]  ;;  %v12851_v27 = vld [vmem:[#allocation2 + $0xe9] sm:$0xff] }
 0xe1f   : > { %18737 = vmatprep.subr.bf16.mxu0 %v20746_v55  ;;  %v12852_v32 = vld [vmem:[#allocation2 + $0xf1] sm:$0xff] }
 0xe20   : > { %v12878_v23 = vpack.c.bf16 %v12852_v32, %v12851_v27  ;;  %v20766_v32 = vld [vmem:[%s26058_s9 + $0x18] sm:$0xff]  }
 0xe22   : > { %18738 = vmatpush3.bf16.msra.mxu0 %v20746_v55  ;;  %v12876_v55 = vpack.c.bf16 %v12848_v50, %v12847_v59  ;;  %v20765_v50 = vld [vmem:[%s26058_s9 + $0x10] sm:$0xff]  }
 0xe23   : > { %18771 = vmatprep.subr.bf16.mxu0 %v20747_v45 }
 0xe25   : > { %18708 = vmatmul.mubr.bf16.gmra.mrb[48].mxu0 %v25178_v9  ;;  %v20756_v9 = vld [vmem:[%s26058_s9 + $0x48] sm:$0xff]  }
 0xe26   : > { %18711 = vmatprep.mubr.bf16.mxu0 %v25180_v13  ;;  %18821 = vmatprep.subr.bf16.mxu1 %v20756_v9  ;;  %v20757_v13 = vld [vmem:[%s26058_s9 + $0x50] sm:$0xff]  }
 0xe27   : > { %18822 = vmatpush3.bf16.msra.mxu1 %v20756_v9 }
 0xe28   : > { %18823 = vmatprep.subr.bf16.mxu1 %v20757_v13 }
 0xe2b   : > { %18824 = vmatpush3.bf16.msra.mxu1 %v20757_v13  ;;  %v12855_v13 = vld [vmem:[#allocation2 + $0x129] sm:$0xff] }
 0xe2d   : > { %18712 = vmatmul.mubr.bf16.gmra.mrb[52].mxu0 %v25184_v33  ;;  %v20748_v33 = vld [vmem:[%s26056_s7 + $0x208] sm:$0xff]  }
 0xe2e   : > { %18715 = vmatprep.mubr.bf16.mxu0 %v25186_v12  ;;  %v20758_v12 = vld [vmem:[%s26058_s9 + $0x58] sm:$0xff]  }
 0xe2f   : > { %18825 = vmatprep.subr.bf16.mxu1 %v20758_v12 }
 0xe30   : > { %18826 = vmatpush3.bf16.msra.mxu1 %v20758_v12  ;;  %v12857_v12 = vld [vmem:[#allocation2 + $0x149] sm:$0xff] }
 0xe31   : > { %18827 = vmatprep.subr.bf16.mxu1 %v20759_v28 }
 0xe34   : > { %18828 = vmatpush3.bf16.msra.mxu1 %v20759_v28 }
 0xe35   : > { %18716 = vmatmul.mubr.bf16.gmra.mrb[56].mxu0 %v25190_v24  ;;  %v20749_v24 = vld [vmem:[%s26056_s7 + $0x210] sm:$0xff]   ;;  %18829 = vmatprep.subr.bf16.mxu1 %v20760_v2 }
 0xe36   : > { %18719 = vmatprep.mubr.bf16.mxu0 %v25301_v26  ;;  %v12545_v26 = vld [vmem:[#allocation2 + $0xe8] sm:$0xff] }
 0xe37   : > { %v12572_v31 = vpack.c.bf16 %v12546_v7, %v12545_v26  ;;  %v12863_v26 = vld [vmem:[#allocation2 + $0x1a9] sm:$0xff] }
 0xe38   : > { %18830 = vmatpush3.bf16.msra.mxu1 %v20760_v2  ;;  %v12861_v2 = vld [vmem:[#allocation2 + $0x189] sm:$0xff] }
 0xe39   : > { %18831 = vmatprep.subr.bf16.mxu1 %v20761_v15 }
 0xe3c   : > { %18832 = vmatpush3.bf16.msra.mxu1 %v20761_v15 }
 0xe3d   : > { %18720 = vmatmul.mubr.bf16.gmra.mrb[60].mxu0 %v12276_v61  ;;  %v12854_v61 = vld [vmem:[#allocation2 + $0x111] sm:$0xff] }
 0xe3e   : > { %18739 = vmatprep.mubr.bf16.mxu0 %v25304_v52  ;;  %v12550_v52 = vld [vmem:[#allocation2 + $0x130] sm:$0xff] }
 0xe45   : > { %18740 = vmatmul.mubr.bf16.vlgmr.msra.gmra.mrb[32].mxu0 %v25309_v57  ;;  %v12574_v57 = vpack.c.bf16 %v12550_v52, %v12549_v60  ;;  %v12868_v60 = vld [vmem:[#allocation2 + $0x1f1] sm:$0xff] }
 0xe46   : > { %18772 = vmatpush3.bf16.msra.mxu0 %v20747_v45  ;;  %18743 = vmatprep.mubr.bf16.mxu0 %v25318_v56  ;;  %v12556_v56 = vld [vmem:[#allocation2 + $0x190] sm:$0xff]  ;;  %v12877_v45 = vpack.c.bf16 %v12850_v48, %v12849_v58 }
 0xe47   : > { %18773 = vmatprep.subr.bf16.mxu0 %v20748_v33  ;;  %v12577_v29 = vpack.c.bf16 %v12556_v56, %v12555_v36  ;;  %v20762_v56 = vld [vmem:[%s26058_s9 + $0x78] sm:$0xff]  }
 0xe48   : > { %18833 = vmatprep.subr.bf16.mxu1 %v20762_v56 }
 0xe49   : > { %18834 = vmatpush3.bf16.msra.mxu1 %v20762_v56 }
 0xe4a   : > { %18774 = vmatpush3.bf16.msra.mxu0 %v20748_v33  ;;  %v12856_v33 = vld [vmem:[#allocation2 + $0x131] sm:$0xff] }
 0xe4b   : > { %18775 = vmatprep.subr.bf16.mxu0 %v20749_v24  ;;  %v12880_v19 = vpack.c.bf16 %v12856_v33, %v12855_v13 }
 0xe4d   : > { %18744 = vmatmul.mubr.bf16.gmra.mrb[36].mxu0 %v12570_v25  ;;  %v12859_v25 = vld [vmem:[#allocation2 + $0x169] sm:$0xff] }
 0xe4e   : > { %18747 = vmatprep.mubr.bf16.mxu0 %v25329_v8  ;;  %18776 = vmatpush3.bf16.msra.mxu0 %v20749_v24  ;;  %v12560_v8 = vld [vmem:[#allocation2 + $0x1d0] sm:$0xff] }
 0xe4f   : > { %18777 = vmatprep.subr.bf16.mxu0 %v20750_v21  ;;  %v12579_v0 = vpack.c.bf16 %v12560_v8, %v12559_v4  ;;  %v12858_v24 = vld [vmem:[#allocation2 + $0x151] sm:$0xff] }
 0xe50   : > { %v12881_v28 = vpack.c.bf16 %v12858_v24, %v12857_v12 }
 0xe52   : > { %18778 = vmatpush3.bf16.msra.mxu0 %v20750_v21  ;;  %v12860_v21 = vld [vmem:[#allocation2 + $0x171] sm:$0xff] }
 0xe53   : > { %18779 = vmatprep.subr.bf16.mxu0 %v20751_v22  ;;  %v12882_v7 = vpack.c.bf16 %v12860_v21, %v12859_v25 }
 0xe55   : > { %18748 = vmatmul.mubr.bf16.gmra.mrb[40].mxu0 %v12572_v31  ;;  %v12864_v31 = vld [vmem:[#allocation2 + $0x1b1] sm:$0xff] }
 0xe56   : > { %18751 = vmatprep.mubr.bf16.mxu0 %v12573_v40  ;;  %18780 = vmatpush3.bf16.msra.mxu0 %v20751_v22  ;;  %v12862_v22 = vld [vmem:[#allocation2 + $0x191] sm:$0xff] }
 0xe57   : > { %18781 = vmatprep.subr.bf16.mxu0 %v20752_v39  ;;  %v12883_v16 = vpack.c.bf16 %v12862_v22, %v12861_v2  ;;  %v12866_v40 = vld [vmem:[#allocation2 + $0x1d1] sm:$0xff] }
 0xe5a   : > { %18782 = vmatpush3.bf16.msra.mxu0 %v20752_v39  ;;  %v12865_v39 = vld [vmem:[#allocation2 + $0x1c9] sm:$0xff] }
 0xe5b   : > { %18783 = vmatprep.subr.bf16.mxu0 %v20753_v35  ;;  %v12885_v52 = vpack.c.bf16 %v12866_v40, %v12865_v39 }
 0xe5d   : > { %18752 = vmatmul.mubr.bf16.gmra.mrb[44].mxu0 %v12574_v57  ;;  %v12886_v57 = vpack.c.bf16 %v12868_v60, %v12867_v53 }
 0xe5e   : > { %18755 = vmatprep.mubr.bf16.mxu0 %v12575_v46  ;;  %18784 = vmatpush3.bf16.msra.mxu0 %v20753_v35  ;;  %v12884_v35 = vpack.c.bf16 %v12864_v31, %v12863_v26 }
 0xe5f   : > { %18785 = vmatprep.subr.bf16.mxu0 %v20754_v41 }
 0xe62   : > { %18786 = vmatpush3.bf16.msra.mxu0 %v20754_v41  ;;  %v12872_v41 = vld [vmem:[#allocation2 + $0x231] sm:$0xff] }
 0xe63   : > { %v12888_v46 = vpack.c.bf16 %v12872_v41, %v12871_v34  ;;  %v20769_v34 = vld [vmem:[%s26058_s9 + $0x30] sm:$0xff]  }
 0xe65   : > { %18756 = vmatmul.mubr.bf16.gmra.mrb[48].mxu0 %v12576_v3 }
 0xe66   : > { %18759 = vmatprep.mubr.bf16.mxu0 %v12577_v29 }
 0xe6d   : > { %18760 = vmatmul.mubr.bf16.gmra.mrb[52].mxu0 %v12578_v37 }
 0xe6e   : > { %18763 = vmatprep.mubr.bf16.mxu0 %v12579_v0 }
 0xe75   : > { %18764 = vmatmul.mubr.bf16.gmra.mrb[56].mxu0 %v12580_v10 }
 0xe76   : > { %18767 = vmatprep.mubr.bf16.mxu0 %v12581_v5 }
 0xe7d   : > { %18768 = vmatmul.mubr.bf16.gmra.mrb[60].mxu0 %v25396_v63  ;;  %v12853_v63 = vld [vmem:[#allocation2 + $0x109] sm:$0xff] }
 0xe7e   : > { %18787 = vmatprep.mubr.bf16.mxu0 %v12873_v11  ;;  %v12879_v9 = vpack.c.bf16 %v12854_v61, %v12853_v63 }
 0xe85   : > { %18788 = vmatmul.mubr.bf16.vlgmr.msra.gmra.mrb[32].mxu0 %v12874_v44 }
 0xe86   : > { %18791 = vmatprep.mubr.bf16.mxu0 %v12875_v38 }
 0xe8d   : > { %18792 = vmatmul.mubr.bf16.gmra.mrb[36].mxu0 %v12876_v55 }
 0xe8e   : > { %18795 = vmatprep.mubr.bf16.mxu0 %v12877_v45 }
 0xe95   : > { %18796 = vmatmul.mubr.bf16.gmra.mrb[40].mxu0 %v12878_v23 }
 0xe96   : > { %18799 = vmatprep.mubr.bf16.mxu0 %v12879_v9 }
 0xe9d   : > { %18800 = vmatmul.mubr.bf16.gmra.mrb[44].mxu0 %v12880_v19 }
 0xe9e   : > { %18803 = vmatprep.mubr.bf16.mxu0 %v12881_v28  ;;  %v20767_v28 = vld [vmem:[%s26058_s9 + $0x20] sm:$0xff]  }
 0xea5   : > { %18804 = vmatmul.mubr.bf16.gmra.mrb[48].mxu0 %v12882_v7 }
 0xea6   : > { %18807 = vmatprep.mubr.bf16.mxu0 %v12883_v16  ;;  %v20768_v16 = vld [vmem:[%s26058_s9 + $0x28] sm:$0xff]  }
 0xead   : > { %18808 = vmatmul.mubr.bf16.gmra.mrb[52].mxu0 %v12884_v35 }
 0xeae   : > { %18811 = vmatprep.mubr.bf16.mxu0 %v12885_v52 }
 0xeb5   : > { %18812 = vmatmul.mubr.bf16.gmra.mrb[56].mxu0 %v12886_v57 }
 0xeb6   : > { %18815 = vmatprep.mubr.bf16.mxu0 %v25399_v62  ;;  %v20763_v62 = vld [vmem:[%s26058_s9] sm:$0xff]  }
 0xeb7   : > { %18867 = vmatprep.subr.bf16.mxu1 %v20763_v62 }
 0xebd   : > { %18816 = vmatmul.mubr.bf16.gmra.mrb[60].mxu0 %v12888_v46 }
 0xf58   : > { %v18789_v3 = vpop.f32.mrb[32].mxu0 }
 0xf59   : > { %v13156_v36 = vadd.f32 %v18789_v3, %v25500_v47  ;;  %v12988_v29 = vpop.f32.mrb[33].mxu0  ;;  %v20770_v3 = vld [vmem:[%s26058_s9 + $0x38] sm:$0xff]  }
 0xf5a   : > { %v13154_v42 = vadd.f32 %v25500_v47, %v12988_v29  ;;  %v18790_v8 = vpop.f32.mrb[34].mxu0 }
 0xf5b   : > { %v13188_v17 = vmax.f32 %v13156_v36, 0.0  ;;  %v13157_v37 = vadd.f32 %v18790_v8, %v25500_v47  ;;  %v12991_v4 = vpop.f32.mrb[35].mxu0 }
 0xf5c   : > { %v13186_v0 = vmax.f32 %v13154_v42, 0.0  ;;  %v13155_v54 = vadd.f32 %v25500_v47, %v12991_v4 }
 0xf5d   : > { %13220 = vst [vmem:[#allocation2 + $0x48] sm:$0xff] %v13188_v17  ;;  %v13189_v51 = vmax.f32 %v13157_v37, 0.0 }
 0xf5e   : > { %13218 = vst [vmem:[#allocation2 + $0x28] sm:$0xff] %v13186_v0  ;;  %v13187_v49 = vmax.f32 %v13155_v54, 0.0 }
 0xf5f   : > { %13221 = vst [vmem:[#allocation2 + $0x50] sm:$0xff] %v13189_v51  ;;  %v13348_v10 = vpack.c.bf16 %v13189_v51, %v13188_v17  ;;  %v25557_v51 = vld [vmem:[%s26058_s9 + $0x80] sm:$0xff]  }
 0xf60   : > { %13219 = vst [vmem:[#allocation2 + $0x30] sm:$0xff] %v13187_v49  ;;  %v18793_v30 = vpop.f32.mrb[36].mxu0  ;;  %v13347_v5 = vpack.c.bf16 %v13187_v49, %v13186_v0 }
 0xf61   : > { %v13160_v14 = vadd.f32 %v18793_v30, %v25500_v47  ;;  %v13004_v11 = vpop.f32.mrb[37].mxu0 }
 0xf62   : > { %v13158_v43 = vadd.f32 %v25500_v47, %v13004_v11  ;;  %v18794_v1 = vpop.f32.mrb[38].mxu0  ;;  %18836 = vmatmul.mubr.bf16.vlgmr.msra.gmra.mrb[32].mxu1 %v13347_v5 }
 0xf63   : > { %v13192_v6 = vmax.f32 %v13160_v14, 0.0  ;;  %v13161_v18 = vadd.f32 %v18794_v1, %v25500_v47  ;;  %v13007_v44 = vpop.f32.mrb[39].mxu0  ;;  %18868 = vmatpush3.bf16.msra.mxu1 %v20763_v62  ;;  %18839 = vmatprep.mubr.bf16.mxu1 %v13348_v10 }
 0xf64   : > { %v13190_v38 = vmax.f32 %v13158_v43, 0.0  ;;  %v13159_v59 = vadd.f32 %v25500_v47, %v13007_v44  ;;  %18869 = vmatprep.subr.bf16.mxu1 %v20764_v20 }
 0xf65   : > { %13224 = vst [vmem:[#allocation2 + $0x88] sm:$0xff] %v13192_v6  ;;  %v13193_v58 = vmax.f32 %v13161_v18, 0.0 }
 0xf66   : > { %13222 = vst [vmem:[#allocation2 + $0x68] sm:$0xff] %v13190_v38  ;;  %v13191_v48 = vmax.f32 %v13159_v59, 0.0 }
 0xf67   : > { %13225 = vst [vmem:[#allocation2 + $0x90] sm:$0xff] %v13193_v58  ;;  %18870 = vmatpush3.bf16.msra.mxu1 %v20764_v20  ;;  %v13350_v55 = vpack.c.bf16 %v13193_v58, %v13192_v6 }
 0xf68   : > { %13223 = vst [vmem:[#allocation2 + $0x70] sm:$0xff] %v13191_v48  ;;  %v18797_v45 = vpop.f32.mrb[40].mxu0  ;;  %v13349_v27 = vpack.c.bf16 %v13191_v48, %v13190_v38  ;;  %18871 = vmatprep.subr.bf16.mxu1 %v20765_v50 }
 0xf69   : > { %v13164_v63 = vadd.f32 %v18797_v45, %v25500_v47  ;;  %v13020_v61 = vpop.f32.mrb[41].mxu0 }
 0xf6a   : > { %v13162_v23 = vadd.f32 %v25500_v47, %v13020_v61  ;;  %v18798_v9 = vpop.f32.mrb[42].mxu0  ;;  %18840 = vmatmul.mubr.bf16.gmra.mrb[36].mxu1 %v13349_v27 }
 0xf6b   : > { %v13196_v13 = vmax.f32 %v13164_v63, 0.0  ;;  %v13165_v33 = vadd.f32 %v18798_v9, %v25500_v47  ;;  %v13023_v12 = vpop.f32.mrb[43].mxu0  ;;  %18843 = vmatprep.mubr.bf16.mxu1 %v13350_v55  ;;  %18872 = vmatpush3.bf16.msra.mxu1 %v20765_v50 }
 0xf6c   : > { %v13194_v24 = vmax.f32 %v13162_v23, 0.0  ;;  %v13163_v19 = vadd.f32 %v25500_v47, %v13023_v12  ;;  %18873 = vmatprep.subr.bf16.mxu1 %v20766_v32 }
 0xf6d   : > { %13228 = vst [vmem:[#allocation2 + $0xc8] sm:$0xff] %v13196_v13  ;;  %v13197_v25 = vmax.f32 %v13165_v33, 0.0 }
 0xf6e   : > { %13226 = vst [vmem:[#allocation2 + $0xa8] sm:$0xff] %v13194_v24  ;;  %v25526_v21 = vmax.f32 %v13163_v19, 0.0 }
 0xf6f   : > { %13229 = vst [vmem:[#allocation2 + $0xd0] sm:$0xff] %v13197_v25  ;;  %v13352_v2 = vpack.c.bf16 %v13197_v25, %v13196_v13  ;;  %18874 = vmatpush3.bf16.msra.mxu1 %v20766_v32 }
 0xf70   : > { %13227 = vst [vmem:[#allocation2 + $0xb0] sm:$0xff] %v25526_v21  ;;  %v18801_v22 = vpop.f32.mrb[44].mxu0  ;;  %v13351_v7 = vpack.c.bf16 %v25526_v21, %v13194_v24  ;;  %18875 = vmatprep.subr.bf16.mxu1 %v20767_v28 }
 0xf71   : > { %v13168_v26 = vadd.f32 %v18801_v22, %v25500_v47  ;;  %v13036_v31 = vpop.f32.mrb[45].mxu0 }
 0xf72   : > { %v13166_v39 = vadd.f32 %v25500_v47, %v13036_v31  ;;  %v18802_v40 = vpop.f32.mrb[46].mxu0  ;;  %18844 = vmatmul.mubr.bf16.gmra.mrb[40].mxu1 %v13351_v7 }
 0xf73   : > { %v13200_v35 = vmax.f32 %v13168_v26, 0.0  ;;  %v13169_v52 = vadd.f32 %v18802_v40, %v25500_v47  ;;  %v13039_v53 = vpop.f32.mrb[47].mxu0  ;;  %18847 = vmatprep.mubr.bf16.mxu1 %v13352_v2  ;;  %18876 = vmatpush3.bf16.msra.mxu1 %v20767_v28 }
 0xf74   : > { %v13198_v60 = vmax.f32 %v13166_v39, 0.0  ;;  %v13167_v57 = vadd.f32 %v25500_v47, %v13039_v53  ;;  %18877 = vmatprep.subr.bf16.mxu1 %v20768_v16  ;;  %v13250_v53 = vld [vmem:[#allocation2 + $0x7] sm:$0xff] }
 0xf75   : > { %13232 = vst [vmem:[#allocation2 + $0x108] sm:$0xff] %v13200_v35  ;;  %v25540_v41 = vmax.f32 %v13169_v52, 0.0 }
 0xf76   : > { %13230 = vst [vmem:[#allocation2 + $0xe8] sm:$0xff] %v13198_v60  ;;  %v13199_v46 = vmax.f32 %v13167_v57, 0.0 }
 0xf77   : > { %13233 = vst [vmem:[#allocation2 + $0x110] sm:$0xff] %v25540_v41  ;;  %v13354_v15 = vpack.c.bf16 %v25540_v41, %v13200_v35  ;;  %18878 = vmatpush3.bf16.msra.mxu1 %v20768_v16 }
 0xf78   : > { %13231 = vst [vmem:[#allocation2 + $0xf0] sm:$0xff] %v13199_v46  ;;  %v18805_v56 = vpop.f32.mrb[48].mxu0  ;;  %v25544_v62 = vpack.c.bf16 %v13199_v46, %v13198_v60  ;;  %18879 = vmatprep.subr.bf16.mxu1 %v20769_v34  ;;  %v13251_v60 = vld [vmem:[#allocation2 + $0xf] sm:$0xff] }
 0xf79   : > { %v13172_v36 = vadd.f32 %v18805_v56, %v25500_v47  ;;  %v13052_v29 = vpop.f32.mrb[49].mxu0  ;;  %v13282_v46 = vpack.c.bf16 %v13251_v60, %v13250_v53 }
 0xf7a   : > { %v13170_v42 = vadd.f32 %v25500_v47, %v13052_v29  ;;  %v18806_v8 = vpop.f32.mrb[50].mxu0  ;;  %18848 = vmatmul.mubr.bf16.gmra.mrb[44].mxu1 %v25544_v62  ;;  %v13252_v29 = vld [vmem:[#allocation2 + $0x27] sm:$0xff] }
 0xf7b   : > { %v13204_v17 = vmax.f32 %v13172_v36, 0.0  ;;  %v13173_v37 = vadd.f32 %v18806_v8, %v25500_v47  ;;  %v13055_v4 = vpop.f32.mrb[51].mxu0  ;;  %18851 = vmatprep.mubr.bf16.mxu1 %v13354_v15  ;;  %18880 = vmatpush3.bf16.msra.mxu1 %v20769_v34  ;;  %v13255_v36 = vld [vmem:[#allocation2 + $0x4f] sm:$0xff] }
 0xf7c   : > { %v13202_v0 = vmax.f32 %v13170_v42, 0.0  ;;  %v13171_v54 = vadd.f32 %v25500_v47, %v13055_v4  ;;  %18881 = vmatprep.subr.bf16.mxu1 %v20770_v3  ;;  %v13254_v42 = vld [vmem:[#allocation2 + $0x47] sm:$0xff]  ;;  %v13257_v4 = vld [vmem:[#allocation2 + $0x6f] sm:$0xff] }
 0xf7d   : > { %13236 = vst [vmem:[#allocation2 + $0x148] sm:$0xff] %v13204_v17  ;;  %v13205_v49 = vmax.f32 %v13173_v37, 0.0  ;;  %v20772_v8 = vld [vmem:[%s26058_s9 + $0x88] sm:$0xff]   ;;  %v20773_v37 = vld [vmem:[%s26058_s9 + $0x90] sm:$0xff]  }
 0xf7e   : > { %13234 = vst [vmem:[#allocation2 + $0x128] sm:$0xff] %v13202_v0  ;;  %v13203_v10 = vmax.f32 %v13171_v54, 0.0  ;;  %v13256_v54 = vld [vmem:[#allocation2 + $0x67] sm:$0xff] }
 0xf7f   : > { %13237 = vst [vmem:[#allocation2 + $0x150] sm:$0xff] %v13205_v49  ;;  %v25559_v30 = vpack.c.bf16 %v13205_v49, %v13204_v17  ;;  %18882 = vmatpush3.bf16.msra.mxu1 %v20770_v3  ;;  %v13253_v3 = vld [vmem:[#allocation2 + $0x2f] sm:$0xff]  ;;  %v25600_v17 = vpack.c.bf16 %v13255_v36, %v13254_v42  ;;  %v25608_v49 = vpack.c.bf16 %v13257_v4, %v13256_v54 }
 0xf80   : > { %13235 = vst [vmem:[#allocation2 + $0x130] sm:$0xff] %v13203_v10  ;;  %v18809_v5 = vpop.f32.mrb[52].mxu0  ;;  %v25561_v20 = vpack.c.bf16 %v13203_v10, %v13202_v0  ;;  %18915 = vmatprep.subr.bf16.mxu1 %v25557_v51  ;;  %v13259_v0 = vld [vmem:[#allocation2 + $0x8f] sm:$0xff]  ;;  %v13258_v10 = vld [vmem:[#allocation2 + $0x87] sm:$0xff] }
 0xf81   : > { %v13176_v14 = vadd.f32 %v18809_v5, %v25500_v47  ;;  %v13068_v11 = vpop.f32.mrb[53].mxu0  ;;  %v20774_v5 = vld [vmem:[%s26058_s9 + $0x98] sm:$0xff]   ;;  %v13799_v42 = vld [vmem:[#allocation2 + $0x29] sm:$0xff] }
 0xf82   : > { %v13174_v43 = vadd.f32 %v25500_v47, %v13068_v11  ;;  %v18810_v1 = vpop.f32.mrb[54].mxu0  ;;  %18852 = vmatmul.mubr.bf16.gmra.mrb[48].mxu1 %v25561_v20  ;;  %v13261_v11 = vld [vmem:[#allocation2 + $0xaf] sm:$0xff] }
 0xf83   : > { %v13208_v6 = vmax.f32 %v13176_v14, 0.0  ;;  %v13177_v18 = vadd.f32 %v18810_v1, %v25500_v47  ;;  %v13071_v44 = vpop.f32.mrb[55].mxu0  ;;  %18855 = vmatprep.mubr.bf16.mxu1 %v25559_v30  ;;  %v20775_v14 = vld [vmem:[%s26058_s9 + $0xa0] sm:$0xff]   ;;  %v13802_v4 = vld [vmem:[#allocation2 + $0x51] sm:$0xff]  ;;  %v20780_v54 = vld [vmem:[%s26058_s9 + $0xc8] sm:$0xff]  }
 0xf84   : > { %v13206_v38 = vmax.f32 %v13174_v43, 0.0  ;;  %v13175_v59 = vadd.f32 %v25500_v47, %v13071_v44  ;;  %v13263_v43 = vld [vmem:[#allocation2 + $0xcf] sm:$0xff]  ;;  %v13260_v1 = vld [vmem:[#allocation2 + $0xa7] sm:$0xff] }
 0xf85   : > { %13240 = vst [vmem:[#allocation2 + $0x188] sm:$0xff] %v13208_v6  ;;  %v13209_v50 = vmax.f32 %v13177_v18, 0.0  ;;  %v13262_v18 = vld [vmem:[#allocation2 + $0xc7] sm:$0xff] }
 0xf86   : > { %13238 = vst [vmem:[#allocation2 + $0x168] sm:$0xff] %v13206_v38  ;;  %v13207_v58 = vmax.f32 %v13175_v59, 0.0  ;;  %v20776_v44 = vld [vmem:[%s26058_s9 + $0xa8] sm:$0xff]   ;;  %v20777_v59 = vld [vmem:[%s26058_s9 + $0xb0] sm:$0xff]  }
 0xf87   : > { %13241 = vst [vmem:[#allocation2 + $0x190] sm:$0xff] %v13209_v50  ;;  %v25570_v48 = vpack.c.bf16 %v13209_v50, %v13208_v6  ;;  %v25620_v6 = vpack.c.bf16 %v13261_v11, %v13260_v1  ;;  %v13265_v50 = vld [vmem:[#allocation2 + $0xef] sm:$0xff] }
 0xf88   : > { %13239 = vst [vmem:[#allocation2 + $0x170] sm:$0xff] %v13207_v58  ;;  %v18813_v55 = vpop.f32.mrb[56].mxu0  ;;  %v25572_v45 = vpack.c.bf16 %v13207_v58, %v13206_v38  ;;  %v25625_v38 = vpack.c.bf16 %v13263_v43, %v13262_v18  ;;  %v13267_v58 = vld [vmem:[#allocation2 + $0x10f] sm:$0xff] }
 0xf89   : > { %v13180_v27 = vadd.f32 %v18813_v55, %v25500_v47  ;;  %v13084_v32 = vpop.f32.mrb[57].mxu0  ;;  %v13264_v55 = vld [vmem:[#allocation2 + $0xe7] sm:$0xff]  ;;  %v13804_v11 = vld [vmem:[#allocation2 + $0x71] sm:$0xff] }
 0xf8a   : > { %v13178_v63 = vadd.f32 %v25500_v47, %v13084_v32  ;;  %v18814_v61 = vpop.f32.mrb[58].mxu0  ;;  %18856 = vmatmul.mubr.bf16.gmra.mrb[52].mxu1 %v25572_v45  ;;  %v13266_v32 = vld [vmem:[#allocation2 + $0x107] sm:$0xff]  ;;  %v13806_v1 = vld [vmem:[#allocation2 + $0x91] sm:$0xff] }
 0xf8b   : > { %v13212_v23 = vmax.f32 %v13180_v27, 0.0  ;;  %v13181_v9 = vadd.f32 %v18814_v61, %v25500_v47  ;;  %v13087_v13 = vpop.f32.mrb[59].mxu0  ;;  %18859 = vmatprep.mubr.bf16.mxu1 %v25570_v48  ;;  %v25632_v27 = vpack.c.bf16 %v13265_v50, %v13264_v55  ;;  %v25637_v61 = vpack.c.bf16 %v13267_v58, %v13266_v32  ;;  %v13805_v43 = vld [vmem:[#allocation2 + $0x89] sm:$0xff]  ;;  %v20783_v50 = vld [vmem:[%s26058_s9 + $0xe0] sm:$0xff]   ;;  %v13808_v55 = vld [vmem:[#allocation2 + $0xb1] sm:$0xff] }
 0xf8c   : > { %v13210_v33 = vmax.f32 %v13178_v63, 0.0  ;;  %v13179_v12 = vadd.f32 %v25500_v47, %v13087_v13  ;;  %v20778_v63 = vld [vmem:[%s26058_s9 + $0xb8] sm:$0xff]   ;;  %v13271_v13 = vld [vmem:[#allocation2 + $0x14f] sm:$0xff] }
 0xf8d   : > { %13244 = vst [vmem:[#allocation2 + $0x1c8] sm:$0xff] %v13212_v23  ;;  %v13213_v24 = vmax.f32 %v13181_v9, 0.0  ;;  %v13269_v9 = vld [vmem:[#allocation2 + $0x12f] sm:$0xff] }
 0xf8e   : > { %13242 = vst [vmem:[#allocation2 + $0x1a8] sm:$0xff] %v13210_v33  ;;  %v13211_v19 = vmax.f32 %v13179_v12, 0.0  ;;  %v13807_v58 = vld [vmem:[#allocation2 + $0xa9] sm:$0xff] }
 0xf8f   : > { %13245 = vst [vmem:[#allocation2 + $0x1d0] sm:$0xff] %v13213_v24  ;;  %v25580_v28 = vpack.c.bf16 %v13213_v24, %v13212_v23  ;;  %v20779_v23 = vld [vmem:[%s26058_s9 + $0xc0] sm:$0xff]   ;;  %v13809_v32 = vld [vmem:[#allocation2 + $0xc9] sm:$0xff] }
 0xf90   : > { %13243 = vst [vmem:[#allocation2 + $0x1b0] sm:$0xff] %v13211_v19  ;;  %v18817_v25 = vpop.f32.mrb[60].mxu0  ;;  %v25582_v2 = vpack.c.bf16 %v13211_v19, %v13210_v33  ;;  %v13268_v33 = vld [vmem:[#allocation2 + $0x127] sm:$0xff] }
 0xf91   : > { %v13184_v22 = vadd.f32 %v18817_v25, %v25500_v47  ;;  %v13100_v7 = vpop.f32.mrb[61].mxu0  ;;  %v25644_v12 = vpack.c.bf16 %v13269_v9, %v13268_v33  ;;  %v13270_v24 = vld [vmem:[#allocation2 + $0x147] sm:$0xff]  ;;  %v13273_v25 = vld [vmem:[#allocation2 + $0x16f] sm:$0xff] }
 0xf92   : > { %v13182_v16 = vadd.f32 %v25500_v47, %v13100_v7  ;;  %v18818_v26 = vpop.f32.mrb[62].mxu0  ;;  %18860 = vmatmul.mubr.bf16.gmra.mrb[56].mxu1 %v25582_v2  ;;  %v25646_v19 = vpack.c.bf16 %v13271_v13, %v13270_v24  ;;  %v13272_v7 = vld [vmem:[#allocation2 + $0x167] sm:$0xff]  ;;  %v20785_v33 = vld [vmem:[%s26058_s9 + $0xf0] sm:$0xff]  }
 0xf93   : > { %v13216_v31 = vmax.f32 %v13184_v22, 0.0  ;;  %v13185_v39 = vadd.f32 %v18818_v26, %v25500_v47  ;;  %v13103_v40 = vpop.f32.mrb[63].mxu0  ;;  %18863 = vmatprep.mubr.bf16.mxu1 %v25580_v28  ;;  %v13275_v22 = vld [vmem:[#allocation2 + $0x18f] sm:$0xff]  ;;  %v13274_v26 = vld [vmem:[#allocation2 + $0x187] sm:$0xff] }
 0xf94   : > { %v13214_v35 = vmax.f32 %v13182_v16, 0.0  ;;  %v13183_v52 = vadd.f32 %v25500_v47, %v13103_v40  ;;  %v25595_v47 = vpack.c.bf16 %v13253_v3, %v13252_v29  ;;  %v25650_v16 = vpack.c.bf16 %v13273_v25, %v13272_v7  ;;  %v13278_v53 = vld [vmem:[#allocation2 + $0x1c7] sm:$0xff]  ;;  %v13812_v25 = vld [vmem:[#allocation2 + $0xf1] sm:$0xff] }
 0xf95   : > { %13248 = vst [vmem:[#allocation2 + $0x208] sm:$0xff] %v13216_v31  ;;  %v13217_v57 = vmax.f32 %v13185_v39, 0.0  ;;  %v20784_v9 = vld [vmem:[%s26058_s9 + $0xe8] sm:$0xff]   ;;  %v13814_v7 = vld [vmem:[#allocation2 + $0x111] sm:$0xff] }
 0xf96   : > { %13246 = vst [vmem:[#allocation2 + $0x1e8] sm:$0xff] %v13214_v35  ;;  %v13215_v34 = vmax.f32 %v13183_v52, 0.0  ;;  %v13279_v40 = vld [vmem:[#allocation2 + $0x1cf] sm:$0xff] }
 0xf97   : > { %13249 = vst [vmem:[#allocation2 + $0x210] sm:$0xff] %v13217_v57  ;;  %v25590_v15 = vpack.c.bf16 %v13217_v57, %v13216_v31  ;;  %v25652_v31 = vpack.c.bf16 %v13275_v22, %v13274_v26  ;;  %v13277_v39 = vld [vmem:[#allocation2 + $0x1af] sm:$0xff]  ;;  %v25658_v60 = vpack.c.bf16 %v13279_v40, %v13278_v53 }
 0xf98   : > { %13247 = vst [vmem:[#allocation2 + $0x1f0] sm:$0xff] %v13215_v34  ;;  %v25592_v56 = vpack.c.bf16 %v13215_v34, %v13214_v35  ;;  %v13276_v35 = vld [vmem:[#allocation2 + $0x1a7] sm:$0xff]  ;;  %v13798_v34 = vld [vmem:[#allocation2 + $0x11] sm:$0xff] }
 0xf99   : > { %v25656_v52 = vpack.c.bf16 %v13277_v39, %v13276_v35  ;;  %v13797_v57 = vld [vmem:[#allocation2 + $0x9] sm:$0xff]  ;;  %v20786_v39 = vld [vmem:[%s26058_s9 + $0xf8] sm:$0xff]   ;;  %v20787_v35 = vld [vmem:[%s26058_s9 + $0x100] sm:$0xff]  }
 0xf9a   : > { %18864 = vmatmul.mubr.bf16.gmra.mrb[60].mxu1 %v25592_v56  ;;  %v13829_v36 = vpack.c.bf16 %v13798_v34, %v13797_v57  ;;  %v13811_v24 = vld [vmem:[#allocation2 + $0xe9] sm:$0xff]  ;;  %v13816_v57 = vld [vmem:[#allocation2 + $0x131] sm:$0xff] }
 0xf9b   : > { %18883 = vmatprep.mubr.bf16.mxu1 %v13282_v46  ;;  %v13813_v22 = vld [vmem:[#allocation2 + $0x109] sm:$0xff]  ;;  %v25701_v26 = vpack.c.bf16 %v13812_v25, %v13811_v24 }
 0xf9c   : > { %v25706_v40 = vpack.c.bf16 %v13814_v7, %v13813_v22  ;;  %v13815_v53 = vld [vmem:[#allocation2 + $0x129] sm:$0xff]  ;;  %v20794_v22 = vld [vmem:[%s26058_s9 + $0x138] sm:$0xff]   ;;  %v20795_v7 = vld [vmem:[%s26058_s9 + $0x140] sm:$0xff]  }
 0xf9d   : > { %v13280_v3 = vld [vmem:[#allocation2 + $0x1e7] sm:$0xff]  ;;  %v20793_v25 = vld [vmem:[%s26058_s9 + $0x130] sm:$0xff]  }
 0xf9e   : > { %v13817_v34 = vld [vmem:[#allocation2 + $0x149] sm:$0xff] }
 0xf9f   : > { %v13281_v46 = vld [vmem:[#allocation2 + $0x1ef] sm:$0xff] }
 0xfa0   : > { %v25662_v29 = vpack.c.bf16 %v13281_v46, %v13280_v3  ;;  %v13818_v46 = vld [vmem:[#allocation2 + $0x151] sm:$0xff]  ;;  %v25713_v3 = vpack.c.bf16 %v13816_v57, %v13815_v53  ;;  %v20792_v24 = vld [vmem:[%s26058_s9 + $0x128] sm:$0xff]  }
 0xfa1   : > { %v14133_v53 = vld [vmem:[#allocation2 + $0x207] sm:$0xff] }
 0xfa2   : > { %18884 = vmatmul.mubr.bf16.vlgmr.msra.gmra.mrb[32].mxu1 %v25595_v47 }
 0xfa3   : > { %18916 = vmatpush3.bf16.msra.mxu1 %v25557_v51  ;;  %18887 = vmatprep.mubr.bf16.mxu1 %v25600_v17  ;;  %v25613_v51 = vpack.c.bf16 %v13259_v0, %v13258_v10 }
 0xfa4   : > { %18917 = vmatprep.subr.bf16.mxu1 %v20772_v8 }
 0xfa7   : > { %18918 = vmatpush3.bf16.msra.mxu1 %v20772_v8  ;;  %v13800_v8 = vld [vmem:[#allocation2 + $0x31] sm:$0xff] }
 0xfa8   : > { %18919 = vmatprep.subr.bf16.mxu1 %v20773_v37  ;;  %v25665_v0 = vpack.c.bf16 %v13800_v8, %v13799_v42  ;;  %v13819_v42 = vld [vmem:[#allocation2 + $0x169] sm:$0xff]  ;;  %v13820_v8 = vld [vmem:[#allocation2 + $0x171] sm:$0xff] }
 0xfaa   : > { %18888 = vmatmul.mubr.bf16.gmra.mrb[36].mxu1 %v25608_v49 }
 0xfab   : > { %18891 = vmatprep.mubr.bf16.mxu1 %v25613_v51  ;;  %18920 = vmatpush3.bf16.msra.mxu1 %v20773_v37  ;;  %v13801_v37 = vld [vmem:[#allocation2 + $0x49] sm:$0xff] }
 0xfac   : > { %18921 = vmatprep.subr.bf16.mxu1 %v20774_v5  ;;  %v25670_v10 = vpack.c.bf16 %v13802_v4, %v13801_v37  ;;  %v13821_v37 = vld [vmem:[#allocation2 + $0x189] sm:$0xff]  ;;  %v13822_v4 = vld [vmem:[#allocation2 + $0x191] sm:$0xff] }
 0xfaf   : > { %18922 = vmatpush3.bf16.msra.mxu1 %v20774_v5  ;;  %v20781_v5 = vld [vmem:[%s26058_s9 + $0xd0] sm:$0xff]  }
 0xfb0   : > { %18923 = vmatprep.subr.bf16.mxu1 %v20775_v14 }
 0xfb2   : > { %18892 = vmatmul.mubr.bf16.gmra.mrb[40].mxu1 %v25620_v6 }
 0xfb3   : > { %18895 = vmatprep.mubr.bf16.mxu1 %v25625_v38  ;;  %18924 = vmatpush3.bf16.msra.mxu1 %v20775_v14  ;;  %v13803_v14 = vld [vmem:[#allocation2 + $0x69] sm:$0xff] }
 0xfb4   : > { %18925 = vmatprep.subr.bf16.mxu1 %v20776_v44  ;;  %v25677_v18 = vpack.c.bf16 %v13804_v11, %v13803_v14  ;;  %v13823_v14 = vld [vmem:[#allocation2 + $0x1a9] sm:$0xff]  ;;  %v13824_v11 = vld [vmem:[#allocation2 + $0x1b1] sm:$0xff] }
 0xfb7   : > { %18926 = vmatpush3.bf16.msra.mxu1 %v20776_v44  ;;  %v20782_v44 = vld [vmem:[%s26058_s9 + $0xd8] sm:$0xff]  }
 0xfb8   : > { %18927 = vmatprep.subr.bf16.mxu1 %v20777_v59 }
 0xfba   : > { %18896 = vmatmul.mubr.bf16.gmra.mrb[44].mxu1 %v25632_v27 }
 0xfbb   : > { %18899 = vmatprep.mubr.bf16.mxu1 %v25637_v61  ;;  %18928 = vmatpush3.bf16.msra.mxu1 %v20777_v59  ;;  %v25682_v59 = vpack.c.bf16 %v13806_v1, %v13805_v43  ;;  %v13825_v43 = vld [vmem:[#allocation2 + $0x1c9] sm:$0xff]  ;;  %v13826_v1 = vld [vmem:[#allocation2 + $0x1d1] sm:$0xff] }
 0xfbc   : > { %18929 = vmatprep.subr.bf16.mxu1 %v20778_v63 }
 0xfbf   : > { %18930 = vmatpush3.bf16.msra.mxu1 %v20778_v63  ;;  %v13810_v63 = vld [vmem:[#allocation2 + $0xd1] sm:$0xff] }
 0xfc0   : > { %18963 = vmatprep.subr.bf16.mxu1 %v20779_v23  ;;  %v25694_v13 = vpack.c.bf16 %v13810_v63, %v13809_v32  ;;  %v20788_v63 = vld [vmem:[%s26058_s9 + $0x108] sm:$0xff]  }
 0xfc2   : > { %18900 = vmatmul.mubr.bf16.gmra.mrb[48].mxu1 %v25644_v12 }
 0xfc3   : > { %18903 = vmatprep.mubr.bf16.mxu1 %v25646_v19 }
 0xfca   : > { %18904 = vmatmul.mubr.bf16.gmra.mrb[52].mxu1 %v25650_v16 }
 0xfcb   : > { %18907 = vmatprep.mubr.bf16.mxu1 %v25652_v31 }
 0xfd2   : > { %18908 = vmatmul.mubr.bf16.gmra.mrb[56].mxu1 %v25656_v52 }
 0xfd3   : > { %18911 = vmatprep.mubr.bf16.mxu1 %v25658_v60 }
 0xfda   : > { %18912 = vmatmul.mubr.bf16.gmra.mrb[60].mxu1 %v25662_v29 }
 0xfdb   : > { %18931 = vmatprep.mubr.bf16.mxu1 %v13829_v36  ;;  %v25715_v36 = vpack.c.bf16 %v13818_v46, %v13817_v34  ;;  %v14409_v34 = vld [vmem:[#allocation2 + $0x28] sm:$0xff] }
 0xfe2   : > { %18932 = vmatmul.mubr.bf16.vlgmr.msra.gmra.mrb[32].mxu1 %v25665_v0 }
 0xfe3   : > { %18964 = vmatpush3.bf16.msra.mxu1 %v20779_v23  ;;  %18935 = vmatprep.mubr.bf16.mxu1 %v25670_v10  ;;  %v25689_v23 = vpack.c.bf16 %v13808_v55, %v13807_v58  ;;  %v13827_v58 = vld [vmem:[#allocation2 + $0x1e9] sm:$0xff]  ;;  %v13828_v55 = vld [vmem:[#allocation2 + $0x1f1] sm:$0xff] }
 0xfe4   : > { %18965 = vmatprep.subr.bf16.mxu1 %v20780_v54  ;;  %v25731_v32 = vpack.c.bf16 %v13828_v55, %v13827_v58  ;;  %v14416_v58 = vld [vmem:[#allocation2 + $0x90] sm:$0xff]  ;;  %v25788_v55 = vld [vmem:[#allocation2 + $0xa8] sm:$0xff] }
 0xfe7   : > { %18966 = vmatpush3.bf16.msra.mxu1 %v20780_v54  ;;  %v25719_v54 = vpack.c.bf16 %v13820_v8, %v13819_v42  ;;  %v14412_v42 = vld [vmem:[#allocation2 + $0x50] sm:$0xff] }
 0xfe8   : > { %18967 = vmatprep.subr.bf16.mxu1 %v20781_v5  ;;  %v14414_v8 = vld [vmem:[#allocation2 + $0x70] sm:$0xff] }
 0xfea   : > { %18936 = vmatmul.mubr.bf16.gmra.mrb[36].mxu1 %v25677_v18 }
 0xfeb   : > { %18939 = vmatprep.mubr.bf16.mxu1 %v25682_v59  ;;  %18968 = vmatpush3.bf16.msra.mxu1 %v20781_v5  ;;  %v25721_v5 = vpack.c.bf16 %v13822_v4, %v13821_v37  ;;  %v14411_v37 = vld [vmem:[#allocation2 + $0x48] sm:$0xff] }
 0xfec   : > { %18969 = vmatprep.subr.bf16.mxu1 %v20782_v44  ;;  %v25776_v4 = vpack.c.bf16 %v14412_v42, %v14411_v37  ;;  %v20826_v42 = vld [vmem:[%s26058_s9 + $0x238] sm:$0xff]   ;;  %v15346_v37 = vld [vmem:[#allocation2 + $0x170] sm:$0xff] }
 0xfef   : > { %18970 = vmatpush3.bf16.msra.mxu1 %v20782_v44  ;;  %v25725_v44 = vpack.c.bf16 %v13824_v11, %v13823_v14  ;;  %v14413_v14 = vld [vmem:[#allocation2 + $0x68] sm:$0xff] }
 0xff0   : > { %18971 = vmatprep.subr.bf16.mxu1 %v20783_v50  ;;  %v20796_v11 = vld [vmem:[%s26058_s9 + $0x148] sm:$0xff]  }
 0xff2   : > { %18940 = vmatmul.mubr.bf16.gmra.mrb[40].mxu1 %v25689_v23 }
 0xff3   : > { %18943 = vmatprep.mubr.bf16.mxu1 %v25694_v13  ;;  %18972 = vmatpush3.bf16.msra.mxu1 %v20783_v50  ;;  %v25727_v50 = vpack.c.bf16 %v13826_v1, %v13825_v43  ;;  %v25781_v43 = vpack.c.bf16 %v14414_v8, %v14413_v14  ;;  %v20797_v1 = vld [vmem:[%s26058_s9 + $0x150] sm:$0xff]   ;;  %v15345_v14 = vld [vmem:[#allocation2 + $0x168] sm:$0xff] }
 0xff4   : > { %18973 = vmatprep.subr.bf16.mxu1 %v20784_v9 }
 0xff7   : > { %18974 = vmatpush3.bf16.msra.mxu1 %v20784_v9  ;;  %v20789_v9 = vld [vmem:[%s26058_s9 + $0x110] sm:$0xff]  }
 0xff8   : > { %18975 = vmatprep.subr.bf16.mxu1 %v20785_v33 }
 0xffa   : > { %18944 = vmatmul.mubr.bf16.gmra.mrb[44].mxu1 %v25701_v26 }
 0xffb   : > { %18947 = vmatprep.mubr.bf16.mxu1 %v25706_v40  ;;  %18976 = vmatpush3.bf16.msra.mxu1 %v20785_v33  ;;  %v20791_v33 = vld [vmem:[%s26058_s9 + $0x120] sm:$0xff]  }
 0xffc   : > { %18977 = vmatprep.subr.bf16.mxu1 %v20786_v39 }
 0xfff   : > { %18978 = vmatpush3.bf16.msra.mxu1 %v20786_v39  ;;  %v14134_v39 = vld [vmem:[#allocation2 + $0x20f] sm:$0xff] }
0x1000   : > { %19011 = vmatprep.subr.bf16.mxu1 %v20787_v35  ;;  %v25773_v57 = vpack.c.bf16 %v14134_v39, %v14133_v53  ;;  %v20800_v39 = vld [vmem:[%s26058_s9 + $0x168] sm:$0xff]  }
0x1002   : > { %18948 = vmatmul.mubr.bf16.gmra.mrb[48].mxu1 %v25713_v3 }
0x1003   : > { %18951 = vmatprep.mubr.bf16.mxu1 %v25715_v36 }
0x100a   : > { %18952 = vmatmul.mubr.bf16.gmra.mrb[52].mxu1 %v25719_v54 }
0x100b   : > { %18955 = vmatprep.mubr.bf16.mxu1 %v25721_v5 }
0x1012   : > { %18956 = vmatmul.mubr.bf16.gmra.mrb[56].mxu1 %v25725_v44 }
0x1013   : > { %18959 = vmatprep.mubr.bf16.mxu1 %v25727_v50 }
0x101a   : > { %18960 = vmatmul.mubr.bf16.gmra.mrb[60].mxu1 %v25731_v32 }
0x101b   : > { %18979 = vmatprep.mubr.bf16.mxu1 %v25595_v47  ;;  %v20790_v47 = vld [vmem:[%s26058_s9 + $0x118] sm:$0xff]  }
0x1022   : > { %18980 = vmatmul.mubr.bf16.vlgmr.msra.gmra.mrb[32].mxu1 %v25600_v17 }
0x1023   : > { %19012 = vmatpush3.bf16.msra.mxu1 %v20787_v35  ;;  %18983 = vmatprep.mubr.bf16.mxu1 %v25608_v49  ;;  %v14410_v35 = vld [vmem:[#allocation2 + $0x30] sm:$0xff] }
0x1024   : > { %19013 = vmatprep.subr.bf16.mxu1 %v20788_v63  ;;  %v14441_v46 = vpack.c.bf16 %v14410_v35, %v14409_v34  ;;  %v25811_v35 = vld [vmem:[#allocation2 + $0x108] sm:$0xff]  ;;  %v20802_v34 = vld [vmem:[%s26058_s9 + $0x178] sm:$0xff]  }
0x1025   : > { %v14448_v53 = vpack.c.bf16 %v25540_v41, %v25811_v35  ;;  %v20804_v41 = vld [vmem:[%s26058_s9 + $0x188] sm:$0xff]  }
0x1027   : > { %19014 = vmatpush3.bf16.msra.mxu1 %v20788_v63  ;;  %v14415_v63 = vld [vmem:[#allocation2 + $0x88] sm:$0xff] }
0x1028   : > { %19015 = vmatprep.subr.bf16.mxu1 %v20789_v9 }
0x102a   : > { %18984 = vmatmul.mubr.bf16.gmra.mrb[36].mxu1 %v25613_v51 }
0x102b   : > { %18987 = vmatprep.mubr.bf16.mxu1 %v25620_v6  ;;  %19016 = vmatpush3.bf16.msra.mxu1 %v20789_v9  ;;  %v25790_v9 = vpack.c.bf16 %v14416_v58, %v14415_v63  ;;  %v15350_v58 = vld [vmem:[#allocation2 + $0x1b0] sm:$0xff]  ;;  %v15349_v63 = vld [vmem:[#allocation2 + $0x1a8] sm:$0xff] }
0x102c   : > { %19017 = vmatprep.subr.bf16.mxu1 %v20790_v47 }
0x102f   : > { %19018 = vmatpush3.bf16.msra.mxu1 %v20790_v47  ;;  %v20798_v47 = vld [vmem:[%s26058_s9 + $0x158] sm:$0xff]  }
0x1030   : > { %19019 = vmatprep.subr.bf16.mxu1 %v20791_v33 }
0x1032   : > { %18988 = vmatmul.mubr.bf16.gmra.mrb[40].mxu1 %v25625_v38 }
0x1033   : > { %18991 = vmatprep.mubr.bf16.mxu1 %v25632_v27  ;;  %19020 = vmatpush3.bf16.msra.mxu1 %v20791_v33  ;;  %v14445_v33 = vpack.c.bf16 %v25526_v21, %v25788_v55  ;;  %v20801_v21 = vld [vmem:[%s26058_s9 + $0x170] sm:$0xff]  }
0x1034   : > { %19021 = vmatprep.subr.bf16.mxu1 %v20792_v24 }
0x1037   : > { %19022 = vmatpush3.bf16.msra.mxu1 %v20792_v24  ;;  %v20799_v24 = vld [vmem:[%s26058_s9 + $0x160] sm:$0xff]  }
0x1038   : > { %19023 = vmatprep.subr.bf16.mxu1 %v20793_v25 }
0x103a   : > { %18992 = vmatmul.mubr.bf16.gmra.mrb[44].mxu1 %v25637_v61 }
0x103b   : > { %18995 = vmatprep.mubr.bf16.mxu1 %v25644_v12  ;;  %19024 = vmatpush3.bf16.msra.mxu1 %v20793_v25  ;;  %v14420_v25 = vld [vmem:[#allocation2 + $0xd0] sm:$0xff] }
0x103c   : > { %19025 = vmatprep.subr.bf16.mxu1 %v20794_v22 }
0x103f   : > { %19026 = vmatpush3.bf16.msra.mxu1 %v20794_v22  ;;  %v14419_v22 = vld [vmem:[#allocation2 + $0xc8] sm:$0xff] }
0x1040   : > { %19059 = vmatprep.subr.bf16.mxu1 %v20795_v7 }
0x1042   : > { %18996 = vmatmul.mubr.bf16.gmra.mrb[48].mxu1 %v25646_v19 }
0x1043   : > { %18999 = vmatprep.mubr.bf16.mxu1 %v25650_v16 }
0x104a   : > { %19000 = vmatmul.mubr.bf16.gmra.mrb[52].mxu1 %v25652_v31 }
0x104b   : > { %19003 = vmatprep.mubr.bf16.mxu1 %v25656_v52 }
0x1052   : > { %19004 = vmatmul.mubr.bf16.gmra.mrb[56].mxu1 %v25658_v60 }
0x1053   : > { %19007 = vmatprep.mubr.bf16.mxu1 %v25662_v29 }
0x105a   : > { %19008 = vmatmul.mubr.bf16.gmra.mrb[60].mxu1 %v25773_v57 }
0x105b   : > { %19027 = vmatprep.mubr.bf16.mxu1 %v14441_v46  ;;  %v15343_v46 = vld [vmem:[#allocation2 + $0x148] sm:$0xff] }
0x1062   : > { %19028 = vmatmul.mubr.bf16.vlgmr.msra.gmra.mrb[32].mxu1 %v25776_v4 }
0x1063   : > { %19060 = vmatpush3.bf16.msra.mxu1 %v20795_v7  ;;  %19031 = vmatprep.mubr.bf16.mxu1 %v25781_v43  ;;  %v25801_v7 = vpack.c.bf16 %v14420_v25, %v14419_v22  ;;  %v15356_v25 = vld [vmem:[#allocation2 + $0x210] sm:$0xff]  ;;  %v15353_v22 = vld [vmem:[#allocation2 + $0x1e8] sm:$0xff] }
0x1064   : > { %19061 = vmatprep.subr.bf16.mxu1 %v20796_v11 }
0x1067   : > { %19062 = vmatpush3.bf16.msra.mxu1 %v20796_v11  ;;  %v15368_v11 = vpack.c.bf16 %v15346_v37, %v15345_v14  ;;  %v15664_v37 = vld [vmem:[#allocation2 + $0x231] sm:$0xff]  ;;  %v25941_v14 = vld [vmem:[%s26059_s10] ss:$0 sm:$0xff] }
0x1068   : > { %19063 = vmatprep.subr.bf16.mxu1 %v20797_v1 }
0x106a   : > { %19032 = vmatmul.mubr.bf16.gmra.mrb[36].mxu1 %v25790_v9 }
0x106b   : > { %19035 = vmatprep.mubr.bf16.mxu1 %v14445_v33  ;;  %19064 = vmatpush3.bf16.msra.mxu1 %v20797_v1 }
0x106c   : > { %19065 = vmatprep.subr.bf16.mxu1 %v20798_v47 }
0x106f   : > { %19066 = vmatpush3.bf16.msra.mxu1 %v20798_v47  ;;  %v15351_v47 = vld [vmem:[#allocation2 + $0x1c8] sm:$0xff] }
0x1070   : > { %19067 = vmatprep.subr.bf16.mxu1 %v20799_v24 }
0x1072   : > { %19036 = vmatmul.mubr.bf16.gmra.mrb[40].mxu1 %v25801_v7 }
0x1073   : > { %19039 = vmatprep.mubr.bf16.mxu1 %v25544_v62  ;;  %19068 = vmatpush3.bf16.msra.mxu1 %v20799_v24  ;;  %v20803_v62 = vld [vmem:[%s26058_s9 + $0x180] sm:$0xff]   ;;  %v15354_v24 = vld [vmem:[#allocation2 + $0x1f0] sm:$0xff] }
0x1074   : > { %19069 = vmatprep.subr.bf16.mxu1 %v20800_v39 }
0x1077   : > { %19070 = vmatpush3.bf16.msra.mxu1 %v20800_v39  ;;  %v15355_v39 = vld [vmem:[#allocation2 + $0x208] sm:$0xff] }
0x1078   : > { %19071 = vmatprep.subr.bf16.mxu1 %v20801_v21 }
0x107a   : > { %19040 = vmatmul.mubr.bf16.gmra.mrb[44].mxu1 %v14448_v53 }
0x107b   : > { %19043 = vmatprep.mubr.bf16.mxu1 %v25561_v20  ;;  %19072 = vmatpush3.bf16.msra.mxu1 %v20801_v21  ;;  %v20806_v20 = vld [vmem:[%s26058_s9 + $0x198] sm:$0xff]   ;;  %v15373_v21 = vpack.c.bf16 %v15356_v25, %v15355_v39 }
0x107c   : > { %19073 = vmatprep.subr.bf16.mxu1 %v20802_v34 }
0x107f   : > { %19074 = vmatpush3.bf16.msra.mxu1 %v20802_v34  ;;  %v15633_v34 = vld [vmem:[#allocation2 + $0x49] sm:$0xff] }
0x1080   : > { %19107 = vmatprep.subr.bf16.mxu1 %v20803_v62 }
0x1082   : > { %19044 = vmatmul.mubr.bf16.gmra.mrb[48].mxu1 %v25559_v30  ;;  %v20805_v30 = vld [vmem:[%s26058_s9 + $0x190] sm:$0xff]  }
0x1083   : > { %19047 = vmatprep.mubr.bf16.mxu1 %v25572_v45  ;;  %v20808_v45 = vld [vmem:[%s26058_s9 + $0x1a8] sm:$0xff]  }
0x108a   : > { %19048 = vmatmul.mubr.bf16.gmra.mrb[52].mxu1 %v25570_v48  ;;  %v20807_v48 = vld [vmem:[%s26058_s9 + $0x1a0] sm:$0xff]  }
0x108b   : > { %19051 = vmatprep.mubr.bf16.mxu1 %v25582_v2  ;;  %v20810_v2 = vld [vmem:[%s26058_s9 + $0x1b8] sm:$0xff]  }
0x1092   : > { %19052 = vmatmul.mubr.bf16.gmra.mrb[56].mxu1 %v25580_v28  ;;  %v20809_v28 = vld [vmem:[%s26058_s9 + $0x1b0] sm:$0xff]  }
0x1093   : > { %19055 = vmatprep.mubr.bf16.mxu1 %v25592_v56  ;;  %v14745_v56 = vld [vmem:[#allocation2 + $0x209] sm:$0xff] }
0x109a   : > { %19056 = vmatmul.mubr.bf16.gmra.mrb[60].mxu1 %v25590_v15  ;;  %v20811_v15 = vld [vmem:[%s26058_s9 + $0x1c0] sm:$0xff]  }
0x109b   : > { %19075 = vmatprep.mubr.bf16.mxu1 %v25665_v0  ;;  %v14746_v0 = vld [vmem:[#allocation2 + $0x211] sm:$0xff] }
0x10a2   : > { %19076 = vmatmul.mubr.bf16.vlgmr.msra.gmra.mrb[32].mxu1 %v25670_v10  ;;  %v25868_v10 = vpack.c.bf16 %v14746_v0, %v14745_v56  ;;  %v15640_v56 = vld [vmem:[#allocation2 + $0xb1] sm:$0xff]  ;;  %v15641_v0 = vld [vmem:[#allocation2 + $0xc9] sm:$0xff] }
0x10a3   : > { %19108 = vmatpush3.bf16.msra.mxu1 %v20803_v62  ;;  %19079 = vmatprep.mubr.bf16.mxu1 %v25677_v18  ;;  %v20812_v18 = vld [vmem:[%s26058_s9 + $0x1c8] sm:$0xff]   ;;  %v15634_v62 = vld [vmem:[#allocation2 + $0x51] sm:$0xff] }
0x10a4   : > { %19109 = vmatprep.subr.bf16.mxu1 %v20804_v41 }
0x10a7   : > { %19110 = vmatpush3.bf16.msra.mxu1 %v20804_v41  ;;  %v15665_v41 = vpack.c.bf16 %v15634_v62, %v15633_v34 }
0x10a8   : > { %19111 = vmatprep.subr.bf16.mxu1 %v20805_v30 }
0x10aa   : > { %19080 = vmatmul.mubr.bf16.gmra.mrb[36].mxu1 %v25682_v59  ;;  %v20813_v59 = vld [vmem:[%s26058_s9 + $0x1d0] sm:$0xff]  }
0x10ab   : > { %19083 = vmatprep.mubr.bf16.mxu1 %v25689_v23  ;;  %19112 = vmatpush3.bf16.msra.mxu1 %v20805_v30  ;;  %v20823_v23 = vld [vmem:[%s26058_s9 + $0x220] sm:$0xff]   ;;  %v15635_v30 = vld [vmem:[#allocation2 + $0x69] sm:$0xff] }
0x10ac   : > { %19113 = vmatprep.subr.bf16.mxu1 %v20806_v20 }
0x10af   : > { %19114 = vmatpush3.bf16.msra.mxu1 %v20806_v20  ;;  %v15636_v20 = vld [vmem:[#allocation2 + $0x71] sm:$0xff] }
0x10b0   : > { %19115 = vmatprep.subr.bf16.mxu1 %v20807_v48 }
0x10b2   : > { %19084 = vmatmul.mubr.bf16.gmra.mrb[40].mxu1 %v25694_v13  ;;  %v15338_v13 = vld [vmem:[#allocation2 + $0xf0] sm:$0xff] }
0x10b3   : > { %19087 = vmatprep.mubr.bf16.mxu1 %v25701_v26  ;;  %19116 = vmatpush3.bf16.msra.mxu1 %v20807_v48  ;;  %v15340_v26 = vld [vmem:[#allocation2 + $0x110] sm:$0xff] }
0x10b4   : > { %19117 = vmatprep.subr.bf16.mxu1 %v20808_v45  ;;  %v15637_v48 = vld [vmem:[#allocation2 + $0x89] sm:$0xff] }
0x10b7   : > { %19118 = vmatpush3.bf16.msra.mxu1 %v20808_v45  ;;  %v15638_v45 = vld [vmem:[#allocation2 + $0x91] sm:$0xff] }
0x10b8   : > { %19119 = vmatprep.subr.bf16.mxu1 %v20809_v28 }
0x10ba   : > { %19088 = vmatmul.mubr.bf16.gmra.mrb[44].mxu1 %v25706_v40  ;;  %v15337_v40 = vld [vmem:[#allocation2 + $0xe8] sm:$0xff] }
0x10bb   : > { %19091 = vmatprep.mubr.bf16.mxu1 %v25713_v3  ;;  %19120 = vmatpush3.bf16.msra.mxu1 %v20809_v28  ;;  %v15364_v3 = vpack.c.bf16 %v15338_v13, %v15337_v40  ;;  %v15666_v28 = vpack.c.bf16 %v15636_v20, %v15635_v30  ;;  %v15653_v13 = vld [vmem:[#allocation2 + $0x189] sm:$0xff] }
0x10bc   : > { %19121 = vmatprep.subr.bf16.mxu1 %v20810_v2 }
0x10bf   : > { %19122 = vmatpush3.bf16.msra.mxu1 %v20810_v2  ;;  %v15667_v2 = vpack.c.bf16 %v15638_v45, %v15637_v48 }
0x10c0   : > { %19155 = vmatprep.subr.bf16.mxu1 %v20811_v15 }
0x10c2   : > { %19092 = vmatmul.mubr.bf16.gmra.mrb[48].mxu1 %v25715_v36  ;;  %v20824_v36 = vld [vmem:[%s26058_s9 + $0x228] sm:$0xff]  }
0x10c3   : > { %19095 = vmatprep.mubr.bf16.mxu1 %v25719_v54  ;;  %v15365_v54 = vpack.c.bf16 %v15340_v26, %v25811_v35  ;;  %v20913_v35 = vld [vmem:[#allocation2 + $0x8] sm:$0xff]  ;;  %v15654_v26 = vld [vmem:[#allocation2 + $0x191] sm:$0xff] }
0x10c4   : > { %v15374_v53 = vpack.c.bf16 %v20913_v35, %v20913_v35 }
0x10ca   : > { %19096 = vmatmul.mubr.bf16.gmra.mrb[52].mxu1 %v25721_v5  ;;  %v20825_v5 = vld [vmem:[%s26058_s9 + $0x230] sm:$0xff]  }
0x10cb   : > { %19099 = vmatprep.mubr.bf16.mxu1 %v25725_v44  ;;  %v15342_v44 = vld [vmem:[#allocation2 + $0x130] sm:$0xff] }
0x10d2   : > { %19100 = vmatmul.mubr.bf16.gmra.mrb[56].mxu1 %v25727_v50  ;;  %v15344_v50 = vld [vmem:[#allocation2 + $0x150] sm:$0xff] }
0x10d3   : > { %19103 = vmatprep.mubr.bf16.mxu1 %v25731_v32  ;;  %v15341_v32 = vld [vmem:[#allocation2 + $0x128] sm:$0xff]  ;;  %v15367_v8 = vpack.c.bf16 %v15344_v50, %v15343_v46  ;;  %v15660_v46 = vld [vmem:[#allocation2 + $0x1f1] sm:$0xff] }
0x10da   : > { %19104 = vmatmul.mubr.bf16.gmra.mrb[60].mxu1 %v25868_v10 }
0x10db   : > { %19123 = vmatprep.mubr.bf16.mxu1 %v25600_v17  ;;  %v20814_v17 = vld [vmem:[%s26058_s9 + $0x1d8] sm:$0xff]  }
0x10e2   : > { %19124 = vmatmul.mubr.bf16.vlgmr.msra.gmra.mrb[32].mxu1 %v25608_v49  ;;  %v20815_v49 = vld [vmem:[%s26058_s9 + $0x1e0] sm:$0xff]  }
0x10e3   : > { %19156 = vmatpush3.bf16.msra.mxu1 %v20811_v15  ;;  %19127 = vmatprep.mubr.bf16.mxu1 %v25613_v51  ;;  %v20816_v51 = vld [vmem:[%s26058_s9 + $0x1e8] sm:$0xff]  }
0x10e4   : > { %19157 = vmatprep.subr.bf16.mxu1 %v20812_v18  ;;  %v15639_v15 = vld [vmem:[#allocation2 + $0xa9] sm:$0xff] }
0x10e7   : > { %19158 = vmatpush3.bf16.msra.mxu1 %v20812_v18  ;;  %v15642_v18 = vld [vmem:[#allocation2 + $0xd1] sm:$0xff] }
0x10e8   : > { %19159 = vmatprep.subr.bf16.mxu1 %v20813_v59 }
0x10ea   : > { %19128 = vmatmul.mubr.bf16.gmra.mrb[36].mxu1 %v25620_v6  ;;  %v20817_v6 = vld [vmem:[%s26058_s9 + $0x1f0] sm:$0xff]  }
0x10eb   : > { %19131 = vmatprep.mubr.bf16.mxu1 %v25625_v38  ;;  %19160 = vmatpush3.bf16.msra.mxu1 %v20813_v59  ;;  %v20818_v38 = vld [vmem:[%s26058_s9 + $0x1f8] sm:$0xff]   ;;  %v15668_v59 = vpack.c.bf16 %v15640_v56, %v15639_v15 }
0x10ec   : > { %19161 = vmatprep.subr.bf16.mxu1 %v20814_v17 }
0x10ef   : > { %19162 = vmatpush3.bf16.msra.mxu1 %v20814_v17  ;;  %v15669_v17 = vpack.c.bf16 %v15642_v18, %v15641_v0 }
0x10f0   : > { %19163 = vmatprep.subr.bf16.mxu1 %v20815_v49 }
0x10f2   : > { %19132 = vmatmul.mubr.bf16.gmra.mrb[40].mxu1 %v25632_v27  ;;  %v20819_v27 = vld [vmem:[%s26058_s9 + $0x200] sm:$0xff]  }
0x10f3   : > { %19135 = vmatprep.mubr.bf16.mxu1 %v25637_v61  ;;  %19164 = vmatpush3.bf16.msra.mxu1 %v20815_v49  ;;  %v15051_v61 = vld [vmem:[#allocation2 + $0x227] sm:$0xff] }
0x10f4   : > { %19165 = vmatprep.subr.bf16.mxu1 %v20816_v51  ;;  %v15643_v49 = vld [vmem:[#allocation2 + $0xe9] sm:$0xff] }
0x10f7   : > { %19166 = vmatpush3.bf16.msra.mxu1 %v20816_v51  ;;  %v15644_v51 = vld [vmem:[#allocation2 + $0xf1] sm:$0xff] }
0x10f8   : > { %19167 = vmatprep.subr.bf16.mxu1 %v20817_v6 }
0x10fa   : > { %19136 = vmatmul.mubr.bf16.gmra.mrb[44].mxu1 %v25644_v12  ;;  %v15052_v12 = vld [vmem:[#allocation2 + $0x22f] sm:$0xff] }
0x10fb   : > { %19139 = vmatprep.mubr.bf16.mxu1 %v25646_v19  ;;  %19168 = vmatpush3.bf16.msra.mxu1 %v20817_v6  ;;  %v15068_v19 = vpack.c.bf16 %v15052_v12, %v15051_v61  ;;  %v15645_v6 = vld [vmem:[#allocation2 + $0x109] sm:$0xff] }
0x10fc   : > { %19169 = vmatprep.subr.bf16.mxu1 %v20818_v38  ;;  %v15647_v12 = vld [vmem:[#allocation2 + $0x129] sm:$0xff] }
0x10ff   : > { %19170 = vmatpush3.bf16.msra.mxu1 %v20818_v38  ;;  %v15646_v38 = vld [vmem:[#allocation2 + $0x111] sm:$0xff] }
0x1100   : > { %19203 = vmatprep.subr.bf16.mxu1 %v20819_v27  ;;  %v15671_v61 = vpack.c.bf16 %v15646_v38, %v15645_v6 }
0x1102   : > { %19140 = vmatmul.mubr.bf16.gmra.mrb[48].mxu1 %v25650_v16  ;;  %v20820_v16 = vld [vmem:[%s26058_s9 + $0x208] sm:$0xff]  }
0x1103   : > { %19143 = vmatprep.mubr.bf16.mxu1 %v25652_v31  ;;  %v20821_v31 = vld [vmem:[%s26058_s9 + $0x210] sm:$0xff]  }
0x110a   : > { %19144 = vmatmul.mubr.bf16.gmra.mrb[52].mxu1 %v25656_v52  ;;  %v15334_v52 = vld [vmem:[#allocation2 + $0xb0] sm:$0xff] }
0x110b   : > { %19147 = vmatprep.mubr.bf16.mxu1 %v25658_v60  ;;  %v15362_v60 = vpack.c.bf16 %v15334_v52, %v25788_v55  ;;  %v15352_v55 = vld [vmem:[#allocation2 + $0x1d0] sm:$0xff] }
0x110c   : > { %v15371_v33 = vpack.c.bf16 %v15352_v55, %v15351_v47 }
0x1112   : > { %19148 = vmatmul.mubr.bf16.gmra.mrb[56].mxu1 %v25662_v29  ;;  %v20822_v29 = vld [vmem:[%s26058_s9 + $0x218] sm:$0xff]  }
0x1113   : > { %19151 = vmatprep.mubr.bf16.mxu1 %v25773_v57  ;;  %v15366_v57 = vpack.c.bf16 %v15342_v44, %v15341_v32  ;;  %v15658_v44 = vld [vmem:[#allocation2 + $0x1d1] sm:$0xff] }
0x111a   : > { %19152 = vmatmul.mubr.bf16.gmra.mrb[60].mxu1 %v15068_v19  ;;  %v15648_v19 = vld [vmem:[#allocation2 + $0x131] sm:$0xff] }
0x111b   : > { %19171 = vmatprep.mubr.bf16.mxu1 %v25776_v4  ;;  %v15348_v4 = vld [vmem:[#allocation2 + $0x190] sm:$0xff]  ;;  %v15672_v52 = vpack.c.bf16 %v15648_v19, %v15647_v12 }
0x1122   : > { %19172 = vmatmul.mubr.bf16.vlgmr.msra.gmra.mrb[32].mxu1 %v25781_v43  ;;  %v15347_v43 = vld [vmem:[#allocation2 + $0x188] sm:$0xff] }
0x1123   : > { %19204 = vmatpush3.bf16.msra.mxu1 %v20819_v27  ;;  %19175 = vmatprep.mubr.bf16.mxu1 %v25790_v9  ;;  %v15369_v1 = vpack.c.bf16 %v15348_v4, %v15347_v43  ;;  %v15370_v9 = vpack.c.bf16 %v15350_v58, %v15349_v63  ;;  %v15670_v27 = vpack.c.bf16 %v15644_v51, %v15643_v49 }
0x1124   : > { %19205 = vmatprep.subr.bf16.mxu1 %v20820_v16 }
0x1127   : > { %19206 = vmatpush3.bf16.msra.mxu1 %v20820_v16  ;;  %v15649_v16 = vld [vmem:[#allocation2 + $0x149] sm:$0xff] }
0x1128   : > { %19207 = vmatprep.subr.bf16.mxu1 %v20821_v31 }
0x112a   : > { %19176 = vmatmul.mubr.bf16.gmra.mrb[36].mxu1 %v15362_v60 }
0x112b   : > { %19179 = vmatprep.mubr.bf16.mxu1 %v25801_v7  ;;  %19208 = vmatpush3.bf16.msra.mxu1 %v20821_v31  ;;  %v15372_v7 = vpack.c.bf16 %v15354_v24, %v15353_v22  ;;  %v15650_v31 = vld [vmem:[#allocation2 + $0x151] sm:$0xff] }
0x112c   : > { %19209 = vmatprep.subr.bf16.mxu1 %v20822_v29  ;;  %v15673_v60 = vpack.c.bf16 %v15650_v31, %v15649_v16 }
0x112f   : > { %19210 = vmatpush3.bf16.msra.mxu1 %v20822_v29  ;;  %v15651_v29 = vld [vmem:[#allocation2 + $0x169] sm:$0xff] }
0x1130   : > { %19211 = vmatprep.subr.bf16.mxu1 %v20823_v23 }
0x1132   : > { %19180 = vmatmul.mubr.bf16.gmra.mrb[40].mxu1 %v15364_v3  ;;  %v15675_v3 = vpack.c.bf16 %v15654_v26, %v15653_v13 }
0x1133   : > { %19183 = vmatprep.mubr.bf16.mxu1 %v15365_v54  ;;  %19212 = vmatpush3.bf16.msra.mxu1 %v20823_v23  ;;  %v15652_v23 = vld [vmem:[#allocation2 + $0x171] sm:$0xff] }
0x1134   : > { %19213 = vmatprep.subr.bf16.mxu1 %v20824_v36  ;;  %v15674_v40 = vpack.c.bf16 %v15652_v23, %v15651_v29  ;;  %v15656_v54 = vld [vmem:[#allocation2 + $0x1b1] sm:$0xff] }
0x1137   : > { %19214 = vmatpush3.bf16.msra.mxu1 %v20824_v36  ;;  %v15655_v36 = vld [vmem:[#allocation2 + $0x1a9] sm:$0xff] }
0x1138   : > { %19215 = vmatprep.subr.bf16.mxu1 %v20825_v5  ;;  %v15676_v50 = vpack.c.bf16 %v15656_v54, %v15655_v36 }
0x113a   : > { %19184 = vmatmul.mubr.bf16.gmra.mrb[44].mxu1 %v15366_v57  ;;  %v15659_v57 = vld [vmem:[#allocation2 + $0x1e9] sm:$0xff] }
0x113b   : > { %19187 = vmatprep.mubr.bf16.mxu1 %v15367_v8  ;;  %19216 = vmatpush3.bf16.msra.mxu1 %v20825_v5  ;;  %v15657_v5 = vld [vmem:[#allocation2 + $0x1c9] sm:$0xff] }
0x113c   : > { %19217 = vmatprep.subr.bf16.mxu1 %v20826_v42  ;;  %v15677_v32 = vpack.c.bf16 %v15658_v44, %v15657_v5  ;;  %v15663_v8 = vld [vmem:[#allocation2 + $0x229] sm:$0xff] }
0x113d   : > { %v15680_v4 = vpack.c.bf16 %v15664_v37, %v15663_v8 }
0x113f   : > { %19218 = vmatpush3.bf16.msra.mxu1 %v20826_v42  ;;  %v15678_v42 = vpack.c.bf16 %v15660_v46, %v15659_v57 }
0x1142   : > { %19188 = vmatmul.mubr.bf16.gmra.mrb[48].mxu1 %v15368_v11 }
0x1143   : > { %19191 = vmatprep.mubr.bf16.mxu1 %v15369_v1 }
0x114a   : > { %19192 = vmatmul.mubr.bf16.gmra.mrb[52].mxu1 %v15370_v9 }
0x114b   : > { %19195 = vmatprep.mubr.bf16.mxu1 %v15371_v33 }
0x1152   : > { %19196 = vmatmul.mubr.bf16.gmra.mrb[56].mxu1 %v15372_v7 }
0x1153   : > { %19199 = vmatprep.mubr.bf16.mxu1 %v15373_v21 }
0x115a   : > { %19200 = vmatmul.mubr.bf16.gmra.mrb[60].mxu1 %v15374_v53 }
0x115b   : > { %19219 = vmatprep.mubr.bf16.mxu1 %v15665_v41 }
0x1162   : > { %19220 = vmatmul.mubr.bf16.vlgmr.msra.gmra.mrb[32].mxu1 %v15666_v28 }
0x1163   : > { %19223 = vmatprep.mubr.bf16.mxu1 %v15667_v2 }
0x116a   : > { %19224 = vmatmul.mubr.bf16.gmra.mrb[36].mxu1 %v15668_v59 }
0x116b   : > { %19227 = vmatprep.mubr.bf16.mxu1 %v15669_v17 }
0x1172   : > { %19228 = vmatmul.mubr.bf16.gmra.mrb[40].mxu1 %v15670_v27 }
0x1173   : > { %19231 = vmatprep.mubr.bf16.mxu1 %v15671_v61 }
0x117a   : > { %19232 = vmatmul.mubr.bf16.gmra.mrb[44].mxu1 %v15672_v52 }
0x117b   : > { %19235 = vmatprep.mubr.bf16.mxu1 %v15673_v60 }
0x1182   : > { %19236 = vmatmul.mubr.bf16.gmra.mrb[48].mxu1 %v15674_v40 }
0x1183   : > { %19239 = vmatprep.mubr.bf16.mxu1 %v15675_v3 }
0x118a   : > { %19240 = vmatmul.mubr.bf16.gmra.mrb[52].mxu1 %v15676_v50 }
0x118b   : > { %19243 = vmatprep.mubr.bf16.mxu1 %v15677_v32 }
0x1192   : > { %19244 = vmatmul.mubr.bf16.gmra.mrb[56].mxu1 %v15678_v42 }
0x1193   : > { %19247 = vmatprep.mubr.bf16.mxu1 %v25868_v10 }
0x119a   : > { %19248 = vmatmul.mubr.bf16.gmra.mrb[60].mxu1 %v15680_v4 }
0x1235   : > { %v19221_v10 = vpop.f32.mrb[32].mxu1 }
0x1236   : > { %v15948_v11 = vadd.f32 %v19221_v10, %v25941_v14  ;;  %v15780_v43 = vpop.f32.mrb[33].mxu1 }
0x1237   : > { %v15946_v1 = vadd.f32 %v25941_v14, %v15780_v43  ;;  %v19222_v58 = vpop.f32.mrb[34].mxu1 }
0x1238   : > { %15980 = vst.msk [vmem:[%s25948_s26 + $0x10] sm:$0xff] %vm493_vm0, %v15948_v11  ;;  %v15949_v55 = vadd.f32 %v19222_v58, %v25941_v14  ;;  %v15783_v63 = vpop.f32.mrb[35].mxu1 }
0x1239   : > { %15978 = vst.msk [vmem:[%s25948_s26] sm:$0xff] %vm493_vm0, %v15946_v1  ;;  %v15947_v9 = vadd.f32 %v25941_v14, %v15783_v63 }
0x123a   : > { %15981 = vst.msk [vmem:[%s25948_s26 + $0x18] sm:$0xff] %vm493_vm0, %v15949_v55 }
0x123b   : > { %15979 = vst.msk [vmem:[%s25948_s26 + $0x8] sm:$0xff] %vm493_vm0, %v15947_v9 }
0x123d   : > { %v19225_v47 = vpop.f32.mrb[36].mxu1 }
0x123e   : > { %v15952_v33 = vadd.f32 %v19225_v47, %v25941_v14  ;;  %v15796_v24 = vpop.f32.mrb[37].mxu1 }
0x123f   : > { %v15950_v25 = vadd.f32 %v25941_v14, %v15796_v24  ;;  %v19226_v22 = vpop.f32.mrb[38].mxu1 }
0x1240   : > { %15984 = vst.msk [vmem:[%s25948_s26 + $0x30] sm:$0xff] %vm493_vm0, %v15952_v33  ;;  %v15953_v7 = vadd.f32 %v19226_v22, %v25941_v14  ;;  %v15799_v39 = vpop.f32.mrb[39].mxu1 }
0x1241   : > { %15982 = vst.msk [vmem:[%s25948_s26 + $0x20] sm:$0xff] %vm493_vm0, %v15950_v25  ;;  %v15951_v21 = vadd.f32 %v25941_v14, %v15799_v39 }
0x1242   : > { %15985 = vst.msk [vmem:[%s25948_s26 + $0x38] sm:$0xff] %vm493_vm0, %v15953_v7 }
0x1243   : > { %15983 = vst.msk [vmem:[%s25948_s26 + $0x28] sm:$0xff] %vm493_vm0, %v15951_v21 }
0x1245   : > { %v19229_v35 = vpop.f32.mrb[40].mxu1 }
0x1246   : > { %v15956_v53 = vadd.f32 %v19229_v35, %v25941_v14  ;;  %v15812_v34 = vpop.f32.mrb[41].mxu1 }
0x1247   : > { %v15954_v62 = vadd.f32 %v25941_v14, %v15812_v34  ;;  %v19230_v41 = vpop.f32.mrb[42].mxu1 }
0x1248   : > { %15988 = vst.msk [vmem:[%s25948_s26 + $0x50] sm:$0xff] %vm493_vm0, %v15956_v53  ;;  %v15957_v30 = vadd.f32 %v19230_v41, %v25941_v14  ;;  %v15815_v20 = vpop.f32.mrb[43].mxu1 }
0x1249   : > { %15986 = vst.msk [vmem:[%s25948_s26 + $0x40] sm:$0xff] %vm493_vm0, %v15954_v62  ;;  %v15955_v48 = vadd.f32 %v25941_v14, %v15815_v20 }
0x124a   : > { %15989 = vst.msk [vmem:[%s25948_s26 + $0x58] sm:$0xff] %vm493_vm0, %v15957_v30 }
0x124b   : > { %15987 = vst.msk [vmem:[%s25948_s26 + $0x48] sm:$0xff] %vm493_vm0, %v15955_v48 }
0x124d   : > { %v19233_v45 = vpop.f32.mrb[44].mxu1 }
0x124e   : > { %v15960_v28 = vadd.f32 %v19233_v45, %v25941_v14  ;;  %v15828_v2 = vpop.f32.mrb[45].mxu1 }
0x124f   : > { %v15958_v15 = vadd.f32 %v25941_v14, %v15828_v2  ;;  %v19234_v56 = vpop.f32.mrb[46].mxu1 }
0x1250   : > { %15992 = vst.msk [vmem:[%s25948_s26 + $0x70] sm:$0xff] %vm493_vm0, %v15960_v28  ;;  %v15961_v0 = vadd.f32 %v19234_v56, %v25941_v14  ;;  %v15831_v18 = vpop.f32.mrb[47].mxu1 }
0x1251   : > { %15990 = vst.msk [vmem:[%s25948_s26 + $0x60] sm:$0xff] %vm493_vm0, %v15958_v15  ;;  %v15959_v59 = vadd.f32 %v25941_v14, %v15831_v18 }
0x1252   : > { %15993 = vst.msk [vmem:[%s25948_s26 + $0x78] sm:$0xff] %vm493_vm0, %v15961_v0 }
0x1253   : > { %15991 = vst.msk [vmem:[%s25948_s26 + $0x68] sm:$0xff] %vm493_vm0, %v15959_v59 }
0x1255   : > { %v19237_v17 = vpop.f32.mrb[48].mxu1 }
0x1256   : > { %v15964_v49 = vadd.f32 %v19237_v17, %v25941_v14  ;;  %v15844_v51 = vpop.f32.mrb[49].mxu1 }
0x1257   : > { %v15962_v6 = vadd.f32 %v25941_v14, %v15844_v51  ;;  %v19238_v38 = vpop.f32.mrb[50].mxu1 }
0x1258   : > { %15996 = vst.msk [vmem:[%s25948_s26 + $0x90] sm:$0xff] %vm493_vm0, %v15964_v49  ;;  %v15965_v27 = vadd.f32 %v19238_v38, %v25941_v14  ;;  %v15847_v61 = vpop.f32.mrb[51].mxu1 }
0x1259   : > { %15994 = vst.msk [vmem:[%s25948_s26 + $0x80] sm:$0xff] %vm493_vm0, %v15962_v6  ;;  %v15963_v12 = vadd.f32 %v25941_v14, %v15847_v61 }
0x125a   : > { %15997 = vst.msk [vmem:[%s25948_s26 + $0x98] sm:$0xff] %vm493_vm0, %v15965_v27 }
0x125b   : > { %15995 = vst.msk [vmem:[%s25948_s26 + $0x88] sm:$0xff] %vm493_vm0, %v15963_v12 }
0x125d   : > { %v19241_v19 = vpop.f32.mrb[52].mxu1 }
0x125e   : > { %v15968_v16 = vadd.f32 %v19241_v19, %v25941_v14  ;;  %v15860_v31 = vpop.f32.mrb[53].mxu1 }
0x125f   : > { %v15966_v52 = vadd.f32 %v25941_v14, %v15860_v31  ;;  %v19242_v60 = vpop.f32.mrb[54].mxu1 }
0x1260   : > { %16000 = vst.msk [vmem:[%s25948_s26 + $0xb0] sm:$0xff] %vm493_vm0, %v15968_v16  ;;  %v15969_v29 = vadd.f32 %v19242_v60, %v25941_v14  ;;  %v15863_v23 = vpop.f32.mrb[55].mxu1 }
0x1261   : > { %15998 = vst.msk [vmem:[%s25948_s26 + $0xa0] sm:$0xff] %vm493_vm0, %v15966_v52  ;;  %v15967_v13 = vadd.f32 %v25941_v14, %v15863_v23 }
0x1262   : > { %16001 = vst.msk [vmem:[%s25948_s26 + $0xb8] sm:$0xff] %vm493_vm0, %v15969_v29 }
0x1263   : > { %15999 = vst.msk [vmem:[%s25948_s26 + $0xa8] sm:$0xff] %vm493_vm0, %v15967_v13 }
0x1265   : > { %v19245_v26 = vpop.f32.mrb[56].mxu1 }
0x1266   : > { %v15972_v40 = vadd.f32 %v19245_v26, %v25941_v14  ;;  %v15876_v3 = vpop.f32.mrb[57].mxu1 }
0x1267   : > { %v15970_v36 = vadd.f32 %v25941_v14, %v15876_v3  ;;  %v19246_v54 = vpop.f32.mrb[58].mxu1 }
0x1268   : > { %16004 = vst.msk [vmem:[%s25948_s26 + $0xd0] sm:$0xff] %vm493_vm0, %v15972_v40  ;;  %v15973_v5 = vadd.f32 %v19246_v54, %v25941_v14  ;;  %v15879_v44 = vpop.f32.mrb[59].mxu1 }
0x1269   : > { %16002 = vst.msk [vmem:[%s25948_s26 + $0xc0] sm:$0xff] %vm493_vm0, %v15970_v36  ;;  %v15971_v50 = vadd.f32 %v25941_v14, %v15879_v44 }
0x126a   : > { %16005 = vst.msk [vmem:[%s25948_s26 + $0xd8] sm:$0xff] %vm493_vm0, %v15973_v5 }
0x126b   : > { %16003 = vst.msk [vmem:[%s25948_s26 + $0xc8] sm:$0xff] %vm493_vm0, %v15971_v50 }
0x126d   : > { %v19249_v32 = vpop.f32.mrb[60].mxu1 }
0x126e   : > { %v15976_v57 = vadd.f32 %v19249_v32, %v25941_v14  ;;  %v15892_v46 = vpop.f32.mrb[61].mxu1 }
0x126f   : > { %v15974_v42 = vadd.f32 %v25941_v14, %v15892_v46  ;;  %v19250_v8 = vpop.f32.mrb[62].mxu1 }
0x1270   : > { %16008 = vst.msk [vmem:[%s25948_s26 + $0xf0] sm:$0xff] %vm493_vm0, %v15976_v57  ;;  %v15977_v37 = vadd.f32 %v19250_v8, %v25941_v14  ;;  %v15895_v4 = vpop.f32.mrb[63].mxu1 }
0x1271   : > { %16006 = vst.msk [vmem:[%s25948_s26 + $0xe0] sm:$0xff] %vm493_vm0, %v15974_v42  ;;  %v15975_v10 = vadd.f32 %v25941_v14, %v15895_v4 }
0x1272   : > { %16009 = vst.msk [vmem:[%s25948_s26 + $0xf8] sm:$0xff] %vm493_vm0, %v15977_v37 }
0x1273   : > { %16007 = vst.msk [vmem:[%s25948_s26 + $0xe8] sm:$0xff] %vm493_vm0, %v15975_v10 }
0x1274 PF: > { %s21_s17 = sadd.s32 1, %s20920_s17  }
0x1275   : > { %p18_p4 = scmp.ge.s32.totalorder %s21_s17, 4  }
0x1277   :  { %20 = sbr.rel (!%p18_p4) target bundleno = 1 (0x1), region = 136 }

</bundles_post_ra>
